<compile_context>
chip_gen: v6e
topology: v6e:2x2x1
jax: 0.10.0
libtpu: 0.0.40
codegen_flags: <defaults>
</compile_context>

<pallas_src>
import jax
import jax.numpy as jnp
from jax import lax
from jax.experimental import pallas as pl
from jax.experimental.pallas import tpu as pltpu


_VMEM = pl.BlockSpec(memory_space=pltpu.MemorySpace.VMEM)


# --------------------------------------------------------------------------- #
# Fused bidirectional GRU over packed gate preactivations.
#   gx    : (T, B, 6*H2)  input-gate preacts, columns [r_f, r_b, z_f, z_b, n_f, n_b]
#   u_big : (H, 6*H2)     block-diagonal recurrent weights, same column order
# Returns time-aligned hidden states (T, B, H) with fwd in lanes 0:H2, bwd in H2:H.
# --------------------------------------------------------------------------- #
def _bigru(gx, u_big):
    T, B, G = gx.shape
    H2 = G // 6
    h = jnp.zeros((B, 2 * H2), jnp.float32)
    hf_list, hb_list = [], []
    for t in range(T):
        tb = T - 1 - t
        uh = jnp.dot(h, u_big, preferred_element_type=jnp.float32)      # (B, 6H2)
        gx_rz = jnp.concatenate(
            [gx[t, :, 0:H2], gx[tb, :, H2:2 * H2],
             gx[t, :, 2 * H2:3 * H2], gx[tb, :, 3 * H2:4 * H2]], axis=-1)
        gx_n = jnp.concatenate(
            [gx[t, :, 4 * H2:5 * H2], gx[tb, :, 5 * H2:6 * H2]], axis=-1)
        rz = jax.nn.sigmoid(gx_rz + uh[:, 0:4 * H2])                     # one sigmoid
        r = rz[:, 0:2 * H2]
        z = rz[:, 2 * H2:4 * H2]
        n = jnp.tanh(gx_n + r * uh[:, 4 * H2:6 * H2])                    # one tanh
        h = (1.0 - z) * n + z * h
        hf_list.append(h[:, 0:H2])          # fwd state at time t
        hb_list.append(h[:, H2:2 * H2])     # bwd state at time T-1-t
    rows = [jnp.concatenate([hf_list[t], hb_list[T - 1 - t]], axis=-1)
            for t in range(T)]
    return jnp.stack(rows, axis=0)                                       # (T, B, H)


# --------------------------------------------------------------------------- #
# Single fused kernel: question bi-GRU + attention + evidence bi-GRU
#                      + tag GRU + CRF negative log-likelihood (summed).
# --------------------------------------------------------------------------- #
def _seq_label_kernel(q_idx_ref, q_len_ref, e_idx_ref, qe_idx_ref, ee_idx_ref,
                      lab_ref, e_len_ref,
                      wemb_ref, qe_tab_ref, ee_tab_ref,
                      wq_ref, uq_ref, bq_ref,
                      p_ref, wa_ref, ba_ref,
                      wex_ref, weq_ref, ue_ref, be_ref,
                      wt_ref, ut_ref, bt_ref,
                      trans_ref, start_ref, end_ref,
                      out_ref):
    Tq, B, _ = q_idx_ref.shape
    Te = e_idx_ref.shape[0]
    vocab, V = wemb_ref.shape
    H = uq_ref.shape[0]
    H2 = H // 2
    L = ut_ref.shape[0]

    wemb = wemb_ref[...]                                                 # (vocab, V)

    # ---------------- question phase ----------------
    q_oh = (lax.broadcasted_iota(jnp.int32, (Tq, B, vocab), 2)
            == q_idx_ref[...]).astype(jnp.float32)                       # (Tq,B,vocab)
    q_emb = jnp.einsum('tbv,vd->tbd', q_oh, wemb,
                       preferred_element_type=jnp.float32)               # (Tq,B,V)
    gq = jnp.einsum('tbd,dg->tbg', q_emb, wq_ref[...],
                    preferred_element_type=jnp.float32) + bq_ref[...][None]
    hq = _bigru(gq, uq_ref[...])                                         # (Tq,B,H)

    # DotMLP attention over the question states
    proj = jnp.tanh(jnp.einsum('tbh,hv->tbv', hq, wa_ref[...],
                               preferred_element_type=jnp.float32)
                    + ba_ref[...][None])                                 # (Tq,B,V)
    scores = jnp.sum(proj * p_ref[...][None], axis=-1)                   # (Tq,B)
    q_mask = (lax.broadcasted_iota(jnp.int32, (Tq, B), 0)
              < q_len_ref[...]).astype(jnp.float32)                      # (Tq,B)
    scores = jnp.where(q_mask > 0.0, scores, jnp.full_like(scores, -1e30))
    smax = jnp.max(scores, axis=0, keepdims=True)
    eexp = jnp.exp(scores - smax) * q_mask
    denom = jnp.sum(eexp, axis=0, keepdims=True) + 1e-30
    attn = eexp / denom                                                  # exact softmax
    q_att = jnp.sum(attn[:, :, None] * hq, axis=0)                       # (B,H)

    # ---------------- evidence phase ----------------
    e_oh = (lax.broadcasted_iota(jnp.int32, (Te, B, vocab), 2)
            == e_idx_ref[...]).astype(jnp.float32)
    e_emb = jnp.einsum('tbv,vd->tbd', e_oh, wemb,
                       preferred_element_type=jnp.float32)               # (Te,B,V)
    qe_tab = qe_tab_ref[...]
    ee_tab = ee_tab_ref[...]
    qe_emb = jnp.where(qe_idx_ref[...] == 0, qe_tab[0:1][None], qe_tab[1:2][None])
    ee_emb = jnp.where(ee_idx_ref[...] == 0, ee_tab[0:1][None], ee_tab[1:2][None])

    x_evi = jnp.concatenate([e_emb, qe_emb, ee_emb], axis=-1)            # (Te,B,3V)
    g_static = (jnp.dot(q_att, weq_ref[...],
                        preferred_element_type=jnp.float32) + be_ref[...])
    ge = (jnp.einsum('tbx,xg->tbg', x_evi, wex_ref[...],
                     preferred_element_type=jnp.float32) + g_static[None])
    he = _bigru(ge, ue_ref[...])                                         # (Te,B,H)

    # tag-GRU input gates, hoisted (columns [r, z, n], each L wide)
    gt = jnp.einsum('tbh,hg->tbg', he, wt_ref[...],
                    preferred_element_type=jnp.float32) + bt_ref[...][None]

    # ---------------- fused tag GRU + CRF NLL ----------------
    ut = ut_ref[...]                                                     # (L,3L)
    trans = trans_ref[...]                                               # (L,L)
    start = start_ref[...]                                               # (1,L)
    end = end_ref[...]                                                   # (1,L)
    trans_b = jnp.broadcast_to(trans[None], (B, L, L))                   # hoisted
    lens = e_len_ref[...]                                                # (B,1)
    lab = lab_ref[...]                                                   # (Te,B,1)
    lane_ids = lax.broadcasted_iota(jnp.int32, (B, L), 1)

    def tag_step(h, t):
        uh = jnp.dot(h, ut, preferred_element_type=jnp.float32)          # (B,3L)
        rz = jax.nn.sigmoid(gt[t, :, 0:2 * L] + uh[:, 0:2 * L])
        n = jnp.tanh(gt[t, :, 2 * L:3 * L] + rz[:, 0:L] * uh[:, 2 * L:3 * L])
        z = rz[:, L:2 * L]
        return (1.0 - z) * n + z * h

    h_tag = tag_step(jnp.zeros((B, L), jnp.float32), 0)                  # emission t=0
    oh_prev = (lane_ids == lab[0]).astype(jnp.float32)
    valid0 = (0 < lens)                                                  # (B,1)
    alpha = start + h_tag
    gold = jnp.where(valid0,
                     jnp.sum(oh_prev * (h_tag + start), axis=-1, keepdims=True),
                     0.0)

    for t in range(1, Te):
        h_tag = tag_step(h_tag, t)
        oh_t = (lane_ids == lab[t]).astype(jnp.float32)
        valid = (t < lens)                                               # (B,1)
        sc = alpha[:, :, None] + trans_b                                 # (B,L,L)
        smax2 = jnp.max(sc, axis=1, keepdims=True)
        lse = jnp.log(jnp.sum(jnp.exp(sc - smax2), axis=1)) + smax2[:, 0, :]
        alpha = jnp.where(valid, lse + h_tag, alpha)
        emit = jnp.sum(oh_t * h_tag, axis=-1, keepdims=True)
        tr = jnp.sum(jnp.dot(oh_prev, trans, preferred_element_type=jnp.float32)
                     * oh_t, axis=-1, keepdims=True)
        gold = gold + jnp.where(valid, emit + tr, 0.0)
        oh_prev = jnp.where(valid, oh_t, oh_prev)

    final = alpha + end
    fmax = jnp.max(final, axis=-1, keepdims=True)
    logz = jnp.log(jnp.sum(jnp.exp(final - fmax), axis=-1, keepdims=True)) + fmax
    gold = gold + jnp.sum(oh_prev * end, axis=-1, keepdims=True)         # last valid label
    nll = jnp.where(lens > 0, logz - gold, 0.0)                          # (B,1)
    out_ref[...] = jnp.sum(nll, axis=0, keepdims=True)                   # (1,1)


# --------------------------------------------------------------------------- #
# Pallas wrapper (tiny shapes -> everything resident in VMEM, no grid)
# --------------------------------------------------------------------------- #
def seq_label_loss(params, q_text, q_lens, e_text, qe_feat, ee_feat, labels, e_lens):
    out = pl.pallas_call(
        _seq_label_kernel,
        out_shape=jax.ShapeDtypeStruct((1, 1), jnp.float32),
        in_specs=[_VMEM] * 26,
        out_specs=_VMEM,
    )(
        q_text.T[:, :, None].astype(jnp.int32),     # (Tq,B,1)
        q_lens[None, :].astype(jnp.int32),          # (1,B)
        e_text.T[:, :, None].astype(jnp.int32),     # (Te,B,1)
        qe_feat.T[:, :, None].astype(jnp.int32),    # (Te,B,1)
        ee_feat.T[:, :, None].astype(jnp.int32),    # (Te,B,1)
        labels.T[:, :, None].astype(jnp.int32),     # (Te,B,1)
        e_lens[:, None].astype(jnp.int32),          # (B,1)
        params['word_emb'], params['qe_tab'], params['ee_tab'],
        params['q_W'], params['q_U'], params['q_b'],
        params['att_p'], params['att_W'], params['att_b'],
        params['e_Wx'], params['e_Wq'], params['e_U'], params['e_b'],
        params['t_W'], params['t_U'], params['t_b'],
        params['crf_trans'], params['crf_start'], params['crf_end'],
    )
    return out[0, 0]


# --------------------------------------------------------------------------- #
# Parameters (deterministic synthetic init) + packing into the fused layouts.
# Gate column order everywhere: bi-GRU [r_f, r_b, z_f, z_b, n_f, n_b].
# --------------------------------------------------------------------------- #
def init_params(key, V, H, L, vocab, feat_vocab=2):
    H2 = H // 2
    keys = iter(jax.random.split(key, 64))

    def rnd(shape, scale=0.1):
        return scale * jax.random.normal(next(keys), shape, jnp.float32)

    def gru(din, h):
        return rnd((din, 3 * h)), rnd((h, 3 * h)), jnp.zeros((1, 3 * h), jnp.float32)

    qf_W, qf_U, qf_b = gru(V, H2)
    qb_W, qb_U, qb_b = gru(V, H2)
    D_evi = 3 * V + H
    ef_W, ef_U, ef_b = gru(D_evi, H2)
    eb_W, eb_U, eb_b = gru(D_evi, H2)
    t_W, t_U, t_b = gru(H, L)

    def pack_cols(Af, Ab, h):
        # [r_f, r_b, z_f, z_b, n_f, n_b]
        return jnp.concatenate(
            [Af[:, 0:h], Ab[:, 0:h],
             Af[:, h:2 * h], Ab[:, h:2 * h],
             Af[:, 2 * h:3 * h], Ab[:, 2 * h:3 * h]], axis=1)

    def pack_U(Uf, Ub, h):
        # block-diagonal (2h, 6h): fwd rows feed only fwd gate columns, etc.
        Ubig = jnp.zeros((2 * h, 6 * h), jnp.float32)
        Ubig = Ubig.at[0:h, 0:h].set(Uf[:, 0:h])            # r_f
        Ubig = Ubig.at[h:2 * h, h:2 * h].set(Ub[:, 0:h])    # r_b
        Ubig = Ubig.at[0:h, 2 * h:3 * h].set(Uf[:, h:2 * h])        # z_f
        Ubig = Ubig.at[h:2 * h, 3 * h:4 * h].set(Ub[:, h:2 * h])    # z_b
        Ubig = Ubig.at[0:h, 4 * h:5 * h].set(Uf[:, 2 * h:3 * h])    # n_f
        Ubig = Ubig.at[h:2 * h, 5 * h:6 * h].set(Ub[:, 2 * h:3 * h])  # n_b
        return Ubig

    q_W = pack_cols(qf_W, qb_W, H2)                         # (V, 6H2)
    q_b = pack_cols(qf_b, qb_b, H2)                         # (1, 6H2)
    q_U = pack_U(qf_U, qb_U, H2)                            # (H, 6H2)

    # evidence input rows follow cat([e_emb, q_att, qe_emb, ee_emb])
    e_W_full = pack_cols(ef_W, eb_W, H2)                    # (3V+H, 6H2)
    e_Wx = jnp.concatenate([e_W_full[0:V],
                            e_W_full[V + H:2 * V + H],
                            e_W_full[2 * V + H:3 * V + H]], axis=0)   # (3V, 6H2)
    e_Wq = e_W_full[V:V + H]                                # (H, 6H2)
    e_b = pack_cols(ef_b, eb_b, H2)
    e_U = pack_U(ef_U, eb_U, H2)

    return {
        'word_emb': rnd((vocab, V), 1.0),                   # shared q / e text embedding
        'qe_tab': rnd((feat_vocab, V), 1.0),                # qe_embedding
        'ee_tab': rnd((feat_vocab, V), 1.0),                # ee_embedding
        'att_p': rnd((V,))[None, :],                        # question_attention_p (1,V)
        'att_W': rnd((H, V)),                               # DotMLP attention
        'att_b': jnp.zeros((1, V), jnp.float32),
        'q_W': q_W, 'q_U': q_U, 'q_b': q_b,                 # question_encoder (packed)
        'e_Wx': e_Wx, 'e_Wq': e_Wq, 'e_U': e_U, 'e_b': e_b,  # evidence_encoder (packed)
        't_W': t_W, 't_U': t_U, 't_b': t_b,                 # tag_encoder (uni, hidden=L)
        'crf_trans': rnd((L, L)),                           # CRFClassifier
        'crf_start': rnd((1, L)),
        'crf_end': rnd((1, L)),
    }


# --------------------------------------------------------------------------- #
if __name__ == "__main__":
    key = jax.random.PRNGKey(0)
    B, Tq, Te = 2, 8, 12
    V, H, L = 32, 32, 5              # word_vec_size, hidden_size, label_num
    vocab = 50

    kp, kq, ke, kqe, kee, kl = jax.random.split(key, 6)
    params = init_params(kp, V, H, L, vocab)

    q_text = jax.random.randint(kq, (B, Tq), 2, vocab, dtype=jnp.int32)
    e_text = jax.random.randint(ke, (B, Te), 2, vocab, dtype=jnp.int32)
    qe_feat = jax.random.randint(kqe, (B, Te), 0, 2, dtype=jnp.int32)
    ee_feat = jax.random.randint(kee, (B, Te), 0, 2, dtype=jnp.int32)
    labels = jax.random.randint(kl, (B, Te), 0, L, dtype=jnp.int32)
    q_lens = jnp.array([Tq, Tq - 2], jnp.int32)
    e_lens = jnp.array([Te, Te - 3], jnp.int32)

    loss = jax.jit(seq_label_loss)(params, q_text, q_lens, e_text,
                                   qe_feat, ee_feat, labels, e_lens)
    loss = jax.block_until_ready(loss)
    assert bool(jnp.isfinite(loss)), f"non-finite loss: {loss}"
    print("KERNEL_OK")
</pallas_src>

<mosaic_0001>
module attributes {stable_mosaic.version = 11 : i64} {
  func.func @_seq_label_kernel(%arg0: memref<8x2x1xi32, #tpu.memory_space<vmem>>, %arg1: memref<1x2xi32, #tpu.memory_space<vmem>>, %arg2: memref<12x2x1xi32, #tpu.memory_space<vmem>>, %arg3: memref<12x2x1xi32, #tpu.memory_space<vmem>>, %arg4: memref<12x2x1xi32, #tpu.memory_space<vmem>>, %arg5: memref<12x2x1xi32, #tpu.memory_space<vmem>>, %arg6: memref<2x1xi32, #tpu.memory_space<vmem>>, %arg7: memref<50x32xf32, #tpu.memory_space<vmem>>, %arg8: memref<2x32xf32, #tpu.memory_space<vmem>>, %arg9: memref<2x32xf32, #tpu.memory_space<vmem>>, %arg10: memref<32x96xf32, #tpu.memory_space<vmem>>, %arg11: memref<32x96xf32, #tpu.memory_space<vmem>>, %arg12: memref<1x96xf32, #tpu.memory_space<vmem>>, %arg13: memref<1x32xf32, #tpu.memory_space<vmem>>, %arg14: memref<32x32xf32, #tpu.memory_space<vmem>>, %arg15: memref<1x32xf32, #tpu.memory_space<vmem>>, %arg16: memref<96x96xf32, #tpu.memory_space<vmem>>, %arg17: memref<32x96xf32, #tpu.memory_space<vmem>>, %arg18: memref<32x96xf32, #tpu.memory_space<vmem>>, %arg19: memref<1x96xf32, #tpu.memory_space<vmem>>, %arg20: memref<32x15xf32, #tpu.memory_space<vmem>>, %arg21: memref<5x15xf32, #tpu.memory_space<vmem>>, %arg22: memref<1x15xf32, #tpu.memory_space<vmem>>, %arg23: memref<5x5xf32, #tpu.memory_space<vmem>>, %arg24: memref<1x5xf32, #tpu.memory_space<vmem>>, %arg25: memref<1x5xf32, #tpu.memory_space<vmem>>, %arg26: memref<1x1xf32, #tpu.memory_space<vmem>>) attributes {dimension_semantics = [], scalar_prefetch = 0 : i64, scratch_operands = 0 : i64, tpu.core_type = #tpu.core_type<tc>} {
    %c0 = arith.constant 0 : index
    %c0_0 = arith.constant 0 : index
    %0 = vector.load %arg7[%c0, %c0_0] : memref<50x32xf32, #tpu.memory_space<vmem>>, vector<50x32xf32>
    %1 = tpu.iota {dimensions = array<i32: 2>} : vector<8x2x50xi32>
    %c0_1 = arith.constant 0 : index
    %c0_2 = arith.constant 0 : index
    %c0_3 = arith.constant 0 : index
    %2 = vector.load %arg0[%c0_1, %c0_2, %c0_3] : memref<8x2x1xi32, #tpu.memory_space<vmem>>, vector<8x2x1xi32>
    %3 = vector.broadcast %2 : vector<8x2x1xi32> to vector<8x2x50xi32>
    %4 = arith.cmpi eq, %1, %3 : vector<8x2x50xi32>
    %5 = arith.extui %4 : vector<8x2x50xi1> to vector<8x2x50xi32>
    %6 = arith.sitofp %5 : vector<8x2x50xi32> to vector<8x2x50xf32>
    "tpu.trace_start"() <{level = 10 : i32, message = "tbv,vd->tbd"}> : () -> ()
    %cst = arith.constant dense<0.000000e+00> : vector<8x2x32xf32>
    %7 = tpu.matmul %6, %0, %cst {dimension_numbers = #tpu.dot_dimension_numbers<[2], [0], [0, 1], [1], [0, 0, 0, 1, 1, 1], [], []>} : vector<8x2x50xf32>, vector<50x32xf32>, vector<8x2x32xf32> -> vector<8x2x32xf32>
    "tpu.trace_stop"() : () -> ()
    %c0_4 = arith.constant 0 : index
    %c0_5 = arith.constant 0 : index
    %8 = vector.load %arg10[%c0_4, %c0_5] : memref<32x96xf32, #tpu.memory_space<vmem>>, vector<32x96xf32>
    "tpu.trace_start"() <{level = 10 : i32, message = "tbd,dg->tbg"}> : () -> ()
    %cst_6 = arith.constant dense<0.000000e+00> : vector<8x2x96xf32>
    %9 = tpu.matmul %7, %8, %cst_6 {dimension_numbers = #tpu.dot_dimension_numbers<[2], [0], [0, 1], [1], [0, 0, 0, 1, 1, 1], [], []>} : vector<8x2x32xf32>, vector<32x96xf32>, vector<8x2x96xf32> -> vector<8x2x96xf32>
    "tpu.trace_stop"() : () -> ()
    %c0_7 = arith.constant 0 : index
    %c0_8 = arith.constant 0 : index
    %10 = vector.load %arg12[%c0_7, %c0_8] : memref<1x96xf32, #tpu.memory_space<vmem>>, vector<1x96xf32>
    %11 = vector.shape_cast %10 : vector<1x96xf32> to vector<1x1x96xf32>
    %12 = vector.broadcast %11 : vector<1x1x96xf32> to vector<8x2x96xf32>
    %13 = arith.addf %9, %12 : vector<8x2x96xf32>
    %c0_9 = arith.constant 0 : index
    %c0_10 = arith.constant 0 : index
    %14 = vector.load %arg11[%c0_9, %c0_10] : memref<32x96xf32, #tpu.memory_space<vmem>>, vector<32x96xf32>
    %cst_11 = arith.constant 0.000000e+00 : f32
    %15 = vector.broadcast %cst_11 : f32 to vector<2x32xf32>
    %cst_12 = arith.constant dense<0.000000e+00> : vector<2x96xf32>
    %16 = tpu.matmul %15, %14, %cst_12 {dimension_numbers = #tpu.dot_dimension_numbers<[1], [0], [0], [1], [0, 0, 1, 1], [], []>} : vector<2x32xf32>, vector<32x96xf32>, vector<2x96xf32> -> vector<2x96xf32>
    %17 = vector.extract_strided_slice %13 {offsets = [0, 0, 0], sizes = [1, 2, 16], strides = [1, 1, 1]} : vector<8x2x96xf32> to vector<1x2x16xf32>
    %18 = vector.shape_cast %17 : vector<1x2x16xf32> to vector<2x16xf32>
    %19 = vector.extract_strided_slice %13 {offsets = [7, 0, 16], sizes = [1, 2, 16], strides = [1, 1, 1]} : vector<8x2x96xf32> to vector<1x2x16xf32>
    %20 = vector.shape_cast %19 : vector<1x2x16xf32> to vector<2x16xf32>
    %21 = vector.extract_strided_slice %13 {offsets = [0, 0, 32], sizes = [1, 2, 16], strides = [1, 1, 1]} : vector<8x2x96xf32> to vector<1x2x16xf32>
    %22 = vector.shape_cast %21 : vector<1x2x16xf32> to vector<2x16xf32>
    %23 = vector.extract_strided_slice %13 {offsets = [7, 0, 48], sizes = [1, 2, 16], strides = [1, 1, 1]} : vector<8x2x96xf32> to vector<1x2x16xf32>
    %24 = vector.shape_cast %23 : vector<1x2x16xf32> to vector<2x16xf32>
    %25 = tpu.concatenate %18, %20, %22, %24 in 1 : vector<2x16xf32>, vector<2x16xf32>, vector<2x16xf32>, vector<2x16xf32> -> vector<2x64xf32>
    %26 = vector.extract_strided_slice %13 {offsets = [0, 0, 64], sizes = [1, 2, 16], strides = [1, 1, 1]} : vector<8x2x96xf32> to vector<1x2x16xf32>
    %27 = vector.shape_cast %26 : vector<1x2x16xf32> to vector<2x16xf32>
    %28 = vector.extract_strided_slice %13 {offsets = [7, 0, 80], sizes = [1, 2, 16], strides = [1, 1, 1]} : vector<8x2x96xf32> to vector<1x2x16xf32>
    %29 = vector.shape_cast %28 : vector<1x2x16xf32> to vector<2x16xf32>
    %30 = tpu.concatenate %27, %29 in 1 : vector<2x16xf32>, vector<2x16xf32> -> vector<2x32xf32>
    %31 = vector.extract_strided_slice %16 {offsets = [0, 0], sizes = [2, 64], strides = [1, 1]} : vector<2x96xf32> to vector<2x64xf32>
    %32 = arith.addf %25, %31 : vector<2x64xf32>
    %33 = arith.negf %32 : vector<2x64xf32>
    %34 = math.exp %33 : vector<2x64xf32>
    %cst_13 = arith.constant 1.000000e+00 : f32
    %35 = vector.broadcast %cst_13 : f32 to vector<2x64xf32>
    %36 = arith.addf %35, %34 : vector<2x64xf32>
    %37 = arith.divf %35, %36 : vector<2x64xf32>
    %38 = vector.extract_strided_slice %37 {offsets = [0, 0], sizes = [2, 32], strides = [1, 1]} : vector<2x64xf32> to vector<2x32xf32>
    %39 = vector.extract_strided_slice %37 {offsets = [0, 32], sizes = [2, 32], strides = [1, 1]} : vector<2x64xf32> to vector<2x32xf32>
    %40 = vector.extract_strided_slice %16 {offsets = [0, 64], sizes = [2, 32], strides = [1, 1]} : vector<2x96xf32> to vector<2x32xf32>
    %41 = arith.mulf %38, %40 : vector<2x32xf32>
    %42 = arith.addf %30, %41 : vector<2x32xf32>
    %43 = math.tanh %42 : vector<2x32xf32>
    %cst_14 = arith.constant 1.000000e+00 : f32
    %44 = vector.broadcast %cst_14 : f32 to vector<2x32xf32>
    %45 = arith.subf %44, %39 : vector<2x32xf32>
    %46 = arith.mulf %45, %43 : vector<2x32xf32>
    %47 = arith.mulf %39, %15 : vector<2x32xf32>
    %48 = arith.addf %46, %47 : vector<2x32xf32>
    %49 = vector.extract_strided_slice %48 {offsets = [0, 0], sizes = [2, 16], strides = [1, 1]} : vector<2x32xf32> to vector<2x16xf32>
    %50 = vector.extract_strided_slice %48 {offsets = [0, 16], sizes = [2, 16], strides = [1, 1]} : vector<2x32xf32> to vector<2x16xf32>
    %cst_15 = arith.constant dense<0.000000e+00> : vector<2x96xf32>
    %51 = tpu.matmul %48, %14, %cst_15 {dimension_numbers = #tpu.dot_dimension_numbers<[1], [0], [0], [1], [0, 0, 1, 1], [], []>} : vector<2x32xf32>, vector<32x96xf32>, vector<2x96xf32> -> vector<2x96xf32>
    %52 = vector.extract_strided_slice %13 {offsets = [1, 0, 0], sizes = [1, 2, 16], strides = [1, 1, 1]} : vector<8x2x96xf32> to vector<1x2x16xf32>
    %53 = vector.shape_cast %52 : vector<1x2x16xf32> to vector<2x16xf32>
    %54 = vector.extract_strided_slice %13 {offsets = [6, 0, 16], sizes = [1, 2, 16], strides = [1, 1, 1]} : vector<8x2x96xf32> to vector<1x2x16xf32>
    %55 = vector.shape_cast %54 : vector<1x2x16xf32> to vector<2x16xf32>
    %56 = vector.extract_strided_slice %13 {offsets = [1, 0, 32], sizes = [1, 2, 16], strides = [1, 1, 1]} : vector<8x2x96xf32> to vector<1x2x16xf32>
    %57 = vector.shape_cast %56 : vector<1x2x16xf32> to vector<2x16xf32>
    %58 = vector.extract_strided_slice %13 {offsets = [6, 0, 48], sizes = [1, 2, 16], strides = [1, 1, 1]} : vector<8x2x96xf32> to vector<1x2x16xf32>
    %59 = vector.shape_cast %58 : vector<1x2x16xf32> to vector<2x16xf32>
    %60 = tpu.concatenate %53, %55, %57, %59 in 1 : vector<2x16xf32>, vector<2x16xf32>, vector<2x16xf32>, vector<2x16xf32> -> vector<2x64xf32>
    %61 = vector.extract_strided_slice %13 {offsets = [1, 0, 64], sizes = [1, 2, 16], strides = [1, 1, 1]} : vector<8x2x96xf32> to vector<1x2x16xf32>
    %62 = vector.shape_cast %61 : vector<1x2x16xf32> to vector<2x16xf32>
    %63 = vector.extract_strided_slice %13 {offsets = [6, 0, 80], sizes = [1, 2, 16], strides = [1, 1, 1]} : vector<8x2x96xf32> to vector<1x2x16xf32>
    %64 = vector.shape_cast %63 : vector<1x2x16xf32> to vector<2x16xf32>
    %65 = tpu.concatenate %62, %64 in 1 : vector<2x16xf32>, vector<2x16xf32> -> vector<2x32xf32>
    %66 = vector.extract_strided_slice %51 {offsets = [0, 0], sizes = [2, 64], strides = [1, 1]} : vector<2x96xf32> to vector<2x64xf32>
    %67 = arith.addf %60, %66 : vector<2x64xf32>
    %68 = arith.negf %67 : vector<2x64xf32>
    %69 = math.exp %68 : vector<2x64xf32>
    %cst_16 = arith.constant 1.000000e+00 : f32
    %70 = vector.broadcast %cst_16 : f32 to vector<2x64xf32>
    %71 = arith.addf %70, %69 : vector<2x64xf32>
    %72 = arith.divf %70, %71 : vector<2x64xf32>
    %73 = vector.extract_strided_slice %72 {offsets = [0, 0], sizes = [2, 32], strides = [1, 1]} : vector<2x64xf32> to vector<2x32xf32>
    %74 = vector.extract_strided_slice %72 {offsets = [0, 32], sizes = [2, 32], strides = [1, 1]} : vector<2x64xf32> to vector<2x32xf32>
    %75 = vector.extract_strided_slice %51 {offsets = [0, 64], sizes = [2, 32], strides = [1, 1]} : vector<2x96xf32> to vector<2x32xf32>
    %76 = arith.mulf %73, %75 : vector<2x32xf32>
    %77 = arith.addf %65, %76 : vector<2x32xf32>
    %78 = math.tanh %77 : vector<2x32xf32>
    %cst_17 = arith.constant 1.000000e+00 : f32
    %79 = vector.broadcast %cst_17 : f32 to vector<2x32xf32>
    %80 = arith.subf %79, %74 : vector<2x32xf32>
    %81 = arith.mulf %80, %78 : vector<2x32xf32>
    %82 = arith.mulf %74, %48 : vector<2x32xf32>
    %83 = arith.addf %81, %82 : vector<2x32xf32>
    %84 = vector.extract_strided_slice %83 {offsets = [0, 0], sizes = [2, 16], strides = [1, 1]} : vector<2x32xf32> to vector<2x16xf32>
    %85 = vector.extract_strided_slice %83 {offsets = [0, 16], sizes = [2, 16], strides = [1, 1]} : vector<2x32xf32> to vector<2x16xf32>
    %cst_18 = arith.constant dense<0.000000e+00> : vector<2x96xf32>
    %86 = tpu.matmul %83, %14, %cst_18 {dimension_numbers = #tpu.dot_dimension_numbers<[1], [0], [0], [1], [0, 0, 1, 1], [], []>} : vector<2x32xf32>, vector<32x96xf32>, vector<2x96xf32> -> vector<2x96xf32>
    %87 = vector.extract_strided_slice %13 {offsets = [2, 0, 0], sizes = [1, 2, 16], strides = [1, 1, 1]} : vector<8x2x96xf32> to vector<1x2x16xf32>
    %88 = vector.shape_cast %87 : vector<1x2x16xf32> to vector<2x16xf32>
    %89 = vector.extract_strided_slice %13 {offsets = [5, 0, 16], sizes = [1, 2, 16], strides = [1, 1, 1]} : vector<8x2x96xf32> to vector<1x2x16xf32>
    %90 = vector.shape_cast %89 : vector<1x2x16xf32> to vector<2x16xf32>
    %91 = vector.extract_strided_slice %13 {offsets = [2, 0, 32], sizes = [1, 2, 16], strides = [1, 1, 1]} : vector<8x2x96xf32> to vector<1x2x16xf32>
    %92 = vector.shape_cast %91 : vector<1x2x16xf32> to vector<2x16xf32>
    %93 = vector.extract_strided_slice %13 {offsets = [5, 0, 48], sizes = [1, 2, 16], strides = [1, 1, 1]} : vector<8x2x96xf32> to vector<1x2x16xf32>
    %94 = vector.shape_cast %93 : vector<1x2x16xf32> to vector<2x16xf32>
    %95 = tpu.concatenate %88, %90, %92, %94 in 1 : vector<2x16xf32>, vector<2x16xf32>, vector<2x16xf32>, vector<2x16xf32> -> vector<2x64xf32>
    %96 = vector.extract_strided_slice %13 {offsets = [2, 0, 64], sizes = [1, 2, 16], strides = [1, 1, 1]} : vector<8x2x96xf32> to vector<1x2x16xf32>
    %97 = vector.shape_cast %96 : vector<1x2x16xf32> to vector<2x16xf32>
    %98 = vector.extract_strided_slice %13 {offsets = [5, 0, 80], sizes = [1, 2, 16], strides = [1, 1, 1]} : vector<8x2x96xf32> to vector<1x2x16xf32>
    %99 = vector.shape_cast %98 : vector<1x2x16xf32> to vector<2x16xf32>
    %100 = tpu.concatenate %97, %99 in 1 : vector<2x16xf32>, vector<2x16xf32> -> vector<2x32xf32>
    %101 = vector.extract_strided_slice %86 {offsets = [0, 0], sizes = [2, 64], strides = [1, 1]} : vector<2x96xf32> to vector<2x64xf32>
    %102 = arith.addf %95, %101 : vector<2x64xf32>
    %103 = arith.negf %102 : vector<2x64xf32>
    %104 = math.exp %103 : vector<2x64xf32>
    %cst_19 = arith.constant 1.000000e+00 : f32
    %105 = vector.broadcast %cst_19 : f32 to vector<2x64xf32>
    %106 = arith.addf %105, %104 : vector<2x64xf32>
    %107 = arith.divf %105, %106 : vector<2x64xf32>
    %108 = vector.extract_strided_slice %107 {offsets = [0, 0], sizes = [2, 32], strides = [1, 1]} : vector<2x64xf32> to vector<2x32xf32>
    %109 = vector.extract_strided_slice %107 {offsets = [0, 32], sizes = [2, 32], strides = [1, 1]} : vector<2x64xf32> to vector<2x32xf32>
    %110 = vector.extract_strided_slice %86 {offsets = [0, 64], sizes = [2, 32], strides = [1, 1]} : vector<2x96xf32> to vector<2x32xf32>
    %111 = arith.mulf %108, %110 : vector<2x32xf32>
    %112 = arith.addf %100, %111 : vector<2x32xf32>
    %113 = math.tanh %112 : vector<2x32xf32>
    %cst_20 = arith.constant 1.000000e+00 : f32
    %114 = vector.broadcast %cst_20 : f32 to vector<2x32xf32>
    %115 = arith.subf %114, %109 : vector<2x32xf32>
    %116 = arith.mulf %115, %113 : vector<2x32xf32>
    %117 = arith.mulf %109, %83 : vector<2x32xf32>
    %118 = arith.addf %116, %117 : vector<2x32xf32>
    %119 = vector.extract_strided_slice %118 {offsets = [0, 0], sizes = [2, 16], strides = [1, 1]} : vector<2x32xf32> to vector<2x16xf32>
    %120 = vector.extract_strided_slice %118 {offsets = [0, 16], sizes = [2, 16], strides = [1, 1]} : vector<2x32xf32> to vector<2x16xf32>
    %cst_21 = arith.constant dense<0.000000e+00> : vector<2x96xf32>
    %121 = tpu.matmul %118, %14, %cst_21 {dimension_numbers = #tpu.dot_dimension_numbers<[1], [0], [0], [1], [0, 0, 1, 1], [], []>} : vector<2x32xf32>, vector<32x96xf32>, vector<2x96xf32> -> vector<2x96xf32>
    %122 = vector.extract_strided_slice %13 {offsets = [3, 0, 0], sizes = [1, 2, 16], strides = [1, 1, 1]} : vector<8x2x96xf32> to vector<1x2x16xf32>
    %123 = vector.shape_cast %122 : vector<1x2x16xf32> to vector<2x16xf32>
    %124 = vector.extract_strided_slice %13 {offsets = [4, 0, 16], sizes = [1, 2, 16], strides = [1, 1, 1]} : vector<8x2x96xf32> to vector<1x2x16xf32>
    %125 = vector.shape_cast %124 : vector<1x2x16xf32> to vector<2x16xf32>
    %126 = vector.extract_strided_slice %13 {offsets = [3, 0, 32], sizes = [1, 2, 16], strides = [1, 1, 1]} : vector<8x2x96xf32> to vector<1x2x16xf32>
    %127 = vector.shape_cast %126 : vector<1x2x16xf32> to vector<2x16xf32>
    %128 = vector.extract_strided_slice %13 {offsets = [4, 0, 48], sizes = [1, 2, 16], strides = [1, 1, 1]} : vector<8x2x96xf32> to vector<1x2x16xf32>
    %129 = vector.shape_cast %128 : vector<1x2x16xf32> to vector<2x16xf32>
    %130 = tpu.concatenate %123, %125, %127, %129 in 1 : vector<2x16xf32>, vector<2x16xf32>, vector<2x16xf32>, vector<2x16xf32> -> vector<2x64xf32>
    %131 = vector.extract_strided_slice %13 {offsets = [3, 0, 64], sizes = [1, 2, 16], strides = [1, 1, 1]} : vector<8x2x96xf32> to vector<1x2x16xf32>
    %132 = vector.shape_cast %131 : vector<1x2x16xf32> to vector<2x16xf32>
    %133 = vector.extract_strided_slice %13 {offsets = [4, 0, 80], sizes = [1, 2, 16], strides = [1, 1, 1]} : vector<8x2x96xf32> to vector<1x2x16xf32>
    %134 = vector.shape_cast %133 : vector<1x2x16xf32> to vector<2x16xf32>
    %135 = tpu.concatenate %132, %134 in 1 : vector<2x16xf32>, vector<2x16xf32> -> vector<2x32xf32>
    %136 = vector.extract_strided_slice %121 {offsets = [0, 0], sizes = [2, 64], strides = [1, 1]} : vector<2x96xf32> to vector<2x64xf32>
    %137 = arith.addf %130, %136 : vector<2x64xf32>
    %138 = arith.negf %137 : vector<2x64xf32>
    %139 = math.exp %138 : vector<2x64xf32>
    %cst_22 = arith.constant 1.000000e+00 : f32
    %140 = vector.broadcast %cst_22 : f32 to vector<2x64xf32>
    %141 = arith.addf %140, %139 : vector<2x64xf32>
    %142 = arith.divf %140, %141 : vector<2x64xf32>
    %143 = vector.extract_strided_slice %142 {offsets = [0, 0], sizes = [2, 32], strides = [1, 1]} : vector<2x64xf32> to vector<2x32xf32>
    %144 = vector.extract_strided_slice %142 {offsets = [0, 32], sizes = [2, 32], strides = [1, 1]} : vector<2x64xf32> to vector<2x32xf32>
    %145 = vector.extract_strided_slice %121 {offsets = [0, 64], sizes = [2, 32], strides = [1, 1]} : vector<2x96xf32> to vector<2x32xf32>
    %146 = arith.mulf %143, %145 : vector<2x32xf32>
    %147 = arith.addf %135, %146 : vector<2x32xf32>
    %148 = math.tanh %147 : vector<2x32xf32>
    %cst_23 = arith.constant 1.000000e+00 : f32
    %149 = vector.broadcast %cst_23 : f32 to vector<2x32xf32>
    %150 = arith.subf %149, %144 : vector<2x32xf32>
    %151 = arith.mulf %150, %148 : vector<2x32xf32>
    %152 = arith.mulf %144, %118 : vector<2x32xf32>
    %153 = arith.addf %151, %152 : vector<2x32xf32>
    %154 = vector.extract_strided_slice %153 {offsets = [0, 0], sizes = [2, 16], strides = [1, 1]} : vector<2x32xf32> to vector<2x16xf32>
    %155 = vector.extract_strided_slice %153 {offsets = [0, 16], sizes = [2, 16], strides = [1, 1]} : vector<2x32xf32> to vector<2x16xf32>
    %cst_24 = arith.constant dense<0.000000e+00> : vector<2x96xf32>
    %156 = tpu.matmul %153, %14, %cst_24 {dimension_numbers = #tpu.dot_dimension_numbers<[1], [0], [0], [1], [0, 0, 1, 1], [], []>} : vector<2x32xf32>, vector<32x96xf32>, vector<2x96xf32> -> vector<2x96xf32>
    %157 = vector.extract_strided_slice %13 {offsets = [4, 0, 0], sizes = [1, 2, 16], strides = [1, 1, 1]} : vector<8x2x96xf32> to vector<1x2x16xf32>
    %158 = vector.shape_cast %157 : vector<1x2x16xf32> to vector<2x16xf32>
    %159 = vector.extract_strided_slice %13 {offsets = [3, 0, 16], sizes = [1, 2, 16], strides = [1, 1, 1]} : vector<8x2x96xf32> to vector<1x2x16xf32>
    %160 = vector.shape_cast %159 : vector<1x2x16xf32> to vector<2x16xf32>
    %161 = vector.extract_strided_slice %13 {offsets = [4, 0, 32], sizes = [1, 2, 16], strides = [1, 1, 1]} : vector<8x2x96xf32> to vector<1x2x16xf32>
    %162 = vector.shape_cast %161 : vector<1x2x16xf32> to vector<2x16xf32>
    %163 = vector.extract_strided_slice %13 {offsets = [3, 0, 48], sizes = [1, 2, 16], strides = [1, 1, 1]} : vector<8x2x96xf32> to vector<1x2x16xf32>
    %164 = vector.shape_cast %163 : vector<1x2x16xf32> to vector<2x16xf32>
    %165 = tpu.concatenate %158, %160, %162, %164 in 1 : vector<2x16xf32>, vector<2x16xf32>, vector<2x16xf32>, vector<2x16xf32> -> vector<2x64xf32>
    %166 = vector.extract_strided_slice %13 {offsets = [4, 0, 64], sizes = [1, 2, 16], strides = [1, 1, 1]} : vector<8x2x96xf32> to vector<1x2x16xf32>
    %167 = vector.shape_cast %166 : vector<1x2x16xf32> to vector<2x16xf32>
    %168 = vector.extract_strided_slice %13 {offsets = [3, 0, 80], sizes = [1, 2, 16], strides = [1, 1, 1]} : vector<8x2x96xf32> to vector<1x2x16xf32>
    %169 = vector.shape_cast %168 : vector<1x2x16xf32> to vector<2x16xf32>
    %170 = tpu.concatenate %167, %169 in 1 : vector<2x16xf32>, vector<2x16xf32> -> vector<2x32xf32>
    %171 = vector.extract_strided_slice %156 {offsets = [0, 0], sizes = [2, 64], strides = [1, 1]} : vector<2x96xf32> to vector<2x64xf32>
    %172 = arith.addf %165, %171 : vector<2x64xf32>
    %173 = arith.negf %172 : vector<2x64xf32>
    %174 = math.exp %173 : vector<2x64xf32>
    %cst_25 = arith.constant 1.000000e+00 : f32
    %175 = vector.broadcast %cst_25 : f32 to vector<2x64xf32>
    %176 = arith.addf %175, %174 : vector<2x64xf32>
    %177 = arith.divf %175, %176 : vector<2x64xf32>
    %178 = vector.extract_strided_slice %177 {offsets = [0, 0], sizes = [2, 32], strides = [1, 1]} : vector<2x64xf32> to vector<2x32xf32>
    %179 = vector.extract_strided_slice %177 {offsets = [0, 32], sizes = [2, 32], strides = [1, 1]} : vector<2x64xf32> to vector<2x32xf32>
    %180 = vector.extract_strided_slice %156 {offsets = [0, 64], sizes = [2, 32], strides = [1, 1]} : vector<2x96xf32> to vector<2x32xf32>
    %181 = arith.mulf %178, %180 : vector<2x32xf32>
    %182 = arith.addf %170, %181 : vector<2x32xf32>
    %183 = math.tanh %182 : vector<2x32xf32>
    %cst_26 = arith.constant 1.000000e+00 : f32
    %184 = vector.broadcast %cst_26 : f32 to vector<2x32xf32>
    %185 = arith.subf %184, %179 : vector<2x32xf32>
    %186 = arith.mulf %185, %183 : vector<2x32xf32>
    %187 = arith.mulf %179, %153 : vector<2x32xf32>
    %188 = arith.addf %186, %187 : vector<2x32xf32>
    %189 = vector.extract_strided_slice %188 {offsets = [0, 0], sizes = [2, 16], strides = [1, 1]} : vector<2x32xf32> to vector<2x16xf32>
    %190 = vector.extract_strided_slice %188 {offsets = [0, 16], sizes = [2, 16], strides = [1, 1]} : vector<2x32xf32> to vector<2x16xf32>
    %cst_27 = arith.constant dense<0.000000e+00> : vector<2x96xf32>
    %191 = tpu.matmul %188, %14, %cst_27 {dimension_numbers = #tpu.dot_dimension_numbers<[1], [0], [0], [1], [0, 0, 1, 1], [], []>} : vector<2x32xf32>, vector<32x96xf32>, vector<2x96xf32> -> vector<2x96xf32>
    %192 = vector.extract_strided_slice %13 {offsets = [5, 0, 0], sizes = [1, 2, 16], strides = [1, 1, 1]} : vector<8x2x96xf32> to vector<1x2x16xf32>
    %193 = vector.shape_cast %192 : vector<1x2x16xf32> to vector<2x16xf32>
    %194 = vector.extract_strided_slice %13 {offsets = [2, 0, 16], sizes = [1, 2, 16], strides = [1, 1, 1]} : vector<8x2x96xf32> to vector<1x2x16xf32>
    %195 = vector.shape_cast %194 : vector<1x2x16xf32> to vector<2x16xf32>
    %196 = vector.extract_strided_slice %13 {offsets = [5, 0, 32], sizes = [1, 2, 16], strides = [1, 1, 1]} : vector<8x2x96xf32> to vector<1x2x16xf32>
    %197 = vector.shape_cast %196 : vector<1x2x16xf32> to vector<2x16xf32>
    %198 = vector.extract_strided_slice %13 {offsets = [2, 0, 48], sizes = [1, 2, 16], strides = [1, 1, 1]} : vector<8x2x96xf32> to vector<1x2x16xf32>
    %199 = vector.shape_cast %198 : vector<1x2x16xf32> to vector<2x16xf32>
    %200 = tpu.concatenate %193, %195, %197, %199 in 1 : vector<2x16xf32>, vector<2x16xf32>, vector<2x16xf32>, vector<2x16xf32> -> vector<2x64xf32>
    %201 = vector.extract_strided_slice %13 {offsets = [5, 0, 64], sizes = [1, 2, 16], strides = [1, 1, 1]} : vector<8x2x96xf32> to vector<1x2x16xf32>
    %202 = vector.shape_cast %201 : vector<1x2x16xf32> to vector<2x16xf32>
    %203 = vector.extract_strided_slice %13 {offsets = [2, 0, 80], sizes = [1, 2, 16], strides = [1, 1, 1]} : vector<8x2x96xf32> to vector<1x2x16xf32>
    %204 = vector.shape_cast %203 : vector<1x2x16xf32> to vector<2x16xf32>
    %205 = tpu.concatenate %202, %204 in 1 : vector<2x16xf32>, vector<2x16xf32> -> vector<2x32xf32>
    %206 = vector.extract_strided_slice %191 {offsets = [0, 0], sizes = [2, 64], strides = [1, 1]} : vector<2x96xf32> to vector<2x64xf32>
    %207 = arith.addf %200, %206 : vector<2x64xf32>
    %208 = arith.negf %207 : vector<2x64xf32>
    %209 = math.exp %208 : vector<2x64xf32>
    %cst_28 = arith.constant 1.000000e+00 : f32
    %210 = vector.broadcast %cst_28 : f32 to vector<2x64xf32>
    %211 = arith.addf %210, %209 : vector<2x64xf32>
    %212 = arith.divf %210, %211 : vector<2x64xf32>
    %213 = vector.extract_strided_slice %212 {offsets = [0, 0], sizes = [2, 32], strides = [1, 1]} : vector<2x64xf32> to vector<2x32xf32>
    %214 = vector.extract_strided_slice %212 {offsets = [0, 32], sizes = [2, 32], strides = [1, 1]} : vector<2x64xf32> to vector<2x32xf32>
    %215 = vector.extract_strided_slice %191 {offsets = [0, 64], sizes = [2, 32], strides = [1, 1]} : vector<2x96xf32> to vector<2x32xf32>
    %216 = arith.mulf %213, %215 : vector<2x32xf32>
    %217 = arith.addf %205, %216 : vector<2x32xf32>
    %218 = math.tanh %217 : vector<2x32xf32>
    %cst_29 = arith.constant 1.000000e+00 : f32
    %219 = vector.broadcast %cst_29 : f32 to vector<2x32xf32>
    %220 = arith.subf %219, %214 : vector<2x32xf32>
    %221 = arith.mulf %220, %218 : vector<2x32xf32>
    %222 = arith.mulf %214, %188 : vector<2x32xf32>
    %223 = arith.addf %221, %222 : vector<2x32xf32>
    %224 = vector.extract_strided_slice %223 {offsets = [0, 0], sizes = [2, 16], strides = [1, 1]} : vector<2x32xf32> to vector<2x16xf32>
    %225 = vector.extract_strided_slice %223 {offsets = [0, 16], sizes = [2, 16], strides = [1, 1]} : vector<2x32xf32> to vector<2x16xf32>
    %cst_30 = arith.constant dense<0.000000e+00> : vector<2x96xf32>
    %226 = tpu.matmul %223, %14, %cst_30 {dimension_numbers = #tpu.dot_dimension_numbers<[1], [0], [0], [1], [0, 0, 1, 1], [], []>} : vector<2x32xf32>, vector<32x96xf32>, vector<2x96xf32> -> vector<2x96xf32>
    %227 = vector.extract_strided_slice %13 {offsets = [6, 0, 0], sizes = [1, 2, 16], strides = [1, 1, 1]} : vector<8x2x96xf32> to vector<1x2x16xf32>
    %228 = vector.shape_cast %227 : vector<1x2x16xf32> to vector<2x16xf32>
    %229 = vector.extract_strided_slice %13 {offsets = [1, 0, 16], sizes = [1, 2, 16], strides = [1, 1, 1]} : vector<8x2x96xf32> to vector<1x2x16xf32>
    %230 = vector.shape_cast %229 : vector<1x2x16xf32> to vector<2x16xf32>
    %231 = vector.extract_strided_slice %13 {offsets = [6, 0, 32], sizes = [1, 2, 16], strides = [1, 1, 1]} : vector<8x2x96xf32> to vector<1x2x16xf32>
    %232 = vector.shape_cast %231 : vector<1x2x16xf32> to vector<2x16xf32>
    %233 = vector.extract_strided_slice %13 {offsets = [1, 0, 48], sizes = [1, 2, 16], strides = [1, 1, 1]} : vector<8x2x96xf32> to vector<1x2x16xf32>
    %234 = vector.shape_cast %233 : vector<1x2x16xf32> to vector<2x16xf32>
    %235 = tpu.concatenate %228, %230, %232, %234 in 1 : vector<2x16xf32>, vector<2x16xf32>, vector<2x16xf32>, vector<2x16xf32> -> vector<2x64xf32>
    %236 = vector.extract_strided_slice %13 {offsets = [6, 0, 64], sizes = [1, 2, 16], strides = [1, 1, 1]} : vector<8x2x96xf32> to vector<1x2x16xf32>
    %237 = vector.shape_cast %236 : vector<1x2x16xf32> to vector<2x16xf32>
    %238 = vector.extract_strided_slice %13 {offsets = [1, 0, 80], sizes = [1, 2, 16], strides = [1, 1, 1]} : vector<8x2x96xf32> to vector<1x2x16xf32>
    %239 = vector.shape_cast %238 : vector<1x2x16xf32> to vector<2x16xf32>
    %240 = tpu.concatenate %237, %239 in 1 : vector<2x16xf32>, vector<2x16xf32> -> vector<2x32xf32>
    %241 = vector.extract_strided_slice %226 {offsets = [0, 0], sizes = [2, 64], strides = [1, 1]} : vector<2x96xf32> to vector<2x64xf32>
    %242 = arith.addf %235, %241 : vector<2x64xf32>
    %243 = arith.negf %242 : vector<2x64xf32>
    %244 = math.exp %243 : vector<2x64xf32>
    %cst_31 = arith.constant 1.000000e+00 : f32
    %245 = vector.broadcast %cst_31 : f32 to vector<2x64xf32>
    %246 = arith.addf %245, %244 : vector<2x64xf32>
    %247 = arith.divf %245, %246 : vector<2x64xf32>
    %248 = vector.extract_strided_slice %247 {offsets = [0, 0], sizes = [2, 32], strides = [1, 1]} : vector<2x64xf32> to vector<2x32xf32>
    %249 = vector.extract_strided_slice %247 {offsets = [0, 32], sizes = [2, 32], strides = [1, 1]} : vector<2x64xf32> to vector<2x32xf32>
    %250 = vector.extract_strided_slice %226 {offsets = [0, 64], sizes = [2, 32], strides = [1, 1]} : vector<2x96xf32> to vector<2x32xf32>
    %251 = arith.mulf %248, %250 : vector<2x32xf32>
    %252 = arith.addf %240, %251 : vector<2x32xf32>
    %253 = math.tanh %252 : vector<2x32xf32>
    %cst_32 = arith.constant 1.000000e+00 : f32
    %254 = vector.broadcast %cst_32 : f32 to vector<2x32xf32>
    %255 = arith.subf %254, %249 : vector<2x32xf32>
    %256 = arith.mulf %255, %253 : vector<2x32xf32>
    %257 = arith.mulf %249, %223 : vector<2x32xf32>
    %258 = arith.addf %256, %257 : vector<2x32xf32>
    %259 = vector.extract_strided_slice %258 {offsets = [0, 0], sizes = [2, 16], strides = [1, 1]} : vector<2x32xf32> to vector<2x16xf32>
    %260 = vector.extract_strided_slice %258 {offsets = [0, 16], sizes = [2, 16], strides = [1, 1]} : vector<2x32xf32> to vector<2x16xf32>
    %cst_33 = arith.constant dense<0.000000e+00> : vector<2x96xf32>
    %261 = tpu.matmul %258, %14, %cst_33 {dimension_numbers = #tpu.dot_dimension_numbers<[1], [0], [0], [1], [0, 0, 1, 1], [], []>} : vector<2x32xf32>, vector<32x96xf32>, vector<2x96xf32> -> vector<2x96xf32>
    %262 = vector.extract_strided_slice %13 {offsets = [7, 0, 0], sizes = [1, 2, 16], strides = [1, 1, 1]} : vector<8x2x96xf32> to vector<1x2x16xf32>
    %263 = vector.shape_cast %262 : vector<1x2x16xf32> to vector<2x16xf32>
    %264 = vector.extract_strided_slice %13 {offsets = [0, 0, 16], sizes = [1, 2, 16], strides = [1, 1, 1]} : vector<8x2x96xf32> to vector<1x2x16xf32>
    %265 = vector.shape_cast %264 : vector<1x2x16xf32> to vector<2x16xf32>
    %266 = vector.extract_strided_slice %13 {offsets = [7, 0, 32], sizes = [1, 2, 16], strides = [1, 1, 1]} : vector<8x2x96xf32> to vector<1x2x16xf32>
    %267 = vector.shape_cast %266 : vector<1x2x16xf32> to vector<2x16xf32>
    %268 = vector.extract_strided_slice %13 {offsets = [0, 0, 48], sizes = [1, 2, 16], strides = [1, 1, 1]} : vector<8x2x96xf32> to vector<1x2x16xf32>
    %269 = vector.shape_cast %268 : vector<1x2x16xf32> to vector<2x16xf32>
    %270 = tpu.concatenate %263, %265, %267, %269 in 1 : vector<2x16xf32>, vector<2x16xf32>, vector<2x16xf32>, vector<2x16xf32> -> vector<2x64xf32>
    %271 = vector.extract_strided_slice %13 {offsets = [7, 0, 64], sizes = [1, 2, 16], strides = [1, 1, 1]} : vector<8x2x96xf32> to vector<1x2x16xf32>
    %272 = vector.shape_cast %271 : vector<1x2x16xf32> to vector<2x16xf32>
    %273 = vector.extract_strided_slice %13 {offsets = [0, 0, 80], sizes = [1, 2, 16], strides = [1, 1, 1]} : vector<8x2x96xf32> to vector<1x2x16xf32>
    %274 = vector.shape_cast %273 : vector<1x2x16xf32> to vector<2x16xf32>
    %275 = tpu.concatenate %272, %274 in 1 : vector<2x16xf32>, vector<2x16xf32> -> vector<2x32xf32>
    %276 = vector.extract_strided_slice %261 {offsets = [0, 0], sizes = [2, 64], strides = [1, 1]} : vector<2x96xf32> to vector<2x64xf32>
    %277 = arith.addf %270, %276 : vector<2x64xf32>
    %278 = arith.negf %277 : vector<2x64xf32>
    %279 = math.exp %278 : vector<2x64xf32>
    %cst_34 = arith.constant 1.000000e+00 : f32
    %280 = vector.broadcast %cst_34 : f32 to vector<2x64xf32>
    %281 = arith.addf %280, %279 : vector<2x64xf32>
    %282 = arith.divf %280, %281 : vector<2x64xf32>
    %283 = vector.extract_strided_slice %282 {offsets = [0, 0], sizes = [2, 32], strides = [1, 1]} : vector<2x64xf32> to vector<2x32xf32>
    %284 = vector.extract_strided_slice %282 {offsets = [0, 32], sizes = [2, 32], strides = [1, 1]} : vector<2x64xf32> to vector<2x32xf32>
    %285 = vector.extract_strided_slice %261 {offsets = [0, 64], sizes = [2, 32], strides = [1, 1]} : vector<2x96xf32> to vector<2x32xf32>
    %286 = arith.mulf %283, %285 : vector<2x32xf32>
    %287 = arith.addf %275, %286 : vector<2x32xf32>
    %288 = math.tanh %287 : vector<2x32xf32>
    %cst_35 = arith.constant 1.000000e+00 : f32
    %289 = vector.broadcast %cst_35 : f32 to vector<2x32xf32>
    %290 = arith.subf %289, %284 : vector<2x32xf32>
    %291 = arith.mulf %290, %288 : vector<2x32xf32>
    %292 = arith.mulf %284, %258 : vector<2x32xf32>
    %293 = arith.addf %291, %292 : vector<2x32xf32>
    %294 = vector.extract_strided_slice %293 {offsets = [0, 0], sizes = [2, 16], strides = [1, 1]} : vector<2x32xf32> to vector<2x16xf32>
    %295 = vector.extract_strided_slice %293 {offsets = [0, 16], sizes = [2, 16], strides = [1, 1]} : vector<2x32xf32> to vector<2x16xf32>
    %296 = tpu.concatenate %49, %295 in 1 : vector<2x16xf32>, vector<2x16xf32> -> vector<2x32xf32>
    %297 = tpu.concatenate %84, %260 in 1 : vector<2x16xf32>, vector<2x16xf32> -> vector<2x32xf32>
    %298 = tpu.concatenate %119, %225 in 1 : vector<2x16xf32>, vector<2x16xf32> -> vector<2x32xf32>
    %299 = tpu.concatenate %154, %190 in 1 : vector<2x16xf32>, vector<2x16xf32> -> vector<2x32xf32>
    %300 = tpu.concatenate %189, %155 in 1 : vector<2x16xf32>, vector<2x16xf32> -> vector<2x32xf32>
    %301 = tpu.concatenate %224, %120 in 1 : vector<2x16xf32>, vector<2x16xf32> -> vector<2x32xf32>
    %302 = tpu.concatenate %259, %85 in 1 : vector<2x16xf32>, vector<2x16xf32> -> vector<2x32xf32>
    %303 = tpu.concatenate %294, %50 in 1 : vector<2x16xf32>, vector<2x16xf32> -> vector<2x32xf32>
    %304 = vector.shape_cast %296 : vector<2x32xf32> to vector<1x2x32xf32>
    %305 = vector.shape_cast %297 : vector<2x32xf32> to vector<1x2x32xf32>
    %306 = vector.shape_cast %298 : vector<2x32xf32> to vector<1x2x32xf32>
    %307 = vector.shape_cast %299 : vector<2x32xf32> to vector<1x2x32xf32>
    %308 = vector.shape_cast %300 : vector<2x32xf32> to vector<1x2x32xf32>
    %309 = vector.shape_cast %301 : vector<2x32xf32> to vector<1x2x32xf32>
    %310 = vector.shape_cast %302 : vector<2x32xf32> to vector<1x2x32xf32>
    %311 = vector.shape_cast %303 : vector<2x32xf32> to vector<1x2x32xf32>
    %312 = tpu.concatenate %304, %305, %306, %307, %308, %309, %310, %311 in 0 : vector<1x2x32xf32>, vector<1x2x32xf32>, vector<1x2x32xf32>, vector<1x2x32xf32>, vector<1x2x32xf32>, vector<1x2x32xf32>, vector<1x2x32xf32>, vector<1x2x32xf32> -> vector<8x2x32xf32>
    %c0_36 = arith.constant 0 : index
    %c0_37 = arith.constant 0 : index
    %313 = vector.load %arg14[%c0_36, %c0_37] : memref<32x32xf32, #tpu.memory_space<vmem>>, vector<32x32xf32>
    "tpu.trace_start"() <{level = 10 : i32, message = "tbh,hv->tbv"}> : () -> ()
    %cst_38 = arith.constant dense<0.000000e+00> : vector<8x2x32xf32>
    %314 = tpu.matmul %312, %313, %cst_38 {dimension_numbers = #tpu.dot_dimension_numbers<[2], [0], [0, 1], [1], [0, 0, 0, 1, 1, 1], [], []>} : vector<8x2x32xf32>, vector<32x32xf32>, vector<8x2x32xf32> -> vector<8x2x32xf32>
    "tpu.trace_stop"() : () -> ()
    %c0_39 = arith.constant 0 : index
    %c0_40 = arith.constant 0 : index
    %315 = vector.load %arg15[%c0_39, %c0_40] : memref<1x32xf32, #tpu.memory_space<vmem>>, vector<1x32xf32>
    %316 = vector.shape_cast %315 : vector<1x32xf32> to vector<1x1x32xf32>
    %317 = vector.broadcast %316 : vector<1x1x32xf32> to vector<8x2x32xf32>
    %318 = arith.addf %314, %317 : vector<8x2x32xf32>
    %319 = math.tanh %318 : vector<8x2x32xf32>
    %c0_41 = arith.constant 0 : index
    %c0_42 = arith.constant 0 : index
    %320 = vector.load %arg13[%c0_41, %c0_42] : memref<1x32xf32, #tpu.memory_space<vmem>>, vector<1x32xf32>
    %321 = vector.shape_cast %320 : vector<1x32xf32> to vector<1x1x32xf32>
    %322 = vector.broadcast %321 : vector<1x1x32xf32> to vector<8x2x32xf32>
    %323 = arith.mulf %319, %322 : vector<8x2x32xf32>
    %cst_43 = arith.constant dense<0.000000e+00> : vector<8x2xf32>
    %324 = vector.multi_reduction <add>, %323, %cst_43 [2] : vector<8x2x32xf32> to vector<8x2xf32>
    %325 = tpu.iota {dimensions = array<i32: 0>} : vector<8x2xi32>
    %c0_44 = arith.constant 0 : index
    %c0_45 = arith.constant 0 : index
    %326 = vector.load %arg1[%c0_44, %c0_45] : memref<1x2xi32, #tpu.memory_space<vmem>>, vector<1x2xi32>
    %327 = vector.broadcast %326 : vector<1x2xi32> to vector<8x2xi32>
    %328 = arith.cmpi slt, %325, %327 : vector<8x2xi32>
    %329 = arith.extui %328 : vector<8x2xi1> to vector<8x2xi32>
    %330 = arith.sitofp %329 : vector<8x2xi32> to vector<8x2xf32>
    %cst_46 = arith.constant 0.000000e+00 : f32
    %331 = vector.broadcast %cst_46 : f32 to vector<8x2xf32>
    %332 = arith.cmpf ogt, %330, %331 : vector<8x2xf32>
    %cst_47 = arith.constant -1.000000e+30 : f32
    %333 = vector.broadcast %cst_47 : f32 to vector<8x2xf32>
    %334 = arith.select %332, %324, %333 : vector<8x2xi1>, vector<8x2xf32>
    %cst_48 = arith.constant dense<0xFF800000> : vector<2xf32>
    %335 = vector.multi_reduction <maximumf>, %334, %cst_48 [0] : vector<8x2xf32> to vector<2xf32>
    %336 = vector.shape_cast %335 : vector<2xf32> to vector<1x2xf32>
    %337 = vector.broadcast %336 : vector<1x2xf32> to vector<8x2xf32>
    %338 = arith.subf %334, %337 : vector<8x2xf32>
    %339 = math.exp %338 : vector<8x2xf32>
    %340 = arith.mulf %339, %330 : vector<8x2xf32>
    %cst_49 = arith.constant dense<0.000000e+00> : vector<2xf32>
    %341 = vector.multi_reduction <add>, %340, %cst_49 [0] : vector<8x2xf32> to vector<2xf32>
    %342 = vector.shape_cast %341 : vector<2xf32> to vector<1x2xf32>
    %cst_50 = arith.constant 1.000000e-30 : f32
    %343 = vector.broadcast %cst_50 : f32 to vector<1x2xf32>
    %344 = arith.addf %342, %343 : vector<1x2xf32>
    %345 = vector.broadcast %344 : vector<1x2xf32> to vector<8x2xf32>
    %346 = arith.divf %340, %345 : vector<8x2xf32>
    %347 = vector.shape_cast %346 : vector<8x2xf32> to vector<8x2x1xf32>
    %348 = vector.broadcast %347 : vector<8x2x1xf32> to vector<8x2x32xf32>
    %349 = arith.mulf %348, %312 : vector<8x2x32xf32>
    %cst_51 = arith.constant dense<0.000000e+00> : vector<2x32xf32>
    %350 = vector.multi_reduction <add>, %349, %cst_51 [0] : vector<8x2x32xf32> to vector<2x32xf32>
    %351 = tpu.iota {dimensions = array<i32: 2>} : vector<12x2x50xi32>
    %c0_52 = arith.constant 0 : index
    %c0_53 = arith.constant 0 : index
    %c0_54 = arith.constant 0 : index
    %352 = vector.load %arg2[%c0_52, %c0_53, %c0_54] : memref<12x2x1xi32, #tpu.memory_space<vmem>>, vector<12x2x1xi32>
    %353 = vector.broadcast %352 : vector<12x2x1xi32> to vector<12x2x50xi32>
    %354 = arith.cmpi eq, %351, %353 : vector<12x2x50xi32>
    %355 = arith.extui %354 : vector<12x2x50xi1> to vector<12x2x50xi32>
    %356 = arith.sitofp %355 : vector<12x2x50xi32> to vector<12x2x50xf32>
    "tpu.trace_start"() <{level = 10 : i32, message = "tbv,vd->tbd"}> : () -> ()
    %cst_55 = arith.constant dense<0.000000e+00> : vector<12x2x32xf32>
    %357 = tpu.matmul %356, %0, %cst_55 {dimension_numbers = #tpu.dot_dimension_numbers<[2], [0], [0, 1], [1], [0, 0, 0, 1, 1, 1], [], []>} : vector<12x2x50xf32>, vector<50x32xf32>, vector<12x2x32xf32> -> vector<12x2x32xf32>
    "tpu.trace_stop"() : () -> ()
    %c0_56 = arith.constant 0 : index
    %c0_57 = arith.constant 0 : index
    %358 = vector.load %arg8[%c0_56, %c0_57] : memref<2x32xf32, #tpu.memory_space<vmem>>, vector<2x32xf32>
    %c0_58 = arith.constant 0 : index
    %c0_59 = arith.constant 0 : index
    %359 = vector.load %arg9[%c0_58, %c0_59] : memref<2x32xf32, #tpu.memory_space<vmem>>, vector<2x32xf32>
    %c0_60 = arith.constant 0 : index
    %c0_61 = arith.constant 0 : index
    %c0_62 = arith.constant 0 : index
    %360 = vector.load %arg3[%c0_60, %c0_61, %c0_62] : memref<12x2x1xi32, #tpu.memory_space<vmem>>, vector<12x2x1xi32>
    %c0_i32 = arith.constant 0 : i32
    %361 = vector.broadcast %c0_i32 : i32 to vector<12x2x1xi32>
    %362 = arith.cmpi eq, %360, %361 : vector<12x2x1xi32>
    %363 = vector.extract_strided_slice %358 {offsets = [0, 0], sizes = [1, 32], strides = [1, 1]} : vector<2x32xf32> to vector<1x32xf32>
    %364 = vector.shape_cast %363 : vector<1x32xf32> to vector<1x1x32xf32>
    %365 = vector.extract_strided_slice %358 {offsets = [1, 0], sizes = [1, 32], strides = [1, 1]} : vector<2x32xf32> to vector<1x32xf32>
    %366 = vector.shape_cast %365 : vector<1x32xf32> to vector<1x1x32xf32>
    %367 = vector.shape_cast %362 : vector<12x2x1xi1> to vector<12x2x1xi1>
    %368 = vector.broadcast %367 : vector<12x2x1xi1> to vector<12x2x32xi1>
    %369 = vector.shape_cast %364 : vector<1x1x32xf32> to vector<1x1x32xf32>
    %370 = vector.broadcast %369 : vector<1x1x32xf32> to vector<12x2x32xf32>
    %371 = vector.shape_cast %366 : vector<1x1x32xf32> to vector<1x1x32xf32>
    %372 = vector.broadcast %371 : vector<1x1x32xf32> to vector<12x2x32xf32>
    %373 = arith.select %368, %370, %372 : vector<12x2x32xi1>, vector<12x2x32xf32>
    %c0_63 = arith.constant 0 : index
    %c0_64 = arith.constant 0 : index
    %c0_65 = arith.constant 0 : index
    %374 = vector.load %arg4[%c0_63, %c0_64, %c0_65] : memref<12x2x1xi32, #tpu.memory_space<vmem>>, vector<12x2x1xi32>
    %c0_i32_66 = arith.constant 0 : i32
    %375 = vector.broadcast %c0_i32_66 : i32 to vector<12x2x1xi32>
    %376 = arith.cmpi eq, %374, %375 : vector<12x2x1xi32>
    %377 = vector.extract_strided_slice %359 {offsets = [0, 0], sizes = [1, 32], strides = [1, 1]} : vector<2x32xf32> to vector<1x32xf32>
    %378 = vector.shape_cast %377 : vector<1x32xf32> to vector<1x1x32xf32>
    %379 = vector.extract_strided_slice %359 {offsets = [1, 0], sizes = [1, 32], strides = [1, 1]} : vector<2x32xf32> to vector<1x32xf32>
    %380 = vector.shape_cast %379 : vector<1x32xf32> to vector<1x1x32xf32>
    %381 = vector.shape_cast %376 : vector<12x2x1xi1> to vector<12x2x1xi1>
    %382 = vector.broadcast %381 : vector<12x2x1xi1> to vector<12x2x32xi1>
    %383 = vector.shape_cast %378 : vector<1x1x32xf32> to vector<1x1x32xf32>
    %384 = vector.broadcast %383 : vector<1x1x32xf32> to vector<12x2x32xf32>
    %385 = vector.shape_cast %380 : vector<1x1x32xf32> to vector<1x1x32xf32>
    %386 = vector.broadcast %385 : vector<1x1x32xf32> to vector<12x2x32xf32>
    %387 = arith.select %382, %384, %386 : vector<12x2x32xi1>, vector<12x2x32xf32>
    %388 = tpu.concatenate %357, %373, %387 in 2 : vector<12x2x32xf32>, vector<12x2x32xf32>, vector<12x2x32xf32> -> vector<12x2x96xf32>
    %c0_67 = arith.constant 0 : index
    %c0_68 = arith.constant 0 : index
    %389 = vector.load %arg17[%c0_67, %c0_68] : memref<32x96xf32, #tpu.memory_space<vmem>>, vector<32x96xf32>
    %cst_69 = arith.constant dense<0.000000e+00> : vector<2x96xf32>
    %390 = tpu.matmul %350, %389, %cst_69 {dimension_numbers = #tpu.dot_dimension_numbers<[1], [0], [0], [1], [0, 0, 1, 1], [], []>} : vector<2x32xf32>, vector<32x96xf32>, vector<2x96xf32> -> vector<2x96xf32>
    %c0_70 = arith.constant 0 : index
    %c0_71 = arith.constant 0 : index
    %391 = vector.load %arg19[%c0_70, %c0_71] : memref<1x96xf32, #tpu.memory_space<vmem>>, vector<1x96xf32>
    %392 = vector.broadcast %391 : vector<1x96xf32> to vector<2x96xf32>
    %393 = arith.addf %390, %392 : vector<2x96xf32>
    %c0_72 = arith.constant 0 : index
    %c0_73 = arith.constant 0 : index
    %394 = vector.load %arg16[%c0_72, %c0_73] : memref<96x96xf32, #tpu.memory_space<vmem>>, vector<96x96xf32>
    "tpu.trace_start"() <{level = 10 : i32, message = "tbx,xg->tbg"}> : () -> ()
    %cst_74 = arith.constant dense<0.000000e+00> : vector<12x2x96xf32>
    %395 = tpu.matmul %388, %394, %cst_74 {dimension_numbers = #tpu.dot_dimension_numbers<[2], [0], [0, 1], [1], [0, 0, 0, 1, 1, 1], [], []>} : vector<12x2x96xf32>, vector<96x96xf32>, vector<12x2x96xf32> -> vector<12x2x96xf32>
    "tpu.trace_stop"() : () -> ()
    %396 = vector.shape_cast %393 : vector<2x96xf32> to vector<1x2x96xf32>
    %397 = vector.broadcast %396 : vector<1x2x96xf32> to vector<12x2x96xf32>
    %398 = arith.addf %395, %397 : vector<12x2x96xf32>
    %c0_75 = arith.constant 0 : index
    %c0_76 = arith.constant 0 : index
    %399 = vector.load %arg18[%c0_75, %c0_76] : memref<32x96xf32, #tpu.memory_space<vmem>>, vector<32x96xf32>
    %cst_77 = arith.constant 0.000000e+00 : f32
    %400 = vector.broadcast %cst_77 : f32 to vector<2x32xf32>
    %cst_78 = arith.constant dense<0.000000e+00> : vector<2x96xf32>
    %401 = tpu.matmul %400, %399, %cst_78 {dimension_numbers = #tpu.dot_dimension_numbers<[1], [0], [0], [1], [0, 0, 1, 1], [], []>} : vector<2x32xf32>, vector<32x96xf32>, vector<2x96xf32> -> vector<2x96xf32>
    %402 = vector.extract_strided_slice %398 {offsets = [0, 0, 0], sizes = [1, 2, 16], strides = [1, 1, 1]} : vector<12x2x96xf32> to vector<1x2x16xf32>
    %403 = vector.shape_cast %402 : vector<1x2x16xf32> to vector<2x16xf32>
    %404 = vector.extract_strided_slice %398 {offsets = [11, 0, 16], sizes = [1, 2, 16], strides = [1, 1, 1]} : vector<12x2x96xf32> to vector<1x2x16xf32>
    %405 = vector.shape_cast %404 : vector<1x2x16xf32> to vector<2x16xf32>
    %406 = vector.extract_strided_slice %398 {offsets = [0, 0, 32], sizes = [1, 2, 16], strides = [1, 1, 1]} : vector<12x2x96xf32> to vector<1x2x16xf32>
    %407 = vector.shape_cast %406 : vector<1x2x16xf32> to vector<2x16xf32>
    %408 = vector.extract_strided_slice %398 {offsets = [11, 0, 48], sizes = [1, 2, 16], strides = [1, 1, 1]} : vector<12x2x96xf32> to vector<1x2x16xf32>
    %409 = vector.shape_cast %408 : vector<1x2x16xf32> to vector<2x16xf32>
    %410 = tpu.concatenate %403, %405, %407, %409 in 1 : vector<2x16xf32>, vector<2x16xf32>, vector<2x16xf32>, vector<2x16xf32> -> vector<2x64xf32>
    %411 = vector.extract_strided_slice %398 {offsets = [0, 0, 64], sizes = [1, 2, 16], strides = [1, 1, 1]} : vector<12x2x96xf32> to vector<1x2x16xf32>
    %412 = vector.shape_cast %411 : vector<1x2x16xf32> to vector<2x16xf32>
    %413 = vector.extract_strided_slice %398 {offsets = [11, 0, 80], sizes = [1, 2, 16], strides = [1, 1, 1]} : vector<12x2x96xf32> to vector<1x2x16xf32>
    %414 = vector.shape_cast %413 : vector<1x2x16xf32> to vector<2x16xf32>
    %415 = tpu.concatenate %412, %414 in 1 : vector<2x16xf32>, vector<2x16xf32> -> vector<2x32xf32>
    %416 = vector.extract_strided_slice %401 {offsets = [0, 0], sizes = [2, 64], strides = [1, 1]} : vector<2x96xf32> to vector<2x64xf32>
    %417 = arith.addf %410, %416 : vector<2x64xf32>
    %418 = arith.negf %417 : vector<2x64xf32>
    %419 = math.exp %418 : vector<2x64xf32>
    %cst_79 = arith.constant 1.000000e+00 : f32
    %420 = vector.broadcast %cst_79 : f32 to vector<2x64xf32>
    %421 = arith.addf %420, %419 : vector<2x64xf32>
    %422 = arith.divf %420, %421 : vector<2x64xf32>
    %423 = vector.extract_strided_slice %422 {offsets = [0, 0], sizes = [2, 32], strides = [1, 1]} : vector<2x64xf32> to vector<2x32xf32>
    %424 = vector.extract_strided_slice %422 {offsets = [0, 32], sizes = [2, 32], strides = [1, 1]} : vector<2x64xf32> to vector<2x32xf32>
    %425 = vector.extract_strided_slice %401 {offsets = [0, 64], sizes = [2, 32], strides = [1, 1]} : vector<2x96xf32> to vector<2x32xf32>
    %426 = arith.mulf %423, %425 : vector<2x32xf32>
    %427 = arith.addf %415, %426 : vector<2x32xf32>
    %428 = math.tanh %427 : vector<2x32xf32>
    %cst_80 = arith.constant 1.000000e+00 : f32
    %429 = vector.broadcast %cst_80 : f32 to vector<2x32xf32>
    %430 = arith.subf %429, %424 : vector<2x32xf32>
    %431 = arith.mulf %430, %428 : vector<2x32xf32>
    %432 = arith.mulf %424, %400 : vector<2x32xf32>
    %433 = arith.addf %431, %432 : vector<2x32xf32>
    %434 = vector.extract_strided_slice %433 {offsets = [0, 0], sizes = [2, 16], strides = [1, 1]} : vector<2x32xf32> to vector<2x16xf32>
    %435 = vector.extract_strided_slice %433 {offsets = [0, 16], sizes = [2, 16], strides = [1, 1]} : vector<2x32xf32> to vector<2x16xf32>
    %cst_81 = arith.constant dense<0.000000e+00> : vector<2x96xf32>
    %436 = tpu.matmul %433, %399, %cst_81 {dimension_numbers = #tpu.dot_dimension_numbers<[1], [0], [0], [1], [0, 0, 1, 1], [], []>} : vector<2x32xf32>, vector<32x96xf32>, vector<2x96xf32> -> vector<2x96xf32>
    %437 = vector.extract_strided_slice %398 {offsets = [1, 0, 0], sizes = [1, 2, 16], strides = [1, 1, 1]} : vector<12x2x96xf32> to vector<1x2x16xf32>
    %438 = vector.shape_cast %437 : vector<1x2x16xf32> to vector<2x16xf32>
    %439 = vector.extract_strided_slice %398 {offsets = [10, 0, 16], sizes = [1, 2, 16], strides = [1, 1, 1]} : vector<12x2x96xf32> to vector<1x2x16xf32>
    %440 = vector.shape_cast %439 : vector<1x2x16xf32> to vector<2x16xf32>
    %441 = vector.extract_strided_slice %398 {offsets = [1, 0, 32], sizes = [1, 2, 16], strides = [1, 1, 1]} : vector<12x2x96xf32> to vector<1x2x16xf32>
    %442 = vector.shape_cast %441 : vector<1x2x16xf32> to vector<2x16xf32>
    %443 = vector.extract_strided_slice %398 {offsets = [10, 0, 48], sizes = [1, 2, 16], strides = [1, 1, 1]} : vector<12x2x96xf32> to vector<1x2x16xf32>
    %444 = vector.shape_cast %443 : vector<1x2x16xf32> to vector<2x16xf32>
    %445 = tpu.concatenate %438, %440, %442, %444 in 1 : vector<2x16xf32>, vector<2x16xf32>, vector<2x16xf32>, vector<2x16xf32> -> vector<2x64xf32>
    %446 = vector.extract_strided_slice %398 {offsets = [1, 0, 64], sizes = [1, 2, 16], strides = [1, 1, 1]} : vector<12x2x96xf32> to vector<1x2x16xf32>
    %447 = vector.shape_cast %446 : vector<1x2x16xf32> to vector<2x16xf32>
    %448 = vector.extract_strided_slice %398 {offsets = [10, 0, 80], sizes = [1, 2, 16], strides = [1, 1, 1]} : vector<12x2x96xf32> to vector<1x2x16xf32>
    %449 = vector.shape_cast %448 : vector<1x2x16xf32> to vector<2x16xf32>
    %450 = tpu.concatenate %447, %449 in 1 : vector<2x16xf32>, vector<2x16xf32> -> vector<2x32xf32>
    %451 = vector.extract_strided_slice %436 {offsets = [0, 0], sizes = [2, 64], strides = [1, 1]} : vector<2x96xf32> to vector<2x64xf32>
    %452 = arith.addf %445, %451 : vector<2x64xf32>
    %453 = arith.negf %452 : vector<2x64xf32>
    %454 = math.exp %453 : vector<2x64xf32>
    %cst_82 = arith.constant 1.000000e+00 : f32
    %455 = vector.broadcast %cst_82 : f32 to vector<2x64xf32>
    %456 = arith.addf %455, %454 : vector<2x64xf32>
    %457 = arith.divf %455, %456 : vector<2x64xf32>
    %458 = vector.extract_strided_slice %457 {offsets = [0, 0], sizes = [2, 32], strides = [1, 1]} : vector<2x64xf32> to vector<2x32xf32>
    %459 = vector.extract_strided_slice %457 {offsets = [0, 32], sizes = [2, 32], strides = [1, 1]} : vector<2x64xf32> to vector<2x32xf32>
    %460 = vector.extract_strided_slice %436 {offsets = [0, 64], sizes = [2, 32], strides = [1, 1]} : vector<2x96xf32> to vector<2x32xf32>
    %461 = arith.mulf %458, %460 : vector<2x32xf32>
    %462 = arith.addf %450, %461 : vector<2x32xf32>
    %463 = math.tanh %462 : vector<2x32xf32>
    %cst_83 = arith.constant 1.000000e+00 : f32
    %464 = vector.broadcast %cst_83 : f32 to vector<2x32xf32>
    %465 = arith.subf %464, %459 : vector<2x32xf32>
    %466 = arith.mulf %465, %463 : vector<2x32xf32>
    %467 = arith.mulf %459, %433 : vector<2x32xf32>
    %468 = arith.addf %466, %467 : vector<2x32xf32>
    %469 = vector.extract_strided_slice %468 {offsets = [0, 0], sizes = [2, 16], strides = [1, 1]} : vector<2x32xf32> to vector<2x16xf32>
    %470 = vector.extract_strided_slice %468 {offsets = [0, 16], sizes = [2, 16], strides = [1, 1]} : vector<2x32xf32> to vector<2x16xf32>
    %cst_84 = arith.constant dense<0.000000e+00> : vector<2x96xf32>
    %471 = tpu.matmul %468, %399, %cst_84 {dimension_numbers = #tpu.dot_dimension_numbers<[1], [0], [0], [1], [0, 0, 1, 1], [], []>} : vector<2x32xf32>, vector<32x96xf32>, vector<2x96xf32> -> vector<2x96xf32>
    %472 = vector.extract_strided_slice %398 {offsets = [2, 0, 0], sizes = [1, 2, 16], strides = [1, 1, 1]} : vector<12x2x96xf32> to vector<1x2x16xf32>
    %473 = vector.shape_cast %472 : vector<1x2x16xf32> to vector<2x16xf32>
    %474 = vector.extract_strided_slice %398 {offsets = [9, 0, 16], sizes = [1, 2, 16], strides = [1, 1, 1]} : vector<12x2x96xf32> to vector<1x2x16xf32>
    %475 = vector.shape_cast %474 : vector<1x2x16xf32> to vector<2x16xf32>
    %476 = vector.extract_strided_slice %398 {offsets = [2, 0, 32], sizes = [1, 2, 16], strides = [1, 1, 1]} : vector<12x2x96xf32> to vector<1x2x16xf32>
    %477 = vector.shape_cast %476 : vector<1x2x16xf32> to vector<2x16xf32>
    %478 = vector.extract_strided_slice %398 {offsets = [9, 0, 48], sizes = [1, 2, 16], strides = [1, 1, 1]} : vector<12x2x96xf32> to vector<1x2x16xf32>
    %479 = vector.shape_cast %478 : vector<1x2x16xf32> to vector<2x16xf32>
    %480 = tpu.concatenate %473, %475, %477, %479 in 1 : vector<2x16xf32>, vector<2x16xf32>, vector<2x16xf32>, vector<2x16xf32> -> vector<2x64xf32>
    %481 = vector.extract_strided_slice %398 {offsets = [2, 0, 64], sizes = [1, 2, 16], strides = [1, 1, 1]} : vector<12x2x96xf32> to vector<1x2x16xf32>
    %482 = vector.shape_cast %481 : vector<1x2x16xf32> to vector<2x16xf32>
    %483 = vector.extract_strided_slice %398 {offsets = [9, 0, 80], sizes = [1, 2, 16], strides = [1, 1, 1]} : vector<12x2x96xf32> to vector<1x2x16xf32>
    %484 = vector.shape_cast %483 : vector<1x2x16xf32> to vector<2x16xf32>
    %485 = tpu.concatenate %482, %484 in 1 : vector<2x16xf32>, vector<2x16xf32> -> vector<2x32xf32>
    %486 = vector.extract_strided_slice %471 {offsets = [0, 0], sizes = [2, 64], strides = [1, 1]} : vector<2x96xf32> to vector<2x64xf32>
    %487 = arith.addf %480, %486 : vector<2x64xf32>
    %488 = arith.negf %487 : vector<2x64xf32>
    %489 = math.exp %488 : vector<2x64xf32>
    %cst_85 = arith.constant 1.000000e+00 : f32
    %490 = vector.broadcast %cst_85 : f32 to vector<2x64xf32>
    %491 = arith.addf %490, %489 : vector<2x64xf32>
    %492 = arith.divf %490, %491 : vector<2x64xf32>
    %493 = vector.extract_strided_slice %492 {offsets = [0, 0], sizes = [2, 32], strides = [1, 1]} : vector<2x64xf32> to vector<2x32xf32>
    %494 = vector.extract_strided_slice %492 {offsets = [0, 32], sizes = [2, 32], strides = [1, 1]} : vector<2x64xf32> to vector<2x32xf32>
    %495 = vector.extract_strided_slice %471 {offsets = [0, 64], sizes = [2, 32], strides = [1, 1]} : vector<2x96xf32> to vector<2x32xf32>
    %496 = arith.mulf %493, %495 : vector<2x32xf32>
    %497 = arith.addf %485, %496 : vector<2x32xf32>
    %498 = math.tanh %497 : vector<2x32xf32>
    %cst_86 = arith.constant 1.000000e+00 : f32
    %499 = vector.broadcast %cst_86 : f32 to vector<2x32xf32>
    %500 = arith.subf %499, %494 : vector<2x32xf32>
    %501 = arith.mulf %500, %498 : vector<2x32xf32>
    %502 = arith.mulf %494, %468 : vector<2x32xf32>
    %503 = arith.addf %501, %502 : vector<2x32xf32>
    %504 = vector.extract_strided_slice %503 {offsets = [0, 0], sizes = [2, 16], strides = [1, 1]} : vector<2x32xf32> to vector<2x16xf32>
    %505 = vector.extract_strided_slice %503 {offsets = [0, 16], sizes = [2, 16], strides = [1, 1]} : vector<2x32xf32> to vector<2x16xf32>
    %cst_87 = arith.constant dense<0.000000e+00> : vector<2x96xf32>
    %506 = tpu.matmul %503, %399, %cst_87 {dimension_numbers = #tpu.dot_dimension_numbers<[1], [0], [0], [1], [0, 0, 1, 1], [], []>} : vector<2x32xf32>, vector<32x96xf32>, vector<2x96xf32> -> vector<2x96xf32>
    %507 = vector.extract_strided_slice %398 {offsets = [3, 0, 0], sizes = [1, 2, 16], strides = [1, 1, 1]} : vector<12x2x96xf32> to vector<1x2x16xf32>
    %508 = vector.shape_cast %507 : vector<1x2x16xf32> to vector<2x16xf32>
    %509 = vector.extract_strided_slice %398 {offsets = [8, 0, 16], sizes = [1, 2, 16], strides = [1, 1, 1]} : vector<12x2x96xf32> to vector<1x2x16xf32>
    %510 = vector.shape_cast %509 : vector<1x2x16xf32> to vector<2x16xf32>
    %511 = vector.extract_strided_slice %398 {offsets = [3, 0, 32], sizes = [1, 2, 16], strides = [1, 1, 1]} : vector<12x2x96xf32> to vector<1x2x16xf32>
    %512 = vector.shape_cast %511 : vector<1x2x16xf32> to vector<2x16xf32>
    %513 = vector.extract_strided_slice %398 {offsets = [8, 0, 48], sizes = [1, 2, 16], strides = [1, 1, 1]} : vector<12x2x96xf32> to vector<1x2x16xf32>
    %514 = vector.shape_cast %513 : vector<1x2x16xf32> to vector<2x16xf32>
    %515 = tpu.concatenate %508, %510, %512, %514 in 1 : vector<2x16xf32>, vector<2x16xf32>, vector<2x16xf32>, vector<2x16xf32> -> vector<2x64xf32>
    %516 = vector.extract_strided_slice %398 {offsets = [3, 0, 64], sizes = [1, 2, 16], strides = [1, 1, 1]} : vector<12x2x96xf32> to vector<1x2x16xf32>
    %517 = vector.shape_cast %516 : vector<1x2x16xf32> to vector<2x16xf32>
    %518 = vector.extract_strided_slice %398 {offsets = [8, 0, 80], sizes = [1, 2, 16], strides = [1, 1, 1]} : vector<12x2x96xf32> to vector<1x2x16xf32>
    %519 = vector.shape_cast %518 : vector<1x2x16xf32> to vector<2x16xf32>
    %520 = tpu.concatenate %517, %519 in 1 : vector<2x16xf32>, vector<2x16xf32> -> vector<2x32xf32>
    %521 = vector.extract_strided_slice %506 {offsets = [0, 0], sizes = [2, 64], strides = [1, 1]} : vector<2x96xf32> to vector<2x64xf32>
    %522 = arith.addf %515, %521 : vector<2x64xf32>
    %523 = arith.negf %522 : vector<2x64xf32>
    %524 = math.exp %523 : vector<2x64xf32>
    %cst_88 = arith.constant 1.000000e+00 : f32
    %525 = vector.broadcast %cst_88 : f32 to vector<2x64xf32>
    %526 = arith.addf %525, %524 : vector<2x64xf32>
    %527 = arith.divf %525, %526 : vector<2x64xf32>
    %528 = vector.extract_strided_slice %527 {offsets = [0, 0], sizes = [2, 32], strides = [1, 1]} : vector<2x64xf32> to vector<2x32xf32>
    %529 = vector.extract_strided_slice %527 {offsets = [0, 32], sizes = [2, 32], strides = [1, 1]} : vector<2x64xf32> to vector<2x32xf32>
    %530 = vector.extract_strided_slice %506 {offsets = [0, 64], sizes = [2, 32], strides = [1, 1]} : vector<2x96xf32> to vector<2x32xf32>
    %531 = arith.mulf %528, %530 : vector<2x32xf32>
    %532 = arith.addf %520, %531 : vector<2x32xf32>
    %533 = math.tanh %532 : vector<2x32xf32>
    %cst_89 = arith.constant 1.000000e+00 : f32
    %534 = vector.broadcast %cst_89 : f32 to vector<2x32xf32>
    %535 = arith.subf %534, %529 : vector<2x32xf32>
    %536 = arith.mulf %535, %533 : vector<2x32xf32>
    %537 = arith.mulf %529, %503 : vector<2x32xf32>
    %538 = arith.addf %536, %537 : vector<2x32xf32>
    %539 = vector.extract_strided_slice %538 {offsets = [0, 0], sizes = [2, 16], strides = [1, 1]} : vector<2x32xf32> to vector<2x16xf32>
    %540 = vector.extract_strided_slice %538 {offsets = [0, 16], sizes = [2, 16], strides = [1, 1]} : vector<2x32xf32> to vector<2x16xf32>
    %cst_90 = arith.constant dense<0.000000e+00> : vector<2x96xf32>
    %541 = tpu.matmul %538, %399, %cst_90 {dimension_numbers = #tpu.dot_dimension_numbers<[1], [0], [0], [1], [0, 0, 1, 1], [], []>} : vector<2x32xf32>, vector<32x96xf32>, vector<2x96xf32> -> vector<2x96xf32>
    %542 = vector.extract_strided_slice %398 {offsets = [4, 0, 0], sizes = [1, 2, 16], strides = [1, 1, 1]} : vector<12x2x96xf32> to vector<1x2x16xf32>
    %543 = vector.shape_cast %542 : vector<1x2x16xf32> to vector<2x16xf32>
    %544 = vector.extract_strided_slice %398 {offsets = [7, 0, 16], sizes = [1, 2, 16], strides = [1, 1, 1]} : vector<12x2x96xf32> to vector<1x2x16xf32>
    %545 = vector.shape_cast %544 : vector<1x2x16xf32> to vector<2x16xf32>
    %546 = vector.extract_strided_slice %398 {offsets = [4, 0, 32], sizes = [1, 2, 16], strides = [1, 1, 1]} : vector<12x2x96xf32> to vector<1x2x16xf32>
    %547 = vector.shape_cast %546 : vector<1x2x16xf32> to vector<2x16xf32>
    %548 = vector.extract_strided_slice %398 {offsets = [7, 0, 48], sizes = [1, 2, 16], strides = [1, 1, 1]} : vector<12x2x96xf32> to vector<1x2x16xf32>
    %549 = vector.shape_cast %548 : vector<1x2x16xf32> to vector<2x16xf32>
    %550 = tpu.concatenate %543, %545, %547, %549 in 1 : vector<2x16xf32>, vector<2x16xf32>, vector<2x16xf32>, vector<2x16xf32> -> vector<2x64xf32>
    %551 = vector.extract_strided_slice %398 {offsets = [4, 0, 64], sizes = [1, 2, 16], strides = [1, 1, 1]} : vector<12x2x96xf32> to vector<1x2x16xf32>
    %552 = vector.shape_cast %551 : vector<1x2x16xf32> to vector<2x16xf32>
    %553 = vector.extract_strided_slice %398 {offsets = [7, 0, 80], sizes = [1, 2, 16], strides = [1, 1, 1]} : vector<12x2x96xf32> to vector<1x2x16xf32>
    %554 = vector.shape_cast %553 : vector<1x2x16xf32> to vector<2x16xf32>
    %555 = tpu.concatenate %552, %554 in 1 : vector<2x16xf32>, vector<2x16xf32> -> vector<2x32xf32>
    %556 = vector.extract_strided_slice %541 {offsets = [0, 0], sizes = [2, 64], strides = [1, 1]} : vector<2x96xf32> to vector<2x64xf32>
    %557 = arith.addf %550, %556 : vector<2x64xf32>
    %558 = arith.negf %557 : vector<2x64xf32>
    %559 = math.exp %558 : vector<2x64xf32>
    %cst_91 = arith.constant 1.000000e+00 : f32
    %560 = vector.broadcast %cst_91 : f32 to vector<2x64xf32>
    %561 = arith.addf %560, %559 : vector<2x64xf32>
    %562 = arith.divf %560, %561 : vector<2x64xf32>
    %563 = vector.extract_strided_slice %562 {offsets = [0, 0], sizes = [2, 32], strides = [1, 1]} : vector<2x64xf32> to vector<2x32xf32>
    %564 = vector.extract_strided_slice %562 {offsets = [0, 32], sizes = [2, 32], strides = [1, 1]} : vector<2x64xf32> to vector<2x32xf32>
    %565 = vector.extract_strided_slice %541 {offsets = [0, 64], sizes = [2, 32], strides = [1, 1]} : vector<2x96xf32> to vector<2x32xf32>
    %566 = arith.mulf %563, %565 : vector<2x32xf32>
    %567 = arith.addf %555, %566 : vector<2x32xf32>
    %568 = math.tanh %567 : vector<2x32xf32>
    %cst_92 = arith.constant 1.000000e+00 : f32
    %569 = vector.broadcast %cst_92 : f32 to vector<2x32xf32>
    %570 = arith.subf %569, %564 : vector<2x32xf32>
    %571 = arith.mulf %570, %568 : vector<2x32xf32>
    %572 = arith.mulf %564, %538 : vector<2x32xf32>
    %573 = arith.addf %571, %572 : vector<2x32xf32>
    %574 = vector.extract_strided_slice %573 {offsets = [0, 0], sizes = [2, 16], strides = [1, 1]} : vector<2x32xf32> to vector<2x16xf32>
    %575 = vector.extract_strided_slice %573 {offsets = [0, 16], sizes = [2, 16], strides = [1, 1]} : vector<2x32xf32> to vector<2x16xf32>
    %cst_93 = arith.constant dense<0.000000e+00> : vector<2x96xf32>
    %576 = tpu.matmul %573, %399, %cst_93 {dimension_numbers = #tpu.dot_dimension_numbers<[1], [0], [0], [1], [0, 0, 1, 1], [], []>} : vector<2x32xf32>, vector<32x96xf32>, vector<2x96xf32> -> vector<2x96xf32>
    %577 = vector.extract_strided_slice %398 {offsets = [5, 0, 0], sizes = [1, 2, 16], strides = [1, 1, 1]} : vector<12x2x96xf32> to vector<1x2x16xf32>
    %578 = vector.shape_cast %577 : vector<1x2x16xf32> to vector<2x16xf32>
    %579 = vector.extract_strided_slice %398 {offsets = [6, 0, 16], sizes = [1, 2, 16], strides = [1, 1, 1]} : vector<12x2x96xf32> to vector<1x2x16xf32>
    %580 = vector.shape_cast %579 : vector<1x2x16xf32> to vector<2x16xf32>
    %581 = vector.extract_strided_slice %398 {offsets = [5, 0, 32], sizes = [1, 2, 16], strides = [1, 1, 1]} : vector<12x2x96xf32> to vector<1x2x16xf32>
    %582 = vector.shape_cast %581 : vector<1x2x16xf32> to vector<2x16xf32>
    %583 = vector.extract_strided_slice %398 {offsets = [6, 0, 48], sizes = [1, 2, 16], strides = [1, 1, 1]} : vector<12x2x96xf32> to vector<1x2x16xf32>
    %584 = vector.shape_cast %583 : vector<1x2x16xf32> to vector<2x16xf32>
    %585 = tpu.concatenate %578, %580, %582, %584 in 1 : vector<2x16xf32>, vector<2x16xf32>, vector<2x16xf32>, vector<2x16xf32> -> vector<2x64xf32>
    %586 = vector.extract_strided_slice %398 {offsets = [5, 0, 64], sizes = [1, 2, 16], strides = [1, 1, 1]} : vector<12x2x96xf32> to vector<1x2x16xf32>
    %587 = vector.shape_cast %586 : vector<1x2x16xf32> to vector<2x16xf32>
    %588 = vector.extract_strided_slice %398 {offsets = [6, 0, 80], sizes = [1, 2, 16], strides = [1, 1, 1]} : vector<12x2x96xf32> to vector<1x2x16xf32>
    %589 = vector.shape_cast %588 : vector<1x2x16xf32> to vector<2x16xf32>
    %590 = tpu.concatenate %587, %589 in 1 : vector<2x16xf32>, vector<2x16xf32> -> vector<2x32xf32>
    %591 = vector.extract_strided_slice %576 {offsets = [0, 0], sizes = [2, 64], strides = [1, 1]} : vector<2x96xf32> to vector<2x64xf32>
    %592 = arith.addf %585, %591 : vector<2x64xf32>
    %593 = arith.negf %592 : vector<2x64xf32>
    %594 = math.exp %593 : vector<2x64xf32>
    %cst_94 = arith.constant 1.000000e+00 : f32
    %595 = vector.broadcast %cst_94 : f32 to vector<2x64xf32>
    %596 = arith.addf %595, %594 : vector<2x64xf32>
    %597 = arith.divf %595, %596 : vector<2x64xf32>
    %598 = vector.extract_strided_slice %597 {offsets = [0, 0], sizes = [2, 32], strides = [1, 1]} : vector<2x64xf32> to vector<2x32xf32>
    %599 = vector.extract_strided_slice %597 {offsets = [0, 32], sizes = [2, 32], strides = [1, 1]} : vector<2x64xf32> to vector<2x32xf32>
    %600 = vector.extract_strided_slice %576 {offsets = [0, 64], sizes = [2, 32], strides = [1, 1]} : vector<2x96xf32> to vector<2x32xf32>
    %601 = arith.mulf %598, %600 : vector<2x32xf32>
    %602 = arith.addf %590, %601 : vector<2x32xf32>
    %603 = math.tanh %602 : vector<2x32xf32>
    %cst_95 = arith.constant 1.000000e+00 : f32
    %604 = vector.broadcast %cst_95 : f32 to vector<2x32xf32>
    %605 = arith.subf %604, %599 : vector<2x32xf32>
    %606 = arith.mulf %605, %603 : vector<2x32xf32>
    %607 = arith.mulf %599, %573 : vector<2x32xf32>
    %608 = arith.addf %606, %607 : vector<2x32xf32>
    %609 = vector.extract_strided_slice %608 {offsets = [0, 0], sizes = [2, 16], strides = [1, 1]} : vector<2x32xf32> to vector<2x16xf32>
    %610 = vector.extract_strided_slice %608 {offsets = [0, 16], sizes = [2, 16], strides = [1, 1]} : vector<2x32xf32> to vector<2x16xf32>
    %cst_96 = arith.constant dense<0.000000e+00> : vector<2x96xf32>
    %611 = tpu.matmul %608, %399, %cst_96 {dimension_numbers = #tpu.dot_dimension_numbers<[1], [0], [0], [1], [0, 0, 1, 1], [], []>} : vector<2x32xf32>, vector<32x96xf32>, vector<2x96xf32> -> vector<2x96xf32>
    %612 = vector.extract_strided_slice %398 {offsets = [6, 0, 0], sizes = [1, 2, 16], strides = [1, 1, 1]} : vector<12x2x96xf32> to vector<1x2x16xf32>
    %613 = vector.shape_cast %612 : vector<1x2x16xf32> to vector<2x16xf32>
    %614 = vector.extract_strided_slice %398 {offsets = [5, 0, 16], sizes = [1, 2, 16], strides = [1, 1, 1]} : vector<12x2x96xf32> to vector<1x2x16xf32>
    %615 = vector.shape_cast %614 : vector<1x2x16xf32> to vector<2x16xf32>
    %616 = vector.extract_strided_slice %398 {offsets = [6, 0, 32], sizes = [1, 2, 16], strides = [1, 1, 1]} : vector<12x2x96xf32> to vector<1x2x16xf32>
    %617 = vector.shape_cast %616 : vector<1x2x16xf32> to vector<2x16xf32>
    %618 = vector.extract_strided_slice %398 {offsets = [5, 0, 48], sizes = [1, 2, 16], strides = [1, 1, 1]} : vector<12x2x96xf32> to vector<1x2x16xf32>
    %619 = vector.shape_cast %618 : vector<1x2x16xf32> to vector<2x16xf32>
    %620 = tpu.concatenate %613, %615, %617, %619 in 1 : vector<2x16xf32>, vector<2x16xf32>, vector<2x16xf32>, vector<2x16xf32> -> vector<2x64xf32>
    %621 = vector.extract_strided_slice %398 {offsets = [6, 0, 64], sizes = [1, 2, 16], strides = [1, 1, 1]} : vector<12x2x96xf32> to vector<1x2x16xf32>
    %622 = vector.shape_cast %621 : vector<1x2x16xf32> to vector<2x16xf32>
    %623 = vector.extract_strided_slice %398 {offsets = [5, 0, 80], sizes = [1, 2, 16], strides = [1, 1, 1]} : vector<12x2x96xf32> to vector<1x2x16xf32>
    %624 = vector.shape_cast %623 : vector<1x2x16xf32> to vector<2x16xf32>
    %625 = tpu.concatenate %622, %624 in 1 : vector<2x16xf32>, vector<2x16xf32> -> vector<2x32xf32>
    %626 = vector.extract_strided_slice %611 {offsets = [0, 0], sizes = [2, 64], strides = [1, 1]} : vector<2x96xf32> to vector<2x64xf32>
    %627 = arith.addf %620, %626 : vector<2x64xf32>
    %628 = arith.negf %627 : vector<2x64xf32>
    %629 = math.exp %628 : vector<2x64xf32>
    %cst_97 = arith.constant 1.000000e+00 : f32
    %630 = vector.broadcast %cst_97 : f32 to vector<2x64xf32>
    %631 = arith.addf %630, %629 : vector<2x64xf32>
    %632 = arith.divf %630, %631 : vector<2x64xf32>
    %633 = vector.extract_strided_slice %632 {offsets = [0, 0], sizes = [2, 32], strides = [1, 1]} : vector<2x64xf32> to vector<2x32xf32>
    %634 = vector.extract_strided_slice %632 {offsets = [0, 32], sizes = [2, 32], strides = [1, 1]} : vector<2x64xf32> to vector<2x32xf32>
    %635 = vector.extract_strided_slice %611 {offsets = [0, 64], sizes = [2, 32], strides = [1, 1]} : vector<2x96xf32> to vector<2x32xf32>
    %636 = arith.mulf %633, %635 : vector<2x32xf32>
    %637 = arith.addf %625, %636 : vector<2x32xf32>
    %638 = math.tanh %637 : vector<2x32xf32>
    %cst_98 = arith.constant 1.000000e+00 : f32
    %639 = vector.broadcast %cst_98 : f32 to vector<2x32xf32>
    %640 = arith.subf %639, %634 : vector<2x32xf32>
    %641 = arith.mulf %640, %638 : vector<2x32xf32>
    %642 = arith.mulf %634, %608 : vector<2x32xf32>
    %643 = arith.addf %641, %642 : vector<2x32xf32>
    %644 = vector.extract_strided_slice %643 {offsets = [0, 0], sizes = [2, 16], strides = [1, 1]} : vector<2x32xf32> to vector<2x16xf32>
    %645 = vector.extract_strided_slice %643 {offsets = [0, 16], sizes = [2, 16], strides = [1, 1]} : vector<2x32xf32> to vector<2x16xf32>
    %cst_99 = arith.constant dense<0.000000e+00> : vector<2x96xf32>
    %646 = tpu.matmul %643, %399, %cst_99 {dimension_numbers = #tpu.dot_dimension_numbers<[1], [0], [0], [1], [0, 0, 1, 1], [], []>} : vector<2x32xf32>, vector<32x96xf32>, vector<2x96xf32> -> vector<2x96xf32>
    %647 = vector.extract_strided_slice %398 {offsets = [7, 0, 0], sizes = [1, 2, 16], strides = [1, 1, 1]} : vector<12x2x96xf32> to vector<1x2x16xf32>
    %648 = vector.shape_cast %647 : vector<1x2x16xf32> to vector<2x16xf32>
    %649 = vector.extract_strided_slice %398 {offsets = [4, 0, 16], sizes = [1, 2, 16], strides = [1, 1, 1]} : vector<12x2x96xf32> to vector<1x2x16xf32>
    %650 = vector.shape_cast %649 : vector<1x2x16xf32> to vector<2x16xf32>
    %651 = vector.extract_strided_slice %398 {offsets = [7, 0, 32], sizes = [1, 2, 16], strides = [1, 1, 1]} : vector<12x2x96xf32> to vector<1x2x16xf32>
    %652 = vector.shape_cast %651 : vector<1x2x16xf32> to vector<2x16xf32>
    %653 = vector.extract_strided_slice %398 {offsets = [4, 0, 48], sizes = [1, 2, 16], strides = [1, 1, 1]} : vector<12x2x96xf32> to vector<1x2x16xf32>
    %654 = vector.shape_cast %653 : vector<1x2x16xf32> to vector<2x16xf32>
    %655 = tpu.concatenate %648, %650, %652, %654 in 1 : vector<2x16xf32>, vector<2x16xf32>, vector<2x16xf32>, vector<2x16xf32> -> vector<2x64xf32>
    %656 = vector.extract_strided_slice %398 {offsets = [7, 0, 64], sizes = [1, 2, 16], strides = [1, 1, 1]} : vector<12x2x96xf32> to vector<1x2x16xf32>
    %657 = vector.shape_cast %656 : vector<1x2x16xf32> to vector<2x16xf32>
    %658 = vector.extract_strided_slice %398 {offsets = [4, 0, 80], sizes = [1, 2, 16], strides = [1, 1, 1]} : vector<12x2x96xf32> to vector<1x2x16xf32>
    %659 = vector.shape_cast %658 : vector<1x2x16xf32> to vector<2x16xf32>
    %660 = tpu.concatenate %657, %659 in 1 : vector<2x16xf32>, vector<2x16xf32> -> vector<2x32xf32>
    %661 = vector.extract_strided_slice %646 {offsets = [0, 0], sizes = [2, 64], strides = [1, 1]} : vector<2x96xf32> to vector<2x64xf32>
    %662 = arith.addf %655, %661 : vector<2x64xf32>
    %663 = arith.negf %662 : vector<2x64xf32>
    %664 = math.exp %663 : vector<2x64xf32>
    %cst_100 = arith.constant 1.000000e+00 : f32
    %665 = vector.broadcast %cst_100 : f32 to vector<2x64xf32>
    %666 = arith.addf %665, %664 : vector<2x64xf32>
    %667 = arith.divf %665, %666 : vector<2x64xf32>
    %668 = vector.extract_strided_slice %667 {offsets = [0, 0], sizes = [2, 32], strides = [1, 1]} : vector<2x64xf32> to vector<2x32xf32>
    %669 = vector.extract_strided_slice %667 {offsets = [0, 32], sizes = [2, 32], strides = [1, 1]} : vector<2x64xf32> to vector<2x32xf32>
    %670 = vector.extract_strided_slice %646 {offsets = [0, 64], sizes = [2, 32], strides = [1, 1]} : vector<2x96xf32> to vector<2x32xf32>
    %671 = arith.mulf %668, %670 : vector<2x32xf32>
    %672 = arith.addf %660, %671 : vector<2x32xf32>
    %673 = math.tanh %672 : vector<2x32xf32>
    %cst_101 = arith.constant 1.000000e+00 : f32
    %674 = vector.broadcast %cst_101 : f32 to vector<2x32xf32>
    %675 = arith.subf %674, %669 : vector<2x32xf32>
    %676 = arith.mulf %675, %673 : vector<2x32xf32>
    %677 = arith.mulf %669, %643 : vector<2x32xf32>
    %678 = arith.addf %676, %677 : vector<2x32xf32>
    %679 = vector.extract_strided_slice %678 {offsets = [0, 0], sizes = [2, 16], strides = [1, 1]} : vector<2x32xf32> to vector<2x16xf32>
    %680 = vector.extract_strided_slice %678 {offsets = [0, 16], sizes = [2, 16], strides = [1, 1]} : vector<2x32xf32> to vector<2x16xf32>
    %cst_102 = arith.constant dense<0.000000e+00> : vector<2x96xf32>
    %681 = tpu.matmul %678, %399, %cst_102 {dimension_numbers = #tpu.dot_dimension_numbers<[1], [0], [0], [1], [0, 0, 1, 1], [], []>} : vector<2x32xf32>, vector<32x96xf32>, vector<2x96xf32> -> vector<2x96xf32>
    %682 = vector.extract_strided_slice %398 {offsets = [8, 0, 0], sizes = [1, 2, 16], strides = [1, 1, 1]} : vector<12x2x96xf32> to vector<1x2x16xf32>
    %683 = vector.shape_cast %682 : vector<1x2x16xf32> to vector<2x16xf32>
    %684 = vector.extract_strided_slice %398 {offsets = [3, 0, 16], sizes = [1, 2, 16], strides = [1, 1, 1]} : vector<12x2x96xf32> to vector<1x2x16xf32>
    %685 = vector.shape_cast %684 : vector<1x2x16xf32> to vector<2x16xf32>
    %686 = vector.extract_strided_slice %398 {offsets = [8, 0, 32], sizes = [1, 2, 16], strides = [1, 1, 1]} : vector<12x2x96xf32> to vector<1x2x16xf32>
    %687 = vector.shape_cast %686 : vector<1x2x16xf32> to vector<2x16xf32>
    %688 = vector.extract_strided_slice %398 {offsets = [3, 0, 48], sizes = [1, 2, 16], strides = [1, 1, 1]} : vector<12x2x96xf32> to vector<1x2x16xf32>
    %689 = vector.shape_cast %688 : vector<1x2x16xf32> to vector<2x16xf32>
    %690 = tpu.concatenate %683, %685, %687, %689 in 1 : vector<2x16xf32>, vector<2x16xf32>, vector<2x16xf32>, vector<2x16xf32> -> vector<2x64xf32>
    %691 = vector.extract_strided_slice %398 {offsets = [8, 0, 64], sizes = [1, 2, 16], strides = [1, 1, 1]} : vector<12x2x96xf32> to vector<1x2x16xf32>
    %692 = vector.shape_cast %691 : vector<1x2x16xf32> to vector<2x16xf32>
    %693 = vector.extract_strided_slice %398 {offsets = [3, 0, 80], sizes = [1, 2, 16], strides = [1, 1, 1]} : vector<12x2x96xf32> to vector<1x2x16xf32>
    %694 = vector.shape_cast %693 : vector<1x2x16xf32> to vector<2x16xf32>
    %695 = tpu.concatenate %692, %694 in 1 : vector<2x16xf32>, vector<2x16xf32> -> vector<2x32xf32>
    %696 = vector.extract_strided_slice %681 {offsets = [0, 0], sizes = [2, 64], strides = [1, 1]} : vector<2x96xf32> to vector<2x64xf32>
    %697 = arith.addf %690, %696 : vector<2x64xf32>
    %698 = arith.negf %697 : vector<2x64xf32>
    %699 = math.exp %698 : vector<2x64xf32>
    %cst_103 = arith.constant 1.000000e+00 : f32
    %700 = vector.broadcast %cst_103 : f32 to vector<2x64xf32>
    %701 = arith.addf %700, %699 : vector<2x64xf32>
    %702 = arith.divf %700, %701 : vector<2x64xf32>
    %703 = vector.extract_strided_slice %702 {offsets = [0, 0], sizes = [2, 32], strides = [1, 1]} : vector<2x64xf32> to vector<2x32xf32>
    %704 = vector.extract_strided_slice %702 {offsets = [0, 32], sizes = [2, 32], strides = [1, 1]} : vector<2x64xf32> to vector<2x32xf32>
    %705 = vector.extract_strided_slice %681 {offsets = [0, 64], sizes = [2, 32], strides = [1, 1]} : vector<2x96xf32> to vector<2x32xf32>
    %706 = arith.mulf %703, %705 : vector<2x32xf32>
    %707 = arith.addf %695, %706 : vector<2x32xf32>
    %708 = math.tanh %707 : vector<2x32xf32>
    %cst_104 = arith.constant 1.000000e+00 : f32
    %709 = vector.broadcast %cst_104 : f32 to vector<2x32xf32>
    %710 = arith.subf %709, %704 : vector<2x32xf32>
    %711 = arith.mulf %710, %708 : vector<2x32xf32>
    %712 = arith.mulf %704, %678 : vector<2x32xf32>
    %713 = arith.addf %711, %712 : vector<2x32xf32>
    %714 = vector.extract_strided_slice %713 {offsets = [0, 0], sizes = [2, 16], strides = [1, 1]} : vector<2x32xf32> to vector<2x16xf32>
    %715 = vector.extract_strided_slice %713 {offsets = [0, 16], sizes = [2, 16], strides = [1, 1]} : vector<2x32xf32> to vector<2x16xf32>
    %cst_105 = arith.constant dense<0.000000e+00> : vector<2x96xf32>
    %716 = tpu.matmul %713, %399, %cst_105 {dimension_numbers = #tpu.dot_dimension_numbers<[1], [0], [0], [1], [0, 0, 1, 1], [], []>} : vector<2x32xf32>, vector<32x96xf32>, vector<2x96xf32> -> vector<2x96xf32>
    %717 = vector.extract_strided_slice %398 {offsets = [9, 0, 0], sizes = [1, 2, 16], strides = [1, 1, 1]} : vector<12x2x96xf32> to vector<1x2x16xf32>
    %718 = vector.shape_cast %717 : vector<1x2x16xf32> to vector<2x16xf32>
    %719 = vector.extract_strided_slice %398 {offsets = [2, 0, 16], sizes = [1, 2, 16], strides = [1, 1, 1]} : vector<12x2x96xf32> to vector<1x2x16xf32>
    %720 = vector.shape_cast %719 : vector<1x2x16xf32> to vector<2x16xf32>
    %721 = vector.extract_strided_slice %398 {offsets = [9, 0, 32], sizes = [1, 2, 16], strides = [1, 1, 1]} : vector<12x2x96xf32> to vector<1x2x16xf32>
    %722 = vector.shape_cast %721 : vector<1x2x16xf32> to vector<2x16xf32>
    %723 = vector.extract_strided_slice %398 {offsets = [2, 0, 48], sizes = [1, 2, 16], strides = [1, 1, 1]} : vector<12x2x96xf32> to vector<1x2x16xf32>
    %724 = vector.shape_cast %723 : vector<1x2x16xf32> to vector<2x16xf32>
    %725 = tpu.concatenate %718, %720, %722, %724 in 1 : vector<2x16xf32>, vector<2x16xf32>, vector<2x16xf32>, vector<2x16xf32> -> vector<2x64xf32>
    %726 = vector.extract_strided_slice %398 {offsets = [9, 0, 64], sizes = [1, 2, 16], strides = [1, 1, 1]} : vector<12x2x96xf32> to vector<1x2x16xf32>
    %727 = vector.shape_cast %726 : vector<1x2x16xf32> to vector<2x16xf32>
    %728 = vector.extract_strided_slice %398 {offsets = [2, 0, 80], sizes = [1, 2, 16], strides = [1, 1, 1]} : vector<12x2x96xf32> to vector<1x2x16xf32>
    %729 = vector.shape_cast %728 : vector<1x2x16xf32> to vector<2x16xf32>
    %730 = tpu.concatenate %727, %729 in 1 : vector<2x16xf32>, vector<2x16xf32> -> vector<2x32xf32>
    %731 = vector.extract_strided_slice %716 {offsets = [0, 0], sizes = [2, 64], strides = [1, 1]} : vector<2x96xf32> to vector<2x64xf32>
    %732 = arith.addf %725, %731 : vector<2x64xf32>
    %733 = arith.negf %732 : vector<2x64xf32>
    %734 = math.exp %733 : vector<2x64xf32>
    %cst_106 = arith.constant 1.000000e+00 : f32
    %735 = vector.broadcast %cst_106 : f32 to vector<2x64xf32>
    %736 = arith.addf %735, %734 : vector<2x64xf32>
    %737 = arith.divf %735, %736 : vector<2x64xf32>
    %738 = vector.extract_strided_slice %737 {offsets = [0, 0], sizes = [2, 32], strides = [1, 1]} : vector<2x64xf32> to vector<2x32xf32>
    %739 = vector.extract_strided_slice %737 {offsets = [0, 32], sizes = [2, 32], strides = [1, 1]} : vector<2x64xf32> to vector<2x32xf32>
    %740 = vector.extract_strided_slice %716 {offsets = [0, 64], sizes = [2, 32], strides = [1, 1]} : vector<2x96xf32> to vector<2x32xf32>
    %741 = arith.mulf %738, %740 : vector<2x32xf32>
    %742 = arith.addf %730, %741 : vector<2x32xf32>
    %743 = math.tanh %742 : vector<2x32xf32>
    %cst_107 = arith.constant 1.000000e+00 : f32
    %744 = vector.broadcast %cst_107 : f32 to vector<2x32xf32>
    %745 = arith.subf %744, %739 : vector<2x32xf32>
    %746 = arith.mulf %745, %743 : vector<2x32xf32>
    %747 = arith.mulf %739, %713 : vector<2x32xf32>
    %748 = arith.addf %746, %747 : vector<2x32xf32>
    %749 = vector.extract_strided_slice %748 {offsets = [0, 0], sizes = [2, 16], strides = [1, 1]} : vector<2x32xf32> to vector<2x16xf32>
    %750 = vector.extract_strided_slice %748 {offsets = [0, 16], sizes = [2, 16], strides = [1, 1]} : vector<2x32xf32> to vector<2x16xf32>
    %cst_108 = arith.constant dense<0.000000e+00> : vector<2x96xf32>
    %751 = tpu.matmul %748, %399, %cst_108 {dimension_numbers = #tpu.dot_dimension_numbers<[1], [0], [0], [1], [0, 0, 1, 1], [], []>} : vector<2x32xf32>, vector<32x96xf32>, vector<2x96xf32> -> vector<2x96xf32>
    %752 = vector.extract_strided_slice %398 {offsets = [10, 0, 0], sizes = [1, 2, 16], strides = [1, 1, 1]} : vector<12x2x96xf32> to vector<1x2x16xf32>
    %753 = vector.shape_cast %752 : vector<1x2x16xf32> to vector<2x16xf32>
    %754 = vector.extract_strided_slice %398 {offsets = [1, 0, 16], sizes = [1, 2, 16], strides = [1, 1, 1]} : vector<12x2x96xf32> to vector<1x2x16xf32>
    %755 = vector.shape_cast %754 : vector<1x2x16xf32> to vector<2x16xf32>
    %756 = vector.extract_strided_slice %398 {offsets = [10, 0, 32], sizes = [1, 2, 16], strides = [1, 1, 1]} : vector<12x2x96xf32> to vector<1x2x16xf32>
    %757 = vector.shape_cast %756 : vector<1x2x16xf32> to vector<2x16xf32>
    %758 = vector.extract_strided_slice %398 {offsets = [1, 0, 48], sizes = [1, 2, 16], strides = [1, 1, 1]} : vector<12x2x96xf32> to vector<1x2x16xf32>
    %759 = vector.shape_cast %758 : vector<1x2x16xf32> to vector<2x16xf32>
    %760 = tpu.concatenate %753, %755, %757, %759 in 1 : vector<2x16xf32>, vector<2x16xf32>, vector<2x16xf32>, vector<2x16xf32> -> vector<2x64xf32>
    %761 = vector.extract_strided_slice %398 {offsets = [10, 0, 64], sizes = [1, 2, 16], strides = [1, 1, 1]} : vector<12x2x96xf32> to vector<1x2x16xf32>
    %762 = vector.shape_cast %761 : vector<1x2x16xf32> to vector<2x16xf32>
    %763 = vector.extract_strided_slice %398 {offsets = [1, 0, 80], sizes = [1, 2, 16], strides = [1, 1, 1]} : vector<12x2x96xf32> to vector<1x2x16xf32>
    %764 = vector.shape_cast %763 : vector<1x2x16xf32> to vector<2x16xf32>
    %765 = tpu.concatenate %762, %764 in 1 : vector<2x16xf32>, vector<2x16xf32> -> vector<2x32xf32>
    %766 = vector.extract_strided_slice %751 {offsets = [0, 0], sizes = [2, 64], strides = [1, 1]} : vector<2x96xf32> to vector<2x64xf32>
    %767 = arith.addf %760, %766 : vector<2x64xf32>
    %768 = arith.negf %767 : vector<2x64xf32>
    %769 = math.exp %768 : vector<2x64xf32>
    %cst_109 = arith.constant 1.000000e+00 : f32
    %770 = vector.broadcast %cst_109 : f32 to vector<2x64xf32>
    %771 = arith.addf %770, %769 : vector<2x64xf32>
    %772 = arith.divf %770, %771 : vector<2x64xf32>
    %773 = vector.extract_strided_slice %772 {offsets = [0, 0], sizes = [2, 32], strides = [1, 1]} : vector<2x64xf32> to vector<2x32xf32>
    %774 = vector.extract_strided_slice %772 {offsets = [0, 32], sizes = [2, 32], strides = [1, 1]} : vector<2x64xf32> to vector<2x32xf32>
    %775 = vector.extract_strided_slice %751 {offsets = [0, 64], sizes = [2, 32], strides = [1, 1]} : vector<2x96xf32> to vector<2x32xf32>
    %776 = arith.mulf %773, %775 : vector<2x32xf32>
    %777 = arith.addf %765, %776 : vector<2x32xf32>
    %778 = math.tanh %777 : vector<2x32xf32>
    %cst_110 = arith.constant 1.000000e+00 : f32
    %779 = vector.broadcast %cst_110 : f32 to vector<2x32xf32>
    %780 = arith.subf %779, %774 : vector<2x32xf32>
    %781 = arith.mulf %780, %778 : vector<2x32xf32>
    %782 = arith.mulf %774, %748 : vector<2x32xf32>
    %783 = arith.addf %781, %782 : vector<2x32xf32>
    %784 = vector.extract_strided_slice %783 {offsets = [0, 0], sizes = [2, 16], strides = [1, 1]} : vector<2x32xf32> to vector<2x16xf32>
    %785 = vector.extract_strided_slice %783 {offsets = [0, 16], sizes = [2, 16], strides = [1, 1]} : vector<2x32xf32> to vector<2x16xf32>
    %cst_111 = arith.constant dense<0.000000e+00> : vector<2x96xf32>
    %786 = tpu.matmul %783, %399, %cst_111 {dimension_numbers = #tpu.dot_dimension_numbers<[1], [0], [0], [1], [0, 0, 1, 1], [], []>} : vector<2x32xf32>, vector<32x96xf32>, vector<2x96xf32> -> vector<2x96xf32>
    %787 = vector.extract_strided_slice %398 {offsets = [11, 0, 0], sizes = [1, 2, 16], strides = [1, 1, 1]} : vector<12x2x96xf32> to vector<1x2x16xf32>
    %788 = vector.shape_cast %787 : vector<1x2x16xf32> to vector<2x16xf32>
    %789 = vector.extract_strided_slice %398 {offsets = [0, 0, 16], sizes = [1, 2, 16], strides = [1, 1, 1]} : vector<12x2x96xf32> to vector<1x2x16xf32>
    %790 = vector.shape_cast %789 : vector<1x2x16xf32> to vector<2x16xf32>
    %791 = vector.extract_strided_slice %398 {offsets = [11, 0, 32], sizes = [1, 2, 16], strides = [1, 1, 1]} : vector<12x2x96xf32> to vector<1x2x16xf32>
    %792 = vector.shape_cast %791 : vector<1x2x16xf32> to vector<2x16xf32>
    %793 = vector.extract_strided_slice %398 {offsets = [0, 0, 48], sizes = [1, 2, 16], strides = [1, 1, 1]} : vector<12x2x96xf32> to vector<1x2x16xf32>
    %794 = vector.shape_cast %793 : vector<1x2x16xf32> to vector<2x16xf32>
    %795 = tpu.concatenate %788, %790, %792, %794 in 1 : vector<2x16xf32>, vector<2x16xf32>, vector<2x16xf32>, vector<2x16xf32> -> vector<2x64xf32>
    %796 = vector.extract_strided_slice %398 {offsets = [11, 0, 64], sizes = [1, 2, 16], strides = [1, 1, 1]} : vector<12x2x96xf32> to vector<1x2x16xf32>
    %797 = vector.shape_cast %796 : vector<1x2x16xf32> to vector<2x16xf32>
    %798 = vector.extract_strided_slice %398 {offsets = [0, 0, 80], sizes = [1, 2, 16], strides = [1, 1, 1]} : vector<12x2x96xf32> to vector<1x2x16xf32>
    %799 = vector.shape_cast %798 : vector<1x2x16xf32> to vector<2x16xf32>
    %800 = tpu.concatenate %797, %799 in 1 : vector<2x16xf32>, vector<2x16xf32> -> vector<2x32xf32>
    %801 = vector.extract_strided_slice %786 {offsets = [0, 0], sizes = [2, 64], strides = [1, 1]} : vector<2x96xf32> to vector<2x64xf32>
    %802 = arith.addf %795, %801 : vector<2x64xf32>
    %803 = arith.negf %802 : vector<2x64xf32>
    %804 = math.exp %803 : vector<2x64xf32>
    %cst_112 = arith.constant 1.000000e+00 : f32
    %805 = vector.broadcast %cst_112 : f32 to vector<2x64xf32>
    %806 = arith.addf %805, %804 : vector<2x64xf32>
    %807 = arith.divf %805, %806 : vector<2x64xf32>
    %808 = vector.extract_strided_slice %807 {offsets = [0, 0], sizes = [2, 32], strides = [1, 1]} : vector<2x64xf32> to vector<2x32xf32>
    %809 = vector.extract_strided_slice %807 {offsets = [0, 32], sizes = [2, 32], strides = [1, 1]} : vector<2x64xf32> to vector<2x32xf32>
    %810 = vector.extract_strided_slice %786 {offsets = [0, 64], sizes = [2, 32], strides = [1, 1]} : vector<2x96xf32> to vector<2x32xf32>
    %811 = arith.mulf %808, %810 : vector<2x32xf32>
    %812 = arith.addf %800, %811 : vector<2x32xf32>
    %813 = math.tanh %812 : vector<2x32xf32>
    %cst_113 = arith.constant 1.000000e+00 : f32
    %814 = vector.broadcast %cst_113 : f32 to vector<2x32xf32>
    %815 = arith.subf %814, %809 : vector<2x32xf32>
    %816 = arith.mulf %815, %813 : vector<2x32xf32>
    %817 = arith.mulf %809, %783 : vector<2x32xf32>
    %818 = arith.addf %816, %817 : vector<2x32xf32>
    %819 = vector.extract_strided_slice %818 {offsets = [0, 0], sizes = [2, 16], strides = [1, 1]} : vector<2x32xf32> to vector<2x16xf32>
    %820 = vector.extract_strided_slice %818 {offsets = [0, 16], sizes = [2, 16], strides = [1, 1]} : vector<2x32xf32> to vector<2x16xf32>
    %821 = tpu.concatenate %434, %820 in 1 : vector<2x16xf32>, vector<2x16xf32> -> vector<2x32xf32>
    %822 = tpu.concatenate %469, %785 in 1 : vector<2x16xf32>, vector<2x16xf32> -> vector<2x32xf32>
    %823 = tpu.concatenate %504, %750 in 1 : vector<2x16xf32>, vector<2x16xf32> -> vector<2x32xf32>
    %824 = tpu.concatenate %539, %715 in 1 : vector<2x16xf32>, vector<2x16xf32> -> vector<2x32xf32>
    %825 = tpu.concatenate %574, %680 in 1 : vector<2x16xf32>, vector<2x16xf32> -> vector<2x32xf32>
    %826 = tpu.concatenate %609, %645 in 1 : vector<2x16xf32>, vector<2x16xf32> -> vector<2x32xf32>
    %827 = tpu.concatenate %644, %610 in 1 : vector<2x16xf32>, vector<2x16xf32> -> vector<2x32xf32>
    %828 = tpu.concatenate %679, %575 in 1 : vector<2x16xf32>, vector<2x16xf32> -> vector<2x32xf32>
    %829 = tpu.concatenate %714, %540 in 1 : vector<2x16xf32>, vector<2x16xf32> -> vector<2x32xf32>
    %830 = tpu.concatenate %749, %505 in 1 : vector<2x16xf32>, vector<2x16xf32> -> vector<2x32xf32>
    %831 = tpu.concatenate %784, %470 in 1 : vector<2x16xf32>, vector<2x16xf32> -> vector<2x32xf32>
    %832 = tpu.concatenate %819, %435 in 1 : vector<2x16xf32>, vector<2x16xf32> -> vector<2x32xf32>
    %833 = vector.shape_cast %821 : vector<2x32xf32> to vector<1x2x32xf32>
    %834 = vector.shape_cast %822 : vector<2x32xf32> to vector<1x2x32xf32>
    %835 = vector.shape_cast %823 : vector<2x32xf32> to vector<1x2x32xf32>
    %836 = vector.shape_cast %824 : vector<2x32xf32> to vector<1x2x32xf32>
    %837 = vector.shape_cast %825 : vector<2x32xf32> to vector<1x2x32xf32>
    %838 = vector.shape_cast %826 : vector<2x32xf32> to vector<1x2x32xf32>
    %839 = vector.shape_cast %827 : vector<2x32xf32> to vector<1x2x32xf32>
    %840 = vector.shape_cast %828 : vector<2x32xf32> to vector<1x2x32xf32>
    %841 = vector.shape_cast %829 : vector<2x32xf32> to vector<1x2x32xf32>
    %842 = vector.shape_cast %830 : vector<2x32xf32> to vector<1x2x32xf32>
    %843 = vector.shape_cast %831 : vector<2x32xf32> to vector<1x2x32xf32>
    %844 = vector.shape_cast %832 : vector<2x32xf32> to vector<1x2x32xf32>
    %845 = tpu.concatenate %833, %834, %835, %836, %837, %838, %839, %840, %841, %842, %843, %844 in 0 : vector<1x2x32xf32>, vector<1x2x32xf32>, vector<1x2x32xf32>, vector<1x2x32xf32>, vector<1x2x32xf32>, vector<1x2x32xf32>, vector<1x2x32xf32>, vector<1x2x32xf32>, vector<1x2x32xf32>, vector<1x2x32xf32>, vector<1x2x32xf32>, vector<1x2x32xf32> -> vector<12x2x32xf32>
    %c0_114 = arith.constant 0 : index
    %c0_115 = arith.constant 0 : index
    %846 = vector.load %arg20[%c0_114, %c0_115] : memref<32x15xf32, #tpu.memory_space<vmem>>, vector<32x15xf32>
    "tpu.trace_start"() <{level = 10 : i32, message = "tbh,hg->tbg"}> : () -> ()
    %cst_116 = arith.constant dense<0.000000e+00> : vector<12x2x15xf32>
    %847 = tpu.matmul %845, %846, %cst_116 {dimension_numbers = #tpu.dot_dimension_numbers<[2], [0], [0, 1], [1], [0, 0, 0, 1, 1, 1], [], []>} : vector<12x2x32xf32>, vector<32x15xf32>, vector<12x2x15xf32> -> vector<12x2x15xf32>
    "tpu.trace_stop"() : () -> ()
    %c0_117 = arith.constant 0 : index
    %c0_118 = arith.constant 0 : index
    %848 = vector.load %arg22[%c0_117, %c0_118] : memref<1x15xf32, #tpu.memory_space<vmem>>, vector<1x15xf32>
    %849 = vector.shape_cast %848 : vector<1x15xf32> to vector<1x1x15xf32>
    %850 = vector.broadcast %849 : vector<1x1x15xf32> to vector<12x2x15xf32>
    %851 = arith.addf %847, %850 : vector<12x2x15xf32>
    %c0_119 = arith.constant 0 : index
    %c0_120 = arith.constant 0 : index
    %852 = vector.load %arg21[%c0_119, %c0_120] : memref<5x15xf32, #tpu.memory_space<vmem>>, vector<5x15xf32>
    %c0_121 = arith.constant 0 : index
    %c0_122 = arith.constant 0 : index
    %853 = vector.load %arg23[%c0_121, %c0_122] : memref<5x5xf32, #tpu.memory_space<vmem>>, vector<5x5xf32>
    %c0_123 = arith.constant 0 : index
    %c0_124 = arith.constant 0 : index
    %854 = vector.load %arg24[%c0_123, %c0_124] : memref<1x5xf32, #tpu.memory_space<vmem>>, vector<1x5xf32>
    %c0_125 = arith.constant 0 : index
    %c0_126 = arith.constant 0 : index
    %855 = vector.load %arg25[%c0_125, %c0_126] : memref<1x5xf32, #tpu.memory_space<vmem>>, vector<1x5xf32>
    %856 = vector.shape_cast %853 : vector<5x5xf32> to vector<1x5x5xf32>
    %857 = vector.shape_cast %856 : vector<1x5x5xf32> to vector<1x5x5xf32>
    %858 = vector.broadcast %857 : vector<1x5x5xf32> to vector<2x5x5xf32>
    %c0_127 = arith.constant 0 : index
    %c0_128 = arith.constant 0 : index
    %859 = vector.load %arg6[%c0_127, %c0_128] : memref<2x1xi32, #tpu.memory_space<vmem>>, vector<2x1xi32>
    %c0_129 = arith.constant 0 : index
    %c0_130 = arith.constant 0 : index
    %c0_131 = arith.constant 0 : index
    %860 = vector.load %arg5[%c0_129, %c0_130, %c0_131] : memref<12x2x1xi32, #tpu.memory_space<vmem>>, vector<12x2x1xi32>
    %861 = tpu.iota {dimensions = array<i32: 1>} : vector<2x5xi32>
    %cst_132 = arith.constant 0.000000e+00 : f32
    %862 = vector.broadcast %cst_132 : f32 to vector<2x5xf32>
    %cst_133 = arith.constant dense<0.000000e+00> : vector<2x15xf32>
    %863 = tpu.matmul %862, %852, %cst_133 {dimension_numbers = #tpu.dot_dimension_numbers<[1], [0], [0], [1], [0, 0, 1, 1], [], []>} : vector<2x5xf32>, vector<5x15xf32>, vector<2x15xf32> -> vector<2x15xf32>
    %864 = vector.extract_strided_slice %851 {offsets = [0, 0, 0], sizes = [1, 2, 10], strides = [1, 1, 1]} : vector<12x2x15xf32> to vector<1x2x10xf32>
    %865 = vector.shape_cast %864 : vector<1x2x10xf32> to vector<2x10xf32>
    %866 = vector.extract_strided_slice %863 {offsets = [0, 0], sizes = [2, 10], strides = [1, 1]} : vector<2x15xf32> to vector<2x10xf32>
    %867 = arith.addf %865, %866 : vector<2x10xf32>
    %868 = arith.negf %867 : vector<2x10xf32>
    %869 = math.exp %868 : vector<2x10xf32>
    %cst_134 = arith.constant 1.000000e+00 : f32
    %870 = vector.broadcast %cst_134 : f32 to vector<2x10xf32>
    %871 = arith.addf %870, %869 : vector<2x10xf32>
    %872 = arith.divf %870, %871 : vector<2x10xf32>
    %873 = vector.extract_strided_slice %851 {offsets = [0, 0, 10], sizes = [1, 2, 5], strides = [1, 1, 1]} : vector<12x2x15xf32> to vector<1x2x5xf32>
    %874 = vector.shape_cast %873 : vector<1x2x5xf32> to vector<2x5xf32>
    %875 = vector.extract_strided_slice %872 {offsets = [0, 0], sizes = [2, 5], strides = [1, 1]} : vector<2x10xf32> to vector<2x5xf32>
    %876 = vector.extract_strided_slice %863 {offsets = [0, 10], sizes = [2, 5], strides = [1, 1]} : vector<2x15xf32> to vector<2x5xf32>
    %877 = arith.mulf %875, %876 : vector<2x5xf32>
    %878 = arith.addf %874, %877 : vector<2x5xf32>
    %879 = math.tanh %878 : vector<2x5xf32>
    %880 = vector.extract_strided_slice %872 {offsets = [0, 5], sizes = [2, 5], strides = [1, 1]} : vector<2x10xf32> to vector<2x5xf32>
    %cst_135 = arith.constant 1.000000e+00 : f32
    %881 = vector.broadcast %cst_135 : f32 to vector<2x5xf32>
    %882 = arith.subf %881, %880 : vector<2x5xf32>
    %883 = arith.mulf %882, %879 : vector<2x5xf32>
    %884 = arith.mulf %880, %862 : vector<2x5xf32>
    %885 = arith.addf %883, %884 : vector<2x5xf32>
    %886 = vector.extract_strided_slice %860 {offsets = [0, 0, 0], sizes = [1, 2, 1], strides = [1, 1, 1]} : vector<12x2x1xi32> to vector<1x2x1xi32>
    %887 = vector.shape_cast %886 : vector<1x2x1xi32> to vector<2x1xi32>
    %888 = vector.broadcast %887 : vector<2x1xi32> to vector<2x5xi32>
    %889 = arith.cmpi eq, %861, %888 : vector<2x5xi32>
    %890 = arith.extui %889 : vector<2x5xi1> to vector<2x5xi32>
    %891 = arith.sitofp %890 : vector<2x5xi32> to vector<2x5xf32>
    %c0_i32_136 = arith.constant 0 : i32
    %892 = vector.broadcast %c0_i32_136 : i32 to vector<2x1xi32>
    %893 = arith.cmpi sgt, %859, %892 : vector<2x1xi32>
    %894 = vector.broadcast %854 : vector<1x5xf32> to vector<2x5xf32>
    %895 = arith.addf %894, %885 : vector<2x5xf32>
    %896 = vector.broadcast %854 : vector<1x5xf32> to vector<2x5xf32>
    %897 = arith.addf %885, %896 : vector<2x5xf32>
    %898 = arith.mulf %891, %897 : vector<2x5xf32>
    %cst_137 = arith.constant dense<0.000000e+00> : vector<2xf32>
    %899 = vector.multi_reduction <add>, %898, %cst_137 [1] : vector<2x5xf32> to vector<2xf32>
    %900 = vector.shape_cast %899 : vector<2xf32> to vector<2x1xf32>
    %cst_138 = arith.constant 0.000000e+00 : f32
    %901 = vector.broadcast %cst_138 : f32 to vector<2x1xf32>
    %902 = arith.select %893, %900, %901 : vector<2x1xi1>, vector<2x1xf32>
    %cst_139 = arith.constant dense<0.000000e+00> : vector<2x15xf32>
    %903 = tpu.matmul %885, %852, %cst_139 {dimension_numbers = #tpu.dot_dimension_numbers<[1], [0], [0], [1], [0, 0, 1, 1], [], []>} : vector<2x5xf32>, vector<5x15xf32>, vector<2x15xf32> -> vector<2x15xf32>
    %904 = vector.extract_strided_slice %851 {offsets = [1, 0, 0], sizes = [1, 2, 10], strides = [1, 1, 1]} : vector<12x2x15xf32> to vector<1x2x10xf32>
    %905 = vector.shape_cast %904 : vector<1x2x10xf32> to vector<2x10xf32>
    %906 = vector.extract_strided_slice %903 {offsets = [0, 0], sizes = [2, 10], strides = [1, 1]} : vector<2x15xf32> to vector<2x10xf32>
    %907 = arith.addf %905, %906 : vector<2x10xf32>
    %908 = arith.negf %907 : vector<2x10xf32>
    %909 = math.exp %908 : vector<2x10xf32>
    %cst_140 = arith.constant 1.000000e+00 : f32
    %910 = vector.broadcast %cst_140 : f32 to vector<2x10xf32>
    %911 = arith.addf %910, %909 : vector<2x10xf32>
    %912 = arith.divf %910, %911 : vector<2x10xf32>
    %913 = vector.extract_strided_slice %851 {offsets = [1, 0, 10], sizes = [1, 2, 5], strides = [1, 1, 1]} : vector<12x2x15xf32> to vector<1x2x5xf32>
    %914 = vector.shape_cast %913 : vector<1x2x5xf32> to vector<2x5xf32>
    %915 = vector.extract_strided_slice %912 {offsets = [0, 0], sizes = [2, 5], strides = [1, 1]} : vector<2x10xf32> to vector<2x5xf32>
    %916 = vector.extract_strided_slice %903 {offsets = [0, 10], sizes = [2, 5], strides = [1, 1]} : vector<2x15xf32> to vector<2x5xf32>
    %917 = arith.mulf %915, %916 : vector<2x5xf32>
    %918 = arith.addf %914, %917 : vector<2x5xf32>
    %919 = math.tanh %918 : vector<2x5xf32>
    %920 = vector.extract_strided_slice %912 {offsets = [0, 5], sizes = [2, 5], strides = [1, 1]} : vector<2x10xf32> to vector<2x5xf32>
    %cst_141 = arith.constant 1.000000e+00 : f32
    %921 = vector.broadcast %cst_141 : f32 to vector<2x5xf32>
    %922 = arith.subf %921, %920 : vector<2x5xf32>
    %923 = arith.mulf %922, %919 : vector<2x5xf32>
    %924 = arith.mulf %920, %885 : vector<2x5xf32>
    %925 = arith.addf %923, %924 : vector<2x5xf32>
    %926 = vector.extract_strided_slice %860 {offsets = [1, 0, 0], sizes = [1, 2, 1], strides = [1, 1, 1]} : vector<12x2x1xi32> to vector<1x2x1xi32>
    %927 = vector.shape_cast %926 : vector<1x2x1xi32> to vector<2x1xi32>
    %928 = vector.broadcast %927 : vector<2x1xi32> to vector<2x5xi32>
    %929 = arith.cmpi eq, %861, %928 : vector<2x5xi32>
    %930 = arith.extui %929 : vector<2x5xi1> to vector<2x5xi32>
    %931 = arith.sitofp %930 : vector<2x5xi32> to vector<2x5xf32>
    %c1_i32 = arith.constant 1 : i32
    %932 = vector.broadcast %c1_i32 : i32 to vector<2x1xi32>
    %933 = arith.cmpi sgt, %859, %932 : vector<2x1xi32>
    %934 = vector.shape_cast %895 : vector<2x5xf32> to vector<2x5x1xf32>
    %935 = vector.broadcast %934 : vector<2x5x1xf32> to vector<2x5x5xf32>
    %936 = arith.addf %935, %858 : vector<2x5x5xf32>
    %cst_142 = arith.constant dense<0xFF800000> : vector<2x5xf32>
    %937 = vector.multi_reduction <maximumf>, %936, %cst_142 [1] : vector<2x5x5xf32> to vector<2x5xf32>
    %938 = vector.shape_cast %937 : vector<2x5xf32> to vector<2x1x5xf32>
    %939 = vector.broadcast %938 : vector<2x1x5xf32> to vector<2x5x5xf32>
    %940 = arith.subf %936, %939 : vector<2x5x5xf32>
    %941 = math.exp %940 : vector<2x5x5xf32>
    %cst_143 = arith.constant dense<0.000000e+00> : vector<2x5xf32>
    %942 = vector.multi_reduction <add>, %941, %cst_143 [1] : vector<2x5x5xf32> to vector<2x5xf32>
    %943 = math.log %942 : vector<2x5xf32>
    %944 = vector.shape_cast %938 : vector<2x1x5xf32> to vector<2x5xf32>
    %945 = arith.addf %943, %944 : vector<2x5xf32>
    %946 = arith.addf %945, %925 : vector<2x5xf32>
    %947 = vector.shape_cast %933 : vector<2x1xi1> to vector<2x1xi1>
    %948 = vector.broadcast %947 : vector<2x1xi1> to vector<2x5xi1>
    %949 = arith.select %948, %946, %895 : vector<2x5xi1>, vector<2x5xf32>
    %950 = arith.mulf %931, %925 : vector<2x5xf32>
    %cst_144 = arith.constant dense<0.000000e+00> : vector<2xf32>
    %951 = vector.multi_reduction <add>, %950, %cst_144 [1] : vector<2x5xf32> to vector<2xf32>
    %952 = vector.shape_cast %951 : vector<2xf32> to vector<2x1xf32>
    %cst_145 = arith.constant dense<0.000000e+00> : vector<2x5xf32>
    %953 = tpu.matmul %891, %853, %cst_145 {dimension_numbers = #tpu.dot_dimension_numbers<[1], [0], [0], [1], [0, 0, 1, 1], [], []>} : vector<2x5xf32>, vector<5x5xf32>, vector<2x5xf32> -> vector<2x5xf32>
    %954 = arith.mulf %953, %931 : vector<2x5xf32>
    %cst_146 = arith.constant dense<0.000000e+00> : vector<2xf32>
    %955 = vector.multi_reduction <add>, %954, %cst_146 [1] : vector<2x5xf32> to vector<2xf32>
    %956 = vector.shape_cast %955 : vector<2xf32> to vector<2x1xf32>
    %957 = arith.addf %952, %956 : vector<2x1xf32>
    %cst_147 = arith.constant 0.000000e+00 : f32
    %958 = vector.broadcast %cst_147 : f32 to vector<2x1xf32>
    %959 = arith.select %933, %957, %958 : vector<2x1xi1>, vector<2x1xf32>
    %960 = arith.addf %902, %959 : vector<2x1xf32>
    %961 = vector.shape_cast %933 : vector<2x1xi1> to vector<2x1xi1>
    %962 = vector.broadcast %961 : vector<2x1xi1> to vector<2x5xi1>
    %963 = arith.select %962, %931, %891 : vector<2x5xi1>, vector<2x5xf32>
    %cst_148 = arith.constant dense<0.000000e+00> : vector<2x15xf32>
    %964 = tpu.matmul %925, %852, %cst_148 {dimension_numbers = #tpu.dot_dimension_numbers<[1], [0], [0], [1], [0, 0, 1, 1], [], []>} : vector<2x5xf32>, vector<5x15xf32>, vector<2x15xf32> -> vector<2x15xf32>
    %965 = vector.extract_strided_slice %851 {offsets = [2, 0, 0], sizes = [1, 2, 10], strides = [1, 1, 1]} : vector<12x2x15xf32> to vector<1x2x10xf32>
    %966 = vector.shape_cast %965 : vector<1x2x10xf32> to vector<2x10xf32>
    %967 = vector.extract_strided_slice %964 {offsets = [0, 0], sizes = [2, 10], strides = [1, 1]} : vector<2x15xf32> to vector<2x10xf32>
    %968 = arith.addf %966, %967 : vector<2x10xf32>
    %969 = arith.negf %968 : vector<2x10xf32>
    %970 = math.exp %969 : vector<2x10xf32>
    %cst_149 = arith.constant 1.000000e+00 : f32
    %971 = vector.broadcast %cst_149 : f32 to vector<2x10xf32>
    %972 = arith.addf %971, %970 : vector<2x10xf32>
    %973 = arith.divf %971, %972 : vector<2x10xf32>
    %974 = vector.extract_strided_slice %851 {offsets = [2, 0, 10], sizes = [1, 2, 5], strides = [1, 1, 1]} : vector<12x2x15xf32> to vector<1x2x5xf32>
    %975 = vector.shape_cast %974 : vector<1x2x5xf32> to vector<2x5xf32>
    %976 = vector.extract_strided_slice %973 {offsets = [0, 0], sizes = [2, 5], strides = [1, 1]} : vector<2x10xf32> to vector<2x5xf32>
    %977 = vector.extract_strided_slice %964 {offsets = [0, 10], sizes = [2, 5], strides = [1, 1]} : vector<2x15xf32> to vector<2x5xf32>
    %978 = arith.mulf %976, %977 : vector<2x5xf32>
    %979 = arith.addf %975, %978 : vector<2x5xf32>
    %980 = math.tanh %979 : vector<2x5xf32>
    %981 = vector.extract_strided_slice %973 {offsets = [0, 5], sizes = [2, 5], strides = [1, 1]} : vector<2x10xf32> to vector<2x5xf32>
    %cst_150 = arith.constant 1.000000e+00 : f32
    %982 = vector.broadcast %cst_150 : f32 to vector<2x5xf32>
    %983 = arith.subf %982, %981 : vector<2x5xf32>
    %984 = arith.mulf %983, %980 : vector<2x5xf32>
    %985 = arith.mulf %981, %925 : vector<2x5xf32>
    %986 = arith.addf %984, %985 : vector<2x5xf32>
    %987 = vector.extract_strided_slice %860 {offsets = [2, 0, 0], sizes = [1, 2, 1], strides = [1, 1, 1]} : vector<12x2x1xi32> to vector<1x2x1xi32>
    %988 = vector.shape_cast %987 : vector<1x2x1xi32> to vector<2x1xi32>
    %989 = vector.broadcast %988 : vector<2x1xi32> to vector<2x5xi32>
    %990 = arith.cmpi eq, %861, %989 : vector<2x5xi32>
    %991 = arith.extui %990 : vector<2x5xi1> to vector<2x5xi32>
    %992 = arith.sitofp %991 : vector<2x5xi32> to vector<2x5xf32>
    %c2_i32 = arith.constant 2 : i32
    %993 = vector.broadcast %c2_i32 : i32 to vector<2x1xi32>
    %994 = arith.cmpi sgt, %859, %993 : vector<2x1xi32>
    %995 = vector.shape_cast %949 : vector<2x5xf32> to vector<2x5x1xf32>
    %996 = vector.broadcast %995 : vector<2x5x1xf32> to vector<2x5x5xf32>
    %997 = arith.addf %996, %858 : vector<2x5x5xf32>
    %cst_151 = arith.constant dense<0xFF800000> : vector<2x5xf32>
    %998 = vector.multi_reduction <maximumf>, %997, %cst_151 [1] : vector<2x5x5xf32> to vector<2x5xf32>
    %999 = vector.shape_cast %998 : vector<2x5xf32> to vector<2x1x5xf32>
    %1000 = vector.broadcast %999 : vector<2x1x5xf32> to vector<2x5x5xf32>
    %1001 = arith.subf %997, %1000 : vector<2x5x5xf32>
    %1002 = math.exp %1001 : vector<2x5x5xf32>
    %cst_152 = arith.constant dense<0.000000e+00> : vector<2x5xf32>
    %1003 = vector.multi_reduction <add>, %1002, %cst_152 [1] : vector<2x5x5xf32> to vector<2x5xf32>
    %1004 = math.log %1003 : vector<2x5xf32>
    %1005 = vector.shape_cast %999 : vector<2x1x5xf32> to vector<2x5xf32>
    %1006 = arith.addf %1004, %1005 : vector<2x5xf32>
    %1007 = arith.addf %1006, %986 : vector<2x5xf32>
    %1008 = vector.shape_cast %994 : vector<2x1xi1> to vector<2x1xi1>
    %1009 = vector.broadcast %1008 : vector<2x1xi1> to vector<2x5xi1>
    %1010 = arith.select %1009, %1007, %949 : vector<2x5xi1>, vector<2x5xf32>
    %1011 = arith.mulf %992, %986 : vector<2x5xf32>
    %cst_153 = arith.constant dense<0.000000e+00> : vector<2xf32>
    %1012 = vector.multi_reduction <add>, %1011, %cst_153 [1] : vector<2x5xf32> to vector<2xf32>
    %1013 = vector.shape_cast %1012 : vector<2xf32> to vector<2x1xf32>
    %cst_154 = arith.constant dense<0.000000e+00> : vector<2x5xf32>
    %1014 = tpu.matmul %963, %853, %cst_154 {dimension_numbers = #tpu.dot_dimension_numbers<[1], [0], [0], [1], [0, 0, 1, 1], [], []>} : vector<2x5xf32>, vector<5x5xf32>, vector<2x5xf32> -> vector<2x5xf32>
    %1015 = arith.mulf %1014, %992 : vector<2x5xf32>
    %cst_155 = arith.constant dense<0.000000e+00> : vector<2xf32>
    %1016 = vector.multi_reduction <add>, %1015, %cst_155 [1] : vector<2x5xf32> to vector<2xf32>
    %1017 = vector.shape_cast %1016 : vector<2xf32> to vector<2x1xf32>
    %1018 = arith.addf %1013, %1017 : vector<2x1xf32>
    %cst_156 = arith.constant 0.000000e+00 : f32
    %1019 = vector.broadcast %cst_156 : f32 to vector<2x1xf32>
    %1020 = arith.select %994, %1018, %1019 : vector<2x1xi1>, vector<2x1xf32>
    %1021 = arith.addf %960, %1020 : vector<2x1xf32>
    %1022 = vector.shape_cast %994 : vector<2x1xi1> to vector<2x1xi1>
    %1023 = vector.broadcast %1022 : vector<2x1xi1> to vector<2x5xi1>
    %1024 = arith.select %1023, %992, %963 : vector<2x5xi1>, vector<2x5xf32>
    %cst_157 = arith.constant dense<0.000000e+00> : vector<2x15xf32>
    %1025 = tpu.matmul %986, %852, %cst_157 {dimension_numbers = #tpu.dot_dimension_numbers<[1], [0], [0], [1], [0, 0, 1, 1], [], []>} : vector<2x5xf32>, vector<5x15xf32>, vector<2x15xf32> -> vector<2x15xf32>
    %1026 = vector.extract_strided_slice %851 {offsets = [3, 0, 0], sizes = [1, 2, 10], strides = [1, 1, 1]} : vector<12x2x15xf32> to vector<1x2x10xf32>
    %1027 = vector.shape_cast %1026 : vector<1x2x10xf32> to vector<2x10xf32>
    %1028 = vector.extract_strided_slice %1025 {offsets = [0, 0], sizes = [2, 10], strides = [1, 1]} : vector<2x15xf32> to vector<2x10xf32>
    %1029 = arith.addf %1027, %1028 : vector<2x10xf32>
    %1030 = arith.negf %1029 : vector<2x10xf32>
    %1031 = math.exp %1030 : vector<2x10xf32>
    %cst_158 = arith.constant 1.000000e+00 : f32
    %1032 = vector.broadcast %cst_158 : f32 to vector<2x10xf32>
    %1033 = arith.addf %1032, %1031 : vector<2x10xf32>
    %1034 = arith.divf %1032, %1033 : vector<2x10xf32>
    %1035 = vector.extract_strided_slice %851 {offsets = [3, 0, 10], sizes = [1, 2, 5], strides = [1, 1, 1]} : vector<12x2x15xf32> to vector<1x2x5xf32>
    %1036 = vector.shape_cast %1035 : vector<1x2x5xf32> to vector<2x5xf32>
    %1037 = vector.extract_strided_slice %1034 {offsets = [0, 0], sizes = [2, 5], strides = [1, 1]} : vector<2x10xf32> to vector<2x5xf32>
    %1038 = vector.extract_strided_slice %1025 {offsets = [0, 10], sizes = [2, 5], strides = [1, 1]} : vector<2x15xf32> to vector<2x5xf32>
    %1039 = arith.mulf %1037, %1038 : vector<2x5xf32>
    %1040 = arith.addf %1036, %1039 : vector<2x5xf32>
    %1041 = math.tanh %1040 : vector<2x5xf32>
    %1042 = vector.extract_strided_slice %1034 {offsets = [0, 5], sizes = [2, 5], strides = [1, 1]} : vector<2x10xf32> to vector<2x5xf32>
    %cst_159 = arith.constant 1.000000e+00 : f32
    %1043 = vector.broadcast %cst_159 : f32 to vector<2x5xf32>
    %1044 = arith.subf %1043, %1042 : vector<2x5xf32>
    %1045 = arith.mulf %1044, %1041 : vector<2x5xf32>
    %1046 = arith.mulf %1042, %986 : vector<2x5xf32>
    %1047 = arith.addf %1045, %1046 : vector<2x5xf32>
    %1048 = vector.extract_strided_slice %860 {offsets = [3, 0, 0], sizes = [1, 2, 1], strides = [1, 1, 1]} : vector<12x2x1xi32> to vector<1x2x1xi32>
    %1049 = vector.shape_cast %1048 : vector<1x2x1xi32> to vector<2x1xi32>
    %1050 = vector.broadcast %1049 : vector<2x1xi32> to vector<2x5xi32>
    %1051 = arith.cmpi eq, %861, %1050 : vector<2x5xi32>
    %1052 = arith.extui %1051 : vector<2x5xi1> to vector<2x5xi32>
    %1053 = arith.sitofp %1052 : vector<2x5xi32> to vector<2x5xf32>
    %c3_i32 = arith.constant 3 : i32
    %1054 = vector.broadcast %c3_i32 : i32 to vector<2x1xi32>
    %1055 = arith.cmpi sgt, %859, %1054 : vector<2x1xi32>
    %1056 = vector.shape_cast %1010 : vector<2x5xf32> to vector<2x5x1xf32>
    %1057 = vector.broadcast %1056 : vector<2x5x1xf32> to vector<2x5x5xf32>
    %1058 = arith.addf %1057, %858 : vector<2x5x5xf32>
    %cst_160 = arith.constant dense<0xFF800000> : vector<2x5xf32>
    %1059 = vector.multi_reduction <maximumf>, %1058, %cst_160 [1] : vector<2x5x5xf32> to vector<2x5xf32>
    %1060 = vector.shape_cast %1059 : vector<2x5xf32> to vector<2x1x5xf32>
    %1061 = vector.broadcast %1060 : vector<2x1x5xf32> to vector<2x5x5xf32>
    %1062 = arith.subf %1058, %1061 : vector<2x5x5xf32>
    %1063 = math.exp %1062 : vector<2x5x5xf32>
    %cst_161 = arith.constant dense<0.000000e+00> : vector<2x5xf32>
    %1064 = vector.multi_reduction <add>, %1063, %cst_161 [1] : vector<2x5x5xf32> to vector<2x5xf32>
    %1065 = math.log %1064 : vector<2x5xf32>
    %1066 = vector.shape_cast %1060 : vector<2x1x5xf32> to vector<2x5xf32>
    %1067 = arith.addf %1065, %1066 : vector<2x5xf32>
    %1068 = arith.addf %1067, %1047 : vector<2x5xf32>
    %1069 = vector.shape_cast %1055 : vector<2x1xi1> to vector<2x1xi1>
    %1070 = vector.broadcast %1069 : vector<2x1xi1> to vector<2x5xi1>
    %1071 = arith.select %1070, %1068, %1010 : vector<2x5xi1>, vector<2x5xf32>
    %1072 = arith.mulf %1053, %1047 : vector<2x5xf32>
    %cst_162 = arith.constant dense<0.000000e+00> : vector<2xf32>
    %1073 = vector.multi_reduction <add>, %1072, %cst_162 [1] : vector<2x5xf32> to vector<2xf32>
    %1074 = vector.shape_cast %1073 : vector<2xf32> to vector<2x1xf32>
    %cst_163 = arith.constant dense<0.000000e+00> : vector<2x5xf32>
    %1075 = tpu.matmul %1024, %853, %cst_163 {dimension_numbers = #tpu.dot_dimension_numbers<[1], [0], [0], [1], [0, 0, 1, 1], [], []>} : vector<2x5xf32>, vector<5x5xf32>, vector<2x5xf32> -> vector<2x5xf32>
    %1076 = arith.mulf %1075, %1053 : vector<2x5xf32>
    %cst_164 = arith.constant dense<0.000000e+00> : vector<2xf32>
    %1077 = vector.multi_reduction <add>, %1076, %cst_164 [1] : vector<2x5xf32> to vector<2xf32>
    %1078 = vector.shape_cast %1077 : vector<2xf32> to vector<2x1xf32>
    %1079 = arith.addf %1074, %1078 : vector<2x1xf32>
    %cst_165 = arith.constant 0.000000e+00 : f32
    %1080 = vector.broadcast %cst_165 : f32 to vector<2x1xf32>
    %1081 = arith.select %1055, %1079, %1080 : vector<2x1xi1>, vector<2x1xf32>
    %1082 = arith.addf %1021, %1081 : vector<2x1xf32>
    %1083 = vector.shape_cast %1055 : vector<2x1xi1> to vector<2x1xi1>
    %1084 = vector.broadcast %1083 : vector<2x1xi1> to vector<2x5xi1>
    %1085 = arith.select %1084, %1053, %1024 : vector<2x5xi1>, vector<2x5xf32>
    %cst_166 = arith.constant dense<0.000000e+00> : vector<2x15xf32>
    %1086 = tpu.matmul %1047, %852, %cst_166 {dimension_numbers = #tpu.dot_dimension_numbers<[1], [0], [0], [1], [0, 0, 1, 1], [], []>} : vector<2x5xf32>, vector<5x15xf32>, vector<2x15xf32> -> vector<2x15xf32>
    %1087 = vector.extract_strided_slice %851 {offsets = [4, 0, 0], sizes = [1, 2, 10], strides = [1, 1, 1]} : vector<12x2x15xf32> to vector<1x2x10xf32>
    %1088 = vector.shape_cast %1087 : vector<1x2x10xf32> to vector<2x10xf32>
    %1089 = vector.extract_strided_slice %1086 {offsets = [0, 0], sizes = [2, 10], strides = [1, 1]} : vector<2x15xf32> to vector<2x10xf32>
    %1090 = arith.addf %1088, %1089 : vector<2x10xf32>
    %1091 = arith.negf %1090 : vector<2x10xf32>
    %1092 = math.exp %1091 : vector<2x10xf32>
    %cst_167 = arith.constant 1.000000e+00 : f32
    %1093 = vector.broadcast %cst_167 : f32 to vector<2x10xf32>
    %1094 = arith.addf %1093, %1092 : vector<2x10xf32>
    %1095 = arith.divf %1093, %1094 : vector<2x10xf32>
    %1096 = vector.extract_strided_slice %851 {offsets = [4, 0, 10], sizes = [1, 2, 5], strides = [1, 1, 1]} : vector<12x2x15xf32> to vector<1x2x5xf32>
    %1097 = vector.shape_cast %1096 : vector<1x2x5xf32> to vector<2x5xf32>
    %1098 = vector.extract_strided_slice %1095 {offsets = [0, 0], sizes = [2, 5], strides = [1, 1]} : vector<2x10xf32> to vector<2x5xf32>
    %1099 = vector.extract_strided_slice %1086 {offsets = [0, 10], sizes = [2, 5], strides = [1, 1]} : vector<2x15xf32> to vector<2x5xf32>
    %1100 = arith.mulf %1098, %1099 : vector<2x5xf32>
    %1101 = arith.addf %1097, %1100 : vector<2x5xf32>
    %1102 = math.tanh %1101 : vector<2x5xf32>
    %1103 = vector.extract_strided_slice %1095 {offsets = [0, 5], sizes = [2, 5], strides = [1, 1]} : vector<2x10xf32> to vector<2x5xf32>
    %cst_168 = arith.constant 1.000000e+00 : f32
    %1104 = vector.broadcast %cst_168 : f32 to vector<2x5xf32>
    %1105 = arith.subf %1104, %1103 : vector<2x5xf32>
    %1106 = arith.mulf %1105, %1102 : vector<2x5xf32>
    %1107 = arith.mulf %1103, %1047 : vector<2x5xf32>
    %1108 = arith.addf %1106, %1107 : vector<2x5xf32>
    %1109 = vector.extract_strided_slice %860 {offsets = [4, 0, 0], sizes = [1, 2, 1], strides = [1, 1, 1]} : vector<12x2x1xi32> to vector<1x2x1xi32>
    %1110 = vector.shape_cast %1109 : vector<1x2x1xi32> to vector<2x1xi32>
    %1111 = vector.broadcast %1110 : vector<2x1xi32> to vector<2x5xi32>
    %1112 = arith.cmpi eq, %861, %1111 : vector<2x5xi32>
    %1113 = arith.extui %1112 : vector<2x5xi1> to vector<2x5xi32>
    %1114 = arith.sitofp %1113 : vector<2x5xi32> to vector<2x5xf32>
    %c4_i32 = arith.constant 4 : i32
    %1115 = vector.broadcast %c4_i32 : i32 to vector<2x1xi32>
    %1116 = arith.cmpi sgt, %859, %1115 : vector<2x1xi32>
    %1117 = vector.shape_cast %1071 : vector<2x5xf32> to vector<2x5x1xf32>
    %1118 = vector.broadcast %1117 : vector<2x5x1xf32> to vector<2x5x5xf32>
    %1119 = arith.addf %1118, %858 : vector<2x5x5xf32>
    %cst_169 = arith.constant dense<0xFF800000> : vector<2x5xf32>
    %1120 = vector.multi_reduction <maximumf>, %1119, %cst_169 [1] : vector<2x5x5xf32> to vector<2x5xf32>
    %1121 = vector.shape_cast %1120 : vector<2x5xf32> to vector<2x1x5xf32>
    %1122 = vector.broadcast %1121 : vector<2x1x5xf32> to vector<2x5x5xf32>
    %1123 = arith.subf %1119, %1122 : vector<2x5x5xf32>
    %1124 = math.exp %1123 : vector<2x5x5xf32>
    %cst_170 = arith.constant dense<0.000000e+00> : vector<2x5xf32>
    %1125 = vector.multi_reduction <add>, %1124, %cst_170 [1] : vector<2x5x5xf32> to vector<2x5xf32>
    %1126 = math.log %1125 : vector<2x5xf32>
    %1127 = vector.shape_cast %1121 : vector<2x1x5xf32> to vector<2x5xf32>
    %1128 = arith.addf %1126, %1127 : vector<2x5xf32>
    %1129 = arith.addf %1128, %1108 : vector<2x5xf32>
    %1130 = vector.shape_cast %1116 : vector<2x1xi1> to vector<2x1xi1>
    %1131 = vector.broadcast %1130 : vector<2x1xi1> to vector<2x5xi1>
    %1132 = arith.select %1131, %1129, %1071 : vector<2x5xi1>, vector<2x5xf32>
    %1133 = arith.mulf %1114, %1108 : vector<2x5xf32>
    %cst_171 = arith.constant dense<0.000000e+00> : vector<2xf32>
    %1134 = vector.multi_reduction <add>, %1133, %cst_171 [1] : vector<2x5xf32> to vector<2xf32>
    %1135 = vector.shape_cast %1134 : vector<2xf32> to vector<2x1xf32>
    %cst_172 = arith.constant dense<0.000000e+00> : vector<2x5xf32>
    %1136 = tpu.matmul %1085, %853, %cst_172 {dimension_numbers = #tpu.dot_dimension_numbers<[1], [0], [0], [1], [0, 0, 1, 1], [], []>} : vector<2x5xf32>, vector<5x5xf32>, vector<2x5xf32> -> vector<2x5xf32>
    %1137 = arith.mulf %1136, %1114 : vector<2x5xf32>
    %cst_173 = arith.constant dense<0.000000e+00> : vector<2xf32>
    %1138 = vector.multi_reduction <add>, %1137, %cst_173 [1] : vector<2x5xf32> to vector<2xf32>
    %1139 = vector.shape_cast %1138 : vector<2xf32> to vector<2x1xf32>
    %1140 = arith.addf %1135, %1139 : vector<2x1xf32>
    %cst_174 = arith.constant 0.000000e+00 : f32
    %1141 = vector.broadcast %cst_174 : f32 to vector<2x1xf32>
    %1142 = arith.select %1116, %1140, %1141 : vector<2x1xi1>, vector<2x1xf32>
    %1143 = arith.addf %1082, %1142 : vector<2x1xf32>
    %1144 = vector.shape_cast %1116 : vector<2x1xi1> to vector<2x1xi1>
    %1145 = vector.broadcast %1144 : vector<2x1xi1> to vector<2x5xi1>
    %1146 = arith.select %1145, %1114, %1085 : vector<2x5xi1>, vector<2x5xf32>
    %cst_175 = arith.constant dense<0.000000e+00> : vector<2x15xf32>
    %1147 = tpu.matmul %1108, %852, %cst_175 {dimension_numbers = #tpu.dot_dimension_numbers<[1], [0], [0], [1], [0, 0, 1, 1], [], []>} : vector<2x5xf32>, vector<5x15xf32>, vector<2x15xf32> -> vector<2x15xf32>
    %1148 = vector.extract_strided_slice %851 {offsets = [5, 0, 0], sizes = [1, 2, 10], strides = [1, 1, 1]} : vector<12x2x15xf32> to vector<1x2x10xf32>
    %1149 = vector.shape_cast %1148 : vector<1x2x10xf32> to vector<2x10xf32>
    %1150 = vector.extract_strided_slice %1147 {offsets = [0, 0], sizes = [2, 10], strides = [1, 1]} : vector<2x15xf32> to vector<2x10xf32>
    %1151 = arith.addf %1149, %1150 : vector<2x10xf32>
    %1152 = arith.negf %1151 : vector<2x10xf32>
    %1153 = math.exp %1152 : vector<2x10xf32>
    %cst_176 = arith.constant 1.000000e+00 : f32
    %1154 = vector.broadcast %cst_176 : f32 to vector<2x10xf32>
    %1155 = arith.addf %1154, %1153 : vector<2x10xf32>
    %1156 = arith.divf %1154, %1155 : vector<2x10xf32>
    %1157 = vector.extract_strided_slice %851 {offsets = [5, 0, 10], sizes = [1, 2, 5], strides = [1, 1, 1]} : vector<12x2x15xf32> to vector<1x2x5xf32>
    %1158 = vector.shape_cast %1157 : vector<1x2x5xf32> to vector<2x5xf32>
    %1159 = vector.extract_strided_slice %1156 {offsets = [0, 0], sizes = [2, 5], strides = [1, 1]} : vector<2x10xf32> to vector<2x5xf32>
    %1160 = vector.extract_strided_slice %1147 {offsets = [0, 10], sizes = [2, 5], strides = [1, 1]} : vector<2x15xf32> to vector<2x5xf32>
    %1161 = arith.mulf %1159, %1160 : vector<2x5xf32>
    %1162 = arith.addf %1158, %1161 : vector<2x5xf32>
    %1163 = math.tanh %1162 : vector<2x5xf32>
    %1164 = vector.extract_strided_slice %1156 {offsets = [0, 5], sizes = [2, 5], strides = [1, 1]} : vector<2x10xf32> to vector<2x5xf32>
    %cst_177 = arith.constant 1.000000e+00 : f32
    %1165 = vector.broadcast %cst_177 : f32 to vector<2x5xf32>
    %1166 = arith.subf %1165, %1164 : vector<2x5xf32>
    %1167 = arith.mulf %1166, %1163 : vector<2x5xf32>
    %1168 = arith.mulf %1164, %1108 : vector<2x5xf32>
    %1169 = arith.addf %1167, %1168 : vector<2x5xf32>
    %1170 = vector.extract_strided_slice %860 {offsets = [5, 0, 0], sizes = [1, 2, 1], strides = [1, 1, 1]} : vector<12x2x1xi32> to vector<1x2x1xi32>
    %1171 = vector.shape_cast %1170 : vector<1x2x1xi32> to vector<2x1xi32>
    %1172 = vector.broadcast %1171 : vector<2x1xi32> to vector<2x5xi32>
    %1173 = arith.cmpi eq, %861, %1172 : vector<2x5xi32>
    %1174 = arith.extui %1173 : vector<2x5xi1> to vector<2x5xi32>
    %1175 = arith.sitofp %1174 : vector<2x5xi32> to vector<2x5xf32>
    %c5_i32 = arith.constant 5 : i32
    %1176 = vector.broadcast %c5_i32 : i32 to vector<2x1xi32>
    %1177 = arith.cmpi sgt, %859, %1176 : vector<2x1xi32>
    %1178 = vector.shape_cast %1132 : vector<2x5xf32> to vector<2x5x1xf32>
    %1179 = vector.broadcast %1178 : vector<2x5x1xf32> to vector<2x5x5xf32>
    %1180 = arith.addf %1179, %858 : vector<2x5x5xf32>
    %cst_178 = arith.constant dense<0xFF800000> : vector<2x5xf32>
    %1181 = vector.multi_reduction <maximumf>, %1180, %cst_178 [1] : vector<2x5x5xf32> to vector<2x5xf32>
    %1182 = vector.shape_cast %1181 : vector<2x5xf32> to vector<2x1x5xf32>
    %1183 = vector.broadcast %1182 : vector<2x1x5xf32> to vector<2x5x5xf32>
    %1184 = arith.subf %1180, %1183 : vector<2x5x5xf32>
    %1185 = math.exp %1184 : vector<2x5x5xf32>
    %cst_179 = arith.constant dense<0.000000e+00> : vector<2x5xf32>
    %1186 = vector.multi_reduction <add>, %1185, %cst_179 [1] : vector<2x5x5xf32> to vector<2x5xf32>
    %1187 = math.log %1186 : vector<2x5xf32>
    %1188 = vector.shape_cast %1182 : vector<2x1x5xf32> to vector<2x5xf32>
    %1189 = arith.addf %1187, %1188 : vector<2x5xf32>
    %1190 = arith.addf %1189, %1169 : vector<2x5xf32>
    %1191 = vector.shape_cast %1177 : vector<2x1xi1> to vector<2x1xi1>
    %1192 = vector.broadcast %1191 : vector<2x1xi1> to vector<2x5xi1>
    %1193 = arith.select %1192, %1190, %1132 : vector<2x5xi1>, vector<2x5xf32>
    %1194 = arith.mulf %1175, %1169 : vector<2x5xf32>
    %cst_180 = arith.constant dense<0.000000e+00> : vector<2xf32>
    %1195 = vector.multi_reduction <add>, %1194, %cst_180 [1] : vector<2x5xf32> to vector<2xf32>
    %1196 = vector.shape_cast %1195 : vector<2xf32> to vector<2x1xf32>
    %cst_181 = arith.constant dense<0.000000e+00> : vector<2x5xf32>
    %1197 = tpu.matmul %1146, %853, %cst_181 {dimension_numbers = #tpu.dot_dimension_numbers<[1], [0], [0], [1], [0, 0, 1, 1], [], []>} : vector<2x5xf32>, vector<5x5xf32>, vector<2x5xf32> -> vector<2x5xf32>
    %1198 = arith.mulf %1197, %1175 : vector<2x5xf32>
    %cst_182 = arith.constant dense<0.000000e+00> : vector<2xf32>
    %1199 = vector.multi_reduction <add>, %1198, %cst_182 [1] : vector<2x5xf32> to vector<2xf32>
    %1200 = vector.shape_cast %1199 : vector<2xf32> to vector<2x1xf32>
    %1201 = arith.addf %1196, %1200 : vector<2x1xf32>
    %cst_183 = arith.constant 0.000000e+00 : f32
    %1202 = vector.broadcast %cst_183 : f32 to vector<2x1xf32>
    %1203 = arith.select %1177, %1201, %1202 : vector<2x1xi1>, vector<2x1xf32>
    %1204 = arith.addf %1143, %1203 : vector<2x1xf32>
    %1205 = vector.shape_cast %1177 : vector<2x1xi1> to vector<2x1xi1>
    %1206 = vector.broadcast %1205 : vector<2x1xi1> to vector<2x5xi1>
    %1207 = arith.select %1206, %1175, %1146 : vector<2x5xi1>, vector<2x5xf32>
    %cst_184 = arith.constant dense<0.000000e+00> : vector<2x15xf32>
    %1208 = tpu.matmul %1169, %852, %cst_184 {dimension_numbers = #tpu.dot_dimension_numbers<[1], [0], [0], [1], [0, 0, 1, 1], [], []>} : vector<2x5xf32>, vector<5x15xf32>, vector<2x15xf32> -> vector<2x15xf32>
    %1209 = vector.extract_strided_slice %851 {offsets = [6, 0, 0], sizes = [1, 2, 10], strides = [1, 1, 1]} : vector<12x2x15xf32> to vector<1x2x10xf32>
    %1210 = vector.shape_cast %1209 : vector<1x2x10xf32> to vector<2x10xf32>
    %1211 = vector.extract_strided_slice %1208 {offsets = [0, 0], sizes = [2, 10], strides = [1, 1]} : vector<2x15xf32> to vector<2x10xf32>
    %1212 = arith.addf %1210, %1211 : vector<2x10xf32>
    %1213 = arith.negf %1212 : vector<2x10xf32>
    %1214 = math.exp %1213 : vector<2x10xf32>
    %cst_185 = arith.constant 1.000000e+00 : f32
    %1215 = vector.broadcast %cst_185 : f32 to vector<2x10xf32>
    %1216 = arith.addf %1215, %1214 : vector<2x10xf32>
    %1217 = arith.divf %1215, %1216 : vector<2x10xf32>
    %1218 = vector.extract_strided_slice %851 {offsets = [6, 0, 10], sizes = [1, 2, 5], strides = [1, 1, 1]} : vector<12x2x15xf32> to vector<1x2x5xf32>
    %1219 = vector.shape_cast %1218 : vector<1x2x5xf32> to vector<2x5xf32>
    %1220 = vector.extract_strided_slice %1217 {offsets = [0, 0], sizes = [2, 5], strides = [1, 1]} : vector<2x10xf32> to vector<2x5xf32>
    %1221 = vector.extract_strided_slice %1208 {offsets = [0, 10], sizes = [2, 5], strides = [1, 1]} : vector<2x15xf32> to vector<2x5xf32>
    %1222 = arith.mulf %1220, %1221 : vector<2x5xf32>
    %1223 = arith.addf %1219, %1222 : vector<2x5xf32>
    %1224 = math.tanh %1223 : vector<2x5xf32>
    %1225 = vector.extract_strided_slice %1217 {offsets = [0, 5], sizes = [2, 5], strides = [1, 1]} : vector<2x10xf32> to vector<2x5xf32>
    %cst_186 = arith.constant 1.000000e+00 : f32
    %1226 = vector.broadcast %cst_186 : f32 to vector<2x5xf32>
    %1227 = arith.subf %1226, %1225 : vector<2x5xf32>
    %1228 = arith.mulf %1227, %1224 : vector<2x5xf32>
    %1229 = arith.mulf %1225, %1169 : vector<2x5xf32>
    %1230 = arith.addf %1228, %1229 : vector<2x5xf32>
    %1231 = vector.extract_strided_slice %860 {offsets = [6, 0, 0], sizes = [1, 2, 1], strides = [1, 1, 1]} : vector<12x2x1xi32> to vector<1x2x1xi32>
    %1232 = vector.shape_cast %1231 : vector<1x2x1xi32> to vector<2x1xi32>
    %1233 = vector.broadcast %1232 : vector<2x1xi32> to vector<2x5xi32>
    %1234 = arith.cmpi eq, %861, %1233 : vector<2x5xi32>
    %1235 = arith.extui %1234 : vector<2x5xi1> to vector<2x5xi32>
    %1236 = arith.sitofp %1235 : vector<2x5xi32> to vector<2x5xf32>
    %c6_i32 = arith.constant 6 : i32
    %1237 = vector.broadcast %c6_i32 : i32 to vector<2x1xi32>
    %1238 = arith.cmpi sgt, %859, %1237 : vector<2x1xi32>
    %1239 = vector.shape_cast %1193 : vector<2x5xf32> to vector<2x5x1xf32>
    %1240 = vector.broadcast %1239 : vector<2x5x1xf32> to vector<2x5x5xf32>
    %1241 = arith.addf %1240, %858 : vector<2x5x5xf32>
    %cst_187 = arith.constant dense<0xFF800000> : vector<2x5xf32>
    %1242 = vector.multi_reduction <maximumf>, %1241, %cst_187 [1] : vector<2x5x5xf32> to vector<2x5xf32>
    %1243 = vector.shape_cast %1242 : vector<2x5xf32> to vector<2x1x5xf32>
    %1244 = vector.broadcast %1243 : vector<2x1x5xf32> to vector<2x5x5xf32>
    %1245 = arith.subf %1241, %1244 : vector<2x5x5xf32>
    %1246 = math.exp %1245 : vector<2x5x5xf32>
    %cst_188 = arith.constant dense<0.000000e+00> : vector<2x5xf32>
    %1247 = vector.multi_reduction <add>, %1246, %cst_188 [1] : vector<2x5x5xf32> to vector<2x5xf32>
    %1248 = math.log %1247 : vector<2x5xf32>
    %1249 = vector.shape_cast %1243 : vector<2x1x5xf32> to vector<2x5xf32>
    %1250 = arith.addf %1248, %1249 : vector<2x5xf32>
    %1251 = arith.addf %1250, %1230 : vector<2x5xf32>
    %1252 = vector.shape_cast %1238 : vector<2x1xi1> to vector<2x1xi1>
    %1253 = vector.broadcast %1252 : vector<2x1xi1> to vector<2x5xi1>
    %1254 = arith.select %1253, %1251, %1193 : vector<2x5xi1>, vector<2x5xf32>
    %1255 = arith.mulf %1236, %1230 : vector<2x5xf32>
    %cst_189 = arith.constant dense<0.000000e+00> : vector<2xf32>
    %1256 = vector.multi_reduction <add>, %1255, %cst_189 [1] : vector<2x5xf32> to vector<2xf32>
    %1257 = vector.shape_cast %1256 : vector<2xf32> to vector<2x1xf32>
    %cst_190 = arith.constant dense<0.000000e+00> : vector<2x5xf32>
    %1258 = tpu.matmul %1207, %853, %cst_190 {dimension_numbers = #tpu.dot_dimension_numbers<[1], [0], [0], [1], [0, 0, 1, 1], [], []>} : vector<2x5xf32>, vector<5x5xf32>, vector<2x5xf32> -> vector<2x5xf32>
    %1259 = arith.mulf %1258, %1236 : vector<2x5xf32>
    %cst_191 = arith.constant dense<0.000000e+00> : vector<2xf32>
    %1260 = vector.multi_reduction <add>, %1259, %cst_191 [1] : vector<2x5xf32> to vector<2xf32>
    %1261 = vector.shape_cast %1260 : vector<2xf32> to vector<2x1xf32>
    %1262 = arith.addf %1257, %1261 : vector<2x1xf32>
    %cst_192 = arith.constant 0.000000e+00 : f32
    %1263 = vector.broadcast %cst_192 : f32 to vector<2x1xf32>
    %1264 = arith.select %1238, %1262, %1263 : vector<2x1xi1>, vector<2x1xf32>
    %1265 = arith.addf %1204, %1264 : vector<2x1xf32>
    %1266 = vector.shape_cast %1238 : vector<2x1xi1> to vector<2x1xi1>
    %1267 = vector.broadcast %1266 : vector<2x1xi1> to vector<2x5xi1>
    %1268 = arith.select %1267, %1236, %1207 : vector<2x5xi1>, vector<2x5xf32>
    %cst_193 = arith.constant dense<0.000000e+00> : vector<2x15xf32>
    %1269 = tpu.matmul %1230, %852, %cst_193 {dimension_numbers = #tpu.dot_dimension_numbers<[1], [0], [0], [1], [0, 0, 1, 1], [], []>} : vector<2x5xf32>, vector<5x15xf32>, vector<2x15xf32> -> vector<2x15xf32>
    %1270 = vector.extract_strided_slice %851 {offsets = [7, 0, 0], sizes = [1, 2, 10], strides = [1, 1, 1]} : vector<12x2x15xf32> to vector<1x2x10xf32>
    %1271 = vector.shape_cast %1270 : vector<1x2x10xf32> to vector<2x10xf32>
    %1272 = vector.extract_strided_slice %1269 {offsets = [0, 0], sizes = [2, 10], strides = [1, 1]} : vector<2x15xf32> to vector<2x10xf32>
    %1273 = arith.addf %1271, %1272 : vector<2x10xf32>
    %1274 = arith.negf %1273 : vector<2x10xf32>
    %1275 = math.exp %1274 : vector<2x10xf32>
    %cst_194 = arith.constant 1.000000e+00 : f32
    %1276 = vector.broadcast %cst_194 : f32 to vector<2x10xf32>
    %1277 = arith.addf %1276, %1275 : vector<2x10xf32>
    %1278 = arith.divf %1276, %1277 : vector<2x10xf32>
    %1279 = vector.extract_strided_slice %851 {offsets = [7, 0, 10], sizes = [1, 2, 5], strides = [1, 1, 1]} : vector<12x2x15xf32> to vector<1x2x5xf32>
    %1280 = vector.shape_cast %1279 : vector<1x2x5xf32> to vector<2x5xf32>
    %1281 = vector.extract_strided_slice %1278 {offsets = [0, 0], sizes = [2, 5], strides = [1, 1]} : vector<2x10xf32> to vector<2x5xf32>
    %1282 = vector.extract_strided_slice %1269 {offsets = [0, 10], sizes = [2, 5], strides = [1, 1]} : vector<2x15xf32> to vector<2x5xf32>
    %1283 = arith.mulf %1281, %1282 : vector<2x5xf32>
    %1284 = arith.addf %1280, %1283 : vector<2x5xf32>
    %1285 = math.tanh %1284 : vector<2x5xf32>
    %1286 = vector.extract_strided_slice %1278 {offsets = [0, 5], sizes = [2, 5], strides = [1, 1]} : vector<2x10xf32> to vector<2x5xf32>
    %cst_195 = arith.constant 1.000000e+00 : f32
    %1287 = vector.broadcast %cst_195 : f32 to vector<2x5xf32>
    %1288 = arith.subf %1287, %1286 : vector<2x5xf32>
    %1289 = arith.mulf %1288, %1285 : vector<2x5xf32>
    %1290 = arith.mulf %1286, %1230 : vector<2x5xf32>
    %1291 = arith.addf %1289, %1290 : vector<2x5xf32>
    %1292 = vector.extract_strided_slice %860 {offsets = [7, 0, 0], sizes = [1, 2, 1], strides = [1, 1, 1]} : vector<12x2x1xi32> to vector<1x2x1xi32>
    %1293 = vector.shape_cast %1292 : vector<1x2x1xi32> to vector<2x1xi32>
    %1294 = vector.broadcast %1293 : vector<2x1xi32> to vector<2x5xi32>
    %1295 = arith.cmpi eq, %861, %1294 : vector<2x5xi32>
    %1296 = arith.extui %1295 : vector<2x5xi1> to vector<2x5xi32>
    %1297 = arith.sitofp %1296 : vector<2x5xi32> to vector<2x5xf32>
    %c7_i32 = arith.constant 7 : i32
    %1298 = vector.broadcast %c7_i32 : i32 to vector<2x1xi32>
    %1299 = arith.cmpi sgt, %859, %1298 : vector<2x1xi32>
    %1300 = vector.shape_cast %1254 : vector<2x5xf32> to vector<2x5x1xf32>
    %1301 = vector.broadcast %1300 : vector<2x5x1xf32> to vector<2x5x5xf32>
    %1302 = arith.addf %1301, %858 : vector<2x5x5xf32>
    %cst_196 = arith.constant dense<0xFF800000> : vector<2x5xf32>
    %1303 = vector.multi_reduction <maximumf>, %1302, %cst_196 [1] : vector<2x5x5xf32> to vector<2x5xf32>
    %1304 = vector.shape_cast %1303 : vector<2x5xf32> to vector<2x1x5xf32>
    %1305 = vector.broadcast %1304 : vector<2x1x5xf32> to vector<2x5x5xf32>
    %1306 = arith.subf %1302, %1305 : vector<2x5x5xf32>
    %1307 = math.exp %1306 : vector<2x5x5xf32>
    %cst_197 = arith.constant dense<0.000000e+00> : vector<2x5xf32>
    %1308 = vector.multi_reduction <add>, %1307, %cst_197 [1] : vector<2x5x5xf32> to vector<2x5xf32>
    %1309 = math.log %1308 : vector<2x5xf32>
    %1310 = vector.shape_cast %1304 : vector<2x1x5xf32> to vector<2x5xf32>
    %1311 = arith.addf %1309, %1310 : vector<2x5xf32>
    %1312 = arith.addf %1311, %1291 : vector<2x5xf32>
    %1313 = vector.shape_cast %1299 : vector<2x1xi1> to vector<2x1xi1>
    %1314 = vector.broadcast %1313 : vector<2x1xi1> to vector<2x5xi1>
    %1315 = arith.select %1314, %1312, %1254 : vector<2x5xi1>, vector<2x5xf32>
    %1316 = arith.mulf %1297, %1291 : vector<2x5xf32>
    %cst_198 = arith.constant dense<0.000000e+00> : vector<2xf32>
    %1317 = vector.multi_reduction <add>, %1316, %cst_198 [1] : vector<2x5xf32> to vector<2xf32>
    %1318 = vector.shape_cast %1317 : vector<2xf32> to vector<2x1xf32>
    %cst_199 = arith.constant dense<0.000000e+00> : vector<2x5xf32>
    %1319 = tpu.matmul %1268, %853, %cst_199 {dimension_numbers = #tpu.dot_dimension_numbers<[1], [0], [0], [1], [0, 0, 1, 1], [], []>} : vector<2x5xf32>, vector<5x5xf32>, vector<2x5xf32> -> vector<2x5xf32>
    %1320 = arith.mulf %1319, %1297 : vector<2x5xf32>
    %cst_200 = arith.constant dense<0.000000e+00> : vector<2xf32>
    %1321 = vector.multi_reduction <add>, %1320, %cst_200 [1] : vector<2x5xf32> to vector<2xf32>
    %1322 = vector.shape_cast %1321 : vector<2xf32> to vector<2x1xf32>
    %1323 = arith.addf %1318, %1322 : vector<2x1xf32>
    %cst_201 = arith.constant 0.000000e+00 : f32
    %1324 = vector.broadcast %cst_201 : f32 to vector<2x1xf32>
    %1325 = arith.select %1299, %1323, %1324 : vector<2x1xi1>, vector<2x1xf32>
    %1326 = arith.addf %1265, %1325 : vector<2x1xf32>
    %1327 = vector.shape_cast %1299 : vector<2x1xi1> to vector<2x1xi1>
    %1328 = vector.broadcast %1327 : vector<2x1xi1> to vector<2x5xi1>
    %1329 = arith.select %1328, %1297, %1268 : vector<2x5xi1>, vector<2x5xf32>
    %cst_202 = arith.constant dense<0.000000e+00> : vector<2x15xf32>
    %1330 = tpu.matmul %1291, %852, %cst_202 {dimension_numbers = #tpu.dot_dimension_numbers<[1], [0], [0], [1], [0, 0, 1, 1], [], []>} : vector<2x5xf32>, vector<5x15xf32>, vector<2x15xf32> -> vector<2x15xf32>
    %1331 = vector.extract_strided_slice %851 {offsets = [8, 0, 0], sizes = [1, 2, 10], strides = [1, 1, 1]} : vector<12x2x15xf32> to vector<1x2x10xf32>
    %1332 = vector.shape_cast %1331 : vector<1x2x10xf32> to vector<2x10xf32>
    %1333 = vector.extract_strided_slice %1330 {offsets = [0, 0], sizes = [2, 10], strides = [1, 1]} : vector<2x15xf32> to vector<2x10xf32>
    %1334 = arith.addf %1332, %1333 : vector<2x10xf32>
    %1335 = arith.negf %1334 : vector<2x10xf32>
    %1336 = math.exp %1335 : vector<2x10xf32>
    %cst_203 = arith.constant 1.000000e+00 : f32
    %1337 = vector.broadcast %cst_203 : f32 to vector<2x10xf32>
    %1338 = arith.addf %1337, %1336 : vector<2x10xf32>
    %1339 = arith.divf %1337, %1338 : vector<2x10xf32>
    %1340 = vector.extract_strided_slice %851 {offsets = [8, 0, 10], sizes = [1, 2, 5], strides = [1, 1, 1]} : vector<12x2x15xf32> to vector<1x2x5xf32>
    %1341 = vector.shape_cast %1340 : vector<1x2x5xf32> to vector<2x5xf32>
    %1342 = vector.extract_strided_slice %1339 {offsets = [0, 0], sizes = [2, 5], strides = [1, 1]} : vector<2x10xf32> to vector<2x5xf32>
    %1343 = vector.extract_strided_slice %1330 {offsets = [0, 10], sizes = [2, 5], strides = [1, 1]} : vector<2x15xf32> to vector<2x5xf32>
    %1344 = arith.mulf %1342, %1343 : vector<2x5xf32>
    %1345 = arith.addf %1341, %1344 : vector<2x5xf32>
    %1346 = math.tanh %1345 : vector<2x5xf32>
    %1347 = vector.extract_strided_slice %1339 {offsets = [0, 5], sizes = [2, 5], strides = [1, 1]} : vector<2x10xf32> to vector<2x5xf32>
    %cst_204 = arith.constant 1.000000e+00 : f32
    %1348 = vector.broadcast %cst_204 : f32 to vector<2x5xf32>
    %1349 = arith.subf %1348, %1347 : vector<2x5xf32>
    %1350 = arith.mulf %1349, %1346 : vector<2x5xf32>
    %1351 = arith.mulf %1347, %1291 : vector<2x5xf32>
    %1352 = arith.addf %1350, %1351 : vector<2x5xf32>
    %1353 = vector.extract_strided_slice %860 {offsets = [8, 0, 0], sizes = [1, 2, 1], strides = [1, 1, 1]} : vector<12x2x1xi32> to vector<1x2x1xi32>
    %1354 = vector.shape_cast %1353 : vector<1x2x1xi32> to vector<2x1xi32>
    %1355 = vector.broadcast %1354 : vector<2x1xi32> to vector<2x5xi32>
    %1356 = arith.cmpi eq, %861, %1355 : vector<2x5xi32>
    %1357 = arith.extui %1356 : vector<2x5xi1> to vector<2x5xi32>
    %1358 = arith.sitofp %1357 : vector<2x5xi32> to vector<2x5xf32>
    %c8_i32 = arith.constant 8 : i32
    %1359 = vector.broadcast %c8_i32 : i32 to vector<2x1xi32>
    %1360 = arith.cmpi sgt, %859, %1359 : vector<2x1xi32>
    %1361 = vector.shape_cast %1315 : vector<2x5xf32> to vector<2x5x1xf32>
    %1362 = vector.broadcast %1361 : vector<2x5x1xf32> to vector<2x5x5xf32>
    %1363 = arith.addf %1362, %858 : vector<2x5x5xf32>
    %cst_205 = arith.constant dense<0xFF800000> : vector<2x5xf32>
    %1364 = vector.multi_reduction <maximumf>, %1363, %cst_205 [1] : vector<2x5x5xf32> to vector<2x5xf32>
    %1365 = vector.shape_cast %1364 : vector<2x5xf32> to vector<2x1x5xf32>
    %1366 = vector.broadcast %1365 : vector<2x1x5xf32> to vector<2x5x5xf32>
    %1367 = arith.subf %1363, %1366 : vector<2x5x5xf32>
    %1368 = math.exp %1367 : vector<2x5x5xf32>
    %cst_206 = arith.constant dense<0.000000e+00> : vector<2x5xf32>
    %1369 = vector.multi_reduction <add>, %1368, %cst_206 [1] : vector<2x5x5xf32> to vector<2x5xf32>
    %1370 = math.log %1369 : vector<2x5xf32>
    %1371 = vector.shape_cast %1365 : vector<2x1x5xf32> to vector<2x5xf32>
    %1372 = arith.addf %1370, %1371 : vector<2x5xf32>
    %1373 = arith.addf %1372, %1352 : vector<2x5xf32>
    %1374 = vector.shape_cast %1360 : vector<2x1xi1> to vector<2x1xi1>
    %1375 = vector.broadcast %1374 : vector<2x1xi1> to vector<2x5xi1>
    %1376 = arith.select %1375, %1373, %1315 : vector<2x5xi1>, vector<2x5xf32>
    %1377 = arith.mulf %1358, %1352 : vector<2x5xf32>
    %cst_207 = arith.constant dense<0.000000e+00> : vector<2xf32>
    %1378 = vector.multi_reduction <add>, %1377, %cst_207 [1] : vector<2x5xf32> to vector<2xf32>
    %1379 = vector.shape_cast %1378 : vector<2xf32> to vector<2x1xf32>
    %cst_208 = arith.constant dense<0.000000e+00> : vector<2x5xf32>
    %1380 = tpu.matmul %1329, %853, %cst_208 {dimension_numbers = #tpu.dot_dimension_numbers<[1], [0], [0], [1], [0, 0, 1, 1], [], []>} : vector<2x5xf32>, vector<5x5xf32>, vector<2x5xf32> -> vector<2x5xf32>
    %1381 = arith.mulf %1380, %1358 : vector<2x5xf32>
    %cst_209 = arith.constant dense<0.000000e+00> : vector<2xf32>
    %1382 = vector.multi_reduction <add>, %1381, %cst_209 [1] : vector<2x5xf32> to vector<2xf32>
    %1383 = vector.shape_cast %1382 : vector<2xf32> to vector<2x1xf32>
    %1384 = arith.addf %1379, %1383 : vector<2x1xf32>
    %cst_210 = arith.constant 0.000000e+00 : f32
    %1385 = vector.broadcast %cst_210 : f32 to vector<2x1xf32>
    %1386 = arith.select %1360, %1384, %1385 : vector<2x1xi1>, vector<2x1xf32>
    %1387 = arith.addf %1326, %1386 : vector<2x1xf32>
    %1388 = vector.shape_cast %1360 : vector<2x1xi1> to vector<2x1xi1>
    %1389 = vector.broadcast %1388 : vector<2x1xi1> to vector<2x5xi1>
    %1390 = arith.select %1389, %1358, %1329 : vector<2x5xi1>, vector<2x5xf32>
    %cst_211 = arith.constant dense<0.000000e+00> : vector<2x15xf32>
    %1391 = tpu.matmul %1352, %852, %cst_211 {dimension_numbers = #tpu.dot_dimension_numbers<[1], [0], [0], [1], [0, 0, 1, 1], [], []>} : vector<2x5xf32>, vector<5x15xf32>, vector<2x15xf32> -> vector<2x15xf32>
    %1392 = vector.extract_strided_slice %851 {offsets = [9, 0, 0], sizes = [1, 2, 10], strides = [1, 1, 1]} : vector<12x2x15xf32> to vector<1x2x10xf32>
    %1393 = vector.shape_cast %1392 : vector<1x2x10xf32> to vector<2x10xf32>
    %1394 = vector.extract_strided_slice %1391 {offsets = [0, 0], sizes = [2, 10], strides = [1, 1]} : vector<2x15xf32> to vector<2x10xf32>
    %1395 = arith.addf %1393, %1394 : vector<2x10xf32>
    %1396 = arith.negf %1395 : vector<2x10xf32>
    %1397 = math.exp %1396 : vector<2x10xf32>
    %cst_212 = arith.constant 1.000000e+00 : f32
    %1398 = vector.broadcast %cst_212 : f32 to vector<2x10xf32>
    %1399 = arith.addf %1398, %1397 : vector<2x10xf32>
    %1400 = arith.divf %1398, %1399 : vector<2x10xf32>
    %1401 = vector.extract_strided_slice %851 {offsets = [9, 0, 10], sizes = [1, 2, 5], strides = [1, 1, 1]} : vector<12x2x15xf32> to vector<1x2x5xf32>
    %1402 = vector.shape_cast %1401 : vector<1x2x5xf32> to vector<2x5xf32>
    %1403 = vector.extract_strided_slice %1400 {offsets = [0, 0], sizes = [2, 5], strides = [1, 1]} : vector<2x10xf32> to vector<2x5xf32>
    %1404 = vector.extract_strided_slice %1391 {offsets = [0, 10], sizes = [2, 5], strides = [1, 1]} : vector<2x15xf32> to vector<2x5xf32>
    %1405 = arith.mulf %1403, %1404 : vector<2x5xf32>
    %1406 = arith.addf %1402, %1405 : vector<2x5xf32>
    %1407 = math.tanh %1406 : vector<2x5xf32>
    %1408 = vector.extract_strided_slice %1400 {offsets = [0, 5], sizes = [2, 5], strides = [1, 1]} : vector<2x10xf32> to vector<2x5xf32>
    %cst_213 = arith.constant 1.000000e+00 : f32
    %1409 = vector.broadcast %cst_213 : f32 to vector<2x5xf32>
    %1410 = arith.subf %1409, %1408 : vector<2x5xf32>
    %1411 = arith.mulf %1410, %1407 : vector<2x5xf32>
    %1412 = arith.mulf %1408, %1352 : vector<2x5xf32>
    %1413 = arith.addf %1411, %1412 : vector<2x5xf32>
    %1414 = vector.extract_strided_slice %860 {offsets = [9, 0, 0], sizes = [1, 2, 1], strides = [1, 1, 1]} : vector<12x2x1xi32> to vector<1x2x1xi32>
    %1415 = vector.shape_cast %1414 : vector<1x2x1xi32> to vector<2x1xi32>
    %1416 = vector.broadcast %1415 : vector<2x1xi32> to vector<2x5xi32>
    %1417 = arith.cmpi eq, %861, %1416 : vector<2x5xi32>
    %1418 = arith.extui %1417 : vector<2x5xi1> to vector<2x5xi32>
    %1419 = arith.sitofp %1418 : vector<2x5xi32> to vector<2x5xf32>
    %c9_i32 = arith.constant 9 : i32
    %1420 = vector.broadcast %c9_i32 : i32 to vector<2x1xi32>
    %1421 = arith.cmpi sgt, %859, %1420 : vector<2x1xi32>
    %1422 = vector.shape_cast %1376 : vector<2x5xf32> to vector<2x5x1xf32>
    %1423 = vector.broadcast %1422 : vector<2x5x1xf32> to vector<2x5x5xf32>
    %1424 = arith.addf %1423, %858 : vector<2x5x5xf32>
    %cst_214 = arith.constant dense<0xFF800000> : vector<2x5xf32>
    %1425 = vector.multi_reduction <maximumf>, %1424, %cst_214 [1] : vector<2x5x5xf32> to vector<2x5xf32>
    %1426 = vector.shape_cast %1425 : vector<2x5xf32> to vector<2x1x5xf32>
    %1427 = vector.broadcast %1426 : vector<2x1x5xf32> to vector<2x5x5xf32>
    %1428 = arith.subf %1424, %1427 : vector<2x5x5xf32>
    %1429 = math.exp %1428 : vector<2x5x5xf32>
    %cst_215 = arith.constant dense<0.000000e+00> : vector<2x5xf32>
    %1430 = vector.multi_reduction <add>, %1429, %cst_215 [1] : vector<2x5x5xf32> to vector<2x5xf32>
    %1431 = math.log %1430 : vector<2x5xf32>
    %1432 = vector.shape_cast %1426 : vector<2x1x5xf32> to vector<2x5xf32>
    %1433 = arith.addf %1431, %1432 : vector<2x5xf32>
    %1434 = arith.addf %1433, %1413 : vector<2x5xf32>
    %1435 = vector.shape_cast %1421 : vector<2x1xi1> to vector<2x1xi1>
    %1436 = vector.broadcast %1435 : vector<2x1xi1> to vector<2x5xi1>
    %1437 = arith.select %1436, %1434, %1376 : vector<2x5xi1>, vector<2x5xf32>
    %1438 = arith.mulf %1419, %1413 : vector<2x5xf32>
    %cst_216 = arith.constant dense<0.000000e+00> : vector<2xf32>
    %1439 = vector.multi_reduction <add>, %1438, %cst_216 [1] : vector<2x5xf32> to vector<2xf32>
    %1440 = vector.shape_cast %1439 : vector<2xf32> to vector<2x1xf32>
    %cst_217 = arith.constant dense<0.000000e+00> : vector<2x5xf32>
    %1441 = tpu.matmul %1390, %853, %cst_217 {dimension_numbers = #tpu.dot_dimension_numbers<[1], [0], [0], [1], [0, 0, 1, 1], [], []>} : vector<2x5xf32>, vector<5x5xf32>, vector<2x5xf32> -> vector<2x5xf32>
    %1442 = arith.mulf %1441, %1419 : vector<2x5xf32>
    %cst_218 = arith.constant dense<0.000000e+00> : vector<2xf32>
    %1443 = vector.multi_reduction <add>, %1442, %cst_218 [1] : vector<2x5xf32> to vector<2xf32>
    %1444 = vector.shape_cast %1443 : vector<2xf32> to vector<2x1xf32>
    %1445 = arith.addf %1440, %1444 : vector<2x1xf32>
    %cst_219 = arith.constant 0.000000e+00 : f32
    %1446 = vector.broadcast %cst_219 : f32 to vector<2x1xf32>
    %1447 = arith.select %1421, %1445, %1446 : vector<2x1xi1>, vector<2x1xf32>
    %1448 = arith.addf %1387, %1447 : vector<2x1xf32>
    %1449 = vector.shape_cast %1421 : vector<2x1xi1> to vector<2x1xi1>
    %1450 = vector.broadcast %1449 : vector<2x1xi1> to vector<2x5xi1>
    %1451 = arith.select %1450, %1419, %1390 : vector<2x5xi1>, vector<2x5xf32>
    %cst_220 = arith.constant dense<0.000000e+00> : vector<2x15xf32>
    %1452 = tpu.matmul %1413, %852, %cst_220 {dimension_numbers = #tpu.dot_dimension_numbers<[1], [0], [0], [1], [0, 0, 1, 1], [], []>} : vector<2x5xf32>, vector<5x15xf32>, vector<2x15xf32> -> vector<2x15xf32>
    %1453 = vector.extract_strided_slice %851 {offsets = [10, 0, 0], sizes = [1, 2, 10], strides = [1, 1, 1]} : vector<12x2x15xf32> to vector<1x2x10xf32>
    %1454 = vector.shape_cast %1453 : vector<1x2x10xf32> to vector<2x10xf32>
    %1455 = vector.extract_strided_slice %1452 {offsets = [0, 0], sizes = [2, 10], strides = [1, 1]} : vector<2x15xf32> to vector<2x10xf32>
    %1456 = arith.addf %1454, %1455 : vector<2x10xf32>
    %1457 = arith.negf %1456 : vector<2x10xf32>
    %1458 = math.exp %1457 : vector<2x10xf32>
    %cst_221 = arith.constant 1.000000e+00 : f32
    %1459 = vector.broadcast %cst_221 : f32 to vector<2x10xf32>
    %1460 = arith.addf %1459, %1458 : vector<2x10xf32>
    %1461 = arith.divf %1459, %1460 : vector<2x10xf32>
    %1462 = vector.extract_strided_slice %851 {offsets = [10, 0, 10], sizes = [1, 2, 5], strides = [1, 1, 1]} : vector<12x2x15xf32> to vector<1x2x5xf32>
    %1463 = vector.shape_cast %1462 : vector<1x2x5xf32> to vector<2x5xf32>
    %1464 = vector.extract_strided_slice %1461 {offsets = [0, 0], sizes = [2, 5], strides = [1, 1]} : vector<2x10xf32> to vector<2x5xf32>
    %1465 = vector.extract_strided_slice %1452 {offsets = [0, 10], sizes = [2, 5], strides = [1, 1]} : vector<2x15xf32> to vector<2x5xf32>
    %1466 = arith.mulf %1464, %1465 : vector<2x5xf32>
    %1467 = arith.addf %1463, %1466 : vector<2x5xf32>
    %1468 = math.tanh %1467 : vector<2x5xf32>
    %1469 = vector.extract_strided_slice %1461 {offsets = [0, 5], sizes = [2, 5], strides = [1, 1]} : vector<2x10xf32> to vector<2x5xf32>
    %cst_222 = arith.constant 1.000000e+00 : f32
    %1470 = vector.broadcast %cst_222 : f32 to vector<2x5xf32>
    %1471 = arith.subf %1470, %1469 : vector<2x5xf32>
    %1472 = arith.mulf %1471, %1468 : vector<2x5xf32>
    %1473 = arith.mulf %1469, %1413 : vector<2x5xf32>
    %1474 = arith.addf %1472, %1473 : vector<2x5xf32>
    %1475 = vector.extract_strided_slice %860 {offsets = [10, 0, 0], sizes = [1, 2, 1], strides = [1, 1, 1]} : vector<12x2x1xi32> to vector<1x2x1xi32>
    %1476 = vector.shape_cast %1475 : vector<1x2x1xi32> to vector<2x1xi32>
    %1477 = vector.broadcast %1476 : vector<2x1xi32> to vector<2x5xi32>
    %1478 = arith.cmpi eq, %861, %1477 : vector<2x5xi32>
    %1479 = arith.extui %1478 : vector<2x5xi1> to vector<2x5xi32>
    %1480 = arith.sitofp %1479 : vector<2x5xi32> to vector<2x5xf32>
    %c10_i32 = arith.constant 10 : i32
    %1481 = vector.broadcast %c10_i32 : i32 to vector<2x1xi32>
    %1482 = arith.cmpi sgt, %859, %1481 : vector<2x1xi32>
    %1483 = vector.shape_cast %1437 : vector<2x5xf32> to vector<2x5x1xf32>
    %1484 = vector.broadcast %1483 : vector<2x5x1xf32> to vector<2x5x5xf32>
    %1485 = arith.addf %1484, %858 : vector<2x5x5xf32>
    %cst_223 = arith.constant dense<0xFF800000> : vector<2x5xf32>
    %1486 = vector.multi_reduction <maximumf>, %1485, %cst_223 [1] : vector<2x5x5xf32> to vector<2x5xf32>
    %1487 = vector.shape_cast %1486 : vector<2x5xf32> to vector<2x1x5xf32>
    %1488 = vector.broadcast %1487 : vector<2x1x5xf32> to vector<2x5x5xf32>
    %1489 = arith.subf %1485, %1488 : vector<2x5x5xf32>
    %1490 = math.exp %1489 : vector<2x5x5xf32>
    %cst_224 = arith.constant dense<0.000000e+00> : vector<2x5xf32>
    %1491 = vector.multi_reduction <add>, %1490, %cst_224 [1] : vector<2x5x5xf32> to vector<2x5xf32>
    %1492 = math.log %1491 : vector<2x5xf32>
    %1493 = vector.shape_cast %1487 : vector<2x1x5xf32> to vector<2x5xf32>
    %1494 = arith.addf %1492, %1493 : vector<2x5xf32>
    %1495 = arith.addf %1494, %1474 : vector<2x5xf32>
    %1496 = vector.shape_cast %1482 : vector<2x1xi1> to vector<2x1xi1>
    %1497 = vector.broadcast %1496 : vector<2x1xi1> to vector<2x5xi1>
    %1498 = arith.select %1497, %1495, %1437 : vector<2x5xi1>, vector<2x5xf32>
    %1499 = arith.mulf %1480, %1474 : vector<2x5xf32>
    %cst_225 = arith.constant dense<0.000000e+00> : vector<2xf32>
    %1500 = vector.multi_reduction <add>, %1499, %cst_225 [1] : vector<2x5xf32> to vector<2xf32>
    %1501 = vector.shape_cast %1500 : vector<2xf32> to vector<2x1xf32>
    %cst_226 = arith.constant dense<0.000000e+00> : vector<2x5xf32>
    %1502 = tpu.matmul %1451, %853, %cst_226 {dimension_numbers = #tpu.dot_dimension_numbers<[1], [0], [0], [1], [0, 0, 1, 1], [], []>} : vector<2x5xf32>, vector<5x5xf32>, vector<2x5xf32> -> vector<2x5xf32>
    %1503 = arith.mulf %1502, %1480 : vector<2x5xf32>
    %cst_227 = arith.constant dense<0.000000e+00> : vector<2xf32>
    %1504 = vector.multi_reduction <add>, %1503, %cst_227 [1] : vector<2x5xf32> to vector<2xf32>
    %1505 = vector.shape_cast %1504 : vector<2xf32> to vector<2x1xf32>
    %1506 = arith.addf %1501, %1505 : vector<2x1xf32>
    %cst_228 = arith.constant 0.000000e+00 : f32
    %1507 = vector.broadcast %cst_228 : f32 to vector<2x1xf32>
    %1508 = arith.select %1482, %1506, %1507 : vector<2x1xi1>, vector<2x1xf32>
    %1509 = arith.addf %1448, %1508 : vector<2x1xf32>
    %1510 = vector.shape_cast %1482 : vector<2x1xi1> to vector<2x1xi1>
    %1511 = vector.broadcast %1510 : vector<2x1xi1> to vector<2x5xi1>
    %1512 = arith.select %1511, %1480, %1451 : vector<2x5xi1>, vector<2x5xf32>
    %cst_229 = arith.constant dense<0.000000e+00> : vector<2x15xf32>
    %1513 = tpu.matmul %1474, %852, %cst_229 {dimension_numbers = #tpu.dot_dimension_numbers<[1], [0], [0], [1], [0, 0, 1, 1], [], []>} : vector<2x5xf32>, vector<5x15xf32>, vector<2x15xf32> -> vector<2x15xf32>
    %1514 = vector.extract_strided_slice %851 {offsets = [11, 0, 0], sizes = [1, 2, 10], strides = [1, 1, 1]} : vector<12x2x15xf32> to vector<1x2x10xf32>
    %1515 = vector.shape_cast %1514 : vector<1x2x10xf32> to vector<2x10xf32>
    %1516 = vector.extract_strided_slice %1513 {offsets = [0, 0], sizes = [2, 10], strides = [1, 1]} : vector<2x15xf32> to vector<2x10xf32>
    %1517 = arith.addf %1515, %1516 : vector<2x10xf32>
    %1518 = arith.negf %1517 : vector<2x10xf32>
    %1519 = math.exp %1518 : vector<2x10xf32>
    %cst_230 = arith.constant 1.000000e+00 : f32
    %1520 = vector.broadcast %cst_230 : f32 to vector<2x10xf32>
    %1521 = arith.addf %1520, %1519 : vector<2x10xf32>
    %1522 = arith.divf %1520, %1521 : vector<2x10xf32>
    %1523 = vector.extract_strided_slice %851 {offsets = [11, 0, 10], sizes = [1, 2, 5], strides = [1, 1, 1]} : vector<12x2x15xf32> to vector<1x2x5xf32>
    %1524 = vector.shape_cast %1523 : vector<1x2x5xf32> to vector<2x5xf32>
    %1525 = vector.extract_strided_slice %1522 {offsets = [0, 0], sizes = [2, 5], strides = [1, 1]} : vector<2x10xf32> to vector<2x5xf32>
    %1526 = vector.extract_strided_slice %1513 {offsets = [0, 10], sizes = [2, 5], strides = [1, 1]} : vector<2x15xf32> to vector<2x5xf32>
    %1527 = arith.mulf %1525, %1526 : vector<2x5xf32>
    %1528 = arith.addf %1524, %1527 : vector<2x5xf32>
    %1529 = math.tanh %1528 : vector<2x5xf32>
    %1530 = vector.extract_strided_slice %1522 {offsets = [0, 5], sizes = [2, 5], strides = [1, 1]} : vector<2x10xf32> to vector<2x5xf32>
    %cst_231 = arith.constant 1.000000e+00 : f32
    %1531 = vector.broadcast %cst_231 : f32 to vector<2x5xf32>
    %1532 = arith.subf %1531, %1530 : vector<2x5xf32>
    %1533 = arith.mulf %1532, %1529 : vector<2x5xf32>
    %1534 = arith.mulf %1530, %1474 : vector<2x5xf32>
    %1535 = arith.addf %1533, %1534 : vector<2x5xf32>
    %1536 = vector.extract_strided_slice %860 {offsets = [11, 0, 0], sizes = [1, 2, 1], strides = [1, 1, 1]} : vector<12x2x1xi32> to vector<1x2x1xi32>
    %1537 = vector.shape_cast %1536 : vector<1x2x1xi32> to vector<2x1xi32>
    %1538 = vector.broadcast %1537 : vector<2x1xi32> to vector<2x5xi32>
    %1539 = arith.cmpi eq, %861, %1538 : vector<2x5xi32>
    %1540 = arith.extui %1539 : vector<2x5xi1> to vector<2x5xi32>
    %1541 = arith.sitofp %1540 : vector<2x5xi32> to vector<2x5xf32>
    %c11_i32 = arith.constant 11 : i32
    %1542 = vector.broadcast %c11_i32 : i32 to vector<2x1xi32>
    %1543 = arith.cmpi sgt, %859, %1542 : vector<2x1xi32>
    %1544 = vector.shape_cast %1498 : vector<2x5xf32> to vector<2x5x1xf32>
    %1545 = vector.broadcast %1544 : vector<2x5x1xf32> to vector<2x5x5xf32>
    %1546 = arith.addf %1545, %858 : vector<2x5x5xf32>
    %cst_232 = arith.constant dense<0xFF800000> : vector<2x5xf32>
    %1547 = vector.multi_reduction <maximumf>, %1546, %cst_232 [1] : vector<2x5x5xf32> to vector<2x5xf32>
    %1548 = vector.shape_cast %1547 : vector<2x5xf32> to vector<2x1x5xf32>
    %1549 = vector.broadcast %1548 : vector<2x1x5xf32> to vector<2x5x5xf32>
    %1550 = arith.subf %1546, %1549 : vector<2x5x5xf32>
    %1551 = math.exp %1550 : vector<2x5x5xf32>
    %cst_233 = arith.constant dense<0.000000e+00> : vector<2x5xf32>
    %1552 = vector.multi_reduction <add>, %1551, %cst_233 [1] : vector<2x5x5xf32> to vector<2x5xf32>
    %1553 = math.log %1552 : vector<2x5xf32>
    %1554 = vector.shape_cast %1548 : vector<2x1x5xf32> to vector<2x5xf32>
    %1555 = arith.addf %1553, %1554 : vector<2x5xf32>
    %1556 = arith.addf %1555, %1535 : vector<2x5xf32>
    %1557 = vector.shape_cast %1543 : vector<2x1xi1> to vector<2x1xi1>
    %1558 = vector.broadcast %1557 : vector<2x1xi1> to vector<2x5xi1>
    %1559 = arith.select %1558, %1556, %1498 : vector<2x5xi1>, vector<2x5xf32>
    %1560 = arith.mulf %1541, %1535 : vector<2x5xf32>
    %cst_234 = arith.constant dense<0.000000e+00> : vector<2xf32>
    %1561 = vector.multi_reduction <add>, %1560, %cst_234 [1] : vector<2x5xf32> to vector<2xf32>
    %1562 = vector.shape_cast %1561 : vector<2xf32> to vector<2x1xf32>
    %cst_235 = arith.constant dense<0.000000e+00> : vector<2x5xf32>
    %1563 = tpu.matmul %1512, %853, %cst_235 {dimension_numbers = #tpu.dot_dimension_numbers<[1], [0], [0], [1], [0, 0, 1, 1], [], []>} : vector<2x5xf32>, vector<5x5xf32>, vector<2x5xf32> -> vector<2x5xf32>
    %1564 = arith.mulf %1563, %1541 : vector<2x5xf32>
    %cst_236 = arith.constant dense<0.000000e+00> : vector<2xf32>
    %1565 = vector.multi_reduction <add>, %1564, %cst_236 [1] : vector<2x5xf32> to vector<2xf32>
    %1566 = vector.shape_cast %1565 : vector<2xf32> to vector<2x1xf32>
    %1567 = arith.addf %1562, %1566 : vector<2x1xf32>
    %cst_237 = arith.constant 0.000000e+00 : f32
    %1568 = vector.broadcast %cst_237 : f32 to vector<2x1xf32>
    %1569 = arith.select %1543, %1567, %1568 : vector<2x1xi1>, vector<2x1xf32>
    %1570 = arith.addf %1509, %1569 : vector<2x1xf32>
    %1571 = vector.shape_cast %1543 : vector<2x1xi1> to vector<2x1xi1>
    %1572 = vector.broadcast %1571 : vector<2x1xi1> to vector<2x5xi1>
    %1573 = arith.select %1572, %1541, %1512 : vector<2x5xi1>, vector<2x5xf32>
    %1574 = vector.broadcast %855 : vector<1x5xf32> to vector<2x5xf32>
    %1575 = arith.addf %1559, %1574 : vector<2x5xf32>
    %cst_238 = arith.constant dense<0xFF800000> : vector<2xf32>
    %1576 = vector.multi_reduction <maximumf>, %1575, %cst_238 [1] : vector<2x5xf32> to vector<2xf32>
    %1577 = vector.shape_cast %1576 : vector<2xf32> to vector<2x1xf32>
    %1578 = vector.broadcast %1577 : vector<2x1xf32> to vector<2x5xf32>
    %1579 = arith.subf %1575, %1578 : vector<2x5xf32>
    %1580 = math.exp %1579 : vector<2x5xf32>
    %cst_239 = arith.constant dense<0.000000e+00> : vector<2xf32>
    %1581 = vector.multi_reduction <add>, %1580, %cst_239 [1] : vector<2x5xf32> to vector<2xf32>
    %1582 = vector.shape_cast %1581 : vector<2xf32> to vector<2x1xf32>
    %1583 = math.log %1582 : vector<2x1xf32>
    %1584 = arith.addf %1583, %1577 : vector<2x1xf32>
    %1585 = vector.broadcast %855 : vector<1x5xf32> to vector<2x5xf32>
    %1586 = arith.mulf %1573, %1585 : vector<2x5xf32>
    %cst_240 = arith.constant dense<0.000000e+00> : vector<2xf32>
    %1587 = vector.multi_reduction <add>, %1586, %cst_240 [1] : vector<2x5xf32> to vector<2xf32>
    %1588 = vector.shape_cast %1587 : vector<2xf32> to vector<2x1xf32>
    %1589 = arith.addf %1570, %1588 : vector<2x1xf32>
    %c0_i32_241 = arith.constant 0 : i32
    %1590 = vector.broadcast %c0_i32_241 : i32 to vector<2x1xi32>
    %1591 = arith.cmpi sgt, %859, %1590 : vector<2x1xi32>
    %1592 = arith.subf %1584, %1589 : vector<2x1xf32>
    %cst_242 = arith.constant 0.000000e+00 : f32
    %1593 = vector.broadcast %cst_242 : f32 to vector<2x1xf32>
    %1594 = arith.select %1591, %1592, %1593 : vector<2x1xi1>, vector<2x1xf32>
    %cst_243 = arith.constant dense<0.000000e+00> : vector<1xf32>
    %1595 = vector.multi_reduction <add>, %1594, %cst_243 [0] : vector<2x1xf32> to vector<1xf32>
    %1596 = vector.shape_cast %1595 : vector<1xf32> to vector<1x1xf32>
    %c0_244 = arith.constant 0 : index
    %c0_245 = arith.constant 0 : index
    %1597 = vector.load %arg26[%c0_244, %c0_245] : memref<1x1xf32, #tpu.memory_space<vmem>>, vector<1x1xf32>
    tpu.vector_store %arg26[%c0_244, %c0_245], %1596 {strides = array<i32>} : memref<1x1xf32, #tpu.memory_space<vmem>>, vector<1x1xf32>,
    return
  }
}

</mosaic_0001>

<bundles_post_ra>
// kernel: seq_label_loss.1
= control target key start
LH: loop header
LB: loop body
LE: loop exit
PB: predicated region body
PF: predicated region fallthrough
CT: control target
= control target key end

     0   :  { %s11576_s0 = inlined_call_operand.vmem [shape: s32[8,2,1], index: 0, kind: input, shape index: {}]   ;;  %s11577_s1 = inlined_call_operand.vmem [shape: s32[1,2], index: 1, kind: input, shape index: {}]   ;;  %s11578_s2 = inlined_call_operand.vmem [shape: s32[12,2,1], index: 2, kind: input, shape index: {}]   ;;  %s11579_s3 = inlined_call_operand.vmem [shape: s32[12,2,1], index: 3, kind: input, shape index: {}]   ;;  %s11580_s4 = inlined_call_operand.vmem [shape: s32[12,2,1], index: 4, kind: input, shape index: {}]   ;;  %s11581_s5 = inlined_call_operand.vmem [shape: s32[12,2,1], index: 5, kind: input, shape index: {}]   ;;  %s11582_s6 = inlined_call_operand.vmem [shape: s32[2,1], index: 6, kind: input, shape index: {}]   ;;  %s11583_s7 = inlined_call_operand.vmem [shape: f32[50,32], index: 7, kind: input, shape index: {}]   ;;  %s11584_s8 = inlined_call_operand.vmem [shape: f32[2,32], index: 8, kind: input, shape index: {}]   ;;  %s11585_s9 = inlined_call_operand.hbm [shape: f32[2,32], index: 9, kind: input, shape index: {}]   ;;  %s11586_s10 = inlined_call_operand.vmem [shape: f32[32,96], index: 10, kind: input, shape index: {}]   ;;  %s11587_s11 = inlined_call_operand.vmem [shape: f32[32,96], index: 11, kind: input, shape index: {}]   ;;  %s11588_s12 = inlined_call_operand.vmem [shape: f32[1,96], index: 12, kind: input, shape index: {}]   ;;  %s11589_s13 = inlined_call_operand.hbm [shape: f32[1,32], index: 13, kind: input, shape index: {}]   ;;  %s11590_s14 = inlined_call_operand.vmem [shape: f32[32,32], index: 14, kind: input, shape index: {}]   ;;  %s11591_s15 = inlined_call_operand.hbm [shape: f32[1,32], index: 15, kind: input, shape index: {}]   ;;  %s11592_s16 = inlined_call_operand.vmem [shape: f32[96,96], index: 16, kind: input, shape index: {}]   ;;  %s11593_s17 = inlined_call_operand.vmem [shape: f32[32,96], index: 17, kind: input, shape index: {}]   ;;  %s11594_s18 = inlined_call_operand.hbm [shape: f32[32,96], index: 18, kind: input, shape index: {}]   ;;  %s11595_s19 = inlined_call_operand.hbm [shape: f32[1,96], index: 19, kind: input, shape index: {}]   ;;  %s11596_s20 = inlined_call_operand.vmem [shape: f32[32,15], index: 20, kind: input, shape index: {}]   ;;  %s11597_s21 = inlined_call_operand.vmem [shape: f32[5,15], index: 21, kind: input, shape index: {}]   ;;  %s11598_s22 = inlined_call_operand.vmem [shape: f32[1,15], index: 22, kind: input, shape index: {}]   ;;  %s11599_s23 = inlined_call_operand.hbm [shape: f32[5,5], index: 23, kind: input, shape index: {}]   ;;  %s11600_s24 = inlined_call_operand.hbm [shape: f32[1,5], index: 24, kind: input, shape index: {}]   ;;  %s11601_s25 = inlined_call_operand.hbm [shape: f32[1,5], index: 25, kind: input, shape index: {}]   ;;  %s11602_s26 = inlined_call_operand.hbm [shape: f32[1,1], index: 26, kind: output, shape index: {}]  }
   0x1   :  { %11622 = sst [smem:[#allocation23_spill]] %s11576_s0 }
   0x2   :  { %11623 = sst [smem:[#allocation24_spill]] %s11577_s1 }
   0x3   :  { %11624 = sst [smem:[#allocation25_spill]] %s11578_s2 }
   0x4   :  { %11625 = sst [smem:[#allocation26_spill]] %s11579_s3 }
   0x5   :  { %11626 = sst [smem:[#allocation27_spill]] %s11580_s4 }
   0x6   :  { %11627 = sst [smem:[#allocation28_spill]] %s11581_s5 }
   0x7   :  { %11628 = sst [smem:[#allocation29_spill]] %s11582_s6 }
   0x8   :  { %11629 = sst [smem:[#allocation30_spill]] %s11583_s7 }
   0x9   :  { %11630 = sst [smem:[#allocation31_spill]] %s11584_s8 }
   0xa   :  { %11631 = sst [smem:[#allocation32_spill]] %s11585_s9 }
   0xb   :  { %11632 = sst [smem:[#allocation33_spill]] %s11586_s10 }
   0xc   :  { %31 = vsyncpa [#allocation3], 0 }
   0xd   :  { %32 = vsyncpa [#allocation6], 0 }
   0xe   :  { %33 = vsyncpa [#allocation9], 0 }
   0xf   :  { %34 = vsyncpa [#allocation12], 0 }
  0x10   :  { %35 = vsyncpa [#allocation15], 0 }
  0x11   :  { %36 = vsyncpa [#allocation4], 0  ;;  %s9024_s27 = smov [#allocation5]   ;;  %s9025_s7 = smov [#allocation8]  }
  0x12   :  { %s77_s3 = sshll.u32 %s9024_s27, 4  ;;  %s102_s28 = sshll.u32 %s9025_s7, 4  ;;  %s78_s3 = int_to_ptr.vmem [resolvable:$true] %s77_s3  ;;  %s103_s28 = int_to_ptr.vmem [resolvable:$true] %s102_s28 }
  0x13   :  { %s8840_s8 = scalar_lea.vmem %s78_s3, 16  ;;  %s8844_s4 = scalar_lea.vmem %s78_s3, 32 }
  0x14   :  { %p8841_p0 = scmp.ne.s32.totalorder %s78_s3, %s8840_s8  ;;  %p8845_p1 = scmp.lt.s32.totalorder %s78_s3, %s78_s3 }
  0x15   :  { %p8846_p2 = scmp.lt.s32.totalorder %s8844_s4, %s8840_s8 }
  0x17   :  { %p8847_p3 = por %p8846_p2, %p8845_p1 }
  0x19   :  { %p8848_p4 = pnand %p8847_p3, %p8841_p0 }
  0x1b   :  { %8851 = shalt.err (!%p8848_p4)
}
  0x1c   :  { %80 = dma.hbm_to_vmem [thread:$0]  %s11589_s13, 16, %s78_s3, [#allocation6]  }
  0x1d   :  { %s8860_s9 = scalar_lea.vmem %s103_s28, 512  ;;  %p8865_p6 = scmp.lt.s32.totalorder %s103_s28, %s103_s28 }
  0x1e   :  { %p8861_p5 = scmp.ne.s32.totalorder %s103_s28, %s8860_s9  ;;  %p8866_p7 = scmp.lt.s32.totalorder %s8860_s9, %s8860_s9 }
  0x20   :  { %p8867_p8 = por %p8866_p7, %p8865_p6 }
  0x22   :  { %p8868_p9 = pnand %p8867_p8, %p8861_p5 }
  0x24   :  { %8871 = shalt.err (!%p8868_p9)
}
  0x25   :  { %s9026_s30 = smov 128   ;;  %s9027_s2 = smov 8  }
  0x26   :  { %108 = dma.hbm_to_vmem [thread:$0]  %s11594_s18, 512, %s103_s28, [#allocation9], %s9026_s30, %s9026_s30, %s9027_s2  }
  0x27   :  { %s9028_s6 = smov [#allocation11]   ;;  %s9029_s27 = smov [#allocation2]  }
  0x28   :  { %s131_s1 = sshll.u32 %s9028_s6, 4  ;;  %s61_s7 = sshll.u32 %s9029_s27, 4  ;;  %s132_s1 = int_to_ptr.vmem [resolvable:$true] %s131_s1  ;;  %s62_s7 = int_to_ptr.vmem [resolvable:$true] %s61_s7 }
  0x29   :  { %s8880_s13 = scalar_lea.vmem %s132_s1, 128  ;;  %p8885_p11 = scmp.lt.s32.totalorder %s132_s1, %s132_s1 }
  0x2a   :  { %p8881_p10 = scmp.ne.s32.totalorder %s132_s1, %s8880_s13  ;;  %p8886_p12 = scmp.lt.s32.totalorder %s8880_s13, %s8880_s13 }
  0x2c   :  { %p8887_p13 = por %p8886_p12, %p8885_p11 }
  0x2e   :  { %p8888_p0 = pnand %p8887_p13, %p8881_p10 }
  0x30   :  { %8891 = shalt.err (!%p8888_p0)
}
  0x31   :  { %134 = dma.hbm_to_vmem [thread:$0]  %s11599_s23, 128, %s132_s1, [#allocation12]  }
  0x32   :  { %s8900_s4 = scalar_lea.vmem %s62_s7, 32  ;;  %p8905_p2 = scmp.lt.s32.totalorder %s62_s7, %s62_s7 }
  0x33   :  { %p8901_p1 = scmp.ne.s32.totalorder %s62_s7, %s8900_s4  ;;  %p8906_p3 = scmp.lt.s32.totalorder %s8900_s4, %s8900_s4 }
  0x35   :  { %p8907_p4 = por %p8906_p3, %p8905_p2 }
  0x37   :  { %p8908_p5 = pnand %p8907_p4, %p8901_p1 }
  0x39   :  { %8911 = shalt.err (!%p8908_p5)
}
  0x3a   :  { %s11633_s29 = sld [smem:[#allocation32_spill]]  ;;  %s9030_s0 = smov [#allocation7]  }
  0x3b   :  { %s89_s9 = sshll.u32 %s9030_s0, 4  ;;  %s9031_s30 = smov [#allocation10]   ;;  %s90_s9 = int_to_ptr.vmem [resolvable:$true] %s89_s9 }
  0x3c   :  { %s115_s2 = sshll.u32 %s9031_s30, 4  ;;  %s8920_s5 = scalar_lea.vmem %s90_s9, 16  ;;  %s116_s2 = int_to_ptr.vmem [resolvable:$true] %s115_s2 }
  0x3d   :  { %p8921_p6 = scmp.ne.s32.totalorder %s90_s9, %s8920_s5  ;;  %s8924_s23 = scalar_lea.vmem %s90_s9, 32 }
  0x3e   :  { %p8925_p7 = scmp.lt.s32.totalorder %s90_s9, %s90_s9  ;;  %p8926_p8 = scmp.lt.s32.totalorder %s8924_s23, %s8920_s5 }
  0x40   :  { %64 = dma.hbm_to_vmem [thread:$0]  %s11633_s29, 32, %s62_s7, [#allocation3]  }
  0x41   :  { %p8927_p9 = por %p8926_p8, %p8925_p7 }
  0x43   :  { %p8928_p10 = pnand %p8927_p9, %p8921_p6 }
  0x45   :  { %8931 = shalt.err (!%p8928_p10)
}
  0x46   :  { %92 = dma.hbm_to_vmem [thread:$0]  %s11591_s15, 16, %s90_s9, [#allocation6]  }
  0x47   :  { %s8940_s1 = scalar_lea.vmem %s116_s2, 16  ;;  %s8944_s27 = scalar_lea.vmem %s116_s2, 32 }
  0x48   :  { %p8941_p11 = scmp.ne.s32.totalorder %s116_s2, %s8940_s1  ;;  %p8945_p12 = scmp.lt.s32.totalorder %s116_s2, %s116_s2 }
  0x49   :  { %p8946_p13 = scmp.lt.s32.totalorder %s8944_s27, %s8940_s1 }
  0x4b   :  { %p8947_p0 = por %p8946_p13, %p8945_p12 }
  0x4d   :  { %p8948_p1 = pnand %p8947_p0, %p8941_p11 }
  0x4f   :  { %8951 = shalt.err (!%p8948_p1)
}
  0x50   :  { %118 = dma.hbm_to_vmem [thread:$0]  %s11595_s19, 16, %s116_s2, [#allocation9]  }
  0x51   :  { %s9032_s3 = smov [#allocation13]   ;;  %s9033_s4 = smov [#allocation14]  }
  0x52   :  { %s141_s8 = sshll.u32 %s9032_s3, 4  ;;  %s151_s18 = sshll.u32 %s9033_s4, 4  ;;  %s142_s8 = int_to_ptr.vmem [resolvable:$true] %s141_s8  ;;  %s152_s18 = int_to_ptr.vmem [resolvable:$true] %s151_s18 }
  0x53   :  { %s8960_s28 = scalar_lea.vmem %s142_s8, 16  ;;  %s8964_s15 = scalar_lea.vmem %s142_s8, 32 }
  0x54   :  { %p8961_p2 = scmp.ne.s32.totalorder %s142_s8, %s8960_s28  ;;  %p8965_p3 = scmp.lt.s32.totalorder %s142_s8, %s142_s8 }
  0x55   :  { %p8966_p4 = scmp.lt.s32.totalorder %s8964_s15, %s8960_s28 }
  0x57   :  { %p8967_p5 = por %p8966_p4, %p8965_p3 }
  0x59   :  { %p8968_p6 = pnand %p8967_p5, %p8961_p2 }
  0x5b   :  { %8971 = shalt.err (!%p8968_p6)
}
  0x5c   :  { %144 = dma.hbm_to_vmem [thread:$0]  %s11600_s24, 16, %s142_s8, [#allocation12]  }
  0x5d   :  { %s8980_s9 = scalar_lea.vmem %s152_s18, 16  ;;  %s8984_s19 = scalar_lea.vmem %s152_s18, 32 }
  0x5e   :  { %p8981_p7 = scmp.ne.s32.totalorder %s152_s18, %s8980_s9  ;;  %p8985_p8 = scmp.lt.s32.totalorder %s152_s18, %s152_s18 }
  0x5f   :  { %p8986_p9 = scmp.lt.s32.totalorder %s8984_s19, %s8980_s9 }
  0x61   :  { %p8987_p10 = por %p8986_p9, %p8985_p8 }
  0x63   :  { %p8988_p11 = pnand %p8987_p10, %p8981_p7 }
  0x65   :  { %8991 = shalt.err (!%p8988_p11)
}
  0x66   :  { %154 = dma.hbm_to_vmem [thread:$0]  %s11601_s25, 16, %s152_s18, [#allocation15]  }
  0x67   :  { %9012 = dma.done.wait [#allocation3], 32  }
  0x68   :  { %9013 = vsyncadd [#allocation3], 4294967264 }
  0x69   :  { %9014 = dma.done.wait [#allocation6], 32  }
  0x6a   :  { %9015 = vsyncadd [#allocation6], 4294967264 }
  0x6b   :  { %9016 = dma.done.wait [#allocation9], 528  }
  0x6c   :  { %9017 = vsyncadd [#allocation9], 4294966768 }
  0x6d   :  { %9018 = dma.done.wait [#allocation12], 144  }
  0x6e   :  { %9019 = vsyncadd [#allocation12], 4294967152 }
  0x6f   :  { %9020 = dma.done.wait [#allocation15], 16  }
  0x70   :  { %9021 = vsyncadd [#allocation15], 4294967280  ;;  %v9034_v0 = vmov 0   ;;  %s11634_s23 = sld [smem:[#allocation23_spill]]  ;;  %vm291_vm0 = vcmask 1041408   ;;  %v9035_v19 = vmov 0.0   ;;  %v186_v20 = vlaneseq }
  0x71   :  { %8520 = vset.pattern.permute.xlu1 %v9034_v0  ;;  %8519 = vset.pattern.permute.xlu0 %v9034_v0  ;;  %s11635_s8 = sld [smem:[#allocation30_spill]]  ;;  %v9036_v21 = vmov 1983009808   ;;  %vm286_vm7 = vcmask 408576   ;;  %v9327_v54 = vld [vmem:[%s11587_s11 + $0x18] sm:$0xff]  ;;  %v9334_v55 = vld [vmem:[%s11587_s11 + $0x10] sm:$0xff] }
  0x72   :  { %s11636_s18 = sld [smem:[#allocation33_spill]]  ;;  %v255_v22 = vunpack.c.l.s4 %v9036_v21  ;;  %v9291_v23 = vand.u32 127, %v186_v20  ;;  %v9293_v27 = vshrl.u32 %v186_v20, 7  ;;  %v9340_v56 = vld [vmem:[%s11587_s11 + $0x8] sm:$0xff]  ;;  %v9347_v57 = vld [vmem:[%s11587_s11] sm:$0xff]  ;;  %vm9037_vm10 = vmmov 0  }
  0x73   :  { %vm390_vm11 = vcmask 261120   ;;  %v7693_v60 = vld [vmem:[%s11588_s12] ss:$0 sm:$0xff]  ;;  %vm593_vm12 = vcmask 130048   ;;  %vm596_vm13 = vcmask 392192   ;;  %s9038_s12 = smov 64  }
  0x74   :  { %v256_v26 = vunpack.c.0.s8 %v255_v22  ;;  %v380_v61 = vcombine.low %v7693_v60, %v7693_v60  ;;  %s9039_s27 = smov 32   ;;  %s9040_s7 = smov 96  }
  0x75   :  { %s11637_s3 = sld [smem:[#allocation25_spill]]  ;;  %s9041_s6 = smov 118  }
  0x76   :  { %v190_v1 = vld [vmem:[%s11634_s23 + $0x4] sm:$0x3]  ;;  %v188_v2 = vld [vmem:[%s11634_s23] sm:$0x3]  ;;  %v191_v3 = vld [vmem:[%s11634_s23 + $0x6] sm:$0x3]  ;;  %v9300_v30 = vsub.s32 %v256_v26, %v9293_v27 }
  0x77   :  { %203 = vperm.xlu1 %8520, %v190_v1   ;;  %197 = vperm.xlu0 %8519, %v188_v2   ;;  %v189_v4 = vld [vmem:[%s11634_s23 + $0x2] sm:$0x3]  ;;  %v9221_v5 = vld [vmem:[%s11635_s8 + $0x30] sm:$0x3]  ;;  %v9228_v6 = vld [vmem:[%s11635_s8 + $0x28] sm:$0xff]  ;;  %s11638_s2 = sld [smem:[#allocation26_spill]] }
  0x78   :  { %8040 = vmatprep.subr.msk.mxu0 %vm291_vm0, %v9221_v5  ;;  %v193_v7 = vld [vmem:[%s11634_s23 + $0xa] sm:$0x3]  ;;  %v192_v8 = vld [vmem:[%s11634_s23 + $0x8] sm:$0x3]  ;;  %v9242_v9 = vld [vmem:[%s11635_s8 + $0x20] sm:$0xff]  ;;  %v387_v62 = vrot.slane %v380_v61, %v9300_v30  ;;  %s11639_s13 = sld [smem:[#allocation27_spill]] }
  0x79   :  { %8041 = vmatpush3.msk.msra.mxu0 %vm291_vm0, %v9221_v5  ;;  %v9248_v10 = vld [vmem:[%s11635_s8 + $0x18] sm:$0xff]  ;;  %v195_v11 = vld [vmem:[%s11634_s23 + $0xe] sm:$0x3]  ;;  %v194_v12 = vld [vmem:[%s11634_s23 + $0xc] sm:$0x3]  ;;  %s11640_s1 = sld [smem:[#allocation24_spill]] }
  0x7a   :  { %8042 = vmatprep.subr.mxu0 %v9228_v6  ;;  %v9262_v13 = vld [vmem:[%s11635_s8 + $0x10] sm:$0xff]  ;;  %v9268_v14 = vld [vmem:[%s11635_s8 + $0x8] sm:$0xff]  ;;  %v9275_v15 = vld [vmem:[%s11635_s8] sm:$0xff]  ;;  %v388_v63 = vcombine.low %v387_v62, %v387_v62  ;;  %s11642_s23 = sld [smem:[#allocation29_spill]] }
  0x7b   :  { %206 = vperm.xlu1 %8520, %v191_v3   ;;  %200 = vperm.xlu0 %8519, %v189_v4   ;;  %v373_v16 = vld [vmem:[%s11636_s18 + $0x18] sm:$0xff]  ;;  %v372_v17 = vld [vmem:[%s11636_s18 + $0x10] sm:$0xff]  ;;  %v371_v18 = vld [vmem:[%s11636_s18 + $0x8] sm:$0xff]  ;;  %s11643_s29 = sld [smem:[#allocation28_spill]] }
  0x7c   :  { %8043 = vmatpush3.msra.mxu0 %v9228_v6  ;;  %8057 = vmatprep.subr.mxu1 %v373_v16  ;;  %v370_v53 = vld [vmem:[%s11636_s18] sm:$0xff]  ;;  %s11641_s18 = sld [smem:[#allocation31_spill]] }
  0x7d   :  { %8044 = vmatprep.subr.mxu0 %v9242_v9  ;;  %8058 = vmatpush3.msra.mxu1 %v373_v16 }
  0x7e   :  { %8045 = vmatpush3.msra.mxu0 %v9242_v9  ;;  %8059 = vmatprep.subr.mxu1 %v372_v17 }
  0x7f   :  { %212 = vperm.xlu1 %8520, %v193_v7   ;;  %209 = vperm.xlu0 %8519, %v192_v8  }
  0x80   :  { %8046 = vmatprep.subr.mxu0 %v9248_v10  ;;  %8060 = vmatpush3.msra.mxu1 %v372_v17 }
  0x81   :  { %8047 = vmatpush3.msra.mxu0 %v9248_v10  ;;  %8061 = vmatprep.subr.mxu1 %v371_v18 }
  0x82   :  { %8048 = vmatprep.subr.mxu0 %v9262_v13  ;;  %8062 = vmatpush3.msra.mxu1 %v371_v18 }
  0x83   :  { %218 = vperm.xlu1 %8520, %v195_v11   ;;  %215 = vperm.xlu0 %8519, %v194_v12  }
  0x84   :  { %8049 = vmatpush3.msra.mxu0 %v9262_v13  ;;  %8063 = vmatprep.subr.mxu1 %v370_v53 }
  0x85   :  { %8050 = vmatprep.subr.mxu0 %v9268_v14  ;;  %8064 = vmatpush3.msra.mxu1 %v370_v53 }
  0x86   :  { %8051 = vmatpush3.msra.mxu0 %v9268_v14  ;;  %8068 = vmatprep.subr.mxu1 %v9035_v19 }
  0x87   :  { %8052 = vmatprep.subr.mxu0 %v9275_v15 }
  0x88   :  { %8053 = vmatpush3.msra.mxu0 %v9275_v15 }
  0x89   :  { %8079 = vmatprep.subr.mxu0 %v9035_v19 }
  0xf2   :  { %v204_v24 = vpop.permute.xlu1 %203  ;;  %v198_v25 = vpop.permute.xlu0 %197 }
  0xf3   :  { %vm222_vm1 = vcmp.eq.s32.totalorder %v9291_v23, %v204_v24  ;;  %vm220_vm2 = vcmp.eq.s32.totalorder %v9291_v23, %v198_v25 }
  0xf4   :  { %v7684_v31 = vsel %vm222_vm1, 1.0, %v9035_v19  ;;  %v7682_v32 = vsel %vm220_vm2, 1.0, %v9035_v19 }
  0xf6   :  { %v207_v28 = vpop.permute.xlu1 %206  ;;  %v201_v29 = vpop.permute.xlu0 %200 }
  0xf7   :  { %vm223_vm3 = vcmp.eq.s32.totalorder %v9291_v23, %v207_v28  ;;  %vm221_vm4 = vcmp.eq.s32.totalorder %v9291_v23, %v201_v29 }
  0xf8   :  { %v7685_v33 = vsel %vm223_vm3, 1.0, %v9035_v19  ;;  %v7683_v34 = vsel %vm221_vm4, 1.0, %v9035_v19 }
  0xf9   :  { %v253_v35 = vcombine.low %v7684_v31, %v7685_v33  ;;  %v252_v36 = vcombine.low %v7682_v32, %v7683_v34 }
  0xfa   :  { %v213_v37 = vpop.permute.xlu1 %212  ;;  %v210_v38 = vpop.permute.xlu0 %209 }
  0xfb   :  { %vm225_vm5 = vcmp.eq.s32.totalorder %v9291_v23, %v213_v37  ;;  %vm224_vm6 = vcmp.eq.s32.totalorder %v9291_v23, %v210_v38  ;;  %v260_v39 = vrot.slane %v252_v36, %v9300_v30  ;;  %v267_v40 = vrot.slane %v253_v35, %v9300_v30 }
  0xfc   :  { %v7687_v41 = vsel %vm225_vm5, 1.0, %v9035_v19  ;;  %v7686_v42 = vsel %vm224_vm6, 1.0, %v9035_v19 }
  0xfd   :  { %v268_v43 = vcombine.low %v260_v39, %v267_v40  ;;  %v269_v46 = vcombine.low %v7686_v42, %v7687_v41 }
  0xfe   :  { %v219_v44 = vpop.permute.xlu1 %218  ;;  %v216_v45 = vpop.permute.xlu0 %215 }
  0xff   :  { %vm227_vm8 = vcmp.eq.s32.totalorder %v9291_v23, %v219_v44  ;;  %vm226_vm9 = vcmp.eq.s32.totalorder %v9291_v23, %v216_v45  ;;  %8054 = vmatprep.mubr.msk.f32.mxu0 %vm286_vm7, %v268_v43  ;;  %v277_v50 = vrot.slane %v269_v46, %v9300_v30 }
 0x100   :  { %v7689_v47 = vsel %vm227_vm8, 1.0, %v9035_v19  ;;  %v7688_v48 = vsel %vm226_vm9, 1.0, %v9035_v19 }
 0x101   :  { %v270_v49 = vcombine.low %v7688_v48, %v7689_v47 }
 0x103   :  { %v284_v51 = vrot.slane %v270_v49, %v9300_v30 }
 0x105   :  { %v285_v52 = vcombine.low %v277_v50, %v284_v51 }
 0x107   :  { %8055 = vmatmul.mubr.msk.f32.vlgmr.msra.gmra.mxu0 %vm286_vm7, %v285_v52 }
 0x108   :  { %8080 = vmatpush3.msra.mxu0 %v9327_v54  ;;  %8087 = vmatprep.mubr.msk.f32.mxu0 %vm9037_vm10, %v9035_v19 }
 0x109   :  { %8081 = vmatprep.subr.mxu0 %v9035_v19 }
 0x10a   :  { %8082 = vmatpush3.msra.mxu0 %v9334_v55 }
 0x10b   :  { %8083 = vmatprep.subr.mxu0 %v9035_v19 }
 0x10c   :  { %8084 = vmatpush3.msra.mxu0 %v9340_v56 }
 0x10d   :  { %8085 = vmatprep.subr.mxu0 %v9035_v19 }
 0x10e   :  { %8086 = vmatpush3.msra.mxu0 %v9347_v57 }
 0x10f   :  { %8101 = vmatprep.subr.mxu0 %v9035_v19 }
 0x1c7   :  { %v8056_v58 = vpop.f32.mrf.mxu0 }
 0x1c9   :  { %v361_v59 = vpop.f32.mrf.mxu0 }
 0x1ca   :  { %8065 = vmatprep.mubr.msk.f32.mxu1 %vm390_vm11, %v361_v59 }
 0x1cb   :  { %8066 = vmatmul.mubr.msk.f32.vlgmr.msra.gmra.mxu1 %vm390_vm11, %v8056_v58 }
 0x1cc   :  { %8069 = vmatpush3.msra.mxu1 %v9327_v54  ;;  %8076 = vmatprep.mubr.msk.f32.mxu1 %vm9037_vm10, %v9035_v19 }
 0x1cd   :  { %8070 = vmatprep.subr.mxu1 %v9035_v19 }
 0x1ce   :  { %8071 = vmatpush3.msra.mxu1 %v9334_v55 }
 0x1cf   :  { %8072 = vmatprep.subr.mxu1 %v9035_v19 }
 0x1d0   :  { %8073 = vmatpush3.msra.mxu1 %v9340_v56 }
 0x1d1   :  { %8074 = vmatprep.subr.mxu1 %v9035_v19 }
 0x1d2   :  { %8075 = vmatpush3.msra.mxu1 %v9347_v57 }
 0x1d3   :  { %8077 = vmatmul.mubr.f32.vlgmr.msra.gmra.mxu1 %v9035_v19  ;;  %8090 = vmatprep.subr.mxu1 %v9035_v19 }
 0x1d4   :  { %8091 = vmatpush3.msra.mxu1 %v9327_v54  ;;  %8098 = vmatprep.mubr.msk.f32.mxu1 %vm9037_vm10, %v9035_v19 }
 0x1d5   :  { %8092 = vmatprep.subr.mxu1 %v9035_v19 }
 0x1d6   :  { %8093 = vmatpush3.msra.mxu1 %v9334_v55 }
 0x1d7   :  { %8094 = vmatprep.subr.mxu1 %v9035_v19 }
 0x1d8   :  { %8095 = vmatpush3.msra.mxu1 %v9340_v56 }
 0x1d9   :  { %8096 = vmatprep.subr.mxu1 %v9035_v19 }
 0x1da   :  { %8097 = vmatpush3.msra.mxu1 %v9347_v57 }
 0x1db   :  { %8112 = vmatprep.subr.mxu1 %v9035_v19 }
 0x28b   :  { %v8067_v1 = vpop.f32.mrf.mxu1 }
 0x28c   :  { %v469_v2 = vadd.f32 %v8067_v1, %v388_v63 }
 0x28d   :  { %v463_v3 = vpop.f32.mrf.mxu1 }
 0x28e   :  { %v491_v4 = vcombine.high %v469_v2, %v469_v2  ;;  %v464_v7 = vadd.f32 %v463_v3, %v388_v63  ;;  %v9382_v8 = vrot.slane %v469_v2, %v9300_v30 }
 0x290   :  { %v9385_v11 = vrot.slane %v491_v4, %v9300_v30  ;;  %v474_v12 = vcombine.high %v464_v7, %v464_v7  ;;  %v481_v16 = vrot.slane %v464_v7, %v9300_v30  ;;  %v9396_v24 = vcombine.high %v9382_v8, %v9382_v8 }
 0x292   :  { %v9389_v17 = vrot.slane %v474_v12, %v9300_v30  ;;  %v507_v18 = vcombine.high %v9385_v11, %v9385_v11  ;;  %v604_v20 = vrot.slane %v481_v16, %v9300_v30  ;;  %v489_v21 = vcombine.high %v481_v16, %v481_v16 }
 0x293   :  { %v589_v22 = vpop.f32.mrf.mxu1 }
 0x294   :  { %v594_v25 = vsel %vm593_vm12, %v481_v16, %v507_v18  ;;  %627 = vrot.lane.b32.xlu0 %v589_v22, %s9038_s12  ;;  %605 = vrot.lane.b32.xlu1 %v604_v20, %s9038_s12  ;;  %v614_v26 = vrot.slane %v507_v18, %v9300_v30  ;;  %v716_v31 = vsel %vm593_vm12, %v489_v21, %v9385_v11 }
 0x295   :  { %v595_v28 = vsel %vm390_vm11, %v594_v25, %v481_v16  ;;  %v8078_v29 = vpop.f32.mrf.mxu1  ;;  %v837_v32 = vsel %vm593_vm12, %v9389_v17, %v9396_v24  ;;  %v717_v34 = vsel %vm390_vm11, %v716_v31, %v489_v21  ;;  %v9414_v36 = vcombine.high %v9389_v17, %v9389_v17 }
 0x296   :  { %v597_v33 = vsel %vm596_vm13, %v595_v28, %v507_v18  ;;  %v838_v35 = vsel %vm390_vm11, %v837_v32, %v9389_v17  ;;  %v718_v38 = vsel %vm596_vm13, %v717_v34, %v9385_v11  ;;  %v1180_v40 = vsel %vm593_vm12, %v9396_v24, %v9389_v17 }
 0x297   :  { %v619_v37 = vadd.f32 %v597_v33, %v589_v22  ;;  %v9420_v39 = vsel %vm596_vm13, %v838_v35, %v9396_v24  ;;  %v958_v41 = vsel %vm593_vm12, %v9414_v36, %v9382_v8  ;;  %v1079_v42 = vsel %vm593_vm12, %v9382_v8, %v9414_v36 }
 0x298   :  { %615 = vrot.lane.b32.xlu0 %v614_v26, %s9038_s12  ;;  %v1181_v43 = vsel %vm390_vm11, %v1180_v40, %v9396_v24  ;;  %v959_v44 = vsel %vm390_vm11, %v958_v41, %v9414_v36  ;;  %v1080_v45 = vsel %vm390_vm11, %v1079_v42, %v9382_v8  ;;  %v1281_v49 = vsel %vm593_vm12, %v9385_v11, %v489_v21 }
 0x299   :  { %v9440_v46 = vsel %vm596_vm13, %v1181_v43, %v9389_v17  ;;  %v9444_v47 = vsel %vm596_vm13, %v959_v44, %v9382_v8  ;;  %v9448_v48 = vsel %vm596_vm13, %v1080_v45, %v9414_v36  ;;  %v1382_v50 = vsel %vm593_vm12, %v507_v18, %v481_v16 }
 0x29a   :  { %v1282_v51 = vsel %vm390_vm11, %v1281_v49, %v9385_v11  ;;  %v1383_v52 = vsel %vm390_vm11, %v1382_v50, %v507_v18  ;;  %v7696_v59 = vmul.f32 -1.442695, %v619_v37  ;;  %v725_v26 = vrot.slane %v489_v21, %v9300_v30 }
 0x29b   :  { %v9457_v53 = vsel %vm596_vm13, %v1282_v51, %v489_v21  ;;  %v9460_v58 = vsel %vm596_vm13, %v1383_v52, %v481_v16  ;;  %v735_v32 = vrot.slane %v9385_v11, %v9300_v30 }
 0x29c   :  { %8521 = vpow2.f32 %v7696_v59  ;;  %v846_v59 = vrot.slane %v9389_v17, %v9300_v30 }
 0x2a9   :  { %v8522_v60 = vpop.eup %8521 }
 0x2aa   :  { %v623_v61 = vadd.f32 1.0, %v8522_v60 }
 0x2ac   :  { %8523 = vrcp.f32 %v623_v61 }
 0x2b9   :  { %v8524_v63 = vpop.eup %8523 }
 0x2ba   :  { %v633_v16 = vsub.f32 1.0, %v8524_v63  ;;  %v639_v20 = vmul.f32 0.0, %v8524_v63 }
 0x306   :  { %v628_v62 = vpop.permute.xlu0 %627  ;;  %v9462_v2 = vpop.permute.xlu1 %605 }
 0x307   :  { %v630_v1 = vmul.f32 %v8524_v63, %v628_v62  ;;  %v856_v63 = vrot.slane %v9396_v24, %v9300_v30 }
 0x30a   :  { %v9464_v3 = vpop.permute.xlu0 %615 }
 0x30b   :  { %v618_v4 = vsel %vm593_vm12, %v9462_v2, %v9464_v3 }
 0x30c   :  { %v631_v7 = vadd.f32 %v630_v1, %v618_v4 }
 0x30e   :  { %8525 = vtanh.f32 %v631_v7 }
 0x31b   :  { %v8526_v12 = vpop.eup %8525 }
 0x31c   :  { %635 = vrot.lane.b32.xlu1 %v8526_v12, %s9039_s27 }
 0x38e   :  { %v636_v18 = vpop.permute.xlu1 %635 }
 0x38f   :  { %v638_v22 = vmul.f32 %v636_v18, %v633_v16 }
 0x391   :  { %v640_v25 = vadd.f32 %v639_v20, %v638_v22 }
 0x393   :  { %642 = vrot.lane.b32.xlu0 %v640_v25, %s9040_s7 }
 0x397   :  { %726 = vrot.lane.b32.xlu0 %v725_v26, %s9038_s12 }
 0x405   :  { %v9473_v28 = vpop.permute.xlu0 %642 }
 0x406   :  { %8088 = vmatmul.mubr.msk.f32.vlgmr.msra.gmra.mxu0 %vm390_vm11, %v9473_v28 }
 0x407   :  { %8102 = vmatpush3.msra.mxu0 %v9327_v54  ;;  %8109 = vmatprep.mubr.msk.f32.mxu0 %vm9037_vm10, %v9035_v19 }
 0x408   :  { %8103 = vmatprep.subr.mxu0 %v9035_v19 }
 0x409   :  { %8104 = vmatpush3.msra.mxu0 %v9334_v55  ;;  %v9491_v41 = vpop.permute.xlu0 %726 }
 0x40a   :  { %8105 = vmatprep.subr.mxu0 %v9035_v19 }
 0x40b   :  { %8106 = vmatpush3.msra.mxu0 %v9340_v56 }
 0x40c   :  { %8107 = vmatprep.subr.mxu0 %v9035_v19 }
 0x40d   :  { %8108 = vmatpush3.msra.mxu0 %v9347_v57 }
 0x40e   :  { %8123 = vmatprep.subr.mxu0 %v9035_v19 }
 0x4c6   :  { %v712_v21 = vpop.f32.mrf.mxu0 }
 0x4c7   :  { %v740_v29 = vadd.f32 %v718_v38, %v712_v21  ;;  %748 = vrot.lane.b32.xlu1 %v712_v21, %s9038_s12 }
 0x4c8   :  { %v8089_v31 = vpop.f32.mrf.mxu0 }
 0x4c9   :  { %v7698_v33 = vmul.f32 -1.442695, %v740_v29 }
 0x4cb   :  { %736 = vrot.lane.b32.xlu1 %v735_v32, %s9038_s12  ;;  %8527 = vpow2.f32 %v7698_v33  ;;  %v967_v33 = vrot.slane %v9414_v36, %v9300_v30 }
 0x4d8   :  { %v8528_v34 = vpop.eup %8527 }
 0x4d9   :  { %v744_v35 = vadd.f32 1.0, %v8528_v34 }
 0x4db   :  { %8529 = vrcp.f32 %v744_v35 }
 0x4e8   :  { %v8530_v40 = vpop.eup %8529 }
 0x4e9   :  { %v754_v45 = vsub.f32 1.0, %v8530_v40  ;;  %v760_v50 = vmul.f32 %v8530_v40, %v640_v25 }
 0x539   :  { %v749_v37 = vpop.permute.xlu1 %748 }
 0x53a   :  { %v751_v42 = vmul.f32 %v8530_v40, %v749_v37  ;;  %v977_v40 = vrot.slane %v9382_v8, %v9300_v30 }
 0x53d   :  { %v9493_v43 = vpop.permute.xlu1 %736 }
 0x53e   :  { %v739_v38 = vsel %vm593_vm12, %v9491_v41, %v9493_v43 }
 0x53f   :  { %v752_v44 = vadd.f32 %v751_v42, %v739_v38 }
 0x541   :  { %8531 = vtanh.f32 %v752_v44 }
 0x54e   :  { %v8532_v11 = vpop.eup %8531 }
 0x54f   :  { %756 = vrot.lane.b32.xlu0 %v8532_v11, %s9039_s27 }
 0x5c1   :  { %v757_v49 = vpop.permute.xlu0 %756 }
 0x5c2   :  { %v759_v51 = vmul.f32 %v757_v49, %v754_v45 }
 0x5c4   :  { %v761_v52 = vadd.f32 %v760_v50, %v759_v51 }
 0x5c6   :  { %763 = vrot.lane.b32.xlu1 %v761_v52, %s9040_s7 }
 0x5ca   :  { %847 = vrot.lane.b32.xlu1 %v846_v59, %s9038_s12 }
 0x638   :  { %v9503_v60 = vpop.permute.xlu1 %763 }
 0x639   :  { %8099 = vmatmul.mubr.msk.f32.vlgmr.msra.gmra.mxu1 %vm390_vm11, %v9503_v60 }
 0x63a   :  { %8113 = vmatpush3.msra.mxu1 %v9327_v54  ;;  %8120 = vmatprep.mubr.msk.f32.mxu1 %vm9037_vm10, %v9035_v19 }
 0x63b   :  { %8114 = vmatprep.subr.mxu1 %v9035_v19 }
 0x63c   :  { %8115 = vmatpush3.msra.mxu1 %v9334_v55  ;;  %v9522_v18 = vpop.permute.xlu1 %847 }
 0x63d   :  { %8116 = vmatprep.subr.mxu1 %v9035_v19 }
 0x63e   :  { %8117 = vmatpush3.msra.mxu1 %v9340_v56 }
 0x63f   :  { %8118 = vmatprep.subr.mxu1 %v9035_v19 }
 0x640   :  { %8119 = vmatpush3.msra.mxu1 %v9347_v57 }
 0x641   :  { %8134 = vmatprep.subr.mxu1 %v9035_v19 }
 0x6f9   :  { %v833_v17 = vpop.f32.mrf.mxu1 }
 0x6fa   :  { %v861_v61 = vadd.f32 %v9420_v39, %v833_v17  ;;  %869 = vrot.lane.b32.xlu0 %v833_v17, %s9038_s12 }
 0x6fb   :  { %v8100_v62 = vpop.f32.mrf.mxu1 }
 0x6fc   :  { %v7700_v1 = vmul.f32 -1.442695, %v861_v61 }
 0x6fe   :  { %857 = vrot.lane.b32.xlu0 %v856_v63, %s9038_s12  ;;  %8533 = vpow2.f32 %v7700_v1 }
 0x70b   :  { %v8534_v4 = vpop.eup %8533 }
 0x70c   :  { %v865_v7 = vadd.f32 1.0, %v8534_v4 }
 0x70e   :  { %8535 = vrcp.f32 %v865_v7 }
 0x71b   :  { %v8536_v16 = vpop.eup %8535 }
 0x71c   :  { %v875_v26 = vsub.f32 1.0, %v8536_v16  ;;  %v881_v29 = vmul.f32 %v8536_v16, %v761_v52 }
 0x76c   :  { %v870_v12 = vpop.permute.xlu0 %869 }
 0x76d   :  { %v872_v20 = vmul.f32 %v8536_v16, %v870_v12 }
 0x770   :  { %v9524_v22 = vpop.permute.xlu0 %857 }
 0x771   :  { %v860_v39 = vsel %vm593_vm12, %v9522_v18, %v9524_v22 }
 0x772   :  { %v873_v25 = vadd.f32 %v872_v20, %v860_v39 }
 0x774   :  { %8537 = vtanh.f32 %v873_v25 }
 0x781   :  { %v8538_v24 = vpop.eup %8537 }
 0x782   :  { %877 = vrot.lane.b32.xlu1 %v8538_v24, %s9039_s27 }
 0x7f4   :  { %v878_v21 = vpop.permute.xlu1 %877 }
 0x7f5   :  { %v880_v31 = vmul.f32 %v878_v21, %v875_v26 }
 0x7f7   :  { %v882_v32 = vadd.f32 %v881_v29, %v880_v31 }
 0x7f9   :  { %884 = vrot.lane.b32.xlu0 %v882_v32, %s9040_s7 }
 0x7fd   :  { %968 = vrot.lane.b32.xlu0 %v967_v33, %s9038_s12 }
 0x86b   :  { %v9534_v34 = vpop.permute.xlu0 %884 }
 0x86c   :  { %8110 = vmatmul.mubr.msk.f32.vlgmr.msra.gmra.mxu0 %vm390_vm11, %v9534_v34 }
 0x86d   :  { %8124 = vmatpush3.msra.mxu0 %v9327_v54  ;;  %8131 = vmatprep.mubr.msk.f32.mxu0 %vm9037_vm10, %v9035_v19 }
 0x86e   :  { %8125 = vmatprep.subr.mxu0 %v9035_v19 }
 0x86f   :  { %8126 = vmatpush3.msra.mxu0 %v9334_v55  ;;  %v969_v49 = vpop.permute.xlu0 %968 }
 0x870   :  { %8127 = vmatprep.subr.mxu0 %v9035_v19 }
 0x871   :  { %8128 = vmatpush3.msra.mxu0 %v9340_v56 }
 0x872   :  { %8129 = vmatprep.subr.mxu0 %v9035_v19 }
 0x873   :  { %8130 = vmatpush3.msra.mxu0 %v9347_v57 }
 0x874   :  { %8145 = vmatprep.subr.mxu0 %v9035_v19 }
 0x92c   :  { %v954_v36 = vpop.f32.mrf.mxu0 }
 0x92d   :  { %v982_v35 = vadd.f32 %v9444_v47, %v954_v36  ;;  %990 = vrot.lane.b32.xlu1 %v954_v36, %s9038_s12 }
 0x92e   :  { %v8111_v37 = vpop.f32.mrf.mxu0 }
 0x92f   :  { %v7702_v42 = vmul.f32 -1.442695, %v982_v35 }
 0x931   :  { %978 = vrot.lane.b32.xlu1 %v977_v40, %s9038_s12  ;;  %8539 = vpow2.f32 %v7702_v42 }
 0x93e   :  { %v8540_v38 = vpop.eup %8539 }
 0x93f   :  { %v986_v44 = vadd.f32 1.0, %v8540_v38 }
 0x941   :  { %8541 = vrcp.f32 %v986_v44 }
 0x94e   :  { %v8542_v45 = vpop.eup %8541 }
 0x94f   :  { %v996_v8 = vsub.f32 1.0, %v8542_v45  ;;  %v1002_v61 = vmul.f32 %v8542_v45, %v882_v32 }
 0x99f   :  { %v991_v11 = vpop.permute.xlu1 %990 }
 0x9a0   :  { %v993_v50 = vmul.f32 %v8542_v45, %v991_v11 }
 0x9a3   :  { %v979_v51 = vpop.permute.xlu1 %978 }
 0x9a4   :  { %v981_v47 = vsel %vm593_vm12, %v969_v49, %v979_v51  ;;  %v1082_v21 = vsel %vm593_vm12, %v979_v51, %v969_v49 }
 0x9a5   :  { %v994_v52 = vadd.f32 %v993_v50, %v981_v47 }
 0x9a7   :  { %8543 = vtanh.f32 %v994_v52 }
 0x9b4   :  { %v8544_v59 = vpop.eup %8543 }
 0x9b5   :  { %998 = vrot.lane.b32.xlu0 %v8544_v59, %s9039_s27 }
 0xa27   :  { %v999_v17 = vpop.permute.xlu0 %998 }
 0xa28   :  { %v1001_v62 = vmul.f32 %v999_v17, %v996_v8 }
 0xa2a   :  { %v1003_v63 = vadd.f32 %v1002_v61, %v1001_v62 }
 0xa2c   :  { %1005 = vrot.lane.b32.xlu1 %v1003_v63, %s9040_s7 }
 0xa9e   :  { %v9556_v1 = vpop.permute.xlu1 %1005 }
 0xa9f   :  { %8121 = vmatmul.mubr.msk.f32.vlgmr.msra.gmra.mxu1 %vm390_vm11, %v9556_v1 }
 0xaa0   :  { %8135 = vmatpush3.msra.mxu1 %v9327_v54  ;;  %8142 = vmatprep.mubr.msk.f32.mxu1 %vm9037_vm10, %v9035_v19 }
 0xaa1   :  { %8136 = vmatprep.subr.mxu1 %v9035_v19 }
 0xaa2   :  { %8137 = vmatpush3.msra.mxu1 %v9334_v55 }
 0xaa3   :  { %8138 = vmatprep.subr.mxu1 %v9035_v19 }
 0xaa4   :  { %8139 = vmatpush3.msra.mxu1 %v9340_v56 }
 0xaa5   :  { %8140 = vmatprep.subr.mxu1 %v9035_v19 }
 0xaa6   :  { %8141 = vmatpush3.msra.mxu1 %v9347_v57 }
 0xb5f   :  { %v1075_v4 = vpop.f32.mrf.mxu1 }
 0xb60   :  { %v1083_v7 = vadd.f32 %v9448_v48, %v1075_v4  ;;  %1091 = vrot.lane.b32.xlu0 %v1075_v4, %s9038_s12 }
 0xb61   :  { %v8122_v12 = vpop.f32.mrf.mxu1 }
 0xb62   :  { %v7704_v16 = vmul.f32 -1.442695, %v1083_v7 }
 0xb64   :  { %8545 = vpow2.f32 %v7704_v16  ;;  %v1284_v16 = vsel %vm593_vm12, %v9493_v43, %v9491_v41 }
 0xb71   :  { %v8546_v20 = vpop.eup %8545 }
 0xb72   :  { %v1087_v39 = vadd.f32 1.0, %v8546_v20 }
 0xb74   :  { %8547 = vrcp.f32 %v1087_v39 }
 0xb81   :  { %v8548_v25 = vpop.eup %8547 }
 0xb82   :  { %v1097_v32 = vsub.f32 1.0, %v8548_v25  ;;  %v1103_v33 = vmul.f32 %v8548_v25, %v1003_v63 }
 0xbd2   :  { %v1092_v24 = vpop.permute.xlu0 %1091 }
 0xbd3   :  { %v1094_v26 = vmul.f32 %v8548_v25, %v1092_v24 }
 0xbd5   :  { %v1095_v29 = vadd.f32 %v1094_v26, %v1082_v21 }
 0xbd7   :  { %8549 = vtanh.f32 %v1095_v29 }
 0xbe4   :  { %v8550_v31 = vpop.eup %8549 }
 0xbe5   :  { %1099 = vrot.lane.b32.xlu1 %v8550_v31, %s9039_s27 }
 0xc57   :  { %v1100_v48 = vpop.permute.xlu1 %1099 }
 0xc58   :  { %v1102_v36 = vmul.f32 %v1100_v48, %v1097_v32 }
 0xc5a   :  { %v1104_v35 = vadd.f32 %v1103_v33, %v1102_v36  ;;  %v1830_v33 = vld [vmem:[%s11637_s3 + $0x4] sm:$0x3]  ;;  %v1832_v36 = vld [vmem:[%s11637_s3 + $0x8] sm:$0x3] }
 0xc5c   :  { %1106 = vrot.lane.b32.xlu0 %v1104_v35, %s9040_s7 }
 0xcce   :  { %v9574_v37 = vpop.permute.xlu0 %1106 }
 0xccf   :  { %8132 = vmatmul.mubr.msk.f32.vlgmr.msra.gmra.mxu0 %vm390_vm11, %v9574_v37 }
 0xcd0   :  { %8146 = vmatpush3.msra.mxu0 %v9327_v54  ;;  %8153 = vmatprep.mubr.msk.f32.mxu0 %vm9037_vm10, %v9035_v19 }
 0xcd1   :  { %8147 = vmatprep.subr.mxu0 %v9035_v19 }
 0xcd2   :  { %8148 = vmatpush3.msra.mxu0 %v9334_v55 }
 0xcd3   :  { %8149 = vmatprep.subr.mxu0 %v9035_v19 }
 0xcd4   :  { %8150 = vmatpush3.msra.mxu0 %v9340_v56 }
 0xcd5   :  { %8151 = vmatprep.subr.mxu0 %v9035_v19 }
 0xcd6   :  { %8152 = vmatpush3.msra.mxu0 %v9347_v57  ;;  %v1183_v57 = vsel %vm593_vm12, %v9524_v22, %v9522_v18 }
 0xcd7   :  { %8167 = vmatprep.subr.mxu0 %v9035_v19 }
 0xd8f   :  { %v1176_v40 = vpop.f32.mrf.mxu0 }
 0xd90   :  { %v1184_v54 = vadd.f32 %v9440_v46, %v1176_v40  ;;  %1192 = vrot.lane.b32.xlu1 %v1176_v40, %s9038_s12  ;;  %v1430_v40 = vld [vmem:[%s11590_s14 + $0x18] sm:$0xff] }
 0xd91   :  { %v8133_v42 = vpop.f32.mrf.mxu0  ;;  %8156 = vmatprep.subr.mxu1 %v1430_v40 }
 0xd92   :  { %v7706_v38 = vmul.f32 -1.442695, %v1184_v54  ;;  %v1429_v54 = vld [vmem:[%s11590_s14 + $0x10] sm:$0xff]  ;;  %v1428_v42 = vld [vmem:[%s11590_s14 + $0x8] sm:$0xff] }
 0xd94   :  { %8551 = vpow2.f32 %v7706_v38 }
 0xda1   :  { %v8552_v44 = vpop.eup %8551 }
 0xda2   :  { %v1188_v55 = vadd.f32 1.0, %v8552_v44 }
 0xda4   :  { %8553 = vrcp.f32 %v1188_v55  ;;  %v1427_v55 = vld [vmem:[%s11590_s14] sm:$0xff] }
 0xdb1   :  { %v8554_v11 = vpop.eup %8553 }
 0xdb2   :  { %v1198_v46 = vsub.f32 1.0, %v8554_v11  ;;  %v1204_v47 = vmul.f32 %v8554_v11, %v1104_v35  ;;  %v1838_v35 = vld [vmem:[%s11637_s3 + $0x14] sm:$0x3] }
 0xe02   :  { %v1193_v45 = vpop.permute.xlu1 %1192 }
 0xe03   :  { %v1195_v56 = vmul.f32 %v8554_v11, %v1193_v45 }
 0xe05   :  { %v1196_v49 = vadd.f32 %v1195_v56, %v1183_v57  ;;  %v1829_v57 = vld [vmem:[%s11637_s3 + $0x2] sm:$0x3] }
 0xe07   :  { %8555 = vtanh.f32 %v1196_v49  ;;  %v1831_v49 = vld [vmem:[%s11637_s3 + $0x6] sm:$0x3] }
 0xe14   :  { %v8556_v50 = vpop.eup %8555 }
 0xe15   :  { %1200 = vrot.lane.b32.xlu0 %v8556_v50, %s9039_s27  ;;  %v1833_v50 = vld [vmem:[%s11637_s3 + $0xa] sm:$0x3] }
 0xe87   :  { %v1201_v51 = vpop.permute.xlu0 %1200 }
 0xe88   :  { %v1203_v52 = vmul.f32 %v1201_v51, %v1198_v46  ;;  %v1835_v46 = vld [vmem:[%s11637_s3 + $0xe] sm:$0x3]  ;;  %v1837_v51 = vld [vmem:[%s11637_s3 + $0x12] sm:$0x3] }
 0xe8a   :  { %v1205_v59 = vadd.f32 %v1204_v47, %v1203_v52  ;;  %v1839_v47 = vld [vmem:[%s11637_s3 + $0x16] sm:$0x3] }
 0xe8c   :  { %1207 = vrot.lane.b32.xlu1 %v1205_v59, %s9040_s7 }
 0xefe   :  { %v9595_v8 = vpop.permute.xlu1 %1207 }
 0xeff   :  { %8143 = vmatmul.mubr.msk.f32.vlgmr.msra.gmra.mxu1 %vm390_vm11, %v9595_v8  ;;  %v9686_v52 = vsel %vm593_vm12, %v9534_v34, %v9595_v8 }
 0xf00   :  { %8157 = vmatpush3.msra.mxu1 %v1430_v40 }
 0xf01   :  { %8158 = vmatprep.subr.mxu1 %v1429_v54 }
 0xf02   :  { %8159 = vmatpush3.msra.mxu1 %v1429_v54 }
 0xf03   :  { %8160 = vmatprep.subr.mxu1 %v1428_v42 }
 0xf04   :  { %8161 = vmatpush3.msra.mxu1 %v1428_v42 }
 0xf05   :  { %8162 = vmatprep.subr.mxu1 %v1427_v55 }
 0xf06   :  { %8163 = vmatpush3.msra.mxu1 %v1427_v55 }
 0xf07   :  { %8190 = vmatprep.subr.mxu1 %v9035_v19 }
 0xfbf   :  { %v1277_v17 = vpop.f32.mrf.mxu1 }
 0xfc0   :  { %v1285_v18 = vadd.f32 %v9457_v53, %v1277_v17  ;;  %1293 = vrot.lane.b32.xlu0 %v1277_v17, %s9038_s12  ;;  %v9696_v17 = vsel %vm593_vm12, %v9556_v1, %v9574_v37 }
 0xfc1   :  { %v8144_v22 = vpop.f32.mrf.mxu1 }
 0xfc2   :  { %v7708_v61 = vmul.f32 -1.442695, %v1285_v18  ;;  %v9701_v18 = vsel %vm593_vm12, %v9574_v37, %v9556_v1 }
 0xfc4   :  { %8557 = vpow2.f32 %v7708_v61  ;;  %v1446_v61 = vcombine.low %v9686_v52, %v9696_v17 }
 0xfd1   :  { %v8558_v62 = vpop.eup %8557 }
 0xfd2   :  { %v1289_v63 = vadd.f32 1.0, %v8558_v62 }
 0xfd4   :  { %8559 = vrcp.f32 %v1289_v63 }
 0xfe1   :  { %v8560_v4 = vpop.eup %8559 }
 0xfe2   :  { %v1299_v53 = vsub.f32 1.0, %v8560_v4  ;;  %v1305_v24 = vmul.f32 %v8560_v4, %v1205_v59  ;;  %v9691_v59 = vsel %vm593_vm12, %v9595_v8, %v9534_v34 }
 0xfe3   :  { %v1462_v62 = vcombine.low %v9701_v18, %v9691_v59 }
0x1032   :  { %v1294_v7 = vpop.permute.xlu0 %1293 }
0x1033   :  { %v1296_v12 = vmul.f32 %v8560_v4, %v1294_v7 }
0x1035   :  { %v1297_v20 = vadd.f32 %v1296_v12, %v1284_v16  ;;  %v1460_v12 = vrot.slane %v1446_v61, %v9300_v30  ;;  %v1470_v16 = vrot.slane %v1462_v62, %v9300_v30 }
0x1037   :  { %8561 = vtanh.f32 %v1297_v20 }
0x1044   :  { %v8562_v39 = vpop.eup %8561 }
0x1045   :  { %1301 = vrot.lane.b32.xlu1 %v8562_v39, %s9039_s27 }
0x10b7   :  { %v1302_v25 = vpop.permute.xlu1 %1301 }
0x10b8   :  { %v1304_v26 = vmul.f32 %v1302_v25, %v1299_v53 }
0x10ba   :  { %v1306_v21 = vadd.f32 %v1305_v24, %v1304_v26 }
0x10bc   :  { %1308 = vrot.lane.b32.xlu0 %v1306_v21, %s9040_s7 }
0x112e   :  { %v9606_v29 = vpop.permute.xlu0 %1308 }
0x112f   :  { %8154 = vmatmul.mubr.msk.f32.vlgmr.msra.gmra.mxu0 %vm390_vm11, %v9606_v29  ;;  %v9714_v8 = vsel %vm593_vm12, %v9503_v60, %v9606_v29  ;;  %v9719_v1 = vsel %vm593_vm12, %v9606_v29, %v9503_v60 }
0x1130   :  { %8168 = vmatpush3.msk.msra.mxu0 %vm291_vm0, %v9221_v5  ;;  %8181 = vmatprep.mubr.msk.f32.mxu0 %vm9037_vm10, %v9035_v19 }
0x1131   :  { %8169 = vmatprep.subr.mxu0 %v9035_v19 }
0x1132   :  { %8170 = vmatpush3.msra.mxu0 %v9228_v6 }
0x1133   :  { %8171 = vmatprep.subr.mxu0 %v9035_v19 }
0x1134   :  { %8172 = vmatpush3.msra.mxu0 %v9242_v9 }
0x1135   :  { %8173 = vmatprep.subr.mxu0 %v9035_v19 }
0x1136   :  { %8174 = vmatpush3.msra.mxu0 %v9248_v10 }
0x1137   :  { %8175 = vmatprep.subr.mxu0 %v9035_v19 }
0x1138   :  { %8176 = vmatpush3.msra.mxu0 %v9262_v13 }
0x1139   :  { %8177 = vmatprep.subr.mxu0 %v9035_v19 }
0x113a   :  { %8178 = vmatpush3.msra.mxu0 %v9268_v14 }
0x113b   :  { %8179 = vmatprep.subr.mxu0 %v9035_v19 }
0x113c   :  { %8180 = vmatpush3.msra.mxu0 %v9275_v15  ;;  %v1385_v15 = vsel %vm593_vm12, %v9464_v3, %v9462_v2  ;;  %v1834_v2 = vld [vmem:[%s11637_s3 + $0xc] sm:$0x3]  ;;  %v1836_v3 = vld [vmem:[%s11637_s3 + $0x10] sm:$0x3] }
0x113d   :  { %8234 = vmatprep.subr.mxu0 %v9035_v19 }
0x11ef   :  { %v1378_v5 = vpop.f32.mrf.mxu0 }
0x11f0   :  { %v1386_v6 = vadd.f32 %v9460_v58, %v1378_v5  ;;  %1394 = vrot.lane.b32.xlu1 %v1378_v5, %s9038_s12  ;;  %v1828_v58 = vld [vmem:[%s11637_s3] sm:$0x3] }
0x11f1   :  { %v8155_v9 = vpop.f32.mrf.mxu0 }
0x11f2   :  { %v7710_v10 = vmul.f32 -1.442695, %v1386_v6 }
0x11f4   :  { %8563 = vpow2.f32 %v7710_v10 }
0x1201   :  { %v8564_v41 = vpop.eup %8563 }
0x1202   :  { %v1390_v13 = vadd.f32 1.0, %v8564_v41 }
0x1204   :  { %8565 = vrcp.f32 %v1390_v13 }
0x1211   :  { %v8566_v43 = vpop.eup %8565 }
0x1212   :  { %v1400_v38 = vsub.f32 1.0, %v8566_v43  ;;  %v1406_v11 = vmul.f32 %v8566_v43, %v1306_v21 }
0x1262   :  { %v1395_v31 = vpop.permute.xlu1 %1394 }
0x1263   :  { %v1397_v14 = vmul.f32 %v8566_v43, %v1395_v31 }
0x1265   :  { %v1398_v32 = vadd.f32 %v1397_v14, %v1385_v15 }
0x1267   :  { %8567 = vtanh.f32 %v1398_v32 }
0x1274   :  { %v8568_v48 = vpop.eup %8567 }
0x1275   :  { %1402 = vrot.lane.b32.xlu0 %v8568_v48, %s9039_s27 }
0x1279   :  { %1841 = vperm.xlu0 %8519, %v1828_v58  }
0x127d   :  { %1847 = vperm.xlu0 %8519, %v1830_v33  }
0x1281   :  { %1853 = vperm.xlu0 %8519, %v1832_v36  }
0x1285   :  { %1859 = vperm.xlu0 %8519, %v1834_v2  }
0x1289   :  { %1865 = vperm.xlu0 %8519, %v1836_v3  }
0x128d   :  { %1871 = vperm.xlu0 %8519, %v1838_v35  }
0x12e7   :  { %v1403_v44 = vpop.permute.xlu0 %1402 }
0x12e8   :  { %v1405_v45 = vmul.f32 %v1403_v44, %v1400_v38 }
0x12ea   :  { %v1407_v56 = vadd.f32 %v1406_v11, %v1405_v45 }
0x12ec   :  { %1410 = vrot.lane.b32.xlu1 %v1407_v56, %s9040_s7 }
0x12f0   :  { %1844 = vperm.xlu1 %8520, %v1829_v57  }
0x12f4   :  { %1850 = vperm.xlu1 %8520, %v1831_v49   ;;  %v1842_v22 = vpop.permute.xlu0 %1841 }
0x12f5   :  { %vm1876_vm14 = vcmp.eq.s32.totalorder %v9291_v23, %v1842_v22 }
0x12f6   :  { %v7717_v21 = vsel %vm1876_vm14, 1.0, %v9035_v19 }
0x12f8   :  { %1856 = vperm.xlu1 %8520, %v1833_v50   ;;  %v1848_v60 = vpop.permute.xlu0 %1847 }
0x12f9   :  { %vm1878_vm0 = vcmp.eq.s32.totalorder %v9291_v23, %v1848_v60 }
0x12fa   :  { %v7719_v9 = vsel %vm1878_vm0, 1.0, %v9035_v19 }
0x12fc   :  { %1862 = vperm.xlu1 %8520, %v1835_v46  }
0x1300   :  { %1868 = vperm.xlu1 %8520, %v1837_v51  }
0x1304   :  { %1874 = vperm.xlu1 %8520, %v1839_v47   ;;  %v7711_v47 = vld [vmem:[#allocation7] ss:$0 sm:$0xff] }
0x1305   :  { %v1479_v22 = vcombine.low %v7711_v47, %v7711_v47 }
0x1307   :  { %v1486_v61 = vrot.slane %v1479_v22, %v9300_v30  ;;  %v2132_v22 = vld [vmem:[%s11638_s2 + $0x6] sm:$0x3] }
0x1309   :  { %v1487_v62 = vcombine.low %v1486_v61, %v1486_v61 }
0x135e   :  { %v1411_v63 = vpop.permute.xlu1 %1410 }
0x135f   :  { %v9709_v34 = vsel %vm593_vm12, %v9473_v28, %v1411_v63  ;;  %v9723_v37 = vsel %vm593_vm12, %v1411_v63, %v9473_v28  ;;  %v1854_v28 = vpop.permute.xlu0 %1853 }
0x1360   :  { %v1445_v4 = vcombine.low %v9709_v34, %v9714_v8  ;;  %v1463_v7 = vcombine.low %v9719_v1, %v9723_v37  ;;  %vm1880_vm2 = vcmp.eq.s32.totalorder %v9291_v23, %v1854_v28 }
0x1361   :  { %v7721_v48 = vsel %vm1880_vm2, 1.0, %v9035_v19 }
0x1362   :  { %v1453_v20 = vrot.slane %v1445_v4, %v9300_v30  ;;  %v1477_v39 = vrot.slane %v1463_v7, %v9300_v30 }
0x1363   :  { %v1860_v29 = vpop.permute.xlu0 %1859 }
0x1364   :  { %v1478_v53 = vcombine.low %v1470_v16, %v1477_v39  ;;  %v1461_v25 = vcombine.low %v1453_v20, %v1460_v12  ;;  %vm1882_vm4 = vcmp.eq.s32.totalorder %v9291_v23, %v1860_v29 }
0x1365   :  { %v7723_v36 = vsel %vm1882_vm4, 1.0, %v9035_v19 }
0x1366   :  { %8164 = vmatprep.mubr.msk.f32.mxu1 %vm390_vm11, %v1461_v25 }
0x1367   :  { %8165 = vmatmul.mubr.msk.f32.vlgmr.msra.gmra.mxu1 %vm390_vm11, %v1478_v53  ;;  %v1866_v14 = vpop.permute.xlu0 %1865 }
0x1368   :  { %8198 = vmatprep.mubr.msk.f32.mxu1 %vm9037_vm10, %v9035_v19  ;;  %vm1884_vm6 = vcmp.eq.s32.totalorder %v9291_v23, %v1866_v14 }
0x1369   :  { %v7725_v55 = vsel %vm1884_vm6, 1.0, %v9035_v19 }
0x136b   :  { %v1845_v24 = vpop.permute.xlu1 %1844  ;;  %v1872_v35 = vpop.permute.xlu0 %1871 }
0x136c   :  { %vm1877_vm15 = vcmp.eq.s32.totalorder %v9291_v23, %v1845_v24  ;;  %vm1886_vm9 = vcmp.eq.s32.totalorder %v9291_v23, %v1872_v35 }
0x136d   :  { %v7718_v26 = vsel %vm1877_vm15, 1.0, %v9035_v19  ;;  %v7727_v56 = vsel %vm1886_vm9, 1.0, %v9035_v19 }
0x136e   :  { %v1924_v6 = vcombine.low %v7717_v21, %v7718_v26 }
0x136f   :  { %v1851_v5 = vpop.permute.xlu1 %1850 }
0x1370   :  { %vm1879_vm1 = vcmp.eq.s32.totalorder %v9291_v23, %v1851_v5  ;;  %v1932_v43 = vrot.slane %v1924_v6, %v9300_v30 }
0x1371   :  { %v7720_v10 = vsel %vm1879_vm1, 1.0, %v9035_v19  ;;  %vm2144_vm1 = vcmp.eq.s32.totalorder %v2132_v22, 0 }
0x1372   :  { %v1925_v41 = vcombine.low %v7719_v9, %v7720_v10 }
0x1373   :  { %v1857_v13 = vpop.permute.xlu1 %1856 }
0x1374   :  { %v1939_v31 = vrot.slane %v1925_v41, %v9300_v30  ;;  %vm1881_vm3 = vcmp.eq.s32.totalorder %v9291_v23, %v1857_v13  ;;  %v7714_v41 = vld [vmem:[#allocation5] ss:$0 sm:$0xff] }
0x1375   :  { %v7722_v15 = vsel %vm1881_vm3, 1.0, %v9035_v19 }
0x1376   :  { %v1940_v32 = vcombine.low %v1932_v43, %v1939_v31  ;;  %v1941_v33 = vcombine.low %v7721_v48, %v7722_v15 }
0x1377   :  { %v1863_v58 = vpop.permute.xlu1 %1862 }
0x1378   :  { %vm1883_vm5 = vcmp.eq.s32.totalorder %v9291_v23, %v1863_v58  ;;  %8182 = vmatmul.mubr.msk.f32.vlgmr.msra.gmra.mxu0 %vm286_vm7, %v1940_v32  ;;  %v1949_v54 = vrot.slane %v1941_v33, %v9300_v30 }
0x1379   :  { %v7724_v2 = vsel %vm1883_vm5, 1.0, %v9035_v19  ;;  %8184 = vmatprep.mubr.msk.f32.mxu0 %vm9037_vm10, %v9035_v19 }
0x137a   :  { %v1942_v3 = vcombine.low %v7723_v36, %v7724_v2 }
0x137b   :  { %v1869_v40 = vpop.permute.xlu1 %1868 }
0x137c   :  { %v1956_v42 = vrot.slane %v1942_v3, %v9300_v30  ;;  %vm1885_vm8 = vcmp.eq.s32.totalorder %v9291_v23, %v1869_v40 }
0x137d   :  { %v7726_v38 = vsel %vm1885_vm8, 1.0, %v9035_v19 }
0x137e   :  { %v1957_v44 = vcombine.low %v1949_v54, %v1956_v42  ;;  %v1958_v45 = vcombine.low %v7725_v55, %v7726_v38 }
0x137f   :  { %v1875_v11 = vpop.permute.xlu1 %1874 }
0x1380   :  { %vm1887_vm14 = vcmp.eq.s32.totalorder %v9291_v23, %v1875_v11  ;;  %8185 = vmatmul.mubr.msk.f32.gmra.mxu0 %vm286_vm7, %v1957_v44  ;;  %v1966_v50 = vrot.slane %v1958_v45, %v9300_v30 }
0x1381   :  { %v7728_v57 = vsel %vm1887_vm14, 1.0, %v9035_v19  ;;  %8187 = vmatprep.mubr.msk.f32.mxu0 %vm9037_vm10, %v9035_v19 }
0x1382   :  { %v1959_v49 = vcombine.low %v7727_v56, %v7728_v57 }
0x1384   :  { %v1973_v46 = vrot.slane %v1959_v49, %v9300_v30 }
0x1386   :  { %v1974_v51 = vcombine.low %v1966_v50, %v1973_v46  ;;  %v2129_v46 = vld [vmem:[%s11638_s2] sm:$0x3] }
0x1387   :  { %vm2141_vm15 = vcmp.eq.s32.totalorder %v2129_v46, 0 }
0x1388   :  { %8188 = vmatmul.mubr.msk.f32.gmra.mxu0 %vm286_vm7, %v1974_v51  ;;  %vm1635_vm7 = vcmask 254976   ;;  %v2131_v51 = vld [vmem:[%s11638_s2 + $0x4] sm:$0x3]  ;;  %v2153_v47 = vsel %vm2141_vm15, 1, %v9034_v0 }
0x1389   :  { %8242 = vmatprep.mubr.msk.f32.mxu0 %vm9037_vm10, %v9035_v19  ;;  %vm2143_vm0 = vcmp.eq.s32.totalorder %v2131_v51, 0 }
0x138a   :  { %v2155_v61 = vsel %vm2143_vm0, 1, %v9034_v0 }
0x1427   :  { %v8166_v63 = vpop.f32.mrf.mxu1 }
0x1428   :  { %v1565_v4 = vadd.f32 %v8166_v63, %v1487_v62  ;;  %v2234_v63 = vld [vmem:[%s11639_s13 + $0x2] sm:$0x3] }
0x1429   :  { %v1559_v7 = vpop.f32.mrf.mxu1  ;;  %vm2246_vm3 = vcmp.eq.s32.totalorder %v2234_v63, 0  ;;  %v9897_v63 = vsub.s32 1, %v9293_v27 }
0x142a   :  { %v1594_v12 = vrot.slane %v1565_v4, %v9300_v30  ;;  %v1560_v16 = vadd.f32 %v1559_v7, %v1487_v62  ;;  %v1587_v53 = vcombine.high %v1565_v4, %v1565_v4  ;;  %v2130_v62 = vld [vmem:[%s11638_s2 + $0x2] sm:$0x3]  ;;  %v2156_v4 = vsel %vm2144_vm1, 1, %v9034_v0  ;;  %v2233_v7 = vld [vmem:[%s11639_s13] sm:$0x3] }
0x142b   :  { %vm2142_vm2 = vcmp.eq.s32.totalorder %v2130_v62, 0  ;;  %vm2245_vm4 = vcmp.eq.s32.totalorder %v2233_v7, 0  ;;  %v9894_v62 = vsub.s32 0, %v9293_v27  ;;  %v7715_v7 = vld [vmem:[%s11640_s1] ss:$0 sm:$0xff] }
0x142c   :  { %v1602_v20 = vcombine.high %v1594_v12, %v1594_v12  ;;  %v1570_v39 = vcombine.high %v1560_v16, %v1560_v16  ;;  %v1577_v60 = vrot.slane %v1560_v16, %v9300_v30  ;;  %8569 = vtanh.f32 %v1594_v12  ;;  %v2236_v12 = vld [vmem:[%s11639_s13 + $0x6] sm:$0x3] }
0x142d   :  { %v1601_v24 = vrot.slane %v1587_v53, %v9300_v30  ;;  %v2154_v16 = vsel %vm2142_vm2, 1, %v9034_v0  ;;  %vm2248_vm5 = vcmp.eq.s32.totalorder %v2236_v12, 0  ;;  %v2257_v53 = vsel %vm2245_vm4, 1, %v9034_v0  ;;  %v2127_v12 = vld [vmem:[%s11641_s18] sm:$0x3] }
0x142e   :  { %v1585_v25 = vcombine.high %v1577_v60, %v1577_v60  ;;  %8571 = vtanh.f32 %v1602_v20  ;;  %v1584_v28 = vrot.slane %v1570_v39, %v9300_v30  ;;  %v2258_v20 = vsel %vm2246_vm3, 1, %v9034_v0  ;;  %v2235_v39 = vld [vmem:[%s11639_s13 + $0x4] sm:$0x3] }
0x142f   :  { %8573 = vtanh.f32 %v1577_v60  ;;  %v1603_v29 = vcombine.high %v1601_v24, %v1601_v24  ;;  %v2134_v60 = vld [vmem:[%s11638_s2 + $0xa] sm:$0x3]  ;;  %vm2247_vm6 = vcmp.eq.s32.totalorder %v2235_v39, 0 }
0x1430   :  { %8575 = vtanh.f32 %v1585_v25  ;;  %v1586_v26 = vcombine.high %v1584_v28, %v1584_v28  ;;  %v2260_v25 = vsel %vm2248_vm5, 1, %v9034_v0  ;;  %vm2146_vm8 = vcmp.eq.s32.totalorder %v2134_v60, 0 }
0x1431   :  { %8577 = vtanh.f32 %v1584_v28  ;;  %v2133_v28 = vld [vmem:[%s11638_s2 + $0x8] sm:$0x3] }
0x1432   :  { %8579 = vtanh.f32 %v1601_v24  ;;  %v2136_v24 = vld [vmem:[%s11638_s2 + $0xe] sm:$0x3]  ;;  %vm2145_vm9 = vcmp.eq.s32.totalorder %v2133_v28, 0 }
0x1433   :  { %8581 = vtanh.f32 %v1586_v26  ;;  %v2259_v26 = vsel %vm2247_vm6, 1, %v9034_v0  ;;  %vm2148_vm14 = vcmp.eq.s32.totalorder %v2136_v24, 0 }
0x1434   :  { %8583 = vtanh.f32 %v1603_v29  ;;  %v2158_v29 = vsel %vm2146_vm8, 1, %v9034_v0 }
0x1438   :  { %v9781_v21 = vpop.f32.mrf.mxu0 }
0x1439   :  { %v8570_v6 = vpop.eup %8569 }
0x143a   :  { %v8183_v5 = vpop.f32.mrf.mxu0  ;;  %v1631_v36 = vmul.f32 %v8570_v6, %v7714_v41  ;;  %v2238_v6 = vld [vmem:[%s11639_s13 + $0xa] sm:$0x3] }
0x143b   :  { %v8572_v9 = vpop.eup %8571  ;;  %v2135_v5 = vld [vmem:[%s11638_s2 + $0xc] sm:$0x3]  ;;  %vm2250_vm0 = vcmp.eq.s32.totalorder %v2238_v6, 0 }
0x143c   :  { %v8574_v10 = vpop.eup %8573  ;;  %v1632_v32 = vmul.f32 %v8572_v9, %v7714_v41  ;;  %v1648_v54 = vsel %vm1635_vm7, %v1631_v36, 0.0  ;;  %v2157_v9 = vsel %vm2145_vm9, 1, %v9034_v0  ;;  %vm2147_vm15 = vcmp.eq.s32.totalorder %v2135_v5, 0  ;;  %v2140_v36 = vld [vmem:[%s11638_s2 + $0x16] sm:$0x3] }
0x143d   :  { %v8576_v13 = vpop.eup %8575  ;;  %v1627_v43 = vmul.f32 %v8574_v10, %v7714_v41  ;;  %v2160_v10 = vsel %vm2148_vm14, 1, %v9034_v0  ;;  %vm2152_vm6 = vcmp.eq.s32.totalorder %v2140_v36, 0 }
0x143e   :  { %v1628_v14 = vmul.f32 %v8576_v13, %v7714_v41  ;;  %v8578_v48 = vpop.eup %8577  ;;  %v1651_v3 = vsel %vm1635_vm7, %v1632_v32, 0.0  ;;  %v2240_v13 = vld [vmem:[%s11639_s13 + $0xe] sm:$0x3]  ;;  %v2138_v32 = vld [vmem:[%s11638_s2 + $0x12] sm:$0x3] }
0x143f   :  { %v1636_v15 = vsel %vm1635_vm7, %v1627_v43, 0.0  ;;  %v8580_v2 = vpop.eup %8579  ;;  %v1629_v35 = vmul.f32 %v8578_v48, %v7714_v41  ;;  %v2159_v43 = vsel %vm2147_vm15, 1, %v9034_v0  ;;  %vm2252_vm2 = vcmp.eq.s32.totalorder %v2240_v13, 0 }
0x1440   :  { %v9783_v31 = vpop.f32.mrf.mxu0  ;;  %1637 = vadd.xlane.f32.xlu0 %v1636_v15  ;;  %v1639_v58 = vsel %vm1635_vm7, %v1628_v14, 0.0  ;;  %v8582_v40 = vpop.eup %8581  ;;  %v1633_v42 = vmul.f32 %v8580_v2, %v7714_v41  ;;  %v2262_v14 = vsel %vm2250_vm0, 1, %v9034_v0  ;;  %v2239_v15 = vld [vmem:[%s11639_s13 + $0xc] sm:$0x3]  ;;  %vm2150_vm4 = vcmp.eq.s32.totalorder %v2138_v32, 0 }
0x1441   :  { %1640 = vadd.xlane.f32.xlu1 %v1639_v58  ;;  %v1642_v44 = vsel %vm1635_vm7, %v1629_v35, 0.0  ;;  %v1630_v55 = vmul.f32 %v8582_v40, %v7714_v41  ;;  %v8584_v11 = vpop.eup %8583  ;;  %v2264_v58 = vsel %vm2252_vm2, 1, %v9034_v0  ;;  %vm2251_vm3 = vcmp.eq.s32.totalorder %v2239_v15, 0  ;;  %v2139_v35 = vld [vmem:[%s11638_s2 + $0x14] sm:$0x3] }
0x1442   :  { %v8186_v33 = vpop.f32.mrf.mxu0  ;;  %v1654_v45 = vsel %vm1635_vm7, %v1633_v42, 0.0  ;;  %v1634_v49 = vmul.f32 %v8584_v11, %v7714_v41  ;;  %v2237_v41 = vld [vmem:[%s11639_s13 + $0x8] sm:$0x3]  ;;  %v2263_v2 = vsel %vm2251_vm3, 1, %v9034_v0  ;;  %v2242_v40 = vld [vmem:[%s11639_s13 + $0x12] sm:$0x3]  ;;  %vm1667_vm3 = vcmp.lt.s32.totalorder %v9293_v27, %v7715_v7 }
0x1443   :  { %v1645_v57 = vsel %vm1635_vm7, %v1630_v55, 0.0  ;;  %vm2249_vm1 = vcmp.eq.s32.totalorder %v2237_v41, 0  ;;  %v2137_v33 = vld [vmem:[%s11638_s2 + $0x10] sm:$0x3]  ;;  %v2164_v42 = vsel %vm2152_vm6, 1, %v9034_v0  ;;  %vm2151_vm8 = vcmp.eq.s32.totalorder %v2139_v35, 0 }
0x1444   :  { %1652 = vadd.xlane.f32.xlu0 %v1651_v3  ;;  %v1657_v50 = vsel %vm1635_vm7, %v1634_v49, 0.0  ;;  %v2261_v48 = vsel %vm2249_vm1, 1, %v9034_v0  ;;  %v2162_v3 = vsel %vm2150_vm4, 1, %v9034_v0  ;;  %vm2149_vm5 = vcmp.eq.s32.totalorder %v2137_v33, 0  ;;  %v2244_v55 = vld [vmem:[%s11639_s13 + $0x16] sm:$0x3] }
0x1445   :  { %1649 = vadd.xlane.f32.xlu1 %v1648_v54  ;;  %v2161_v54 = vsel %vm2149_vm5, 1, %v9034_v0  ;;  %vm2254_vm9 = vcmp.eq.s32.totalorder %v2242_v40, 0  ;;  %v2163_v11 = vsel %vm2151_vm8, 1, %v9034_v0  ;;  %vm2256_vm15 = vcmp.eq.s32.totalorder %v2244_v55, 0  ;;  %v9941_v7 = vld [vmem:[#allocation8 + $0x10] sm:$0xff] }
0x1446   :  { %v2268_v49 = vsel %vm2256_vm15, 1, %v9034_v0  ;;  %vm1711_vm1 = vcmask 1041409   ;;  %vm1713_vm2 = vcmask 1042434   ;;  %vm1715_vm4 = vcmask 1043459  }
0x1447   :  { %vm1717_vm5 = vcmask 1044484   ;;  %vm1719_vm6 = vcmask 1045509  }
0x1448   :  { %v9789_v38 = vpop.f32.mrf.mxu0  ;;  %1643 = vadd.xlane.f32.xlu0 %v1642_v44  ;;  %v2241_v44 = vld [vmem:[%s11639_s13 + $0x10] sm:$0x3] }
0x1449   :  { %1655 = vadd.xlane.f32.xlu1 %v1654_v45  ;;  %v2266_v45 = vsel %vm2254_vm9, 1, %v9034_v0  ;;  %vm2253_vm14 = vcmp.eq.s32.totalorder %v2241_v44, 0  ;;  %vm1721_vm9 = vcmask 1046534  }
0x144a   :  { %v8189_v56 = vpop.f32.mrf.mxu0 }
0x144b   :  { %v2243_v56 = vld [vmem:[%s11639_s13 + $0x14] sm:$0x3]  ;;  %s9043_s13 = smov 123  }
0x144c   :  { %1646 = vadd.xlane.f32.xlu0 %v1645_v57  ;;  %v2265_v57 = vsel %vm2253_vm14, 1, %v9034_v0  ;;  %vm2255_vm0 = vcmp.eq.s32.totalorder %v2243_v56, 0  ;;  %vm1723_vm14 = vcmask 1047559  }
0x1450   :  { %1658 = vadd.xlane.f32.xlu0 %v1657_v50  ;;  %v2267_v50 = vsel %vm2255_vm0, 1, %v9034_v0  ;;  %vm1727_vm0 = vcmask 15360  }
0x145a   :  { %2166 = vperm.xlu1 %8520, %v2153_v47  }
0x145e   :  { %2172 = vperm.xlu1 %8520, %v2155_v61   ;;  %v1681_v61 = vsub.s32 %v9291_v23, %v9293_v27 }
0x1462   :  { %2175 = vperm.xlu1 %8520, %v2156_v4  }
0x1466   :  { %2169 = vperm.xlu0 %8519, %v2154_v16   ;;  %2273 = vperm.xlu1 %8520, %v2258_v20  }
0x146a   :  { %2270 = vperm.xlu0 %8519, %v2257_v53   ;;  %2279 = vperm.xlu1 %8520, %v2260_v25   ;;  %v9907_v53 = vrot.slane %v2127_v12, %v9894_v62  ;;  %v9910_v25 = vrot.slane %v2127_v12, %v9897_v63 }
0x146e   :  { %2276 = vperm.xlu0 %8519, %v2259_v26   ;;  %2181 = vperm.xlu1 %8520, %v2158_v29  }
0x1472   :  { %2178 = vperm.xlu0 %8519, %v2157_v9   ;;  %2187 = vperm.xlu1 %8520, %v2160_v10   ;;  %v9914_v9 = vsel %vm1667_vm3, 1.0, %v9035_v19 }
0x1473   :  { %vm1670_vm15 = vcmp.gt.f32.partialorder %v9914_v9, 0.0 }
0x1476   :  { %2184 = vperm.xlu0 %8519, %v2159_v43   ;;  %2285 = vperm.xlu1 %8520, %v2262_v14  }
0x147a   :  { %2282 = vperm.xlu0 %8519, %v2261_v48   ;;  %2291 = vperm.xlu1 %8520, %v2264_v58  }
0x147e   :  { %2288 = vperm.xlu0 %8519, %v2263_v2   ;;  %2193 = vperm.xlu1 %8520, %v2162_v3  }
0x1482   :  { %2190 = vperm.xlu0 %8519, %v2161_v54   ;;  %2199 = vperm.xlu1 %8520, %v2164_v42  }
0x1486   :  { %2196 = vperm.xlu0 %8519, %v2163_v11   ;;  %2297 = vperm.xlu1 %8520, %v2266_v45   ;;  %v2128_v11 = vld [vmem:[#allocation2] sm:$0x3] }
0x148a   :  { %2294 = vperm.xlu0 %8519, %v2265_v57   ;;  %2303 = vperm.xlu1 %8520, %v2268_v49  }
0x148e   :  { %2300 = vperm.xlu0 %8519, %v2267_v50   ;;  %v9928_v50 = vrot.slane %v2128_v11, %v9894_v62 }
0x14c9   :  { %v1638_v46 = vpop.xlane.xlu0 %1637 }
0x14ca   :  { %v1641_v51 = vpop.xlane.xlu1 %1640  ;;  %v1682_v60 = vrot.slane %v1638_v46, %v1681_v61  ;;  %v9931_v46 = vrot.slane %v2128_v11, %v9897_v63 }
0x14cb   :  { %v1686_v16 = vrot.slane %v1641_v51, %v1681_v61 }
0x14cd   :  { %v1653_v47 = vpop.xlane.xlu0 %1652  ;;  %v1712_v24 = vsel %vm1711_vm1, %v1686_v16, %v1682_v60 }
0x14ce   :  { %v1650_v22 = vpop.xlane.xlu1 %1649  ;;  %v1702_v10 = vrot.slane %v1653_v47, %v1681_v61 }
0x14cf   :  { %v1698_v5 = vrot.slane %v1650_v22, %v1681_v61 }
0x14d1   :  { %v1644_v4 = vpop.xlane.xlu0 %1643 }
0x14d2   :  { %v1656_v20 = vpop.xlane.xlu1 %1655  ;;  %v1690_v39 = vrot.slane %v1644_v4, %v1681_v61  ;;  %v9939_v4 = vld [vmem:[#allocation8 + $0x18] sm:$0xff] }
0x14d3   :  { %v1706_v43 = vrot.slane %v1656_v20, %v1681_v61  ;;  %8235 = vmatpush3.msra.mxu0 %v9939_v4 }
0x14d4   :  { %v1714_v6 = vsel %vm1713_vm2, %v1690_v39, %v1712_v24  ;;  %8236 = vmatprep.subr.mxu0 %v9035_v19  ;;  %v9950_v24 = vld [vmem:[#allocation8 + $0x8] sm:$0xff] }
0x14d5   :  { %v1647_v28 = vpop.xlane.xlu0 %1646  ;;  %8237 = vmatpush3.msra.mxu0 %v9941_v7 }
0x14d6   :  { %v1694_v26 = vrot.slane %v1647_v28, %v1681_v61  ;;  %v2167_v29 = vpop.permute.xlu1 %2166  ;;  %8238 = vmatprep.subr.mxu0 %v9035_v19 }
0x14d7   :  { %vm2201_vm8 = vcmp.eq.s32.totalorder %v2167_v29, 1  ;;  %8239 = vmatpush3.msra.mxu0 %v9950_v24 }
0x14d8   :  { %v1716_v41 = vsel %vm1715_vm4, %v1694_v26, %v1714_v6  ;;  %v2221_v13 = vsel %vm2201_vm8, %v9907_v53, %v9910_v25  ;;  %v9959_v6 = vld [vmem:[#allocation8] sm:$0xff]  ;;  %8240 = vmatprep.subr.mxu0 %v9035_v19 }
0x14d9   :  { %v1718_v14 = vsel %vm1717_vm5, %v1698_v5, %v1716_v41  ;;  %v1659_v15 = vpop.xlane.xlu0 %1658  ;;  %2349 = vrot.lane.b32.xlu0 %v2221_v13, %s9039_s27  ;;  %8241 = vmatpush3.msra.mxu0 %v9959_v6 }
0x14da   :  { %v1720_v32 = vsel %vm1719_vm6, %v1702_v10, %v1718_v14  ;;  %v1710_v48 = vrot.slane %v1659_v15, %v1681_v61  ;;  %v2173_v58 = vpop.permute.xlu1 %2172  ;;  %8243 = vmatmul.mubr.f32.vlgmr.msra.gmra.mxu0 %v9035_v19  ;;  %8245 = vmatprep.subr.mxu0 %v9035_v19 }
0x14db   :  { %v1722_v33 = vsel %vm1721_vm9, %v1706_v43, %v1720_v32  ;;  %vm2203_vm2 = vcmp.eq.s32.totalorder %v2173_v58, 1  ;;  %8246 = vmatpush3.msra.mxu0 %v9939_v4  ;;  %8253 = vmatprep.mubr.msk.f32.mxu0 %vm9037_vm10, %v9035_v19 }
0x14dc   :  { %v1724_v36 = vsel %vm1723_vm14, %v1710_v48, %v1722_v33  ;;  %v2223_v2 = vsel %vm2203_vm2, %v9907_v53, %v9910_v25  ;;  %8247 = vmatprep.subr.mxu0 %v9035_v19 }
0x14dd   :  { %v1726_v3 = vsel %vm1670_vm15, %v1724_v36, -1e+30  ;;  %2353 = vrot.lane.b32.xlu0 %v2223_v2, %s9039_s27  ;;  %8248 = vmatpush3.msra.mxu0 %v9941_v7 }
0x14de   :  { %v1728_v35 = vsel %vm1727_vm0, %v1726_v3, -inf  ;;  %v2176_v40 = vpop.permute.xlu1 %2175  ;;  %8249 = vmatprep.subr.mxu0 %v9035_v19 }
0x14df   :  { %v1729_v54 = vrot.slane %v1728_v35, 4  ;;  %vm2204_vm4 = vcmp.eq.s32.totalorder %v2176_v40, 1  ;;  %8250 = vmatpush3.msra.mxu0 %v9950_v24 }
0x14e0   :  { %v2224_v22 = vsel %vm2204_vm4, %v9907_v53, %v9910_v25  ;;  %8251 = vmatprep.subr.mxu0 %v9035_v19 }
0x14e1   :  { %v1730_v42 = vmax.f32 %v1728_v35, %v1729_v54  ;;  %v2170_v44 = vpop.permute.xlu0 %2169  ;;  %8252 = vmatpush3.msra.mxu0 %v9959_v6 }
0x14e2   :  { %vm2202_vm3 = vcmp.eq.s32.totalorder %v2170_v44, 1  ;;  %v2274_v55 = vpop.permute.xlu1 %2273  ;;  %8256 = vmatprep.subr.mxu0 %v9035_v19 }
0x14e3   :  { %v1731_v45 = vrot.slane %v1730_v42, 2  ;;  %v2222_v56 = vsel %vm2202_vm3, %v9907_v53, %v9910_v25  ;;  %vm2306_vm6 = vcmp.eq.s32.totalorder %v2274_v55, 1 }
0x14e4   :  { %2351 = vrot.lane.b32.xlu1 %v2222_v56, %s9039_s27  ;;  %v2326_v60 = vsel %vm2306_vm6, %v9928_v50, %v9931_v46 }
0x14e5   :  { %v1732_v57 = vmax.f32 %v1730_v42, %v1731_v45  ;;  %v2271_v49 = vpop.permute.xlu0 %2270 }
0x14e6   :  { %vm2305_vm5 = vcmp.eq.s32.totalorder %v2271_v49, 1  ;;  %v2280_v51 = vpop.permute.xlu1 %2279 }
0x14e7   :  { %v1733_v47 = vrot.slane %v1732_v57, 1  ;;  %v2325_v61 = vsel %vm2305_vm5, %v9928_v50, %v9931_v46  ;;  %vm2308_vm14 = vcmp.eq.s32.totalorder %v2280_v51, 1 }
0x14e8   :  { %2355 = vrot.lane.b32.xlu1 %v2224_v22, %s9039_s27  ;;  %2397 = vrot.lane.b32.xlu0 %v2325_v61, %s9038_s12  ;;  %v2328_v41 = vsel %vm2308_vm14, %v9928_v50, %v9931_v46 }
0x14e9   :  { %v1734_v12 = vmax.f32 %v1732_v57, %v1733_v47  ;;  %v2277_v16 = vpop.permute.xlu0 %2276 }
0x14ea   :  { %vm2307_vm8 = vcmp.eq.s32.totalorder %v2277_v16, 1  ;;  %v2182_v20 = vpop.permute.xlu1 %2181 }
0x14eb   :  { %v1735_v39 = vsub.f32 %v1726_v3, %v1734_v12  ;;  %vm2206_vm9 = vcmp.eq.s32.totalorder %v2182_v20, 1  ;;  %v2327_v28 = vsel %vm2307_vm8, %v9928_v50, %v9931_v46 }
0x14ec   :  { %2399 = vrot.lane.b32.xlu1 %v2326_v60, %s9038_s12  ;;  %2401 = vrot.lane.b32.xlu0 %v2327_v28, %s9038_s12  ;;  %v9956_v26 = vsel %vm2206_vm9, %v9907_v53, %v9910_v25 }
0x14ed   :  { %v1736_v29 = vmul.f32 1.442695, %v1735_v39  ;;  %v2179_v5 = vpop.permute.xlu0 %2178 }
0x14ee   :  { %vm2205_vm15 = vcmp.eq.s32.totalorder %v2179_v5, 1  ;;  %v2188_v10 = vpop.permute.xlu1 %2187 }
0x14ef   :  { %8585 = vpow2.f32 %v1736_v29  ;;  %vm2208_vm2 = vcmp.eq.s32.totalorder %v2188_v10, 1  ;;  %v9966_v13 = vsel %vm2205_vm15, %v9907_v53, %v9910_v25 }
0x14f0   :  { %2403 = vrot.lane.b32.xlu1 %v2328_v41, %s9038_s12  ;;  %v9972_v43 = vsel %vm2208_vm2, %v9907_v53, %v9910_v25 }
0x14f1   :  { %v2185_v14 = vpop.permute.xlu0 %2184 }
0x14f2   :  { %vm2207_vm3 = vcmp.eq.s32.totalorder %v2185_v14, 1  ;;  %v2286_v15 = vpop.permute.xlu1 %2285 }
0x14f3   :  { %vm2310_vm4 = vcmp.eq.s32.totalorder %v2286_v15, 1  ;;  %v9982_v32 = vsel %vm2207_vm3, %v9907_v53, %v9910_v25 }
0x14f4   :  { %v9987_v48 = vsel %vm2310_vm4, %v9928_v50, %v9931_v46 }
0x14f5   :  { %v2283_v58 = vpop.permute.xlu0 %2282 }
0x14f6   :  { %vm2309_vm5 = vcmp.eq.s32.totalorder %v2283_v58, 1  ;;  %v2292_v33 = vpop.permute.xlu1 %2291 }
0x14f7   :  { %vm2312_vm6 = vcmp.eq.s32.totalorder %v2292_v33, 1  ;;  %v9994_v36 = vsel %vm2309_vm5, %v9928_v50, %v9931_v46  ;;  %v1772_v33 = vsub.s32 3, %v9293_v27 }
0x14f8   :  { %v9999_v2 = vsel %vm2312_vm6, %v9928_v50, %v9931_v46  ;;  %vm2628_vm6 = vcmask 785408  }
0x14f9   :  { %v2289_v3 = vpop.permute.xlu0 %2288 }
0x14fa   :  { %vm2311_vm8 = vcmp.eq.s32.totalorder %v2289_v3, 1  ;;  %v2194_v35 = vpop.permute.xlu1 %2193  ;;  %v1765_v3 = vsub.s32 2, %v9293_v27 }
0x14fb   :  { %vm2210_vm9 = vcmp.eq.s32.totalorder %v2194_v35, 1  ;;  %v10005_v40 = vsel %vm2311_vm8, %v9928_v50, %v9931_v46  ;;  %v2461_v35 = vld [vmem:[%s11593_s17 + $0x18] sm:$0xff]  ;;  %vm11621_vm8 = vcmask 36864  }
0x14fc   :  { %v8586_v54 = vpop.eup %8585  ;;  %v10009_v42 = vsel %vm2210_vm9, %v9907_v53, %v9910_v25  ;;  %8191 = vmatpush3.msra.mxu1 %v2461_v35 }
0x14fd   :  { %v1738_v44 = vmul.f32 %v8586_v54, %v9914_v9  ;;  %v2191_v55 = vpop.permute.xlu0 %2190  ;;  %8192 = vmatprep.subr.mxu1 %v9035_v19 }
0x14fe   :  { %vm2209_vm14 = vcmp.eq.s32.totalorder %v2191_v55, 1  ;;  %v2200_v11 = vpop.permute.xlu1 %2199  ;;  %v1779_v55 = vsub.s32 4, %v9293_v27 }
0x14ff   :  { %v1739_v45 = vsel %vm1727_vm0, %v1738_v44, 0.0  ;;  %vm2212_vm15 = vcmp.eq.s32.totalorder %v2200_v11, 1  ;;  %v10015_v56 = vsel %vm2209_vm14, %v9907_v53, %v9910_v25  ;;  %v2459_v11 = vld [vmem:[%s11593_s17 + $0x8] sm:$0xff] }
0x1500   :  { %v1740_v57 = vrot.slane %v1739_v45, 4  ;;  %v10019_v49 = vsel %vm2212_vm15, %v9907_v53, %v9910_v25 }
0x1501   :  { %v2197_v51 = vpop.permute.xlu0 %2196 }
0x1502   :  { %v1741_v47 = vadd.f32 %v1740_v57, %v1739_v45  ;;  %vm2211_vm2 = vcmp.eq.s32.totalorder %v2197_v51, 1  ;;  %v2298_v22 = vpop.permute.xlu1 %2297  ;;  %v2458_v45 = vld [vmem:[%s11593_s17] sm:$0xff] }
0x1503   :  { %vm2314_vm3 = vcmp.eq.s32.totalorder %v2298_v22, 1  ;;  %v10023_v9 = vsel %vm2211_vm2, %v9907_v53, %v9910_v25  ;;  %v1793_v22 = vsub.s32 6, %v9293_v27 }
0x1504   :  { %v1742_v61 = vrot.slane %v1741_v47, 2  ;;  %v2334_v12 = vsel %vm2314_vm3, %v9928_v50, %v9931_v46 }
0x1505   :  { %v2295_v16 = vpop.permute.xlu0 %2294 }
0x1506   :  { %v1743_v20 = vadd.f32 %v1742_v61, %v1741_v47  ;;  %vm2313_vm0 = vcmp.eq.s32.totalorder %v2295_v16, 1  ;;  %v2304_v39 = vpop.permute.xlu1 %2303  ;;  %v1800_v47 = vsub.s32 7, %v9293_v27 }
0x1507   :  { %vm2316_vm4 = vcmp.eq.s32.totalorder %v2304_v39, 1  ;;  %v2333_v60 = vsel %vm2313_vm0, %v9928_v50, %v9931_v46 }
0x1508   :  { %v1744_v28 = vrot.slane %v1743_v20, 1  ;;  %v2336_v29 = vsel %vm2316_vm4, %v9928_v50, %v9931_v46 }
0x1509   :  { %v2301_v5 = vpop.permute.xlu0 %2300 }
0x150a   :  { %v1745_v10 = vadd.f32 %v1744_v28, %v1743_v20  ;;  %vm2315_vm5 = vcmp.eq.s32.totalorder %v2301_v5, 1 }
0x150b   :  { %v2335_v53 = vsel %vm2315_vm5, %v9928_v50, %v9931_v46  ;;  %v2460_v50 = vld [vmem:[%s11593_s17 + $0x10] sm:$0xff] }
0x150c   :  { %v1746_v25 = vadd.f32 1e-30, %v1745_v10  ;;  %8193 = vmatpush3.msra.mxu1 %v2460_v50 }
0x150d   :  { %8194 = vmatprep.subr.mxu1 %v9035_v19 }
0x150e   :  { %8587 = vrcp.f32 %v1746_v25  ;;  %8195 = vmatpush3.msra.mxu1 %v2459_v11  ;;  %v2553_v11 = vld [vmem:[%s11592_s16 + $0x58] sm:$0xff] }
0x150f   :  { %8196 = vmatprep.subr.mxu1 %v9035_v19 }
0x1510   :  { %8197 = vmatpush3.msra.mxu1 %v2458_v45 }
0x1511   :  { %8201 = vmatprep.subr.mxu1 %v9035_v19 }
0x151b   :  { %v8588_v41 = vpop.eup %8587 }
0x151c   :  { %v1748_v14 = vmul.f32 %v8588_v41, %v1738_v44  ;;  %v1786_v44 = vsub.s32 5, %v9293_v27 }
0x151e   :  { %v1759_v15 = vrot.slane %v1748_v14, %v9897_v63  ;;  %v1752_v58 = vrot.slane %v1748_v14, %v9894_v62  ;;  %v1773_v46 = vrot.slane %v1748_v14, %v1772_v33  ;;  %v1766_v54 = vrot.slane %v1748_v14, %v1765_v3 }
0x151f   :  { %v1787_v57 = vrot.slane %v1748_v14, %v1786_v44  ;;  %v1780_v51 = vrot.slane %v1748_v14, %v1779_v55  ;;  %v1801_v61 = vrot.slane %v1748_v14, %v1800_v47  ;;  %v1794_v16 = vrot.slane %v1748_v14, %v1793_v22 }
0x1520   :  { %1761 = vbcast.lane.b32.xlu1 %v1759_v15, 256  ;;  %1754 = vbcast.lane.b32.xlu0 %v1752_v58, 256  ;;  %v2081_v47 = vcombine.high %v9783_v31, %v9783_v31 }
0x1524   :  { %1775 = vbcast.lane.b32.xlu1 %v1773_v46, 256  ;;  %1768 = vbcast.lane.b32.xlu0 %v1766_v54, 256 }
0x1528   :  { %1789 = vbcast.lane.b32.xlu1 %v1787_v57, 256  ;;  %1782 = vbcast.lane.b32.xlu0 %v1780_v51, 256  ;;  %v2552_v57 = vld [vmem:[%s11592_s16 + $0x50] sm:$0xff]  ;;  %v2551_v51 = vld [vmem:[%s11592_s16 + $0x48] sm:$0xff] }
0x152c   :  { %1803 = vbcast.lane.b32.xlu1 %v1801_v61, 256  ;;  %1796 = vbcast.lane.b32.xlu0 %v1794_v16, 256 }
0x1530   :  { %2359 = vrot.lane.b32.xlu1 %v9956_v26, %s9039_s27  ;;  %2357 = vrot.lane.b32.xlu0 %v9966_v13, %s9039_s27 }
0x1534   :  { %2363 = vrot.lane.b32.xlu1 %v9972_v43, %s9039_s27  ;;  %2361 = vrot.lane.b32.xlu0 %v9982_v32, %s9039_s27 }
0x1538   :  { %2407 = vrot.lane.b32.xlu1 %v9987_v48, %s9038_s12  ;;  %2405 = vrot.lane.b32.xlu0 %v9994_v36, %s9038_s12 }
0x153c   :  { %2411 = vrot.lane.b32.xlu1 %v9999_v2, %s9038_s12  ;;  %2409 = vrot.lane.b32.xlu0 %v10005_v40, %s9038_s12 }
0x1540   :  { %2367 = vrot.lane.b32.xlu1 %v10009_v42, %s9039_s27  ;;  %2365 = vrot.lane.b32.xlu0 %v10015_v56, %s9039_s27 }
0x1544   :  { %2371 = vrot.lane.b32.xlu1 %v10019_v49, %s9039_s27  ;;  %2369 = vrot.lane.b32.xlu0 %v10023_v9, %s9039_s27 }
0x1548   :  { %2415 = vrot.lane.b32.xlu1 %v2334_v12, %s9038_s12  ;;  %2413 = vrot.lane.b32.xlu0 %v2333_v60, %s9038_s12 }
0x154b   :  { %v10087_v26 = vpop.permute.xlu0 %2349 }
0x154c   :  { %2419 = vrot.lane.b32.xlu1 %v2336_v29, %s9038_s12  ;;  %2417 = vrot.lane.b32.xlu0 %v2335_v53, %s9038_s12 }
0x154f   :  { %v10091_v43 = vpop.permute.xlu0 %2353 }
0x1556   :  { %v10085_v27 = vpop.permute.xlu1 %2351 }
0x155a   :  { %v10089_v13 = vpop.permute.xlu1 %2355  ;;  %v10093_v32 = vpop.permute.xlu0 %2397 }
0x155e   :  { %v10095_v48 = vpop.permute.xlu1 %2399  ;;  %v10097_v36 = vpop.permute.xlu0 %2401 }
0x1562   :  { %v10099_v2 = vpop.permute.xlu1 %2403 }
0x1592   :  { %v1762_v40 = vpop.permute.xlu1 %1761  ;;  %v1755_v42 = vpop.permute.xlu0 %1754 }
0x1593   :  { %v1806_v56 = vmul.f32 %v1762_v40, %v9714_v8  ;;  %v1805_v49 = vmul.f32 %v1755_v42, %v9709_v34  ;;  %v2550_v40 = vld [vmem:[%s11592_s16 + $0x40] sm:$0xff]  ;;  %v2071_v42 = vrot.slane %v9781_v21, %v9300_v30 }
0x1595   :  { %v1814_v9 = vsel %vm1635_vm7, %v1806_v56, 0.0  ;;  %v1813_v12 = vsel %vm1635_vm7, %v1805_v49, 0.0  ;;  %v2549_v56 = vld [vmem:[%s11592_s16 + $0x38] sm:$0xff]  ;;  %v2088_v49 = vrot.slane %v9783_v31, %v9300_v30  ;;  %v2547_v31 = vld [vmem:[%s11592_s16 + $0x28] sm:$0xff] }
0x1596   :  { %v1776_v20 = vpop.permute.xlu1 %1775  ;;  %v1769_v39 = vpop.permute.xlu0 %1768  ;;  %v1815_v29 = vadd.f32 %v1814_v9, %v1813_v12  ;;  %v2095_v9 = vrot.slane %v2081_v47, %v9300_v30 }
0x1597   :  { %v1808_v60 = vmul.f32 %v1776_v20, %v9696_v17  ;;  %v1807_v28 = vmul.f32 %v1769_v39, %v9686_v52 }
0x1599   :  { %v1816_v5 = vsel %vm1635_vm7, %v1807_v28, 0.0  ;;  %v1818_v8 = vsel %vm1635_vm7, %v1808_v60, 0.0  ;;  %v2079_v60 = vcombine.high %v2071_v42, %v2071_v42 }
0x159a   :  { %v1817_v10 = vadd.f32 %v1816_v5, %v1815_v29  ;;  %v1790_v53 = vpop.permute.xlu1 %1789  ;;  %v1783_v25 = vpop.permute.xlu0 %1782  ;;  %v2096_v29 = vcombine.high %v2088_v49, %v2088_v49  ;;  %v2097_v5 = vcombine.high %v2095_v9, %v2095_v9 }
0x159b   :  { %v1810_v34 = vmul.f32 %v1790_v53, %v9691_v59  ;;  %v1809_v41 = vmul.f32 %v1783_v25, %v9701_v18  ;;  %v10164_v53 = vpop.f32.mrf.mxu0  ;;  %v2098_v25 = vcombine.high %v9789_v38, %v9789_v38 }
0x159c   :  { %v1819_v14 = vadd.f32 %v1818_v8, %v1817_v10  ;;  %v2434_v8 = vsel %vm390_vm11, %v2079_v60, %v10085_v27  ;;  %2887 = vrot.lane.b32.xlu0 %v10164_v53, %s9038_s12 }
0x159d   :  { %v1820_v15 = vsel %vm1635_vm7, %v1809_v41, 0.0  ;;  %v1822_v52 = vsel %vm1635_vm7, %v1810_v34, 0.0 }
0x159e   :  { %v1821_v58 = vadd.f32 %v1820_v15, %v1819_v14  ;;  %v1804_v33 = vpop.permute.xlu1 %1803  ;;  %v1797_v17 = vpop.permute.xlu0 %1796  ;;  %v2105_v14 = vrot.slane %v9789_v38, %v9300_v30  ;;  %v2545_v38 = vld [vmem:[%s11592_s16 + $0x18] sm:$0xff] }
0x159f   :  { %v1812_v3 = vmul.f32 %v1804_v33, %v9723_v37  ;;  %v1811_v35 = vmul.f32 %v1797_v17, %v9719_v1  ;;  %v2064_v37 = vcombine.high %v9781_v21, %v9781_v21  ;;  %v2548_v21 = vld [vmem:[%s11592_s16 + $0x30] sm:$0xff] }
0x15a0   :  { %v1823_v50 = vadd.f32 %v1822_v52, %v1821_v58  ;;  %v8244_v58 = vpop.f32.mrf.mxu0 }
0x15a1   :  { %v1824_v46 = vsel %vm1635_vm7, %v1811_v35, 0.0  ;;  %v1826_v18 = vsel %vm1635_vm7, %v1812_v3, 0.0  ;;  %v2078_v22 = vrot.slane %v2064_v37, %v9300_v30  ;;  %vm2445_vm7 = vcmask 523264  }
0x15a2   :  { %v1825_v54 = vadd.f32 %v1824_v46, %v1823_v50  ;;  %v10116_v44 = vpop.permute.xlu1 %2359  ;;  %v10118_v59 = vpop.permute.xlu0 %2357  ;;  %v2447_v27 = vsel %vm2445_vm7, %v2434_v8, %v10095_v48 }
0x15a3   :  { %v2080_v12 = vcombine.high %v2078_v22, %v2078_v22  ;;  %v2437_v48 = vsel %vm390_vm11, %v2088_v49, %v10118_v59  ;;  %v2112_v59 = vrot.slane %v2098_v25, %v9300_v30 }
0x15a4   :  { %v1827_v55 = vadd.f32 %v1826_v18, %v1825_v54 }
0x15a5   :  { %v2436_v28 = vsel %vm390_vm11, %v2080_v12, %v10089_v13  ;;  %v2435_v13 = vsel %vm390_vm11, %v2078_v22, %v10091_v43  ;;  %v2433_v43 = vsel %vm390_vm11, %v2071_v42, %v10087_v26  ;;  %v2438_v26 = vsel %vm390_vm11, %v2096_v29, %v10116_v44  ;;  %v2544_v44 = vld [vmem:[%s11592_s16 + $0x10] sm:$0xff] }
0x15a6   :  { %v2364_v45 = vpop.permute.xlu1 %2363  ;;  %8199 = vmatmul.mubr.msk.f32.vlgmr.msra.gmra.mxu1 %vm390_vm11, %v1827_v55  ;;  %v2362_v1 = vpop.permute.xlu0 %2361  ;;  %v2449_v10 = vsel %vm2445_vm7, %v2436_v28, %v10099_v2  ;;  %v2546_v2 = vld [vmem:[%s11592_s16 + $0x20] sm:$0xff]  ;;  %v2448_v15 = vsel %vm2445_vm7, %v2435_v13, %v10097_v36  ;;  %v2446_v33 = vsel %vm2445_vm7, %v2433_v43, %v10093_v32  ;;  %v2113_v55 = vcombine.high %v2105_v14, %v2105_v14 }
0x15a7   :  { %8202 = vmatpush3.msra.mxu1 %v2553_v11  ;;  %8225 = vmatprep.mubr.msk.f32.mxu1 %vm9037_vm10, %v9035_v19  ;;  %v2567_v17 = vcombine.low %v2448_v15, %v2449_v10  ;;  %v2440_v52 = vsel %vm390_vm11, %v2097_v5, %v2364_v45  ;;  %v2439_v3 = vsel %vm390_vm11, %v2095_v9, %v2362_v1  ;;  %v2543_v45 = vld [vmem:[%s11592_s16 + $0x8] sm:$0xff] }
0x15a8   :  { %8203 = vmatprep.subr.mxu1 %v9035_v19  ;;  %v2566_v35 = vcombine.low %v2446_v33, %v2447_v27 }
0x15a9   :  { %8204 = vmatpush3.msra.mxu1 %v2552_v57  ;;  %v2581_v11 = vrot.slane %v2567_v17, %v9300_v30 }
0x15aa   :  { %8205 = vmatprep.subr.mxu1 %v9035_v19  ;;  %v2408_v61 = vpop.permute.xlu1 %2407  ;;  %v2406_v16 = vpop.permute.xlu0 %2405  ;;  %v2574_v57 = vrot.slane %v2566_v35, %v9300_v30 }
0x15ab   :  { %8206 = vmatpush3.msra.mxu1 %v2551_v51  ;;  %v2451_v50 = vsel %vm2445_vm7, %v2438_v26, %v2408_v61  ;;  %v2450_v46 = vsel %vm2445_vm7, %v2437_v48, %v2406_v16  ;;  %v2542_v16 = vld [vmem:[%s11592_s16] sm:$0xff] }
0x15ac   :  { %8207 = vmatprep.subr.mxu1 %v9035_v19  ;;  %v2583_v1 = vcombine.low %v2450_v46, %v2451_v50  ;;  %v2582_v49 = vcombine.low %v2574_v57, %v2581_v11 }
0x15ad   :  { %8208 = vmatpush3.msra.mxu1 %v2550_v40 }
0x15ae   :  { %8209 = vmatprep.subr.mxu1 %v9035_v19  ;;  %v2412_v20 = vpop.permute.xlu1 %2411  ;;  %v2410_v39 = vpop.permute.xlu0 %2409  ;;  %v2591_v12 = vrot.slane %v2583_v1, %v9300_v30 }
0x15af   :  { %8210 = vmatpush3.msra.mxu1 %v2549_v56  ;;  %v2453_v36 = vsel %vm2445_vm7, %v2440_v52, %v2412_v20  ;;  %v2452_v32 = vsel %vm2445_vm7, %v2439_v3, %v2410_v39  ;;  %v2114_v56 = vcombine.high %v2112_v59, %v2112_v59 }
0x15b0   :  { %8211 = vmatprep.subr.mxu1 %v9035_v19  ;;  %v2584_v37 = vcombine.low %v2452_v32, %v2453_v36 }
0x15b1   :  { %8212 = vmatpush3.msra.mxu1 %v2548_v21 }
0x15b2   :  { %8213 = vmatprep.subr.mxu1 %v9035_v19  ;;  %v2368_v34 = vpop.permute.xlu1 %2367  ;;  %v2366_v41 = vpop.permute.xlu0 %2365  ;;  %v2598_v9 = vrot.slane %v2584_v37, %v9300_v30 }
0x15b3   :  { %8214 = vmatpush3.msra.mxu1 %v2547_v31  ;;  %v2442_v51 = vsel %vm390_vm11, %v2113_v55, %v2368_v34  ;;  %v2441_v47 = vsel %vm390_vm11, %v2105_v14, %v2366_v41 }
0x15b4   :  { %8215 = vmatprep.subr.mxu1 %v9035_v19  ;;  %v2599_v5 = vcombine.low %v2591_v12, %v2598_v9 }
0x15b5   :  { %8216 = vmatpush3.msra.mxu1 %v2546_v2  ;;  %v7733_v2 = vld [vmem:[#allocation10] ss:$0 sm:$0xff] }
0x15b6   :  { %8217 = vmatprep.subr.mxu1 %v9035_v19  ;;  %v2372_v54 = vpop.permute.xlu1 %2371  ;;  %v2370_v18 = vpop.permute.xlu0 %2369 }
0x15b7   :  { %8218 = vmatpush3.msra.mxu1 %v2545_v38  ;;  %v2444_v20 = vsel %vm390_vm11, %v2114_v56, %v2372_v54  ;;  %v2443_v39 = vsel %vm390_vm11, %v2112_v59, %v2370_v18 }
0x15b8   :  { %8219 = vmatprep.subr.mxu1 %v9035_v19 }
0x15b9   :  { %8220 = vmatpush3.msra.mxu1 %v2544_v44 }
0x15ba   :  { %8221 = vmatprep.subr.mxu1 %v9035_v19  ;;  %v2416_v22 = vpop.permute.xlu1 %2415  ;;  %v2414_v61 = vpop.permute.xlu0 %2413 }
0x15bb   :  { %v2455_v40 = vsel %vm2445_vm7, %v2442_v51, %v2416_v22  ;;  %8222 = vmatpush3.msra.mxu1 %v2543_v45  ;;  %v2454_v42 = vsel %vm2445_vm7, %v2441_v47, %v2414_v61 }
0x15bc   :  { %8223 = vmatprep.subr.mxu1 %v9035_v19  ;;  %v2600_v21 = vcombine.low %v2454_v42, %v2455_v40 }
0x15bd   :  { %8224 = vmatpush3.msra.mxu1 %v2542_v16 }
0x15be   :  { %8226 = vmatmul.mubr.msk.f32.vlgmr.msra.gmra.mxu1 %vm2628_vm6, %v2582_v49  ;;  %v2420_v60 = vpop.permute.xlu1 %2419  ;;  %v2418_v28 = vpop.permute.xlu0 %2417  ;;  %8267 = vmatprep.subr.mxu1 %v9035_v19  ;;  %v2608_v25 = vrot.slane %v2600_v21, %v9300_v30 }
0x15bf   :  { %v2457_v31 = vsel %vm2445_vm7, %v2444_v20, %v2420_v60  ;;  %v2456_v29 = vsel %vm2445_vm7, %v2443_v39, %v2418_v28  ;;  %8228 = vmatprep.mubr.msk.f32.mxu1 %vm9037_vm10, %v9035_v19  ;;  %8268 = vmatpush3.msra.mxu1 %v9939_v4 }
0x15c0   :  { %v2601_v10 = vcombine.low %v2456_v29, %v2457_v31  ;;  %8269 = vmatprep.subr.mxu1 %v9035_v19 }
0x15c1   :  { %8270 = vmatpush3.msra.mxu1 %v9941_v7 }
0x15c2   :  { %v2615_v13 = vrot.slane %v2601_v10, %v9300_v30  ;;  %8229 = vmatmul.mubr.msk.f32.gmra.mxu1 %vm2628_vm6, %v2599_v5  ;;  %8271 = vmatprep.subr.mxu1 %v9035_v19 }
0x15c3   :  { %8231 = vmatprep.mubr.msk.f32.mxu1 %vm9037_vm10, %v9035_v19  ;;  %8272 = vmatpush3.msra.mxu1 %v9950_v24 }
0x15c4   :  { %v2616_v8 = vcombine.low %v2608_v25, %v2615_v13  ;;  %8273 = vmatprep.subr.mxu1 %v9035_v19 }
0x15c5   :  { %8274 = vmatpush3.msra.mxu1 %v9959_v6 }
0x15c6   :  { %8232 = vmatmul.mubr.msk.f32.gmra.mxu1 %vm2628_vm6, %v2616_v8  ;;  %8289 = vmatprep.subr.mxu1 %v9035_v19 }
0x15c7   :  { %8275 = vmatprep.mubr.msk.f32.mxu1 %vm9037_vm10, %v9035_v19 }
0x1666   :  { %v2538_v34 = vpop.f32.mrf.mxu1 }
0x1667   :  { %v2539_v14 = vadd.f32 %v7733_v2, %v2538_v34 }
0x1668   :  { %v8200_v41 = vpop.f32.mrf.mxu1 }
0x1669   :  { %v2618_v43 = vcombine.low %v2539_v14, %v2539_v14 }
0x166b   :  { %v2625_v27 = vrot.slane %v2618_v43, %v9300_v30 }
0x166d   :  { %v2626_v15 = vcombine.low %v2625_v27, %v2625_v27 }
0x167e   :  { %v2701_v58 = vpop.f32.mrf.mxu1 }
0x167f   :  { %v2702_v33 = vadd.f32 %v2701_v58, %v2626_v15 }
0x1680   :  { %v8227_v17 = vpop.f32.mrf.mxu1 }
0x1681   :  { %v2718_v52 = vcombine.high %v2702_v33, %v2702_v33  ;;  %v2725_v3 = vrot.slane %v2702_v33, %v9300_v30 }
0x1682   :  { %v2706_v38 = vpop.f32.mrf.mxu1 }
0x1683   :  { %v2707_v26 = vadd.f32 %v2706_v38, %v2626_v15  ;;  %v2864_v48 = vrot.slane %v2725_v3, %v9300_v30  ;;  %v10252_v32 = vrot.slane %v2718_v52, %v9300_v30  ;;  %v2733_v47 = vcombine.high %v2725_v3, %v2725_v3 }
0x1684   :  { %v8230_v36 = vpop.f32.mrf.mxu1 }
0x1685   :  { %v2735_v35 = vcombine.high %v2707_v26, %v2707_v26  ;;  %v10255_v50 = vrot.slane %v2707_v26, %v9300_v30  ;;  %2865 = vrot.lane.b32.xlu1 %v2864_v48, %s9038_s12  ;;  %v10270_v37 = vcombine.high %v10252_v32, %v10252_v32 }
0x1686   :  { %v2711_v46 = vpop.f32.mrf.mxu1 }
0x1687   :  { %v10259_v54 = vrot.slane %v2735_v35, %v9300_v30  ;;  %v2712_v18 = vadd.f32 %v2711_v46, %v2626_v15  ;;  %v10263_v44 = vcombine.high %v10255_v50, %v10255_v50 }
0x1688   :  { %v8233_v59 = vpop.f32.mrf.mxu1 }
0x1689   :  { %v2752_v55 = vcombine.high %v2712_v18, %v2712_v18  ;;  %v10266_v11 = vrot.slane %v2712_v18, %v9300_v30  ;;  %v10274_v45 = vcombine.high %v10259_v54, %v10259_v54  ;;  %v3460_v1 = vsel %vm593_vm12, %v10263_v44, %v10259_v54 }
0x168a   :  { %v3581_v57 = vsel %vm593_vm12, %v10259_v54, %v10263_v44  ;;  %v3461_v42 = vsel %vm390_vm11, %v3460_v1, %v10263_v44  ;;  %v2888_v1 = vpop.permute.xlu0 %2887 }
0x168b   :  { %v10283_v51 = vrot.slane %v2752_v55, %v9300_v30  ;;  %v10287_v22 = vcombine.high %v10266_v11, %v10266_v11  ;;  %v3218_v61 = vsel %vm593_vm12, %v10270_v37, %v10266_v11  ;;  %v3339_v40 = vsel %vm593_vm12, %v10255_v50, %v10274_v45 }
0x168c   :  { %v3219_v16 = vsel %vm390_vm11, %v3218_v61, %v10270_v37  ;;  %v3340_v5 = vsel %vm390_vm11, %v3339_v40, %v10255_v50  ;;  %v10326_v10 = vsel %vm596_vm13, %v3461_v42, %v10259_v54  ;;  %v3582_v25 = vsel %vm390_vm11, %v3581_v57, %v10259_v54 }
0x168d   :  { %v2768_v56 = vcombine.high %v10283_v51, %v10283_v51  ;;  %v2976_v49 = vsel %vm593_vm12, %v2733_v47, %v10283_v51  ;;  %v3097_v9 = vsel %vm593_vm12, %v10252_v32, %v10287_v22  ;;  %v10311_v39 = vsel %vm596_vm13, %v3219_v16, %v10266_v11 }
0x168e   :  { %v2977_v12 = vsel %vm390_vm11, %v2976_v49, %v2733_v47  ;;  %v3098_v20 = vsel %vm390_vm11, %v3097_v9, %v10252_v32  ;;  %v10334_v8 = vsel %vm596_vm13, %v3340_v5, %v10274_v45  ;;  %v10338_v34 = vsel %vm596_vm13, %v3582_v25, %v10263_v44 }
0x168f   :  { %v2874_v21 = vrot.slane %v2768_v56, %v9300_v30  ;;  %v2855_v60 = vsel %vm593_vm12, %v2725_v3, %v2768_v56  ;;  %v2978_v28 = vsel %vm596_vm13, %v2977_v12, %v10283_v51  ;;  %v10319_v31 = vsel %vm596_vm13, %v3098_v20, %v10287_v22 }
0x1690   :  { %v2856_v29 = vsel %vm390_vm11, %v2855_v60, %v2725_v3  ;;  %v3682_v41 = vsel %vm593_vm12, %v10274_v45, %v10255_v50  ;;  %v3783_v14 = vsel %vm593_vm12, %v10266_v11, %v10270_v37  ;;  %v3884_v43 = vsel %vm593_vm12, %v10287_v22, %v10252_v32 }
0x1691   :  { %2875 = vrot.lane.b32.xlu0 %v2874_v21, %s9038_s12  ;;  %v2857_v13 = vsel %vm596_vm13, %v2856_v29, %v2768_v56  ;;  %v3683_v2 = vsel %vm390_vm11, %v3682_v41, %v10274_v45  ;;  %v3784_v15 = vsel %vm390_vm11, %v3783_v14, %v10266_v11  ;;  %v3885_v58 = vsel %vm390_vm11, %v3884_v43, %v10287_v22 }
0x1692   :  { %v10353_v27 = vsel %vm596_vm13, %v3683_v2, %v10255_v50  ;;  %v3985_v33 = vsel %vm593_vm12, %v10283_v51, %v2733_v47  ;;  %v10363_v17 = vsel %vm596_vm13, %v3784_v15, %v10270_v37  ;;  %v10367_v52 = vsel %vm596_vm13, %v3885_v58, %v10252_v32 }
0x1693   :  { %v3986_v38 = vsel %vm390_vm11, %v3985_v33, %v10283_v51  ;;  %v4086_v48 = vsel %vm593_vm12, %v2768_v56, %v2725_v3  ;;  %v2879_v46 = vadd.f32 %v2857_v13, %v10164_v53  ;;  %v2985_v21 = vrot.slane %v2733_v47, %v9300_v30 }
0x1694   :  { %v10372_v26 = vsel %vm596_vm13, %v3986_v38, %v2733_v47  ;;  %v4087_v36 = vsel %vm390_vm11, %v4086_v48, %v2768_v56  ;;  %v2995_v25 = vrot.slane %v10283_v51, %v9300_v30 }
0x1695   :  { %v10377_v35 = vsel %vm596_vm13, %v4087_v36, %v2725_v3  ;;  %v7738_v18 = vmul.f32 -1.442695, %v2879_v46  ;;  %vm4394_vm13 = vcmask 1044480  }
0x1697   :  { %8589 = vpow2.f32 %v7738_v18 }
0x16a4   :  { %v8590_v59 = vpop.eup %8589 }
0x16a5   :  { %v2883_v55 = vadd.f32 1.0, %v8590_v59 }
0x16a7   :  { %8591 = vrcp.f32 %v2883_v55  ;;  %v3106_v55 = vrot.slane %v10252_v32, %v9300_v30 }
0x16b4   :  { %v8592_v57 = vpop.eup %8591 }
0x16b5   :  { %v2890_v61 = vmul.f32 %v8592_v57, %v2888_v1  ;;  %v2893_v53 = vsub.f32 1.0, %v8592_v57  ;;  %v2899_v9 = vmul.f32 0.0, %v8592_v57 }
0x16f7   :  { %v10380_v16 = vpop.permute.xlu1 %2865 }
0x1703   :  { %v10382_v40 = vpop.permute.xlu0 %2875 }
0x1704   :  { %v2878_v42 = vsel %vm593_vm12, %v10380_v16, %v10382_v40 }
0x1705   :  { %v2891_v3 = vadd.f32 %v2890_v61, %v2878_v42  ;;  %v3116_v42 = vrot.slane %v10287_v22, %v9300_v30 }
0x1707   :  { %8593 = vtanh.f32 %v2891_v3 }
0x1714   :  { %v8594_v56 = vpop.eup %8593 }
0x1715   :  { %2895 = vrot.lane.b32.xlu1 %v8594_v56, %s9039_s27 }
0x1787   :  { %v2896_v49 = vpop.permute.xlu1 %2895 }
0x1788   :  { %v2898_v12 = vmul.f32 %v2896_v49, %v2893_v53 }
0x178a   :  { %v2900_v20 = vadd.f32 %v2899_v9, %v2898_v12 }
0x178c   :  { %2902 = vrot.lane.b32.xlu0 %v2900_v20, %s9040_s7 }
0x1790   :  { %2986 = vrot.lane.b32.xlu0 %v2985_v21, %s9038_s12 }
0x17fe   :  { %v10391_v60 = vpop.permute.xlu0 %2902 }
0x17ff   :  { %8254 = vmatmul.mubr.msk.f32.vlgmr.msra.gmra.mxu0 %vm390_vm11, %v10391_v60 }
0x1800   :  { %8257 = vmatpush3.msra.mxu0 %v9939_v4  ;;  %8264 = vmatprep.mubr.msk.f32.mxu0 %vm9037_vm10, %v9035_v19 }
0x1801   :  { %8258 = vmatprep.subr.mxu0 %v9035_v19 }
0x1802   :  { %8259 = vmatpush3.msra.mxu0 %v9941_v7  ;;  %v10409_v15 = vpop.permute.xlu0 %2986 }
0x1803   :  { %8260 = vmatprep.subr.mxu0 %v9035_v19 }
0x1804   :  { %8261 = vmatpush3.msra.mxu0 %v9950_v24 }
0x1805   :  { %8262 = vmatprep.subr.mxu0 %v9035_v19 }
0x1806   :  { %8263 = vmatpush3.msra.mxu0 %v9959_v6 }
0x1807   :  { %8278 = vmatprep.subr.mxu0 %v9035_v19 }
0x18bf   :  { %v2972_v47 = vpop.f32.mrf.mxu0 }
0x18c0   :  { %v3000_v29 = vadd.f32 %v2978_v28, %v2972_v47  ;;  %3008 = vrot.lane.b32.xlu1 %v2972_v47, %s9038_s12 }
0x18c1   :  { %v8255_v5 = vpop.f32.mrf.mxu0 }
0x18c2   :  { %v7740_v13 = vmul.f32 -1.442695, %v3000_v29 }
0x18c4   :  { %2996 = vrot.lane.b32.xlu1 %v2995_v25, %s9038_s12  ;;  %8595 = vpow2.f32 %v7740_v13 }
0x18d1   :  { %v8596_v41 = vpop.eup %8595 }
0x18d2   :  { %v3004_v2 = vadd.f32 1.0, %v8596_v41 }
0x18d4   :  { %8597 = vrcp.f32 %v3004_v2  ;;  %v3227_v2 = vrot.slane %v10270_v37, %v9300_v30 }
0x18e1   :  { %v8598_v43 = vpop.eup %8597 }
0x18e2   :  { %v3014_v48 = vsub.f32 1.0, %v8598_v43  ;;  %v3020_v46 = vmul.f32 %v8598_v43, %v2900_v20 }
0x1932   :  { %v3009_v14 = vpop.permute.xlu1 %3008 }
0x1933   :  { %v3011_v58 = vmul.f32 %v8598_v43, %v3009_v14 }
0x1936   :  { %v10411_v33 = vpop.permute.xlu1 %2996 }
0x1937   :  { %v2999_v28 = vsel %vm593_vm12, %v10409_v15, %v10411_v33 }
0x1938   :  { %v3012_v38 = vadd.f32 %v3011_v58, %v2999_v28  ;;  %v3237_v58 = vrot.slane %v10266_v11, %v9300_v30 }
0x193a   :  { %8599 = vtanh.f32 %v3012_v38 }
0x1947   :  { %v8600_v51 = vpop.eup %8599 }
0x1948   :  { %3016 = vrot.lane.b32.xlu0 %v8600_v51, %s9039_s27 }
0x19ba   :  { %v3017_v36 = vpop.permute.xlu0 %3016 }
0x19bb   :  { %v3019_v18 = vmul.f32 %v3017_v36, %v3014_v48 }
0x19bd   :  { %v3021_v59 = vadd.f32 %v3020_v46, %v3019_v18 }
0x19bf   :  { %3023 = vrot.lane.b32.xlu1 %v3021_v59, %s9040_s7 }
0x19c3   :  { %3107 = vrot.lane.b32.xlu1 %v3106_v55, %s9038_s12 }
0x1a31   :  { %v10421_v1 = vpop.permute.xlu1 %3023 }
0x1a32   :  { %8265 = vmatmul.mubr.msk.f32.vlgmr.msra.gmra.mxu0 %vm390_vm11, %v10421_v1 }
0x1a33   :  { %8279 = vmatpush3.msra.mxu0 %v9939_v4  ;;  %8286 = vmatprep.mubr.msk.f32.mxu0 %vm9037_vm10, %v9035_v19 }
0x1a34   :  { %8280 = vmatprep.subr.mxu0 %v9035_v19 }
0x1a35   :  { %8281 = vmatpush3.msra.mxu0 %v9941_v7  ;;  %v10440_v12 = vpop.permute.xlu1 %3107 }
0x1a36   :  { %8282 = vmatprep.subr.mxu0 %v9035_v19 }
0x1a37   :  { %8283 = vmatpush3.msra.mxu0 %v9950_v24 }
0x1a38   :  { %8284 = vmatprep.subr.mxu0 %v9035_v19 }
0x1a39   :  { %8285 = vmatpush3.msra.mxu0 %v9959_v6 }
0x1a3a   :  { %8300 = vmatprep.subr.mxu0 %v9035_v19 }
0x1af2   :  { %v3093_v32 = vpop.f32.mrf.mxu0 }
0x1af3   :  { %v3121_v57 = vadd.f32 %v10319_v31, %v3093_v32  ;;  %3129 = vrot.lane.b32.xlu0 %v3093_v32, %s9038_s12 }
0x1af4   :  { %v8266_v61 = vpop.f32.mrf.mxu0 }
0x1af5   :  { %v7742_v3 = vmul.f32 -1.442695, %v3121_v57  ;;  %v3348_v61 = vrot.slane %v10255_v50, %v9300_v30  ;;  %v10497_v50 = vld [vmem:[#allocation8 + $0x8] sm:$0xff] }
0x1af7   :  { %3117 = vrot.lane.b32.xlu0 %v3116_v42, %s9038_s12  ;;  %8601 = vpow2.f32 %v7742_v3  ;;  %v10487_v3 = vld [vmem:[#allocation8 + $0x18] sm:$0xff] }
0x1b04   :  { %v8602_v56 = vpop.eup %8601 }
0x1b05   :  { %v3125_v53 = vadd.f32 1.0, %v8602_v56  ;;  %v10493_v56 = vld [vmem:[#allocation8 + $0x10] sm:$0xff] }
0x1b07   :  { %8603 = vrcp.f32 %v3125_v53  ;;  %v10501_v53 = vld [vmem:[#allocation8] sm:$0xff] }
0x1b14   :  { %v8604_v9 = vpop.eup %8603 }
0x1b15   :  { %v3135_v29 = vsub.f32 1.0, %v8604_v9  ;;  %v3141_v25 = vmul.f32 %v8604_v9, %v3021_v59 }
0x1b65   :  { %v3130_v49 = vpop.permute.xlu0 %3129 }
0x1b66   :  { %v3132_v20 = vmul.f32 %v8604_v9, %v3130_v49 }
0x1b69   :  { %v10442_v21 = vpop.permute.xlu0 %3117 }
0x1b6a   :  { %v3120_v31 = vsel %vm593_vm12, %v10440_v12, %v10442_v21 }
0x1b6b   :  { %v3133_v47 = vadd.f32 %v3132_v20, %v3120_v31  ;;  %v3358_v31 = vrot.slane %v10274_v45, %v9300_v30 }
0x1b6d   :  { %8605 = vtanh.f32 %v3133_v47 }
0x1b7a   :  { %v8606_v22 = vpop.eup %8605 }
0x1b7b   :  { %3137 = vrot.lane.b32.xlu1 %v8606_v22, %s9039_s27 }
0x1bed   :  { %v3138_v5 = vpop.permute.xlu1 %3137 }
0x1bee   :  { %v3140_v13 = vmul.f32 %v3138_v5, %v3135_v29 }
0x1bf0   :  { %v3142_v41 = vadd.f32 %v3141_v25, %v3140_v13 }
0x1bf2   :  { %3144 = vrot.lane.b32.xlu0 %v3142_v41, %s9040_s7 }
0x1bf6   :  { %3228 = vrot.lane.b32.xlu0 %v3227_v2, %s9038_s12 }
0x1c64   :  { %v10452_v14 = vpop.permute.xlu0 %3144 }
0x1c65   :  { %8276 = vmatmul.mubr.msk.f32.vlgmr.msra.gmra.mxu1 %vm390_vm11, %v10452_v14 }
0x1c66   :  { %8290 = vmatpush3.msra.mxu1 %v9939_v4  ;;  %8297 = vmatprep.mubr.msk.f32.mxu1 %vm9037_vm10, %v9035_v19 }
0x1c67   :  { %8291 = vmatprep.subr.mxu1 %v9035_v19 }
0x1c68   :  { %8292 = vmatpush3.msra.mxu1 %v9941_v7  ;;  %v10471_v51 = vpop.permute.xlu0 %3228 }
0x1c69   :  { %8293 = vmatprep.subr.mxu1 %v9035_v19 }
0x1c6a   :  { %8294 = vmatpush3.msra.mxu1 %v9950_v24 }
0x1c6b   :  { %8295 = vmatprep.subr.mxu1 %v9035_v19 }
0x1c6c   :  { %8296 = vmatpush3.msra.mxu1 %v9959_v6 }
0x1c6d   :  { %8311 = vmatprep.subr.mxu1 %v9035_v19 }
0x1d25   :  { %v3214_v37 = vpop.f32.mrf.mxu1 }
0x1d26   :  { %v3242_v4 = vadd.f32 %v10311_v39, %v3214_v37  ;;  %3250 = vrot.lane.b32.xlu1 %v3214_v37, %s9038_s12 }
0x1d27   :  { %v8277_v43 = vpop.f32.mrf.mxu1 }
0x1d28   :  { %v7744_v7 = vmul.f32 -1.442695, %v3242_v4 }
0x1d2a   :  { %3238 = vrot.lane.b32.xlu1 %v3237_v58, %s9038_s12  ;;  %8607 = vpow2.f32 %v7744_v7 }
0x1d37   :  { %v8608_v24 = vpop.eup %8607 }
0x1d38   :  { %v3246_v28 = vadd.f32 1.0, %v8608_v24 }
0x1d3a   :  { %8609 = vrcp.f32 %v3246_v28  ;;  %v3469_v28 = vrot.slane %v10263_v44, %v9300_v30 }
0x1d47   :  { %v8610_v6 = vpop.eup %8609 }
0x1d48   :  { %v3256_v18 = vsub.f32 1.0, %v8610_v6  ;;  %v3262_v55 = vmul.f32 %v8610_v6, %v3142_v41 }
0x1d98   :  { %v3251_v38 = vpop.permute.xlu1 %3250 }
0x1d99   :  { %v3253_v48 = vmul.f32 %v8610_v6, %v3251_v38 }
0x1d9c   :  { %v10473_v36 = vpop.permute.xlu1 %3238 }
0x1d9d   :  { %v3241_v39 = vsel %vm593_vm12, %v10471_v51, %v10473_v36 }
0x1d9e   :  { %v3254_v46 = vadd.f32 %v3253_v48, %v3241_v39  ;;  %v3479_v39 = vrot.slane %v10259_v54, %v9300_v30 }
0x1da0   :  { %8611 = vtanh.f32 %v3254_v46 }
0x1dad   :  { %v8612_v11 = vpop.eup %8611 }
0x1dae   :  { %3258 = vrot.lane.b32.xlu0 %v8612_v11, %s9039_s27 }
0x1e20   :  { %v3259_v59 = vpop.permute.xlu0 %3258 }
0x1e21   :  { %v3261_v32 = vmul.f32 %v3259_v59, %v3256_v18 }
0x1e23   :  { %v3263_v57 = vadd.f32 %v3262_v55, %v3261_v32 }
0x1e25   :  { %3265 = vrot.lane.b32.xlu1 %v3263_v57, %s9040_s7 }
0x1e29   :  { %3349 = vrot.lane.b32.xlu1 %v3348_v61, %s9038_s12 }
0x1e97   :  { %v10483_v42 = vpop.permute.xlu1 %3265 }
0x1e98   :  { %8287 = vmatmul.mubr.msk.f32.vlgmr.msra.gmra.mxu0 %vm390_vm11, %v10483_v42 }
0x1e99   :  { %8301 = vmatpush3.msra.mxu0 %v10487_v3  ;;  %8308 = vmatprep.mubr.msk.f32.mxu0 %vm9037_vm10, %v9035_v19 }
0x1e9a   :  { %8302 = vmatprep.subr.mxu0 %v9035_v19 }
0x1e9b   :  { %8303 = vmatpush3.msra.mxu0 %v10493_v56  ;;  %v10510_v13 = vpop.permute.xlu1 %3349 }
0x1e9c   :  { %8304 = vmatprep.subr.mxu0 %v9035_v19 }
0x1e9d   :  { %8305 = vmatpush3.msra.mxu0 %v10497_v50 }
0x1e9e   :  { %8306 = vmatprep.subr.mxu0 %v9035_v19 }
0x1e9f   :  { %8307 = vmatpush3.msra.mxu0 %v10501_v53 }
0x1ea0   :  { %8322 = vmatprep.subr.mxu0 %v9035_v19 }
0x1f58   :  { %v3335_v49 = vpop.f32.mrf.mxu0 }
0x1f59   :  { %v3363_v9 = vadd.f32 %v10334_v8, %v3335_v49  ;;  %3371 = vrot.lane.b32.xlu0 %v3335_v49, %s9038_s12 }
0x1f5a   :  { %v8288_v20 = vpop.f32.mrf.mxu0 }
0x1f5b   :  { %v7746_v47 = vmul.f32 -1.442695, %v3363_v9 }
0x1f5d   :  { %3359 = vrot.lane.b32.xlu0 %v3358_v31, %s9038_s12  ;;  %8613 = vpow2.f32 %v7746_v47 }
0x1f6a   :  { %v8614_v22 = vpop.eup %8613 }
0x1f6b   :  { %v3367_v29 = vadd.f32 1.0, %v8614_v22 }
0x1f6d   :  { %8615 = vrcp.f32 %v3367_v29 }
0x1f7a   :  { %v8616_v25 = vpop.eup %8615 }
0x1f7b   :  { %v3377_v4 = vsub.f32 1.0, %v8616_v25  ;;  %v3383_v58 = vmul.f32 %v8616_v25, %v3263_v57 }
0x1fcb   :  { %v3372_v5 = vpop.permute.xlu0 %3371 }
0x1fcc   :  { %v3374_v41 = vmul.f32 %v8616_v25, %v3372_v5 }
0x1fcf   :  { %v10512_v2 = vpop.permute.xlu0 %3359 }
0x1fd0   :  { %v3362_v8 = vsel %vm593_vm12, %v10510_v13, %v10512_v2 }
0x1fd1   :  { %v3375_v37 = vadd.f32 %v3374_v41, %v3362_v8 }
0x1fd3   :  { %8617 = vtanh.f32 %v3375_v37 }
0x1fe0   :  { %v8618_v45 = vpop.eup %8617 }
0x1fe1   :  { %3379 = vrot.lane.b32.xlu1 %v8618_v45, %s9039_s27 }
0x2053   :  { %v3380_v43 = vpop.permute.xlu1 %3379 }
0x2054   :  { %v3382_v7 = vmul.f32 %v3380_v43, %v3377_v4 }
0x2056   :  { %v3384_v24 = vadd.f32 %v3383_v58, %v3382_v7 }
0x2058   :  { %3386 = vrot.lane.b32.xlu0 %v3384_v24, %s9040_s7 }
0x205c   :  { %3470 = vrot.lane.b32.xlu0 %v3469_v28, %s9038_s12 }
0x20ca   :  { %v10522_v38 = vpop.permute.xlu0 %3386 }
0x20cb   :  { %8298 = vmatmul.mubr.msk.f32.vlgmr.msra.gmra.mxu1 %vm390_vm11, %v10522_v38 }
0x20cc   :  { %8312 = vmatpush3.msra.mxu1 %v10487_v3  ;;  %8319 = vmatprep.mubr.msk.f32.mxu1 %vm9037_vm10, %v9035_v19 }
0x20cd   :  { %8313 = vmatprep.subr.mxu1 %v9035_v19 }
0x20ce   :  { %8314 = vmatpush3.msra.mxu1 %v10493_v56  ;;  %v3471_v32 = vpop.permute.xlu0 %3470 }
0x20cf   :  { %8315 = vmatprep.subr.mxu1 %v9035_v19 }
0x20d0   :  { %8316 = vmatpush3.msra.mxu1 %v10497_v50 }
0x20d1   :  { %8317 = vmatprep.subr.mxu1 %v9035_v19 }
0x20d2   :  { %8318 = vmatpush3.msra.mxu1 %v10501_v53 }
0x20d3   :  { %8333 = vmatprep.subr.mxu1 %v9035_v19 }
0x218b   :  { %v3456_v44 = vpop.f32.mrf.mxu1 }
0x218c   :  { %v3484_v6 = vadd.f32 %v10326_v10, %v3456_v44  ;;  %3492 = vrot.lane.b32.xlu1 %v3456_v44, %s9038_s12 }
0x218d   :  { %v8299_v48 = vpop.f32.mrf.mxu1 }
0x218e   :  { %v7748_v46 = vmul.f32 -1.442695, %v3484_v6 }
0x2190   :  { %3480 = vrot.lane.b32.xlu1 %v3479_v39, %s9038_s12  ;;  %8619 = vpow2.f32 %v7748_v46 }
0x219d   :  { %v8620_v11 = vpop.eup %8619 }
0x219e   :  { %v3488_v18 = vadd.f32 1.0, %v8620_v11 }
0x21a0   :  { %8621 = vrcp.f32 %v3488_v18 }
0x21ad   :  { %v8622_v55 = vpop.eup %8621 }
0x21ae   :  { %v3498_v54 = vsub.f32 1.0, %v8622_v55  ;;  %v3504_v31 = vmul.f32 %v8622_v55, %v3384_v24 }
0x21fe   :  { %v3493_v59 = vpop.permute.xlu1 %3492 }
0x21ff   :  { %v3495_v57 = vmul.f32 %v8622_v55, %v3493_v59 }
0x2202   :  { %v3481_v61 = vpop.permute.xlu1 %3480 }
0x2203   :  { %v3483_v10 = vsel %vm593_vm12, %v3471_v32, %v3481_v61  ;;  %v3584_v7 = vsel %vm593_vm12, %v3481_v61, %v3471_v32 }
0x2204   :  { %v3496_v49 = vadd.f32 %v3495_v57, %v3483_v10 }
0x2206   :  { %8623 = vtanh.f32 %v3496_v49 }
0x2213   :  { %v8624_v9 = vpop.eup %8623 }
0x2214   :  { %3500 = vrot.lane.b32.xlu0 %v8624_v9, %s9039_s27  ;;  %v3685_v9 = vsel %vm593_vm12, %v10512_v2, %v10510_v13 }
0x2286   :  { %v3501_v20 = vpop.permute.xlu0 %3500 }
0x2287   :  { %v3503_v47 = vmul.f32 %v3501_v20, %v3498_v54 }
0x2289   :  { %v3505_v22 = vadd.f32 %v3504_v31, %v3503_v47 }
0x228b   :  { %3507 = vrot.lane.b32.xlu1 %v3505_v22, %s9040_s7 }
0x22fd   :  { %v10544_v29 = vpop.permute.xlu1 %3507 }
0x22fe   :  { %8309 = vmatmul.mubr.msk.f32.vlgmr.msra.gmra.mxu0 %vm390_vm11, %v10544_v29 }
0x22ff   :  { %8323 = vmatpush3.msra.mxu0 %v10487_v3  ;;  %8330 = vmatprep.mubr.msk.f32.mxu0 %vm9037_vm10, %v9035_v19 }
0x2300   :  { %8324 = vmatprep.subr.mxu0 %v9035_v19 }
0x2301   :  { %8325 = vmatpush3.msra.mxu0 %v10493_v56 }
0x2302   :  { %8326 = vmatprep.subr.mxu0 %v9035_v19 }
0x2303   :  { %8327 = vmatpush3.msra.mxu0 %v10497_v50 }
0x2304   :  { %8328 = vmatprep.subr.mxu0 %v9035_v19 }
0x2305   :  { %8329 = vmatpush3.msra.mxu0 %v10501_v53 }
0x2306   :  { %8344 = vmatprep.subr.mxu0 %v9035_v19 }
0x23be   :  { %v3577_v5 = vpop.f32.mrf.mxu0 }
0x23bf   :  { %v3585_v25 = vadd.f32 %v10338_v34, %v3577_v5  ;;  %3593 = vrot.lane.b32.xlu0 %v3577_v5, %s9038_s12 }
0x23c0   :  { %v8310_v41 = vpop.f32.mrf.mxu0 }
0x23c1   :  { %v7750_v8 = vmul.f32 -1.442695, %v3585_v25 }
0x23c3   :  { %8625 = vpow2.f32 %v7750_v8 }
0x23d0   :  { %v8626_v37 = vpop.eup %8625 }
0x23d1   :  { %v3589_v45 = vadd.f32 1.0, %v8626_v37 }
0x23d3   :  { %8627 = vrcp.f32 %v3589_v45 }
0x23e0   :  { %v8628_v4 = vpop.eup %8627 }
0x23e1   :  { %v3599_v44 = vsub.f32 1.0, %v8628_v4  ;;  %v3605_v6 = vmul.f32 %v8628_v4, %v3505_v22 }
0x2431   :  { %v3594_v43 = vpop.permute.xlu0 %3593 }
0x2432   :  { %v3596_v58 = vmul.f32 %v8628_v4, %v3594_v43 }
0x2434   :  { %v3597_v24 = vadd.f32 %v3596_v58, %v3584_v7  ;;  %v3786_v7 = vsel %vm593_vm12, %v10473_v36, %v10471_v51 }
0x2436   :  { %8629 = vtanh.f32 %v3597_v24 }
0x2443   :  { %v8630_v28 = vpop.eup %8629 }
0x2444   :  { %3601 = vrot.lane.b32.xlu1 %v8630_v28, %s9039_s27 }
0x24b6   :  { %v3602_v34 = vpop.permute.xlu1 %3601 }
0x24b7   :  { %v3604_v48 = vmul.f32 %v3602_v34, %v3599_v44 }
0x24b9   :  { %v3606_v39 = vadd.f32 %v3605_v6, %v3604_v48 }
0x24bb   :  { %3608 = vrot.lane.b32.xlu0 %v3606_v39, %s9040_s7 }
0x252d   :  { %v10563_v46 = vpop.permute.xlu0 %3608 }
0x252e   :  { %8320 = vmatmul.mubr.msk.f32.vlgmr.msra.gmra.mxu1 %vm390_vm11, %v10563_v46 }
0x252f   :  { %8334 = vmatpush3.msra.mxu1 %v10487_v3  ;;  %8341 = vmatprep.mubr.msk.f32.mxu1 %vm9037_vm10, %v9035_v19 }
0x2530   :  { %8335 = vmatprep.subr.mxu1 %v9035_v19 }
0x2531   :  { %8336 = vmatpush3.msra.mxu1 %v10493_v56 }
0x2532   :  { %8337 = vmatprep.subr.mxu1 %v9035_v19 }
0x2533   :  { %8338 = vmatpush3.msra.mxu1 %v10497_v50 }
0x2534   :  { %8339 = vmatprep.subr.mxu1 %v9035_v19 }
0x2535   :  { %8340 = vmatpush3.msra.mxu1 %v10501_v53 }
0x2536   :  { %8355 = vmatprep.subr.mxu1 %v9035_v19 }
0x25ee   :  { %v3678_v11 = vpop.f32.mrf.mxu1 }
0x25ef   :  { %v3686_v18 = vadd.f32 %v10353_v27, %v3678_v11  ;;  %3694 = vrot.lane.b32.xlu1 %v3678_v11, %s9038_s12 }
0x25f0   :  { %v8321_v59 = vpop.f32.mrf.mxu1 }
0x25f1   :  { %v7752_v55 = vmul.f32 -1.442695, %v3686_v18 }
0x25f3   :  { %8631 = vpow2.f32 %v7752_v55 }
0x2600   :  { %v8632_v32 = vpop.eup %8631 }
0x2601   :  { %v3690_v57 = vadd.f32 1.0, %v8632_v32 }
0x2603   :  { %8633 = vrcp.f32 %v3690_v57 }
0x2610   :  { %v8634_v61 = vpop.eup %8633 }
0x2611   :  { %v3700_v27 = vsub.f32 1.0, %v8634_v61  ;;  %v3706_v47 = vmul.f32 %v8634_v61, %v3606_v39 }
0x2661   :  { %v3695_v10 = vpop.permute.xlu1 %3694 }
0x2662   :  { %v3697_v49 = vmul.f32 %v8634_v61, %v3695_v10 }
0x2664   :  { %v3698_v54 = vadd.f32 %v3697_v49, %v3685_v9 }
0x2666   :  { %8635 = vtanh.f32 %v3698_v54 }
0x2673   :  { %v8636_v20 = vpop.eup %8635 }
0x2674   :  { %3702 = vrot.lane.b32.xlu0 %v8636_v20, %s9039_s27 }
0x26e6   :  { %v3703_v31 = vpop.permute.xlu0 %3702 }
0x26e7   :  { %v3705_v22 = vmul.f32 %v3703_v31, %v3700_v27 }
0x26e9   :  { %v3707_v5 = vadd.f32 %v3706_v47, %v3705_v22 }
0x26eb   :  { %3709 = vrot.lane.b32.xlu1 %v3707_v5, %s9040_s7 }
0x275d   :  { %v10584_v25 = vpop.permute.xlu1 %3709 }
0x275e   :  { %8331 = vmatmul.mubr.msk.f32.vlgmr.msra.gmra.mxu0 %vm390_vm11, %v10584_v25 }
0x275f   :  { %8345 = vmatpush3.msra.mxu0 %v10487_v3  ;;  %8352 = vmatprep.mubr.msk.f32.mxu0 %vm9037_vm10, %v9035_v19 }
0x2760   :  { %8346 = vmatprep.subr.mxu0 %v9035_v19 }
0x2761   :  { %8347 = vmatpush3.msra.mxu0 %v10493_v56 }
0x2762   :  { %8348 = vmatprep.subr.mxu0 %v9035_v19 }
0x2763   :  { %8349 = vmatpush3.msra.mxu0 %v10497_v50 }
0x2764   :  { %8350 = vmatprep.subr.mxu0 %v9035_v19 }
0x2765   :  { %8351 = vmatpush3.msra.mxu0 %v10501_v53 }
0x2766   :  { %8366 = vmatprep.subr.mxu0 %v9035_v19 }
0x281e   :  { %v3779_v13 = vpop.f32.mrf.mxu0 }
0x281f   :  { %v3787_v2 = vadd.f32 %v10363_v17, %v3779_v13  ;;  %3795 = vrot.lane.b32.xlu0 %v3779_v13, %s9038_s12 }
0x2820   :  { %v8332_v41 = vpop.f32.mrf.mxu0 }
0x2821   :  { %v7754_v8 = vmul.f32 -1.442695, %v3787_v2  ;;  %v3988_v2 = vsel %vm593_vm12, %v10411_v33, %v10409_v15 }
0x2823   :  { %8637 = vpow2.f32 %v7754_v8 }
0x2830   :  { %v8638_v37 = vpop.eup %8637 }
0x2831   :  { %v3791_v45 = vadd.f32 1.0, %v8638_v37 }
0x2833   :  { %8639 = vrcp.f32 %v3791_v45 }
0x2840   :  { %v8640_v4 = vpop.eup %8639 }
0x2841   :  { %v3801_v17 = vsub.f32 1.0, %v8640_v4  ;;  %v3807_v34 = vmul.f32 %v8640_v4, %v3707_v5 }
0x2891   :  { %v3796_v43 = vpop.permute.xlu0 %3795 }
0x2892   :  { %v3798_v58 = vmul.f32 %v8640_v4, %v3796_v43 }
0x2894   :  { %v3799_v24 = vadd.f32 %v3798_v58, %v3786_v7 }
0x2896   :  { %8641 = vtanh.f32 %v3799_v24 }
0x28a3   :  { %v8642_v28 = vpop.eup %8641 }
0x28a4   :  { %3803 = vrot.lane.b32.xlu1 %v8642_v28, %s9039_s27 }
0x2916   :  { %v3804_v44 = vpop.permute.xlu1 %3803 }
0x2917   :  { %v3806_v6 = vmul.f32 %v3804_v44, %v3801_v17 }
0x2919   :  { %v3808_v48 = vadd.f32 %v3807_v34, %v3806_v6 }
0x291b   :  { %3810 = vrot.lane.b32.xlu0 %v3808_v48, %s9040_s7 }
0x298d   :  { %v10605_v39 = vpop.permute.xlu0 %3810 }
0x298e   :  { %8342 = vmatmul.mubr.msk.f32.vlgmr.msra.gmra.mxu1 %vm390_vm11, %v10605_v39 }
0x298f   :  { %8356 = vmatpush3.msra.mxu1 %v10487_v3  ;;  %8363 = vmatprep.mubr.msk.f32.mxu1 %vm9037_vm10, %v9035_v19 }
0x2990   :  { %8357 = vmatprep.subr.mxu1 %v9035_v19 }
0x2991   :  { %8358 = vmatpush3.msra.mxu1 %v10493_v56 }
0x2992   :  { %8359 = vmatprep.subr.mxu1 %v9035_v19 }
0x2993   :  { %8360 = vmatpush3.msra.mxu1 %v10497_v50 }
0x2994   :  { %8361 = vmatprep.subr.mxu1 %v9035_v19 }
0x2995   :  { %8362 = vmatpush3.msra.mxu1 %v10501_v53  ;;  %v3887_v53 = vsel %vm593_vm12, %v10442_v21, %v10440_v12 }
0x2996   :  { %8383 = vmatprep.subr.mxu1 %v9035_v19 }
0x2a4e   :  { %v3880_v51 = vpop.f32.mrf.mxu1 }
0x2a4f   :  { %v3888_v36 = vadd.f32 %v10367_v52, %v3880_v51  ;;  %3896 = vrot.lane.b32.xlu1 %v3880_v51, %s9038_s12 }
0x2a50   :  { %v8343_v3 = vpop.f32.mrf.mxu1 }
0x2a51   :  { %v7756_v11 = vmul.f32 -1.442695, %v3888_v36  ;;  %v4141_v36 = vld [vmem:[%s11596_s20 + $0x10] sm:$0xff] }
0x2a53   :  { %8643 = vpow2.f32 %v7756_v11  ;;  %v4140_v11 = vld [vmem:[%s11596_s20 + $0x8] sm:$0xff] }
0x2a60   :  { %v8644_v18 = vpop.eup %8643 }
0x2a61   :  { %v3892_v56 = vadd.f32 1.0, %v8644_v18 }
0x2a63   :  { %8645 = vrcp.f32 %v3892_v56 }
0x2a70   :  { %v8646_v59 = vpop.eup %8645 }
0x2a71   :  { %v3902_v52 = vsub.f32 1.0, %v8646_v59  ;;  %v3908_v10 = vmul.f32 %v8646_v59, %v3808_v48  ;;  %v4089_v48 = vsel %vm593_vm12, %v10382_v40, %v10380_v16  ;;  %v4142_v40 = vld [vmem:[%s11596_s20 + $0x18] sm:$0xff] }
0x2ac1   :  { %v3897_v55 = vpop.permute.xlu1 %3896 }
0x2ac2   :  { %v3899_v50 = vmul.f32 %v8646_v59, %v3897_v55  ;;  %v4139_v55 = vld [vmem:[%s11596_s20] sm:$0xff] }
0x2ac4   :  { %v3900_v32 = vadd.f32 %v3899_v50, %v3887_v53 }
0x2ac6   :  { %8647 = vtanh.f32 %v3900_v32 }
0x2ad3   :  { %v8648_v57 = vpop.eup %8647 }
0x2ad4   :  { %3904 = vrot.lane.b32.xlu0 %v8648_v57, %s9039_s27 }
0x2b46   :  { %v3905_v61 = vpop.permute.xlu0 %3904 }
0x2b47   :  { %v3907_v49 = vmul.f32 %v3905_v61, %v3902_v52  ;;  %v4129_v61 = vsel %vm593_vm12, %v10522_v38, %v10584_v25 }
0x2b49   :  { %v3909_v9 = vadd.f32 %v3908_v10, %v3907_v49  ;;  %v4134_v10 = vsel %vm593_vm12, %v10584_v25, %v10522_v38  ;;  %v4126_v49 = vsel %vm593_vm12, %v10483_v42, %v10605_v39 }
0x2b4b   :  { %3911 = vrot.lane.b32.xlu1 %v3909_v9, %s9040_s7 }
0x2bbd   :  { %v10626_v54 = vpop.permute.xlu1 %3911 }
0x2bbe   :  { %8353 = vmatmul.mubr.msk.f32.vlgmr.msra.gmra.mxu0 %vm390_vm11, %v10626_v54  ;;  %v4123_v52 = vsel %vm593_vm12, %v10452_v14, %v10626_v54 }
0x2bbf   :  { %8374 = vmatprep.mubr.msk.f32.mxu0 %vm9037_vm10, %v9035_v19  ;;  %8367 = vmatpush3.msra.mxu0 %v4142_v40 }
0x2bc0   :  { %8368 = vmatprep.subr.mxu0 %v9035_v19 }
0x2bc1   :  { %8369 = vmatpush3.msra.mxu0 %v4141_v36 }
0x2bc2   :  { %8370 = vmatprep.subr.mxu0 %v9035_v19 }
0x2bc3   :  { %8371 = vmatpush3.msra.mxu0 %v4140_v11 }
0x2bc4   :  { %8372 = vmatprep.subr.mxu0 %v9035_v19 }
0x2bc5   :  { %8373 = vmatpush3.msra.mxu0 %v4139_v55 }
0x2bc6   :  { %8398 = vmatprep.subr.mxu0 %v9035_v19 }
0x2c7e   :  { %v3981_v12 = vpop.f32.mrf.mxu0 }
0x2c7f   :  { %v3989_v21 = vadd.f32 %v10372_v26, %v3981_v12  ;;  %3997 = vrot.lane.b32.xlu0 %v3981_v12, %s9038_s12 }
0x2c80   :  { %v8354_v20 = vpop.f32.mrf.mxu0 }
0x2c81   :  { %v7758_v27 = vmul.f32 -1.442695, %v3989_v21  ;;  %v4132_v21 = vsel %vm593_vm12, %v10544_v29, %v10563_v46  ;;  %v4133_v20 = vsel %vm593_vm12, %v10563_v46, %v10544_v29  ;;  %v4136_v29 = vsel %vm593_vm12, %v10626_v54, %v10452_v14 }
0x2c82   :  { %v4178_v25 = vcombine.low %v4129_v61, %v4132_v21 }
0x2c83   :  { %8649 = vpow2.f32 %v7758_v27 }
0x2c90   :  { %v8650_v31 = vpop.eup %8649 }
0x2c91   :  { %v3993_v47 = vadd.f32 1.0, %v8650_v31  ;;  %v4179_v31 = vcombine.low %v4133_v20, %v4134_v10 }
0x2c93   :  { %8651 = vrcp.f32 %v3993_v47 }
0x2ca0   :  { %v8652_v22 = vpop.eup %8651 }
0x2ca1   :  { %v4003_v26 = vsub.f32 1.0, %v8652_v22  ;;  %v4009_v45 = vmul.f32 %v8652_v22, %v3909_v9  ;;  %v4162_v9 = vcombine.low %v4123_v52, %v4126_v49 }
0x2cf1   :  { %v3998_v5 = vpop.permute.xlu0 %3997 }
0x2cf2   :  { %v4000_v13 = vmul.f32 %v8652_v22, %v3998_v5  ;;  %v4176_v5 = vrot.slane %v4162_v9, %v9300_v30 }
0x2cf4   :  { %v4001_v41 = vadd.f32 %v4000_v13, %v3988_v2  ;;  %v4186_v2 = vrot.slane %v4178_v25, %v9300_v30 }
0x2cf6   :  { %8653 = vtanh.f32 %v4001_v41  ;;  %v4193_v41 = vrot.slane %v4179_v31, %v9300_v30 }
0x2cf8   :  { %v4194_v14 = vcombine.low %v4186_v2, %v4193_v41 }
0x2d03   :  { %v8654_v8 = vpop.eup %8653 }
0x2d04   :  { %4005 = vrot.lane.b32.xlu1 %v8654_v8, %s9039_s27 }
0x2d76   :  { %v4006_v37 = vpop.permute.xlu1 %4005 }
0x2d77   :  { %v4008_v4 = vmul.f32 %v4006_v37, %v4003_v26 }
0x2d79   :  { %v4010_v43 = vadd.f32 %v4009_v45, %v4008_v4 }
0x2d7b   :  { %4012 = vrot.lane.b32.xlu0 %v4010_v43, %s9040_s7 }
0x2ded   :  { %v10639_v58 = vpop.permute.xlu0 %4012 }
0x2dee   :  { %8364 = vmatmul.mubr.msk.f32.vlgmr.msra.gmra.mxu1 %vm390_vm11, %v10639_v58  ;;  %v4120_v38 = vsel %vm593_vm12, %v10421_v1, %v10639_v58  ;;  %v4137_v46 = vsel %vm593_vm12, %v10639_v58, %v10421_v1 }
0x2def   :  { %8385 = vmatprep.mubr.msk.f32.mxu1 %vm9037_vm10, %v9035_v19 }
0x2eae   :  { %v4082_v15 = vpop.f32.mrf.mxu1 }
0x2eaf   :  { %v4090_v33 = vadd.f32 %v10377_v35, %v4082_v15  ;;  %4098 = vrot.lane.b32.xlu1 %v4082_v15, %s9038_s12  ;;  %v10653_v35 = vld [vmem:[%s11597_s21] sm:$0x1f] }
0x2eb0   :  { %v8365_v7 = vpop.f32.mrf.mxu1  ;;  %8384 = vmatpush3.msk.msra.mxu1 %vm4394_vm13, %v10653_v35 }
0x2eb1   :  { %v7760_v24 = vmul.f32 -1.442695, %v4090_v33  ;;  %8386 = vmatmul.mubr.f32.vlgmr.msra.gmra.mxu1 %v9035_v19  ;;  %8388 = vmatprep.subr.mxu1 %v9035_v19 }
0x2eb2   :  { %8389 = vmatpush3.msk.msra.mxu1 %vm4394_vm13, %v10653_v35  ;;  %8390 = vmatprep.mubr.msk.f32.mxu1 %vm9037_vm10, %v9035_v19 }
0x2eb3   :  { %8655 = vpow2.f32 %v7760_v24  ;;  %8393 = vmatprep.subr.mxu1 %v9035_v19 }
0x2ec0   :  { %v8656_v28 = vpop.eup %8655 }
0x2ec1   :  { %v4094_v17 = vadd.f32 1.0, %v8656_v28 }
0x2ec3   :  { %8657 = vrcp.f32 %v4094_v17 }
0x2ed0   :  { %v8658_v44 = vpop.eup %8657 }
0x2ed1   :  { %v4104_v3 = vsub.f32 1.0, %v8658_v44  ;;  %v4110_v56 = vmul.f32 %v8658_v44, %v4010_v43 }
0x2f21   :  { %v4099_v34 = vpop.permute.xlu1 %4098 }
0x2f22   :  { %v4101_v6 = vmul.f32 %v8658_v44, %v4099_v34 }
0x2f24   :  { %v4102_v51 = vadd.f32 %v4101_v6, %v4089_v48 }
0x2f26   :  { %8659 = vtanh.f32 %v4102_v51 }
0x2f33   :  { %v8660_v16 = vpop.eup %8659 }
0x2f34   :  { %4106 = vrot.lane.b32.xlu0 %v8660_v16, %s9039_s27 }
0x2f71   :  { %v4464_v53 = vpop.f32.mrf.mxu1 }
0x2f72   :  { %v4482_v32 = vrot.slane %v4464_v53, %v9300_v30 }
0x2f73   :  { %v8387_v57 = vpop.f32.mrf.mxu1 }
0x2f74   :  { %4483 = vrot.lane.b32.xlu0 %v4482_v32, %s9041_s6 }
0x2fa6   :  { %v4107_v18 = vpop.permute.xlu0 %4106 }
0x2fa7   :  { %v4109_v59 = vmul.f32 %v4107_v18, %v4104_v3 }
0x2fa9   :  { %v4111_v50 = vadd.f32 %v4110_v56, %v4109_v59 }
0x2fab   :  { %4114 = vrot.lane.b32.xlu1 %v4111_v50, %s9040_s7 }
0x2fe6   :  { %v4484_v36 = vpop.permute.xlu0 %4483 }
0x301d   :  { %v4115_v12 = vpop.permute.xlu1 %4114 }
0x301e   :  { %v4117_v27 = vsel %vm593_vm12, %v10391_v60, %v4115_v12  ;;  %v4138_v22 = vsel %vm593_vm12, %v4115_v12, %v10391_v60  ;;  %v4135_v60 = vsel %vm593_vm12, %v10605_v39, %v10483_v42  ;;  %v7761_v39 = vld [vmem:[%s11598_s22] ss:$0 sm:$0xff]  ;;  %s9042_s22 = smov 10  }
0x301f   :  { %v4161_v47 = vcombine.low %v4117_v27, %v4120_v38  ;;  %v4196_v26 = vcombine.low %v4137_v46, %v4138_v22  ;;  %v4195_v37 = vcombine.low %v4135_v60, %v4136_v29  ;;  %v4212_v45 = vcombine.low %v7761_v39, %v7761_v39 }
0x3021   :  { %v4169_v13 = vrot.slane %v4161_v47, %v9300_v30  ;;  %v4210_v1 = vrot.slane %v4196_v26, %v9300_v30  ;;  %v4203_v54 = vrot.slane %v4195_v37, %v9300_v30  ;;  %v4219_v4 = vrot.slane %v4212_v45, %v9300_v30 }
0x3023   :  { %v4177_v8 = vcombine.low %v4169_v13, %v4176_v5  ;;  %v4211_v42 = vcombine.low %v4203_v54, %v4210_v1  ;;  %v4220_v43 = vcombine.low %v4219_v4, %v4219_v4 }
0x3025   :  { %8375 = vmatmul.mubr.msk.f32.vlgmr.msra.gmra.mxu0 %vm390_vm11, %v4177_v8 }
0x3026   :  { %8377 = vmatprep.mubr.msk.f32.mxu0 %vm9037_vm10, %v9035_v19  ;;  %8399 = vmatpush3.msk.msra.mxu0 %vm4394_vm13, %v10653_v35 }
0x3027   :  { %8408 = vmatprep.subr.mxu0 %v9035_v19 }
0x3029   :  { %8378 = vmatmul.mubr.msk.f32.gmra.mxu0 %vm390_vm11, %v4194_v14 }
0x302a   :  { %8380 = vmatprep.mubr.msk.f32.mxu0 %vm9037_vm10, %v9035_v19 }
0x302d   :  { %8381 = vmatmul.mubr.msk.f32.gmra.mxu0 %vm390_vm11, %v4211_v42  ;;  %vm4391_vm11 = vcmask 39936  }
0x302e   :  { %8400 = vmatprep.mubr.msk.f32.mxu0 %vm9037_vm10, %v9035_v19 }
0x30e5   :  { %v4294_v58 = vpop.f32.mrf.mxu0 }
0x30e6   :  { %v10740_v15 = vadd.f32 %v4294_v58, %v4220_v43 }
0x30e7   :  { %v8376_v33 = vpop.f32.mrf.mxu0 }
0x30e8   :  { %v4318_v7 = vrot.slane %v10740_v15, %v9300_v30  ;;  %v4311_v54 = vcombine.high %v10740_v15, %v10740_v15 }
0x30e9   :  { %v4299_v24 = vpop.f32.mrf.mxu0 }
0x30ea   :  { %v4468_v28 = vadd.f32 %v4464_v53, %v4318_v7  ;;  %v10744_v17 = vadd.f32 %v4299_v24, %v4220_v43  ;;  %v4326_v12 = vcombine.high %v4318_v7, %v4318_v7  ;;  %v4325_v42 = vrot.slane %v4311_v54, %v9300_v30 }
0x30eb   :  { %v8379_v44 = vpop.f32.mrf.mxu0 }
0x30ec   :  { %v7766_v34 = vmul.f32 -1.442695, %v4468_v28 }
0x30ed   :  { %v4304_v6 = vpop.f32.mrf.mxu0 }
0x30ee   :  { %8661 = vpow2.f32 %v7766_v34  ;;  %v10746_v48 = vadd.f32 %v4304_v6, %v4220_v43 }
0x30ef   :  { %v8382_v51 = vpop.f32.mrf.mxu0 }
0x30fb   :  { %v8662_v16 = vpop.eup %8661 }
0x30fc   :  { %v4472_v40 = vadd.f32 1.0, %v8662_v16 }
0x30fe   :  { %8663 = vrcp.f32 %v4472_v40 }
0x310b   :  { %v8664_v3 = vpop.eup %8663 }
0x310c   :  { %v4486_v11 = vmul.f32 %v8664_v3, %v4484_v36  ;;  %v4493_v55 = vsub.f32 1.0, %v8664_v3  ;;  %v4499_v53 = vmul.f32 0.0, %v8664_v3 }
0x310e   :  { %4488 = vrot.lane.b32.xlu1 %v4486_v11, %s9042_s22 }
0x3180   :  { %v4489_v18 = vpop.permute.xlu1 %4488 }
0x3181   :  { %v4491_v56 = vadd.f32 %v4489_v18, %v4318_v7 }
0x3183   :  { %8665 = vtanh.f32 %v4491_v56  ;;  %v4327_v56 = vcombine.high %v4325_v42, %v4325_v42 }
0x3190   :  { %v8666_v59 = vpop.eup %8665 }
0x3191   :  { %4495 = vrot.lane.b32.xlu0 %v8666_v59, %s9043_s13 }
0x3203   :  { %v4496_v50 = vpop.permute.xlu0 %4495 }
0x3204   :  { %v4498_v32 = vmul.f32 %v4496_v50, %v4493_v55 }
0x3206   :  { %v4500_v57 = vadd.f32 %v4499_v53, %v4498_v32 }
0x3208   :  { %v4521_v52 = vrot.slane %v4500_v57, %v9300_v30 }
0x320a   :  { %4522 = vrot.lane.b32.xlu1 %v4521_v52, %s9043_s13 }
0x327c   :  { %v10752_v61 = vpop.permute.xlu1 %4522 }
0x327d   :  { %8391 = vmatmul.mubr.msk.f32.vlgmr.msra.gmra.mxu1 %vm4391_vm11, %v10752_v61 }
0x327e   :  { %8395 = vmatprep.mubr.msk.f32.mxu1 %vm9037_vm10, %v9035_v19 }
0x333d   :  { %v4600_v10 = vpop.f32.mrf.mxu1 }
0x333e   :  { %v4618_v49 = vrot.slane %v4600_v10, %v9300_v30  ;;  %v4604_v21 = vadd.f32 %v4600_v10, %v4326_v12 }
0x333f   :  { %v8392_v9 = vpop.f32.mrf.mxu1 }
0x3340   :  { %4619 = vrot.lane.b32.xlu0 %v4618_v49, %s9041_s6  ;;  %v7771_v20 = vmul.f32 -1.442695, %v4604_v21 }
0x3342   :  { %8667 = vpow2.f32 %v7771_v20 }
0x334f   :  { %v8668_v27 = vpop.eup %8667 }
0x3350   :  { %v4608_v38 = vadd.f32 1.0, %v8668_v27 }
0x3352   :  { %8669 = vrcp.f32 %v4608_v38 }
0x335f   :  { %v8670_v25 = vpop.eup %8669 }
0x3360   :  { %v4629_v29 = vsub.f32 1.0, %v8670_v25  ;;  %v4635_v2 = vmul.f32 %v8670_v25, %v4500_v57 }
0x33b2   :  { %v4620_v31 = vpop.permute.xlu0 %4619 }
0x33b3   :  { %v4622_v47 = vmul.f32 %v8670_v25, %v4620_v31 }
0x33b5   :  { %4624 = vrot.lane.b32.xlu1 %v4622_v47, %s9042_s22 }
0x3427   :  { %v4625_v22 = vpop.permute.xlu1 %4624 }
0x3428   :  { %v4627_v5 = vadd.f32 %v4625_v22, %v4326_v12 }
0x342a   :  { %8671 = vtanh.f32 %v4627_v5 }
0x3437   :  { %v8672_v13 = vpop.eup %8671 }
0x3438   :  { %4631 = vrot.lane.b32.xlu0 %v8672_v13, %s9043_s13  ;;  %v4335_v13 = vrot.slane %v10744_v17, %v9300_v30 }
0x34aa   :  { %v4632_v46 = vpop.permute.xlu0 %4631 }
0x34ab   :  { %v4634_v41 = vmul.f32 %v4632_v46, %v4629_v29 }
0x34ad   :  { %v4636_v8 = vadd.f32 %v4635_v2, %v4634_v41 }
0x34af   :  { %v10763_v26 = vrot.slane %v4636_v8, %v9300_v30 }
0x34b1   :  { %4710 = vrot.lane.b32.xlu1 %v10763_v26, %s9043_s13 }
0x3523   :  { %v10767_v60 = vpop.permute.xlu1 %4710 }
0x3524   :  { %8401 = vmatmul.mubr.msk.f32.vlgmr.msra.gmra.mxu0 %vm4391_vm11, %v10767_v60 }
0x3525   :  { %8409 = vmatpush3.msk.msra.mxu0 %vm4394_vm13, %v10653_v35  ;;  %8410 = vmatprep.mubr.msk.f32.mxu0 %vm9037_vm10, %v9035_v19 }
0x3526   :  { %8418 = vmatprep.subr.mxu0 %v9035_v19 }
0x35e4   :  { %v4885_v37 = vpop.f32.mrf.mxu0 }
0x35e5   :  { %v4903_v1 = vrot.slane %v4885_v37, %v9300_v30  ;;  %v4889_v39 = vadd.f32 %v4885_v37, %v4325_v42 }
0x35e6   :  { %v8402_v14 = vpop.f32.mrf.mxu0 }
0x35e7   :  { %4904 = vrot.lane.b32.xlu0 %v4903_v1, %s9041_s6  ;;  %v7777_v45 = vmul.f32 -1.442695, %v4889_v39 }
0x35e9   :  { %8673 = vpow2.f32 %v7777_v45 }
0x35f6   :  { %v8674_v4 = vpop.eup %8673 }
0x35f7   :  { %v4893_v43 = vadd.f32 1.0, %v8674_v4 }
0x35f9   :  { %8675 = vrcp.f32 %v4893_v43 }
0x3606   :  { %v8676_v58 = vpop.eup %8675 }
0x3607   :  { %v4914_v15 = vsub.f32 1.0, %v8676_v58  ;;  %v4920_v6 = vmul.f32 %v8676_v58, %v4636_v8 }
0x3659   :  { %v4905_v33 = vpop.permute.xlu0 %4904 }
0x365a   :  { %v4907_v7 = vmul.f32 %v8676_v58, %v4905_v33 }
0x365c   :  { %4909 = vrot.lane.b32.xlu1 %v4907_v7, %s9042_s22 }
0x36ce   :  { %v4910_v24 = vpop.permute.xlu1 %4909 }
0x36cf   :  { %v4912_v28 = vadd.f32 %v4910_v24, %v4325_v42 }
0x36d1   :  { %8677 = vtanh.f32 %v4912_v28 }
0x36de   :  { %v8678_v44 = vpop.eup %8677 }
0x36df   :  { %4916 = vrot.lane.b32.xlu0 %v8678_v44, %s9043_s13 }
0x3751   :  { %v4917_v34 = vpop.permute.xlu0 %4916 }
0x3752   :  { %v4919_v51 = vmul.f32 %v4917_v34, %v4914_v15  ;;  %v4343_v15 = vcombine.high %v4335_v13, %v4335_v13 }
0x3754   :  { %v4921_v16 = vadd.f32 %v4920_v6, %v4919_v51 }
0x3756   :  { %v10784_v40 = vrot.slane %v4921_v16, %v9300_v30 }
0x3758   :  { %4994 = vrot.lane.b32.xlu1 %v10784_v40, %s9043_s13 }
0x37ca   :  { %v10788_v36 = vpop.permute.xlu1 %4994 }
0x37cb   :  { %8411 = vmatmul.mubr.msk.f32.vlgmr.msra.gmra.mxu0 %vm4391_vm11, %v10788_v36 }
0x37cc   :  { %8419 = vmatpush3.msk.msra.mxu0 %vm4394_vm13, %v10653_v35  ;;  %8420 = vmatprep.mubr.msk.f32.mxu0 %vm9037_vm10, %v9035_v19 }
0x37cd   :  { %8428 = vmatprep.subr.mxu0 %v9035_v19 }
0x388b   :  { %v5166_v3 = vpop.f32.mrf.mxu0 }
0x388c   :  { %v5184_v11 = vrot.slane %v5166_v3, %v9300_v30  ;;  %v5170_v59 = vadd.f32 %v5166_v3, %v4327_v56 }
0x388d   :  { %v8412_v18 = vpop.f32.mrf.mxu0 }
0x388e   :  { %5185 = vrot.lane.b32.xlu0 %v5184_v11, %s9041_s6  ;;  %v7783_v55 = vmul.f32 -1.442695, %v5170_v59 }
0x3890   :  { %8679 = vpow2.f32 %v7783_v55 }
0x389d   :  { %v8680_v50 = vpop.eup %8679 }
0x389e   :  { %v5174_v53 = vadd.f32 1.0, %v8680_v50 }
0x38a0   :  { %8681 = vrcp.f32 %v5174_v53 }
0x38ad   :  { %v8682_v32 = vpop.eup %8681 }
0x38ae   :  { %v5195_v12 = vsub.f32 1.0, %v8682_v32  ;;  %v5201_v20 = vmul.f32 %v8682_v32, %v4921_v16 }
0x3900   :  { %v5186_v57 = vpop.permute.xlu0 %5185 }
0x3901   :  { %v5188_v52 = vmul.f32 %v8682_v32, %v5186_v57 }
0x3903   :  { %5190 = vrot.lane.b32.xlu1 %v5188_v52, %s9042_s22 }
0x3975   :  { %v5191_v10 = vpop.permute.xlu1 %5190 }
0x3976   :  { %v5193_v49 = vadd.f32 %v5191_v10, %v4327_v56 }
0x3978   :  { %8683 = vtanh.f32 %v5193_v49 }
0x3985   :  { %v8684_v9 = vpop.eup %8683 }
0x3986   :  { %5197 = vrot.lane.b32.xlu0 %v8684_v9, %s9043_s13 }
0x39f8   :  { %v5198_v21 = vpop.permute.xlu0 %5197 }
0x39f9   :  { %v5200_v27 = vmul.f32 %v5198_v21, %v5195_v12 }
0x39fb   :  { %v5202_v38 = vadd.f32 %v5201_v20, %v5200_v27  ;;  %v4328_v20 = vcombine.high %v10744_v17, %v10744_v17 }
0x39fd   :  { %v10802_v25 = vrot.slane %v5202_v38, %v9300_v30  ;;  %v4342_v27 = vrot.slane %v4328_v20, %v9300_v30 }
0x39ff   :  { %5275 = vrot.lane.b32.xlu1 %v10802_v25, %s9043_s13 }
0x3a71   :  { %v10806_v31 = vpop.permute.xlu1 %5275 }
0x3a72   :  { %8421 = vmatmul.mubr.msk.f32.vlgmr.msra.gmra.mxu0 %vm4391_vm11, %v10806_v31 }
0x3a73   :  { %8429 = vmatpush3.msk.msra.mxu0 %vm4394_vm13, %v10653_v35  ;;  %8430 = vmatprep.mubr.msk.f32.mxu0 %vm9037_vm10, %v9035_v19 }
0x3a74   :  { %8438 = vmatprep.subr.mxu0 %v9035_v19 }
0x3b32   :  { %v5447_v47 = vpop.f32.mrf.mxu0 }
0x3b33   :  { %v5465_v22 = vrot.slane %v5447_v47, %v9300_v30  ;;  %v5451_v29 = vadd.f32 %v5447_v47, %v4335_v13 }
0x3b34   :  { %v8422_v5 = vpop.f32.mrf.mxu0 }
0x3b35   :  { %5466 = vrot.lane.b32.xlu0 %v5465_v22, %s9041_s6  ;;  %v7789_v46 = vmul.f32 -1.442695, %v5451_v29 }
0x3b37   :  { %8685 = vpow2.f32 %v7789_v46 }
0x3b44   :  { %v8686_v2 = vpop.eup %8685 }
0x3b45   :  { %v5455_v41 = vadd.f32 1.0, %v8686_v2 }
0x3b47   :  { %8687 = vrcp.f32 %v5455_v41 }
0x3b54   :  { %v8688_v8 = vpop.eup %8687 }
0x3b55   :  { %v5476_v39 = vsub.f32 1.0, %v8688_v8  ;;  %v5482_v4 = vmul.f32 %v8688_v8, %v5202_v38 }
0x3ba7   :  { %v5467_v37 = vpop.permute.xlu0 %5466 }
0x3ba8   :  { %v5469_v1 = vmul.f32 %v8688_v8, %v5467_v37 }
0x3baa   :  { %5471 = vrot.lane.b32.xlu1 %v5469_v1, %s9042_s22 }
0x3c1c   :  { %v5472_v14 = vpop.permute.xlu1 %5471 }
0x3c1d   :  { %v5474_v54 = vadd.f32 %v5472_v14, %v4335_v13 }
0x3c1f   :  { %8689 = vtanh.f32 %v5474_v54 }
0x3c2c   :  { %v8690_v42 = vpop.eup %8689 }
0x3c2d   :  { %5478 = vrot.lane.b32.xlu0 %v8690_v42, %s9043_s13 }
0x3c9f   :  { %v5479_v45 = vpop.permute.xlu0 %5478 }
0x3ca0   :  { %v5481_v43 = vmul.f32 %v5479_v45, %v5476_v39 }
0x3ca2   :  { %v5483_v58 = vadd.f32 %v5482_v4, %v5481_v43 }
0x3ca4   :  { %v10822_v33 = vrot.slane %v5483_v58, %v9300_v30 }
0x3ca6   :  { %5556 = vrot.lane.b32.xlu1 %v10822_v33, %s9043_s13 }
0x3d18   :  { %v10826_v7 = vpop.permute.xlu1 %5556 }
0x3d19   :  { %8431 = vmatmul.mubr.msk.f32.vlgmr.msra.gmra.mxu0 %vm4391_vm11, %v10826_v7 }
0x3d1a   :  { %8439 = vmatpush3.msk.msra.mxu0 %vm4394_vm13, %v10653_v35  ;;  %8440 = vmatprep.mubr.msk.f32.mxu0 %vm9037_vm10, %v9035_v19 }
0x3d1b   :  { %8448 = vmatprep.subr.mxu0 %v9035_v19 }
0x3dd9   :  { %v5728_v24 = vpop.f32.mrf.mxu0 }
0x3dda   :  { %v5746_v28 = vrot.slane %v5728_v24, %v9300_v30  ;;  %v5732_v34 = vadd.f32 %v5728_v24, %v4343_v15 }
0x3ddb   :  { %v8432_v44 = vpop.f32.mrf.mxu0 }
0x3ddc   :  { %5747 = vrot.lane.b32.xlu0 %v5746_v28, %s9041_s6  ;;  %v7795_v6 = vmul.f32 -1.442695, %v5732_v34 }
0x3dde   :  { %8691 = vpow2.f32 %v7795_v6 }
0x3deb   :  { %v8692_v51 = vpop.eup %8691 }
0x3dec   :  { %v5736_v16 = vadd.f32 1.0, %v8692_v51 }
0x3dee   :  { %8693 = vrcp.f32 %v5736_v16 }
0x3dfb   :  { %v8694_v3 = vpop.eup %8693 }
0x3dfc   :  { %v5757_v50 = vsub.f32 1.0, %v8694_v3  ;;  %v5763_v32 = vmul.f32 %v8694_v3, %v5483_v58  ;;  %v4344_v58 = vcombine.high %v4342_v27, %v4342_v27 }
0x3e4e   :  { %v5748_v11 = vpop.permute.xlu0 %5747 }
0x3e4f   :  { %v5750_v18 = vmul.f32 %v8694_v3, %v5748_v11 }
0x3e51   :  { %5752 = vrot.lane.b32.xlu1 %v5750_v18, %s9042_s22 }
0x3ec3   :  { %v5753_v56 = vpop.permute.xlu1 %5752 }
0x3ec4   :  { %v5755_v59 = vadd.f32 %v5753_v56, %v4343_v15 }
0x3ec6   :  { %8695 = vtanh.f32 %v5755_v59 }
0x3ed3   :  { %v8696_v55 = vpop.eup %8695 }
0x3ed4   :  { %5759 = vrot.lane.b32.xlu0 %v8696_v55, %s9043_s13 }
0x3f46   :  { %v5760_v53 = vpop.permute.xlu0 %5759 }
0x3f47   :  { %v5762_v57 = vmul.f32 %v5760_v53, %v5757_v50 }
0x3f49   :  { %v5764_v52 = vadd.f32 %v5763_v32, %v5762_v57 }
0x3f4b   :  { %v10840_v10 = vrot.slane %v5764_v52, %v9300_v30 }
0x3f4d   :  { %5837 = vrot.lane.b32.xlu1 %v10840_v10, %s9043_s13 }
0x3fbf   :  { %v10844_v49 = vpop.permute.xlu1 %5837 }
0x3fc0   :  { %8441 = vmatmul.mubr.msk.f32.vlgmr.msra.gmra.mxu0 %vm4391_vm11, %v10844_v49 }
0x3fc1   :  { %8449 = vmatpush3.msk.msra.mxu0 %vm4394_vm13, %v10653_v35  ;;  %8450 = vmatprep.mubr.msk.f32.mxu0 %vm9037_vm10, %v9035_v19 }
0x3fc2   :  { %8458 = vmatprep.subr.mxu0 %v9035_v19 }
0x4080   :  { %v6009_v9 = vpop.f32.mrf.mxu0 }
0x4081   :  { %v6027_v12 = vrot.slane %v6009_v9, %v9300_v30  ;;  %v6013_v38 = vadd.f32 %v6009_v9, %v4342_v27 }
0x4082   :  { %v8442_v21 = vpop.f32.mrf.mxu0 }
0x4083   :  { %6028 = vrot.lane.b32.xlu0 %v6027_v12, %s9041_s6  ;;  %v7801_v47 = vmul.f32 -1.442695, %v6013_v38  ;;  %v10896_v12 = vrot.slane %v10746_v48, %v9300_v30 }
0x4085   :  { %8697 = vpow2.f32 %v7801_v47  ;;  %v10899_v47 = vld [vmem:[#allocation11] sm:$0x1f] }
0x4086   :  { %8394 = vmatpush3.msk.msra.mxu1 %vm4394_vm13, %v10899_v47 }
0x4087   :  { %8403 = vmatprep.subr.mxu1 %v9035_v19 }
0x4092   :  { %v8698_v22 = vpop.eup %8697 }
0x4093   :  { %v6017_v5 = vadd.f32 1.0, %v8698_v22  ;;  %v7768_v22 = vld [vmem:[#allocation13] ss:$0 sm:$0xff] }
0x4095   :  { %8699 = vrcp.f32 %v6017_v5 }
0x40a2   :  { %v8700_v13 = vpop.eup %8699 }
0x40a3   :  { %v6038_v17 = vsub.f32 1.0, %v8700_v13  ;;  %v6044_v1 = vmul.f32 %v8700_v13, %v5764_v52 }
0x40f5   :  { %v6029_v29 = vpop.permute.xlu0 %6028 }
0x40f6   :  { %v6031_v46 = vmul.f32 %v8700_v13, %v6029_v29  ;;  %v10905_v29 = vadd.f32 %v7768_v22, %v10752_v61 }
0x40f8   :  { %6033 = vrot.lane.b32.xlu1 %v6031_v46, %s9042_s22  ;;  %v4647_v61 = vrot.slane %v10905_v29, %v9894_v62 }
0x416a   :  { %v6034_v2 = vpop.permute.xlu1 %6033 }
0x416b   :  { %v6036_v41 = vadd.f32 %v6034_v2, %v4342_v27  ;;  %v4654_v2 = vrot.slane %v10905_v29, %v9897_v63 }
0x416d   :  { %8701 = vtanh.f32 %v6036_v41 }
0x417a   :  { %v8702_v8 = vpop.eup %8701 }
0x417b   :  { %6040 = vrot.lane.b32.xlu0 %v8702_v8, %s9043_s13 }
0x41ed   :  { %v6041_v37 = vpop.permute.xlu0 %6040 }
0x41ee   :  { %v6043_v14 = vmul.f32 %v6041_v37, %v6038_v17  ;;  %v10914_v37 = vld [vmem:[%s11642_s23] sm:$0x3] }
0x41ef   :  { %vm11620_vm12 = vcmp.gt.s32.totalorder %v10914_v37, 1  ;;  %vm11618_vm14 = vcmp.gt.s32.totalorder %v10914_v37, 2  ;;  %vm11616_vm2 = vcmp.gt.s32.totalorder %v10914_v37, 3  ;;  %vm11614_vm0 = vcmp.gt.s32.totalorder %v10914_v37, 4 }
0x41f0   :  { %v6045_v54 = vadd.f32 %v6044_v1, %v6043_v14  ;;  %v4718_v1 = vsel %vm11620_vm12, 1, %v9034_v0  ;;  %vm11612_vm5 = vcmp.gt.s32.totalorder %v10914_v37, 5  ;;  %vm11611_vm6 = vcmp.gt.s32.totalorder %v10914_v37, 6 }
0x41f2   :  { %v10861_v42 = vrot.slane %v6045_v54, %v9300_v30 }
0x41f4   :  { %6118 = vrot.lane.b32.xlu1 %v10861_v42, %s9043_s13 }
0x4266   :  { %v10865_v39 = vpop.permute.xlu1 %6118 }
0x4267   :  { %8451 = vmatmul.mubr.msk.f32.vlgmr.msra.gmra.mxu0 %vm4391_vm11, %v10865_v39 }
0x4268   :  { %8459 = vmatpush3.msk.msra.mxu0 %vm4394_vm13, %v10653_v35  ;;  %8460 = vmatprep.mubr.msk.f32.mxu0 %vm9037_vm10, %v9035_v19 }
0x4269   :  { %8468 = vmatprep.subr.mxu0 %v9035_v19 }
0x4327   :  { %v6290_v45 = vpop.f32.mrf.mxu0 }
0x4328   :  { %v6308_v4 = vrot.slane %v6290_v45, %v9300_v30  ;;  %v6294_v24 = vadd.f32 %v6290_v45, %v4344_v58 }
0x4329   :  { %v8452_v43 = vpop.f32.mrf.mxu0 }
0x432a   :  { %6309 = vrot.lane.b32.xlu0 %v6308_v4, %s9041_s6  ;;  %v7807_v28 = vmul.f32 -1.442695, %v6294_v24  ;;  %v4709_v24 = vrot.slane %v10763_v26, 1 }
0x432c   :  { %8703 = vpow2.f32 %v7807_v28 }
0x4339   :  { %v8704_v44 = vpop.eup %8703 }
0x433a   :  { %v6298_v15 = vadd.f32 1.0, %v8704_v44 }
0x433c   :  { %8705 = vrcp.f32 %v6298_v15 }
0x4349   :  { %v8706_v34 = vpop.eup %8705 }
0x434a   :  { %v6319_v18 = vsub.f32 1.0, %v8706_v34  ;;  %v6325_v59 = vmul.f32 %v8706_v34, %v6045_v54 }
0x439c   :  { %v6310_v6 = vpop.permute.xlu0 %6309 }
0x439d   :  { %v6312_v51 = vmul.f32 %v8706_v34, %v6310_v6 }
0x439f   :  { %6314 = vrot.lane.b32.xlu1 %v6312_v51, %s9042_s22 }
0x4411   :  { %v6315_v16 = vpop.permute.xlu1 %6314 }
0x4412   :  { %v6317_v3 = vadd.f32 %v6315_v16, %v4344_v58 }
0x4414   :  { %8707 = vtanh.f32 %v6317_v3 }
0x4421   :  { %v8708_v11 = vpop.eup %8707 }
0x4422   :  { %6321 = vrot.lane.b32.xlu0 %v8708_v11, %s9043_s13 }
0x4494   :  { %v6322_v56 = vpop.permute.xlu0 %6321 }
0x4495   :  { %v6324_v55 = vmul.f32 %v6322_v56, %v6319_v18 }
0x4497   :  { %v6326_v50 = vadd.f32 %v6325_v59, %v6324_v55 }
0x4499   :  { %v10879_v53 = vrot.slane %v6326_v50, %v9300_v30 }
0x449b   :  { %6399 = vrot.lane.b32.xlu1 %v10879_v53, %s9043_s13 }
0x450d   :  { %v10883_v32 = vpop.permute.xlu1 %6399 }
0x450e   :  { %8461 = vmatmul.mubr.msk.f32.vlgmr.msra.gmra.mxu0 %vm4391_vm11, %v10883_v32 }
0x450f   :  { %8469 = vmatpush3.msk.msra.mxu0 %vm4394_vm13, %v10653_v35  ;;  %8470 = vmatprep.mubr.msk.f32.mxu0 %vm9037_vm10, %v9035_v19 }
0x4510   :  { %8478 = vmatprep.subr.mxu0 %v9035_v19 }
0x45ce   :  { %v6571_v57 = vpop.f32.mrf.mxu0 }
0x45cf   :  { %v6589_v52 = vrot.slane %v6571_v57, %v9300_v30  ;;  %v6575_v21 = vadd.f32 %v6571_v57, %v10896_v12 }
0x45d0   :  { %v8462_v9 = vpop.f32.mrf.mxu0 }
0x45d1   :  { %6590 = vrot.lane.b32.xlu0 %v6589_v52, %s9041_s6  ;;  %v7813_v20 = vmul.f32 -1.442695, %v6575_v21 }
0x45d3   :  { %8709 = vpow2.f32 %v7813_v20 }
0x45e0   :  { %v8710_v27 = vpop.eup %8709 }
0x45e1   :  { %v6579_v38 = vadd.f32 1.0, %v8710_v27 }
0x45e3   :  { %8711 = vrcp.f32 %v6579_v38 }
0x45f0   :  { %v8712_v5 = vpop.eup %8711 }
0x45f1   :  { %v6600_v14 = vsub.f32 1.0, %v8712_v5  ;;  %v6606_v45 = vmul.f32 %v8712_v5, %v6326_v50 }
0x4643   :  { %v6591_v13 = vpop.permute.xlu0 %6590 }
0x4644   :  { %v6593_v46 = vmul.f32 %v8712_v5, %v6591_v13 }
0x4646   :  { %6595 = vrot.lane.b32.xlu1 %v6593_v46, %s9042_s22 }
0x464a   :  { %4656 = vbcast.lane.b32.xlu1 %v4654_v2, 256 }
0x46b8   :  { %v6596_v41 = vpop.permute.xlu1 %6595 }
0x46b9   :  { %v6598_v8 = vadd.f32 %v6596_v41, %v10896_v12 }
0x46bb   :  { %8713 = vtanh.f32 %v6598_v8 }
0x46bc   :  { %v4657_v28 = vpop.permute.xlu1 %4656 }
0x46bd   :  { %v4659_v15 = vadd.f32 %v4657_v28, %v10899_v47 }
0x46bf   :  { %v4668_v6 = vsel %vm11621_vm8, %v4659_v15, -inf }
0x46c0   :  { %v4669_v16 = vrot.slane %v4668_v6, 4 }
0x46c2   :  { %v4670_v11 = vmax.f32 %v4668_v6, %v4669_v16 }
0x46c4   :  { %v4671_v56 = vrot.slane %v4670_v11, 2 }
0x46c6   :  { %v4672_v26 = vmax.f32 %v4670_v11, %v4671_v56 }
0x46c8   :  { %v8714_v17 = vpop.eup %8713  ;;  %v4673_v50 = vrot.slane %v4672_v26, 1 }
0x46c9   :  { %6602 = vrot.lane.b32.xlu0 %v8714_v17, %s9043_s13 }
0x46ca   :  { %v4674_v52 = vmax.f32 %v4672_v26, %v4673_v50 }
0x46cc   :  { %v4676_v21 = vsub.f32 %v4659_v15, %v4674_v52 }
0x46cd   :  { %4649 = vbcast.lane.b32.xlu0 %v4647_v61, 256 }
0x46ce   :  { %v4679_v27 = vmul.f32 1.442695, %v4676_v21 }
0x46d0   :  { %8715 = vpow2.f32 %v4679_v27 }
0x46d1   :  { %4720 = vperm.xlu0 %8519, %v4718_v1  }
0x46dd   :  { %v8716_v22 = vpop.eup %8715 }
0x46de   :  { %v4688_v13 = vsel %vm11621_vm8, %v8716_v22, 0.0 }
0x46df   :  { %v4689_v2 = vrot.slane %v4688_v13, 4 }
0x46e1   :  { %v4690_v8 = vadd.f32 %v4689_v2, %v4688_v13 }
0x46e3   :  { %v4691_v61 = vrot.slane %v4690_v8, 2 }
0x473b   :  { %v6603_v54 = vpop.permute.xlu0 %6602 }
0x473c   :  { %v6605_v4 = vmul.f32 %v6603_v54, %v6600_v14  ;;  %v4692_v14 = vadd.f32 %v4691_v61, %v4690_v8 }
0x473e   :  { %v10923_v43 = vadd.f32 %v6606_v45, %v6605_v4  ;;  %v4693_v45 = vrot.slane %v4692_v14, 1 }
0x473f   :  { %v4650_v44 = vpop.permute.xlu0 %4649 }
0x4740   :  { %v10927_v58 = vrot.slane %v10923_v43, %v9300_v30  ;;  %v4658_v34 = vadd.f32 %v4650_v44, %v10899_v47 }
0x4742   :  { %6680 = vrot.lane.b32.xlu1 %v10927_v58, %s9043_s13  ;;  %v4661_v51 = vsel %vm11621_vm8, %v4658_v34, -inf }
0x4743   :  { %v4662_v3 = vrot.slane %v4661_v51, 4 }
0x4745   :  { %v4663_v18 = vmax.f32 %v4661_v51, %v4662_v3 }
0x4746   :  { %4712 = vrot.lane.b32.xlu1 %v4709_v24, %s9043_s13  ;;  %v4694_v24 = vadd.f32 %v4693_v45, %v4692_v14 }
0x4747   :  { %v4664_v59 = vrot.slane %v4663_v18, 2 }
0x4749   :  { %v4665_v55 = vmax.f32 %v4663_v18, %v4664_v59 }
0x474b   :  { %v4666_v57 = vrot.slane %v4665_v55, 1 }
0x474c   :  { %v10948_v56 = vpop.permute.xlu0 %4720 }
0x474d   :  { %v4667_v9 = vmax.f32 %v4665_v55, %v4666_v57  ;;  %vm4722_vm9 = vcmp.eq.s32.totalorder %v10948_v56, 1 }
0x474f   :  { %v4675_v20 = vsub.f32 %v4658_v34, %v4667_v9 }
0x4751   :  { %v4677_v38 = vmul.f32 1.442695, %v4675_v20 }
0x4753   :  { %8717 = vpow2.f32 %v4677_v38 }
0x4754   :  { %8719 = vlog2.f32 %v4694_v24 }
0x4760   :  { %v8718_v5 = vpop.eup %8717 }
0x4761   :  { %v4681_v46 = vsel %vm11621_vm8, %v8718_v5, 0.0  ;;  %v8720_v44 = vpop.eup %8719 }
0x4762   :  { %v4682_v41 = vrot.slane %v4681_v46, 4  ;;  %v4698_v6 = vmul.f32 0.6931472, %v8720_v44 }
0x4764   :  { %v4683_v17 = vadd.f32 %v4682_v41, %v4681_v46  ;;  %v4700_v3 = vadd.f32 %v4698_v6, %v4674_v52  ;;  %v5002_v52 = vsel %vm11618_vm14, 1, %v9034_v0 }
0x4766   :  { %v4684_v1 = vrot.slane %v4683_v17, 2 }
0x4768   :  { %v4685_v54 = vadd.f32 %v4684_v1, %v4683_v17 }
0x476a   :  { %v4686_v4 = vrot.slane %v4685_v54, 1 }
0x476c   :  { %v4687_v28 = vadd.f32 %v4686_v4, %v4685_v54 }
0x476e   :  { %8721 = vlog2.f32 %v4687_v28 }
0x477b   :  { %v8722_v15 = vpop.eup %8721 }
0x477c   :  { %v4696_v34 = vmul.f32 0.6931472, %v8722_v15 }
0x477e   :  { %v4699_v16 = vadd.f32 %v4696_v34, %v4667_v9  ;;  %v4993_v9 = vrot.slane %v10784_v40, 1 }
0x4780   :  { %v4716_v59 = vadd.f32 %v10767_v60, %v4699_v16 }
0x47b4   :  { %v10939_v51 = vpop.permute.xlu1 %6680 }
0x47b5   :  { %8471 = vmatmul.mubr.msk.f32.vlgmr.msra.gmra.mxu0 %vm4391_vm11, %v10939_v51 }
0x47b6   :  { %8479 = vmatpush3.msk.msra.mxu0 %vm4394_vm13, %v10653_v35  ;;  %8480 = vmatprep.mubr.msk.f32.mxu0 %vm9037_vm10, %v9035_v19 }
0x47b7   :  { %8488 = vmatprep.subr.mxu0 %v9035_v19 }
0x47b8   :  { %v4713_v11 = vpop.permute.xlu1 %4712 }
0x47b9   :  { %v4717_v18 = vadd.f32 %v4713_v11, %v4700_v3 }
0x47bb   :  { %v4725_v26 = vrot.slane %v4717_v18, 7 }
0x47bd   :  { %v4726_v55 = vsel %vm1711_vm1, %v4725_v26, %v4716_v59 }
0x47be   :  { %v10956_v35 = vsel %vm4722_vm9, %v4726_v55, %v10905_v29 }
0x47bf   :  { %v4939_v50 = vrot.slane %v10956_v35, %v9897_v63  ;;  %v4932_v57 = vrot.slane %v10956_v35, %v9894_v62 }
0x47c1   :  { %4941 = vbcast.lane.b32.xlu0 %v4939_v50, 256  ;;  %4934 = vbcast.lane.b32.xlu1 %v4932_v57, 256 }
0x47c5   :  { %5004 = vperm.xlu0 %8519, %v5002_v52   ;;  %4996 = vrot.lane.b32.xlu1 %v4993_v9, %s9043_s13 }
0x4833   :  { %v4942_v21 = vpop.permute.xlu0 %4941  ;;  %v4935_v20 = vpop.permute.xlu1 %4934 }
0x4834   :  { %v4944_v27 = vadd.f32 %v4942_v21, %v10899_v47  ;;  %v4943_v38 = vadd.f32 %v4935_v20, %v10899_v47 }
0x4836   :  { %v4952_v22 = vsel %vm11621_vm8, %v4944_v27, -inf  ;;  %v4945_v5 = vsel %vm11621_vm8, %v4943_v38, -inf }
0x4837   :  { %v4953_v13 = vrot.slane %v4952_v22, 4  ;;  %v4946_v46 = vrot.slane %v4945_v5, 4 }
0x4839   :  { %v4954_v2 = vmax.f32 %v4952_v22, %v4953_v13  ;;  %v4947_v41 = vmax.f32 %v4945_v5, %v4946_v46 }
0x483b   :  { %v4955_v8 = vrot.slane %v4954_v2, 2  ;;  %v4948_v17 = vrot.slane %v4947_v41, 2 }
0x483d   :  { %v4956_v40 = vmax.f32 %v4954_v2, %v4955_v8  ;;  %v4949_v61 = vmax.f32 %v4947_v41, %v4948_v17  ;;  %v4997_v2 = vpop.permute.xlu1 %4996 }
0x483f   :  { %v4957_v1 = vrot.slane %v4956_v40, 1  ;;  %v4950_v14 = vrot.slane %v4949_v61, 1 }
0x4840   :  { %v10974_v8 = vpop.permute.xlu0 %5004 }
0x4841   :  { %v4958_v54 = vmax.f32 %v4956_v40, %v4957_v1  ;;  %v4951_v45 = vmax.f32 %v4949_v61, %v4950_v14  ;;  %vm5006_vm15 = vcmp.eq.s32.totalorder %v10974_v8, 1 }
0x4843   :  { %v4960_v4 = vsub.f32 %v4944_v27, %v4958_v54  ;;  %v4959_v24 = vsub.f32 %v4943_v38, %v4951_v45 }
0x4845   :  { %v4963_v28 = vmul.f32 1.442695, %v4960_v4  ;;  %v4961_v44 = vmul.f32 1.442695, %v4959_v24 }
0x4847   :  { %8723 = vpow2.f32 %v4963_v28  ;;  %v5283_v28 = vsel %vm11616_vm2, 1, %v9034_v0 }
0x4848   :  { %8725 = vpow2.f32 %v4961_v44 }
0x4854   :  { %v8724_v15 = vpop.eup %8723 }
0x4855   :  { %v8726_v34 = vpop.eup %8725  ;;  %v4972_v6 = vsel %vm11621_vm8, %v8724_v15, 0.0 }
0x4856   :  { %v4965_v16 = vsel %vm11621_vm8, %v8726_v34, 0.0  ;;  %v4973_v3 = vrot.slane %v4972_v6, 4 }
0x4857   :  { %v4966_v11 = vrot.slane %v4965_v16, 4 }
0x4858   :  { %v4974_v18 = vadd.f32 %v4973_v3, %v4972_v6 }
0x4859   :  { %v4967_v59 = vadd.f32 %v4966_v11, %v4965_v16 }
0x485a   :  { %v4975_v26 = vrot.slane %v4974_v18, 2 }
0x485b   :  { %v4968_v55 = vrot.slane %v4967_v59, 2 }
0x485c   :  { %v4976_v50 = vadd.f32 %v4975_v26, %v4974_v18 }
0x485d   :  { %v4969_v57 = vadd.f32 %v4968_v55, %v4967_v59  ;;  %v5274_v59 = vrot.slane %v10802_v25, 1 }
0x485e   :  { %v4977_v52 = vrot.slane %v4976_v50, 1 }
0x485f   :  { %v4970_v9 = vrot.slane %v4969_v57, 1 }
0x4860   :  { %v4978_v21 = vadd.f32 %v4977_v52, %v4976_v50 }
0x4861   :  { %v4971_v20 = vadd.f32 %v4970_v9, %v4969_v57 }
0x4862   :  { %8727 = vlog2.f32 %v4978_v21 }
0x4863   :  { %8729 = vlog2.f32 %v4971_v20 }
0x486f   :  { %v8728_v27 = vpop.eup %8727 }
0x4870   :  { %v8730_v38 = vpop.eup %8729  ;;  %v4982_v22 = vmul.f32 0.6931472, %v8728_v27 }
0x4871   :  { %v4980_v5 = vmul.f32 0.6931472, %v8730_v38 }
0x4872   :  { %v4984_v13 = vadd.f32 %v4982_v22, %v4958_v54 }
0x4873   :  { %v4983_v46 = vadd.f32 %v4980_v5, %v4951_v45 }
0x4874   :  { %v5001_v41 = vadd.f32 %v4997_v2, %v4984_v13 }
0x4875   :  { %v6852_v17 = vpop.f32.mrf.mxu0  ;;  %v5000_v40 = vadd.f32 %v10788_v36, %v4983_v46 }
0x4876   :  { %v5009_v61 = vrot.slane %v5001_v41, 7  ;;  %v6870_v24 = vrot.slane %v6852_v17, %v9300_v30 }
0x4877   :  { %v8472_v1 = vpop.f32.mrf.mxu0 }
0x4878   :  { %v5010_v14 = vsel %vm1711_vm1, %v5009_v61, %v5000_v40 }
0x4879   :  { %v10982_v4 = vsel %vm5006_vm15, %v5010_v14, %v10956_v35  ;;  %v4360_v35 = vcombine.high %v10896_v12, %v10896_v12 }
0x487a   :  { %v5220_v54 = vrot.slane %v10982_v4, %v9897_v63  ;;  %v5213_v45 = vrot.slane %v10982_v4, %v9894_v62 }
0x487b   :  { %v6856_v44 = vadd.f32 %v6852_v17, %v4360_v35 }
0x487c   :  { %5222 = vbcast.lane.b32.xlu0 %v5220_v54, 256  ;;  %5215 = vbcast.lane.b32.xlu1 %v5213_v45, 256 }
0x487d   :  { %v7819_v15 = vmul.f32 -1.442695, %v6856_v44 }
0x487f   :  { %8731 = vpow2.f32 %v7819_v15 }
0x4880   :  { %6871 = vrot.lane.b32.xlu0 %v6870_v24, %s9041_s6 }
0x4884   :  { %5285 = vperm.xlu0 %8519, %v5283_v28  }
0x488c   :  { %v8732_v34 = vpop.eup %8731 }
0x488d   :  { %v6860_v6 = vadd.f32 1.0, %v8732_v34 }
0x488f   :  { %8733 = vrcp.f32 %v6860_v6 }
0x489c   :  { %v10996_v3 = vpop.eup %8733 }
0x48ee   :  { %v5223_v16 = vpop.permute.xlu0 %5222  ;;  %v5216_v26 = vpop.permute.xlu1 %5215 }
0x48ef   :  { %v5225_v12 = vadd.f32 %v5223_v16, %v10899_v47  ;;  %v5224_v55 = vadd.f32 %v5216_v26, %v10899_v47 }
0x48f1   :  { %v5233_v50 = vsel %vm11621_vm8, %v5225_v12, -inf  ;;  %v5226_v57 = vsel %vm11621_vm8, %v5224_v55, -inf }
0x48f2   :  { %v6872_v11 = vpop.permute.xlu0 %6871  ;;  %v5234_v52 = vrot.slane %v5233_v50, 4  ;;  %v5227_v9 = vrot.slane %v5226_v57, 4 }
0x48f3   :  { %v6874_v18 = vmul.f32 %v10996_v3, %v6872_v11 }
0x48f4   :  { %v5235_v21 = vmax.f32 %v5233_v50, %v5234_v52  ;;  %v5228_v20 = vmax.f32 %v5226_v57, %v5227_v9 }
0x48f5   :  { %6876 = vrot.lane.b32.xlu1 %v6874_v18, %s9042_s22 }
0x48f6   :  { %v5236_v27 = vrot.slane %v5235_v21, 2  ;;  %v5229_v38 = vrot.slane %v5228_v20, 2 }
0x48f8   :  { %v5237_v22 = vmax.f32 %v5235_v21, %v5236_v27  ;;  %v5230_v5 = vmax.f32 %v5228_v20, %v5229_v38 }
0x48f9   :  { %5277 = vrot.lane.b32.xlu1 %v5274_v59, %s9043_s13 }
0x48fa   :  { %v5238_v25 = vrot.slane %v5237_v22, 1  ;;  %v5231_v13 = vrot.slane %v5230_v5, 1 }
0x48fc   :  { %v5239_v46 = vmax.f32 %v5237_v22, %v5238_v25  ;;  %v5232_v2 = vmax.f32 %v5230_v5, %v5231_v13 }
0x48fe   :  { %v5241_v41 = vsub.f32 %v5225_v12, %v5239_v46  ;;  %v5240_v17 = vsub.f32 %v5224_v55, %v5232_v2 }
0x48ff   :  { %v11008_v5 = vpop.permute.xlu0 %5285 }
0x4900   :  { %v5244_v40 = vmul.f32 1.442695, %v5241_v41  ;;  %v5242_v61 = vmul.f32 1.442695, %v5240_v17  ;;  %vm5287_vm3 = vcmp.eq.s32.totalorder %v11008_v5, 1 }
0x4902   :  { %8735 = vpow2.f32 %v5244_v40 }
0x4903   :  { %8737 = vpow2.f32 %v5242_v61 }
0x490f   :  { %v8736_v1 = vpop.eup %8735 }
0x4910   :  { %v8738_v14 = vpop.eup %8737  ;;  %v5253_v54 = vsel %vm11621_vm8, %v8736_v1, 0.0 }
0x4911   :  { %v5246_v45 = vsel %vm11621_vm8, %v8738_v14, 0.0  ;;  %v5254_v24 = vrot.slane %v5253_v54, 4 }
0x4912   :  { %v5247_v28 = vrot.slane %v5246_v45, 4 }
0x4913   :  { %v5255_v44 = vadd.f32 %v5254_v24, %v5253_v54 }
0x4914   :  { %v5248_v15 = vadd.f32 %v5247_v28, %v5246_v45  ;;  %v6881_v28 = vsub.f32 1.0, %v10996_v3 }
0x4915   :  { %v5256_v34 = vrot.slane %v5255_v44, 2 }
0x4916   :  { %v5249_v6 = vrot.slane %v5248_v15, 2 }
0x4917   :  { %v5257_v16 = vadd.f32 %v5256_v34, %v5255_v44 }
0x4918   :  { %v5250_v11 = vadd.f32 %v5249_v6, %v5248_v15 }
0x4919   :  { %v5258_v18 = vrot.slane %v5257_v16, 1 }
0x491a   :  { %v5251_v59 = vrot.slane %v5250_v11, 1 }
0x491b   :  { %v5259_v26 = vadd.f32 %v5258_v18, %v5257_v16 }
0x491c   :  { %v5252_v12 = vadd.f32 %v5251_v59, %v5250_v11 }
0x491d   :  { %8739 = vlog2.f32 %v5259_v26 }
0x491e   :  { %8741 = vlog2.f32 %v5252_v12 }
0x492a   :  { %v8740_v55 = vpop.eup %8739 }
0x492b   :  { %v8742_v50 = vpop.eup %8741  ;;  %v5263_v52 = vmul.f32 0.6931472, %v8740_v55 }
0x492c   :  { %v5261_v57 = vmul.f32 0.6931472, %v8742_v50 }
0x492d   :  { %v5265_v27 = vadd.f32 %v5263_v52, %v5239_v46 }
0x492e   :  { %v5264_v20 = vadd.f32 %v5261_v57, %v5232_v2  ;;  %v5564_v2 = vsel %vm11614_vm0, 1, %v9034_v0 }
0x4930   :  { %v5281_v25 = vadd.f32 %v10806_v31, %v5264_v20 }
0x4967   :  { %v6877_v9 = vpop.permute.xlu1 %6876 }
0x4968   :  { %v6879_v21 = vadd.f32 %v6877_v9, %v4360_v35 }
0x496a   :  { %8743 = vtanh.f32 %v6879_v21 }
0x496b   :  { %v5278_v38 = vpop.permute.xlu1 %5277 }
0x496c   :  { %v5282_v22 = vadd.f32 %v5278_v38, %v5265_v27 }
0x496e   :  { %v5290_v13 = vrot.slane %v5282_v22, 7 }
0x4970   :  { %v5291_v41 = vsel %vm1711_vm1, %v5290_v13, %v5281_v25 }
0x4971   :  { %v11016_v17 = vsel %vm5287_vm3, %v5291_v41, %v10982_v4  ;;  %v5555_v4 = vrot.slane %v10822_v33, 1  ;;  %v6887_v33 = vmul.f32 %v10996_v3, %v10923_v43 }
0x4972   :  { %v5501_v35 = vrot.slane %v11016_v17, %v9897_v63  ;;  %v5494_v46 = vrot.slane %v11016_v17, %v9894_v62 }
0x4974   :  { %5503 = vbcast.lane.b32.xlu0 %v5501_v35, 256  ;;  %5496 = vbcast.lane.b32.xlu1 %v5494_v46, 256 }
0x4977   :  { %v8744_v40 = vpop.eup %8743 }
0x4978   :  { %6883 = vrot.lane.b32.xlu0 %v8744_v40, %s9043_s13  ;;  %5566 = vperm.xlu1 %8520, %v5564_v2  }
0x497c   :  { %5558 = vrot.lane.b32.xlu0 %v5555_v4, %s9043_s13 }
0x49e6   :  { %v5504_v61 = vpop.permute.xlu0 %5503  ;;  %v5497_v1 = vpop.permute.xlu1 %5496 }
0x49e7   :  { %v5506_v14 = vadd.f32 %v5504_v61, %v10899_v47  ;;  %v5505_v54 = vadd.f32 %v5497_v1, %v10899_v47 }
0x49e9   :  { %v5514_v45 = vsel %vm11621_vm8, %v5506_v14, -inf  ;;  %v5507_v24 = vsel %vm11621_vm8, %v5505_v54, -inf }
0x49ea   :  { %v5515_v44 = vrot.slane %v5514_v45, 4  ;;  %v5508_v15 = vrot.slane %v5507_v24, 4  ;;  %v6884_v34 = vpop.permute.xlu0 %6883 }
0x49eb   :  { %v6886_v6 = vmul.f32 %v6884_v34, %v6881_v28 }
0x49ec   :  { %v5516_v16 = vmax.f32 %v5514_v45, %v5515_v44  ;;  %v5509_v11 = vmax.f32 %v5507_v24, %v5508_v15 }
0x49ed   :  { %v11036_v18 = vadd.f32 %v6887_v33, %v6886_v6 }
0x49ee   :  { %v5517_v59 = vrot.slane %v5516_v16, 2  ;;  %v5510_v26 = vrot.slane %v5509_v11, 2 }
0x49ef   :  { %v11040_v12 = vrot.slane %v11036_v18, %v9300_v30 }
0x49f0   :  { %v5518_v55 = vmax.f32 %v5516_v16, %v5517_v59  ;;  %v5511_v50 = vmax.f32 %v5509_v11, %v5510_v26  ;;  %v5559_v16 = vpop.permute.xlu0 %5558 }
0x49f1   :  { %6961 = vrot.lane.b32.xlu1 %v11040_v12, %s9043_s13 }
0x49f2   :  { %v5519_v57 = vrot.slane %v5518_v55, 1  ;;  %v5512_v52 = vrot.slane %v5511_v50, 1 }
0x49f3   :  { %v11046_v59 = vpop.permute.xlu1 %5566 }
0x49f4   :  { %v5520_v9 = vmax.f32 %v5518_v55, %v5519_v57  ;;  %v5513_v43 = vmax.f32 %v5511_v50, %v5512_v52  ;;  %vm5568_vm4 = vcmp.eq.s32.totalorder %v11046_v59, 1 }
0x49f6   :  { %v5522_v3 = vsub.f32 %v5506_v14, %v5520_v9  ;;  %v5521_v21 = vsub.f32 %v5505_v54, %v5513_v43 }
0x49f8   :  { %v5525_v20 = vmul.f32 1.442695, %v5522_v3  ;;  %v5523_v27 = vmul.f32 1.442695, %v5521_v21  ;;  %v5836_v3 = vrot.slane %v10840_v10, 1 }
0x49f9   :  { %v8829_v21 = vld [vmem:[%s11597_s21] sm:$0x1f] }
0x49fa   :  { %8745 = vpow2.f32 %v5525_v20 }
0x49fb   :  { %8747 = vpow2.f32 %v5523_v27 }
0x4a07   :  { %v8746_v38 = vpop.eup %8745 }
0x4a08   :  { %v8748_v22 = vpop.eup %8747  ;;  %v5534_v25 = vsel %vm11621_vm8, %v8746_v38, 0.0 }
0x4a09   :  { %v5527_v13 = vsel %vm11621_vm8, %v8748_v22, 0.0  ;;  %v5535_v41 = vrot.slane %v5534_v25, 4 }
0x4a0a   :  { %v5528_v35 = vrot.slane %v5527_v13, 4 }
0x4a0b   :  { %v5536_v46 = vadd.f32 %v5535_v41, %v5534_v25 }
0x4a0c   :  { %v5529_v2 = vadd.f32 %v5528_v35, %v5527_v13 }
0x4a0d   :  { %v5537_v40 = vrot.slane %v5536_v46, 2 }
0x4a0e   :  { %v5530_v4 = vrot.slane %v5529_v2, 2 }
0x4a0f   :  { %v5538_v61 = vadd.f32 %v5537_v40, %v5536_v46 }
0x4a10   :  { %v5531_v1 = vadd.f32 %v5530_v4, %v5529_v2 }
0x4a11   :  { %v5539_v14 = vrot.slane %v5538_v61, 1 }
0x4a12   :  { %v5532_v54 = vrot.slane %v5531_v1, 1 }
0x4a13   :  { %v5540_v45 = vadd.f32 %v5539_v14, %v5538_v61 }
0x4a14   :  { %v5533_v24 = vadd.f32 %v5532_v54, %v5531_v1 }
0x4a15   :  { %8749 = vlog2.f32 %v5540_v45 }
0x4a16   :  { %8751 = vlog2.f32 %v5533_v24 }
0x4a22   :  { %v8750_v28 = vpop.eup %8749 }
0x4a23   :  { %v8752_v44 = vpop.eup %8751  ;;  %v5544_v15 = vmul.f32 0.6931472, %v8750_v28 }
0x4a24   :  { %v5542_v34 = vmul.f32 0.6931472, %v8752_v44 }
0x4a25   :  { %v5546_v33 = vadd.f32 %v5544_v15, %v5520_v9 }
0x4a26   :  { %v5545_v6 = vadd.f32 %v5542_v34, %v5513_v43  ;;  %v5845_v43 = vsel %vm11612_vm5, 1, %v9034_v0  ;;  %vm11613_vm5 = vcmp.gt.s32.totalorder %v10914_v37, 7 }
0x4a27   :  { %v5563_v11 = vadd.f32 %v5559_v16, %v5546_v33 }
0x4a28   :  { %v5562_v26 = vadd.f32 %v10826_v7, %v5545_v6 }
0x4a29   :  { %v5571_v55 = vrot.slane %v5563_v11, 7 }
0x4a2b   :  { %v5572_v50 = vsel %vm1711_vm1, %v5571_v55, %v5562_v26 }
0x4a2c   :  { %v11054_v57 = vsel %vm5568_vm4, %v5572_v50, %v11016_v17 }
0x4a2d   :  { %v5782_v52 = vrot.slane %v11054_v57, %v9897_v63  ;;  %v5775_v9 = vrot.slane %v11054_v57, %v9894_v62 }
0x4a2f   :  { %5784 = vbcast.lane.b32.xlu0 %v5782_v52, 256  ;;  %5777 = vbcast.lane.b32.xlu1 %v5775_v9, 256 }
0x4a33   :  { %5847 = vperm.xlu0 %8519, %v5845_v43   ;;  %5839 = vrot.lane.b32.xlu1 %v5836_v3, %s9043_s13 }
0x4a63   :  { %v11066_v17 = vpop.permute.xlu1 %6961 }
0x4a64   :  { %8481 = vmatmul.mubr.msk.f32.vlgmr.msra.gmra.mxu0 %vm4391_vm11, %v11066_v17 }
0x4a65   :  { %8489 = vmatpush3.msk.msra.mxu0 %vm4394_vm13, %v8829_v21  ;;  %8490 = vmatprep.mubr.msk.f32.mxu0 %vm9037_vm10, %v9035_v19 }
0x4aa1   :  { %v5785_v20 = vpop.permute.xlu0 %5784  ;;  %v5778_v27 = vpop.permute.xlu1 %5777 }
0x4aa2   :  { %v5787_v10 = vadd.f32 %v5785_v20, %v10899_v47  ;;  %v5786_v38 = vadd.f32 %v5778_v27, %v10899_v47 }
0x4aa4   :  { %v5795_v22 = vsel %vm11621_vm8, %v5787_v10, -inf  ;;  %v5788_v25 = vsel %vm11621_vm8, %v5786_v38, -inf }
0x4aa5   :  { %v5796_v13 = vrot.slane %v5795_v22, 4  ;;  %v5789_v41 = vrot.slane %v5788_v25, 4 }
0x4aa7   :  { %v5797_v35 = vmax.f32 %v5795_v22, %v5796_v13  ;;  %v5790_v46 = vmax.f32 %v5788_v25, %v5789_v41 }
0x4aa9   :  { %v5798_v2 = vrot.slane %v5797_v35, 2  ;;  %v5791_v40 = vrot.slane %v5790_v46, 2 }
0x4aab   :  { %v5799_v4 = vmax.f32 %v5797_v35, %v5798_v2  ;;  %v5792_v61 = vmax.f32 %v5790_v46, %v5791_v40  ;;  %v5840_v46 = vpop.permute.xlu1 %5839 }
0x4aad   :  { %v5800_v1 = vrot.slane %v5799_v4, 1  ;;  %v5793_v14 = vrot.slane %v5792_v61, 1 }
0x4aae   :  { %v11082_v40 = vpop.permute.xlu0 %5847 }
0x4aaf   :  { %v5801_v54 = vmax.f32 %v5799_v4, %v5800_v1  ;;  %v5794_v45 = vmax.f32 %v5792_v61, %v5793_v14  ;;  %vm5849_vm7 = vcmp.eq.s32.totalorder %v11082_v40, 1 }
0x4ab1   :  { %v5803_v24 = vsub.f32 %v5787_v10, %v5801_v54  ;;  %v5802_v28 = vsub.f32 %v5786_v38, %v5794_v45 }
0x4ab3   :  { %v5806_v44 = vmul.f32 1.442695, %v5803_v24  ;;  %v5804_v15 = vmul.f32 1.442695, %v5802_v28  ;;  %v6126_v24 = vsel %vm11611_vm6, 1, %v9034_v0  ;;  %v6117_v28 = vrot.slane %v10861_v42, 1 }
0x4ab5   :  { %8753 = vpow2.f32 %v5806_v44 }
0x4ab6   :  { %8755 = vpow2.f32 %v5804_v15 }
0x4ac2   :  { %v8754_v34 = vpop.eup %8753 }
0x4ac3   :  { %v8756_v33 = vpop.eup %8755  ;;  %v5815_v6 = vsel %vm11621_vm8, %v8754_v34, 0.0 }
0x4ac4   :  { %v5808_v16 = vsel %vm11621_vm8, %v8756_v33, 0.0  ;;  %v5816_v11 = vrot.slane %v5815_v6, 4 }
0x4ac5   :  { %v5809_v26 = vrot.slane %v5808_v16, 4 }
0x4ac6   :  { %v5817_v55 = vadd.f32 %v5816_v11, %v5815_v6 }
0x4ac7   :  { %v5810_v50 = vadd.f32 %v5809_v26, %v5808_v16 }
0x4ac8   :  { %v5818_v52 = vrot.slane %v5817_v55, 2 }
0x4ac9   :  { %v5811_v9 = vrot.slane %v5810_v50, 2 }
0x4aca   :  { %v5819_v43 = vadd.f32 %v5818_v52, %v5817_v55 }
0x4acb   :  { %v5812_v3 = vadd.f32 %v5811_v9, %v5810_v50 }
0x4acc   :  { %v5820_v21 = vrot.slane %v5819_v43, 1 }
0x4acd   :  { %v5813_v20 = vrot.slane %v5812_v3, 1 }
0x4ace   :  { %v5821_v27 = vadd.f32 %v5820_v21, %v5819_v43 }
0x4acf   :  { %v5814_v10 = vadd.f32 %v5813_v20, %v5812_v3  ;;  %v4345_v20 = vcombine.high %v10746_v48, %v10746_v48 }
0x4ad0   :  { %8757 = vlog2.f32 %v5821_v27 }
0x4ad1   :  { %8759 = vlog2.f32 %v5814_v10 }
0x4add   :  { %v8758_v38 = vpop.eup %8757 }
0x4ade   :  { %v8760_v22 = vpop.eup %8759  ;;  %v5825_v25 = vmul.f32 0.6931472, %v8758_v38 }
0x4adf   :  { %v5823_v13 = vmul.f32 0.6931472, %v8760_v22 }
0x4ae0   :  { %v5827_v41 = vadd.f32 %v5825_v25, %v5801_v54  ;;  %v11111_v25 = vrot.slane %v4345_v20, %v9300_v30 }
0x4ae1   :  { %v5826_v35 = vadd.f32 %v5823_v13, %v5794_v45 }
0x4ae2   :  { %v5844_v2 = vadd.f32 %v5840_v46, %v5827_v41 }
0x4ae3   :  { %v5843_v4 = vadd.f32 %v10844_v49, %v5826_v35 }
0x4ae4   :  { %v5852_v61 = vrot.slane %v5844_v2, 7 }
0x4ae6   :  { %v5853_v1 = vsel %vm1711_vm1, %v5852_v61, %v5843_v4 }
0x4ae7   :  { %v11090_v14 = vsel %vm5849_vm7, %v5853_v1, %v11054_v57 }
0x4ae8   :  { %v6063_v54 = vrot.slane %v11090_v14, %v9897_v63  ;;  %v6056_v45 = vrot.slane %v11090_v14, %v9894_v62 }
0x4aea   :  { %6065 = vbcast.lane.b32.xlu0 %v6063_v54, 256  ;;  %6058 = vbcast.lane.b32.xlu1 %v6056_v45, 256 }
0x4aee   :  { %6128 = vperm.xlu0 %8519, %v6126_v24  }
0x4af2   :  { %6120 = vrot.lane.b32.xlu0 %v6117_v28, %s9043_s13 }
0x4b24   :  { %v7133_v57 = vpop.f32.mrf.mxu0 }
0x4b25   :  { %v7151_v44 = vrot.slane %v7133_v57, %v9300_v30  ;;  %v7137_v35 = vadd.f32 %v7133_v57, %v11111_v25 }
0x4b26   :  { %v8482_v15 = vpop.f32.mrf.mxu0 }
0x4b27   :  { %7152 = vrot.lane.b32.xlu1 %v7151_v44, %s9041_s6  ;;  %v7825_v4 = vmul.f32 -1.442695, %v7137_v35 }
0x4b5c   :  { %v6066_v34 = vpop.permute.xlu0 %6065  ;;  %v6059_v33 = vpop.permute.xlu1 %6058 }
0x4b5d   :  { %v6068_v6 = vadd.f32 %v6066_v34, %v10899_v47  ;;  %v6067_v16 = vadd.f32 %v6059_v33, %v10899_v47 }
0x4b5f   :  { %v6076_v11 = vsel %vm11621_vm8, %v6068_v6, -inf  ;;  %v6069_v26 = vsel %vm11621_vm8, %v6067_v16, -inf }
0x4b60   :  { %v6077_v55 = vrot.slane %v6076_v11, 4  ;;  %v6070_v42 = vrot.slane %v6069_v26, 4 }
0x4b62   :  { %v6078_v50 = vmax.f32 %v6076_v11, %v6077_v55  ;;  %v6071_v52 = vmax.f32 %v6069_v26, %v6070_v42 }
0x4b64   :  { %v6079_v9 = vrot.slane %v6078_v50, 2  ;;  %v6072_v43 = vrot.slane %v6071_v52, 2 }
0x4b66   :  { %v6080_v3 = vmax.f32 %v6078_v50, %v6079_v9  ;;  %v6073_v21 = vmax.f32 %v6071_v52, %v6072_v43 }
0x4b68   :  { %v6081_v27 = vrot.slane %v6080_v3, 1  ;;  %v6074_v10 = vrot.slane %v6073_v21, 1 }
0x4b69   :  { %v11116_v50 = vpop.permute.xlu0 %6128 }
0x4b6a   :  { %v6082_v38 = vmax.f32 %v6080_v3, %v6081_v27  ;;  %v6075_v22 = vmax.f32 %v6073_v21, %v6074_v10  ;;  %vm6130_vm6 = vcmp.eq.s32.totalorder %v11116_v50, 1 }
0x4b6c   :  { %v6084_v13 = vsub.f32 %v6068_v6, %v6082_v38  ;;  %v6083_v41 = vsub.f32 %v6067_v16, %v6075_v22 }
0x4b6e   :  { %v6087_v46 = vmul.f32 1.442695, %v6084_v13  ;;  %v6085_v2 = vmul.f32 1.442695, %v6083_v41  ;;  %v6121_v41 = vpop.permute.xlu0 %6120 }
0x4b70   :  { %8761 = vpow2.f32 %v6087_v46 }
0x4b71   :  { %8763 = vpow2.f32 %v6085_v2 }
0x4b72   :  { %8765 = vpow2.f32 %v7825_v4 }
0x4b7d   :  { %v8762_v61 = vpop.eup %8761 }
0x4b7e   :  { %v8764_v1 = vpop.eup %8763  ;;  %v6096_v48 = vsel %vm11621_vm8, %v8762_v61, 0.0 }
0x4b7f   :  { %v6089_v54 = vsel %vm11621_vm8, %v8764_v1, 0.0  ;;  %v6097_v45 = vrot.slane %v6096_v48, 4  ;;  %v8766_v15 = vpop.eup %8765  ;;  %v6407_v1 = vsel %vm11613_vm5, 1, %v9034_v0 }
0x4b80   :  { %v6090_v24 = vrot.slane %v6089_v54, 4  ;;  %v7141_v6 = vadd.f32 1.0, %v8766_v15 }
0x4b81   :  { %v6098_v28 = vadd.f32 %v6097_v45, %v6096_v48  ;;  %v6398_v48 = vrot.slane %v10879_v53, 1 }
0x4b82   :  { %v6091_v44 = vadd.f32 %v6090_v24, %v6089_v54  ;;  %8767 = vrcp.f32 %v7141_v6 }
0x4b83   :  { %v6099_v34 = vrot.slane %v6098_v28, 2 }
0x4b84   :  { %v6092_v33 = vrot.slane %v6091_v44, 2 }
0x4b85   :  { %v6100_v57 = vadd.f32 %v6099_v34, %v6098_v28 }
0x4b86   :  { %v6093_v16 = vadd.f32 %v6092_v33, %v6091_v44 }
0x4b87   :  { %v6101_v11 = vrot.slane %v6100_v57, 1 }
0x4b88   :  { %v6094_v26 = vrot.slane %v6093_v16, 1 }
0x4b89   :  { %v6102_v55 = vadd.f32 %v6101_v11, %v6100_v57 }
0x4b8a   :  { %v6095_v42 = vadd.f32 %v6094_v26, %v6093_v16 }
0x4b8b   :  { %8769 = vlog2.f32 %v6102_v55 }
0x4b8c   :  { %8771 = vlog2.f32 %v6095_v42 }
0x4b8f   :  { %v11118_v52 = vpop.eup %8767 }
0x4b98   :  { %v8770_v9 = vpop.eup %8769 }
0x4b99   :  { %v8772_v43 = vpop.eup %8771  ;;  %v6106_v3 = vmul.f32 0.6931472, %v8770_v9  ;;  %v7153_v21 = vpop.permute.xlu1 %7152 }
0x4b9a   :  { %v6104_v20 = vmul.f32 0.6931472, %v8772_v43  ;;  %v7155_v27 = vmul.f32 %v11118_v52, %v7153_v21 }
0x4b9b   :  { %v6108_v10 = vadd.f32 %v6106_v3, %v6082_v38 }
0x4b9c   :  { %v6107_v13 = vadd.f32 %v6104_v20, %v6075_v22  ;;  %7157 = vrot.lane.b32.xlu1 %v7155_v27, %s9042_s22 }
0x4b9d   :  { %v6125_v35 = vadd.f32 %v6121_v41, %v6108_v10 }
0x4b9e   :  { %v6124_v46 = vadd.f32 %v10865_v39, %v6107_v13 }
0x4b9f   :  { %v6133_v2 = vrot.slane %v6125_v35, 7 }
0x4ba1   :  { %v6134_v4 = vsel %vm1711_vm1, %v6133_v2, %v6124_v46 }
0x4ba2   :  { %v11128_v61 = vsel %vm6130_vm6, %v6134_v4, %v11090_v14 }
0x4ba3   :  { %v6344_v38 = vrot.slane %v11128_v61, %v9897_v63  ;;  %v6337_v22 = vrot.slane %v11128_v61, %v9894_v62 }
0x4ba5   :  { %6346 = vbcast.lane.b32.xlu0 %v6344_v38, 256  ;;  %6339 = vbcast.lane.b32.xlu1 %v6337_v22, 256 }
0x4ba9   :  { %6409 = vperm.xlu0 %8519, %v6407_v1   ;;  %6401 = vrot.lane.b32.xlu1 %v6398_v48, %s9043_s13 }
0x4c0e   :  { %v7158_v14 = vpop.permute.xlu1 %7157 }
0x4c0f   :  { %v7160_v54 = vadd.f32 %v7158_v14, %v11111_v25 }
0x4c11   :  { %8773 = vtanh.f32 %v7160_v54 }
0x4c17   :  { %v6347_v45 = vpop.permute.xlu0 %6346  ;;  %v6340_v24 = vpop.permute.xlu1 %6339 }
0x4c18   :  { %v6349_v28 = vadd.f32 %v6347_v45, %v10899_v47  ;;  %v6348_v44 = vadd.f32 %v6340_v24, %v10899_v47 }
0x4c1a   :  { %v6357_v15 = vsel %vm11621_vm8, %v6349_v28, -inf  ;;  %v6350_v34 = vsel %vm11621_vm8, %v6348_v44, -inf }
0x4c1b   :  { %v6358_v33 = vrot.slane %v6357_v15, 4  ;;  %v6351_v57 = vrot.slane %v6350_v34, 4 }
0x4c1d   :  { %v6359_v53 = vmax.f32 %v6357_v15, %v6358_v33  ;;  %v6352_v6 = vmax.f32 %v6350_v34, %v6351_v57 }
0x4c1e   :  { %v8774_v16 = vpop.eup %8773 }
0x4c1f   :  { %v6360_v11 = vrot.slane %v6359_v53, 2  ;;  %v6353_v26 = vrot.slane %v6352_v6, 2  ;;  %7164 = vrot.lane.b32.xlu0 %v8774_v16, %s9043_s13  ;;  %v6402_v16 = vpop.permute.xlu1 %6401 }
0x4c21   :  { %v6361_v55 = vmax.f32 %v6359_v53, %v6360_v11  ;;  %v6354_v42 = vmax.f32 %v6352_v6, %v6353_v26 }
0x4c23   :  { %v6362_v9 = vrot.slane %v6361_v55, 1  ;;  %v6355_v43 = vrot.slane %v6354_v42, 1 }
0x4c24   :  { %v11148_v26 = vpop.permute.xlu0 %6409 }
0x4c25   :  { %v6363_v3 = vmax.f32 %v6361_v55, %v6362_v9  ;;  %v6356_v21 = vmax.f32 %v6354_v42, %v6355_v43  ;;  %vm6411_vm5 = vcmp.eq.s32.totalorder %v11148_v26, 1 }
0x4c27   :  { %v6365_v47 = vsub.f32 %v6349_v28, %v6363_v3  ;;  %v6364_v20 = vsub.f32 %v6348_v44, %v6356_v21 }
0x4c29   :  { %v6368_v27 = vmul.f32 1.442695, %v6365_v47  ;;  %v6366_v10 = vmul.f32 1.442695, %v6364_v20  ;;  %v6679_v47 = vrot.slane %v10927_v58, 1  ;;  %v7162_v20 = vsub.f32 1.0, %v11118_v52 }
0x4c2b   :  { %8775 = vpow2.f32 %v6368_v27 }
0x4c2c   :  { %8777 = vpow2.f32 %v6366_v10  ;;  %v7168_v10 = vmul.f32 %v11118_v52, %v11036_v18  ;;  %v11184_v52 = vld [vmem:[#allocation11] sm:$0x1f] }
0x4c38   :  { %v8776_v13 = vpop.eup %8775 }
0x4c39   :  { %v8778_v41 = vpop.eup %8777  ;;  %v6377_v35 = vsel %vm11621_vm8, %v8776_v13, 0.0 }
0x4c3a   :  { %v6370_v46 = vsel %vm11621_vm8, %v8778_v41, 0.0  ;;  %v6378_v2 = vrot.slane %v6377_v35, 4 }
0x4c3b   :  { %v6371_v4 = vrot.slane %v6370_v46, 4 }
0x4c3c   :  { %v6379_v38 = vadd.f32 %v6378_v2, %v6377_v35  ;;  %v11176_v35 = vld [vmem:[%s11642_s23] sm:$0x3]  ;;  %s9044_s23 = smov [#allocation16]  }
0x4c3d   :  { %v6372_v22 = vadd.f32 %v6371_v4, %v6370_v46  ;;  %vm11615_vm0 = vcmp.gt.s32.totalorder %v11176_v35, 8  ;;  %vm11617_vm2 = vcmp.gt.s32.totalorder %v11176_v35, 9  ;;  %vm11619_vm14 = vcmp.gt.s32.totalorder %v11176_v35, 10  ;;  %s7669_s4 = sshll.u32 %s9044_s23, 4  ;;  %s7670_s4 = int_to_ptr.vmem [resolvable:$true] %s7669_s4 }
0x4c3e   :  { %v6380_v1 = vrot.slane %v6379_v38, 2  ;;  %v6688_v58 = vsel %vm11615_vm0, 1, %v9034_v0  ;;  %s8992_s18 = scalar_lea.vmem %s7670_s4, 16  ;;  %s8996_s21 = scalar_lea.vmem %s7670_s4, 32 }
0x4c3f   :  { %v6373_v48 = vrot.slane %v6372_v22, 2  ;;  %p8993_p12 = scmp.ne.s32.totalorder %s7670_s4, %s8992_s18  ;;  %p8997_p13 = scmp.lt.s32.totalorder %s7670_s4, %s7670_s4 }
0x4c40   :  { %v6381_v14 = vadd.f32 %v6380_v1, %v6379_v38  ;;  %p8998_p0 = scmp.lt.s32.totalorder %s8996_s21, %s8992_s18 }
0x4c41   :  { %v6374_v54 = vadd.f32 %v6373_v48, %v6372_v22 }
0x4c42   :  { %v6382_v45 = vrot.slane %v6381_v14, 1  ;;  %p8999_p1 = por %p8998_p0, %p8997_p13 }
0x4c43   :  { %v6375_v24 = vrot.slane %v6374_v54, 1 }
0x4c44   :  { %v6383_v28 = vadd.f32 %v6382_v45, %v6381_v14  ;;  %p9000_p2 = pnand %p8999_p1, %p8993_p12 }
0x4c45   :  { %v6376_v44 = vadd.f32 %v6375_v24, %v6374_v54 }
0x4c46   :  { %8779 = vlog2.f32 %v6383_v28 }
0x4c47   :  { %8781 = vlog2.f32 %v6376_v44 }
0x4c53   :  { %v8780_v15 = vpop.eup %8779 }
0x4c54   :  { %v8782_v34 = vpop.eup %8781  ;;  %v6387_v33 = vmul.f32 0.6931472, %v8780_v15 }
0x4c55   :  { %v6385_v57 = vmul.f32 0.6931472, %v8782_v34 }
0x4c56   :  { %v6389_v53 = vadd.f32 %v6387_v33, %v6363_v3 }
0x4c57   :  { %v6388_v6 = vadd.f32 %v6385_v57, %v6356_v21 }
0x4c58   :  { %v6406_v11 = vadd.f32 %v6402_v16, %v6389_v53 }
0x4c59   :  { %v6405_v55 = vadd.f32 %v10883_v32, %v6388_v6 }
0x4c5a   :  { %v6414_v42 = vrot.slane %v6406_v11, 7 }
0x4c5c   :  { %v6415_v9 = vsel %vm1711_vm1, %v6414_v42, %v6405_v55 }
0x4c5d   :  { %v11156_v43 = vsel %vm6411_vm5, %v6415_v9, %v11128_v61 }
0x4c5e   :  { %v6625_v3 = vrot.slane %v11156_v43, %v9897_v63  ;;  %v6618_v21 = vrot.slane %v11156_v43, %v9894_v62 }
0x4c60   :  { %6627 = vbcast.lane.b32.xlu1 %v6625_v3, 256 }
0x4c64   :  { %6620 = vbcast.lane.b32.xlu1 %v6618_v21, 256 }
0x4c68   :  { %6682 = vrot.lane.b32.xlu1 %v6679_v47, %s9043_s13 }
0x4c91   :  { %v7165_v27 = vpop.permute.xlu0 %7164 }
0x4c92   :  { %v7167_v61 = vmul.f32 %v7165_v27, %v7162_v20 }
0x4c94   :  { %v11167_v13 = vadd.f32 %v7168_v10, %v7167_v61 }
0x4c96   :  { %v11171_v41 = vrot.slane %v11167_v13, %v9300_v30 }
0x4c98   :  { %7242 = vrot.lane.b32.xlu0 %v11171_v41, %s9043_s13 }
0x4c9c   :  { %6690 = vperm.xlu0 %8519, %v6688_v58  }
0x4cd2   :  { %v6628_v18 = vpop.permute.xlu1 %6627 }
0x4cd3   :  { %v6630_v46 = vadd.f32 %v11184_v52, %v6628_v18 }
0x4cd5   :  { %v6638_v2 = vsel %vm11621_vm8, %v6630_v46, -inf }
0x4cd6   :  { %v6639_v4 = vrot.slane %v6638_v2, 4  ;;  %v6621_v38 = vpop.permute.xlu1 %6620 }
0x4cd7   :  { %v6629_v22 = vadd.f32 %v11184_v52, %v6621_v38 }
0x4cd8   :  { %v6640_v1 = vmax.f32 %v6638_v2, %v6639_v4 }
0x4cd9   :  { %v6631_v48 = vsel %vm11621_vm8, %v6629_v22, -inf }
0x4cda   :  { %v6641_v14 = vrot.slane %v6640_v1, 2  ;;  %v6632_v54 = vrot.slane %v6631_v48, 4 }
0x4cdc   :  { %v6642_v45 = vmax.f32 %v6640_v1, %v6641_v14  ;;  %v6633_v24 = vmax.f32 %v6631_v48, %v6632_v54 }
0x4cde   :  { %v6643_v28 = vrot.slane %v6642_v45, 1  ;;  %v6634_v44 = vrot.slane %v6633_v24, 2 }
0x4ce0   :  { %v6644_v15 = vmax.f32 %v6642_v45, %v6643_v28  ;;  %v6635_v34 = vmax.f32 %v6633_v24, %v6634_v44  ;;  %v6683_v45 = vpop.permute.xlu1 %6682 }
0x4ce2   :  { %v6646_v33 = vsub.f32 %v6630_v46, %v6644_v15  ;;  %v6636_v57 = vrot.slane %v6635_v34, 1 }
0x4ce4   :  { %v6649_v53 = vmul.f32 1.442695, %v6646_v33  ;;  %v6637_v6 = vmax.f32 %v6635_v34, %v6636_v57 }
0x4ce6   :  { %8783 = vpow2.f32 %v6649_v53  ;;  %v6645_v16 = vsub.f32 %v6629_v22, %v6637_v6 }
0x4ce8   :  { %v6647_v11 = vmul.f32 1.442695, %v6645_v16 }
0x4cea   :  { %8785 = vpow2.f32 %v6647_v11  ;;  %v6969_v11 = vsel %vm11617_vm2, 1, %v9034_v0 }
0x4cf3   :  { %v8784_v55 = vpop.eup %8783 }
0x4cf4   :  { %v6658_v42 = vsel %vm11621_vm8, %v8784_v55, 0.0  ;;  %v6960_v55 = vrot.slane %v11040_v12, 1 }
0x4cf5   :  { %v6659_v9 = vrot.slane %v6658_v42, 4 }
0x4cf7   :  { %v8786_v3 = vpop.eup %8785  ;;  %v6660_v21 = vadd.f32 %v6659_v9, %v6658_v42 }
0x4cf8   :  { %v6651_v47 = vsel %vm11621_vm8, %v8786_v3, 0.0 }
0x4cf9   :  { %v6652_v20 = vrot.slane %v6651_v47, 4  ;;  %v6661_v27 = vrot.slane %v6660_v21, 2 }
0x4cfb   :  { %v6653_v10 = vadd.f32 %v6652_v20, %v6651_v47  ;;  %v6662_v61 = vadd.f32 %v6661_v27, %v6660_v21 }
0x4cfd   :  { %v6654_v58 = vrot.slane %v6653_v10, 2  ;;  %v6663_v18 = vrot.slane %v6662_v61, 1 }
0x4cff   :  { %v6655_v46 = vadd.f32 %v6654_v58, %v6653_v10  ;;  %v6664_v2 = vadd.f32 %v6663_v18, %v6662_v61 }
0x4d01   :  { %v6656_v4 = vrot.slane %v6655_v46, 1  ;;  %8787 = vlog2.f32 %v6664_v2 }
0x4d03   :  { %v6657_v38 = vadd.f32 %v6656_v4, %v6655_v46 }
0x4d05   :  { %8789 = vlog2.f32 %v6657_v38 }
0x4d0a   :  { %v11192_v22 = vpop.permute.xlu0 %7242 }
0x4d0b   :  { %8491 = vmatmul.mubr.msk.f32.vlgmr.msra.gmra.mxu0 %vm4391_vm11, %v11192_v22 }
0x4d0e   :  { %v8788_v1 = vpop.eup %8787 }
0x4d0f   :  { %v6668_v48 = vmul.f32 0.6931472, %v8788_v1 }
0x4d11   :  { %v6670_v14 = vadd.f32 %v6668_v48, %v6644_v15 }
0x4d12   :  { %v8790_v54 = vpop.eup %8789 }
0x4d13   :  { %v6666_v24 = vmul.f32 0.6931472, %v8790_v54  ;;  %v6687_v28 = vadd.f32 %v6683_v45, %v6670_v14 }
0x4d15   :  { %v6669_v44 = vadd.f32 %v6666_v24, %v6637_v6  ;;  %v6695_v33 = vrot.slane %v6687_v28, 7 }
0x4d17   :  { %v6686_v34 = vadd.f32 %v10939_v51, %v6669_v44  ;;  %v11197_v57 = vpop.permute.xlu0 %6690 }
0x4d18   :  { %vm6692_vm0 = vcmp.eq.s32.totalorder %v11197_v57, 1 }
0x4d19   :  { %v6696_v53 = vsel %vm1711_vm1, %v6695_v33, %v6686_v34 }
0x4d1a   :  { %v11204_v16 = vsel %vm6692_vm0, %v6696_v53, %v11156_v43 }
0x4d1b   :  { %v6906_v15 = vrot.slane %v11204_v16, %v9897_v63  ;;  %v6899_v6 = vrot.slane %v11204_v16, %v9894_v62 }
0x4d1d   :  { %6908 = vbcast.lane.b32.xlu0 %v6906_v15, 256  ;;  %6901 = vbcast.lane.b32.xlu1 %v6899_v6, 256 }
0x4d21   :  { %6971 = vperm.xlu0 %8519, %v6969_v11   ;;  %6963 = vrot.lane.b32.xlu1 %v6960_v55, %s9043_s13 }
0x4d8f   :  { %v6909_v43 = vpop.permute.xlu0 %6908  ;;  %v6902_v42 = vpop.permute.xlu1 %6901 }
0x4d90   :  { %v6911_v9 = vadd.f32 %v11184_v52, %v6909_v43  ;;  %v6910_v3 = vadd.f32 %v11184_v52, %v6902_v42 }
0x4d92   :  { %v6919_v21 = vsel %vm11621_vm8, %v6911_v9, -inf  ;;  %v6912_v47 = vsel %vm11621_vm8, %v6910_v3, -inf }
0x4d93   :  { %v6920_v20 = vrot.slane %v6919_v21, 4  ;;  %v6913_v27 = vrot.slane %v6912_v47, 4 }
0x4d95   :  { %v6921_v10 = vmax.f32 %v6919_v21, %v6920_v20  ;;  %v6914_v61 = vmax.f32 %v6912_v47, %v6913_v27 }
0x4d97   :  { %v6922_v58 = vrot.slane %v6921_v10, 2  ;;  %v6915_v18 = vrot.slane %v6914_v61, 2 }
0x4d99   :  { %v6923_v12 = vmax.f32 %v6921_v10, %v6922_v58  ;;  %v6916_v46 = vmax.f32 %v6914_v61, %v6915_v18 }
0x4d9b   :  { %v6924_v2 = vrot.slane %v6923_v12, 1  ;;  %v6917_v4 = vrot.slane %v6916_v46, 1 }
0x4d9d   :  { %v6925_v38 = vmax.f32 %v6923_v12, %v6924_v2  ;;  %v6918_v1 = vmax.f32 %v6916_v46, %v6917_v4  ;;  %v6964_v4 = vpop.permute.xlu1 %6963 }
0x4d9f   :  { %v6927_v48 = vsub.f32 %v6911_v9, %v6925_v38  ;;  %v6926_v14 = vsub.f32 %v6910_v3, %v6918_v1 }
0x4da1   :  { %v6930_v54 = vmul.f32 1.442695, %v6927_v48  ;;  %v6928_v45 = vmul.f32 1.442695, %v6926_v14  ;;  %v11224_v14 = vpop.permute.xlu0 %6971 }
0x4da2   :  { %vm6973_vm2 = vcmp.eq.s32.totalorder %v11224_v14, 1 }
0x4da3   :  { %8791 = vpow2.f32 %v6930_v54 }
0x4da4   :  { %8793 = vpow2.f32 %v6928_v45 }
0x4db0   :  { %v8792_v24 = vpop.eup %8791 }
0x4db1   :  { %v8794_v28 = vpop.eup %8793  ;;  %v6939_v44 = vsel %vm11621_vm8, %v8792_v24, 0.0 }
0x4db2   :  { %v6932_v34 = vsel %vm11621_vm8, %v8794_v28, 0.0  ;;  %v6940_v33 = vrot.slane %v6939_v44, 4 }
0x4db3   :  { %v6933_v53 = vrot.slane %v6932_v34, 4 }
0x4db4   :  { %v6941_v15 = vadd.f32 %v6940_v33, %v6939_v44  ;;  %v4379_v44 = vld [vmem:[%s11643_s29] sm:$0x3]  ;;  %v4383_v33 = vld [vmem:[%s11643_s29 + $0x8] sm:$0x3] }
0x4db5   :  { %v6934_v6 = vadd.f32 %v6933_v53, %v6932_v34  ;;  %v4381_v34 = vld [vmem:[%s11643_s29 + $0x4] sm:$0x3]  ;;  %v4385_v53 = vld [vmem:[%s11643_s29 + $0xc] sm:$0x3] }
0x4db6   :  { %v6942_v11 = vrot.slane %v6941_v15, 2 }
0x4db7   :  { %v6935_v55 = vrot.slane %v6934_v6, 2 }
0x4db8   :  { %v6943_v43 = vadd.f32 %v6942_v11, %v6941_v15  ;;  %v4387_v15 = vld [vmem:[%s11643_s29 + $0x10] sm:$0x3]  ;;  %v11262_v11 = vcombine.high %v11111_v25, %v11111_v25  ;;  %v7241_v25 = vrot.slane %v11171_v41, 1  ;;  %v4388_v41 = vld [vmem:[%s11643_s29 + $0x12] sm:$0x3] }
0x4db9   :  { %v6936_v42 = vadd.f32 %v6935_v55, %v6934_v6  ;;  %v4389_v6 = vld [vmem:[%s11643_s29 + $0x14] sm:$0x3] }
0x4dba   :  { %v6944_v9 = vrot.slane %v6943_v43, 1 }
0x4dbb   :  { %v6937_v3 = vrot.slane %v6936_v42, 1 }
0x4dbc   :  { %v6945_v21 = vadd.f32 %v6944_v9, %v6943_v43 }
0x4dbd   :  { %v6938_v47 = vadd.f32 %v6937_v3, %v6936_v42 }
0x4dbe   :  { %8795 = vlog2.f32 %v6945_v21 }
0x4dbf   :  { %8797 = vlog2.f32 %v6938_v47 }
0x4dcb   :  { %v8796_v20 = vpop.eup %8795  ;;  %v7414_v27 = vpop.f32.mrf.mxu0 }
0x4dcc   :  { %v8798_v10 = vpop.eup %8797  ;;  %v6949_v61 = vmul.f32 0.6931472, %v8796_v20  ;;  %v7432_v58 = vrot.slane %v7414_v27, %v9300_v30  ;;  %v7418_v55 = vadd.f32 %v7414_v27, %v11262_v11  ;;  %v4380_v20 = vld [vmem:[%s11643_s29 + $0x2] sm:$0x3]  ;;  %v4382_v27 = vld [vmem:[%s11643_s29 + $0x6] sm:$0x3] }
0x4dcd   :  { %v6947_v18 = vmul.f32 0.6931472, %v8798_v10  ;;  %v8492_v12 = vpop.f32.mrf.mxu0  ;;  %v4384_v10 = vld [vmem:[%s11643_s29 + $0xa] sm:$0x3] }
0x4dce   :  { %v6951_v46 = vadd.f32 %v6949_v61, %v6925_v38  ;;  %7433 = vrot.lane.b32.xlu0 %v7432_v58, %s9041_s6  ;;  %v7831_v43 = vmul.f32 -1.442695, %v7418_v55  ;;  %v4386_v58 = vld [vmem:[%s11643_s29 + $0xe] sm:$0x3] }
0x4dcf   :  { %v6950_v2 = vadd.f32 %v6947_v18, %v6918_v1 }
0x4dd0   :  { %v6968_v48 = vadd.f32 %v6964_v4, %v6951_v46  ;;  %8799 = vpow2.f32 %v7831_v43 }
0x4dd1   :  { %v6967_v54 = vadd.f32 %v11066_v17, %v6950_v2 }
0x4dd2   :  { %v6976_v45 = vrot.slane %v6968_v48, 7 }
0x4dd4   :  { %v6977_v24 = vsel %vm1711_vm1, %v6976_v45, %v6967_v54 }
0x4dd5   :  { %v11232_v28 = vsel %vm6973_vm2, %v6977_v24, %v11204_v16  ;;  %v7250_v16 = vsel %vm11619_vm14, 1, %v9034_v0 }
0x4dd6   :  { %v7187_v38 = vrot.slane %v11232_v28, %v9897_v63  ;;  %v7180_v1 = vrot.slane %v11232_v28, %v9894_v62 }
0x4dd8   :  { %7189 = vbcast.lane.b32.xlu1 %v7187_v38, 256  ;;  %7182 = vbcast.lane.b32.xlu0 %v7180_v1, 256 }
0x4ddc   :  { %4502 = vperm.xlu0 %8519, %v4379_v44  }
0x4ddd   :  { %v8800_v42 = vpop.eup %8799 }
0x4dde   :  { %v7422_v9 = vadd.f32 1.0, %v8800_v42 }
0x4de0   :  { %7252 = vperm.xlu0 %8519, %v7250_v16   ;;  %8801 = vrcp.f32 %v7422_v9 }
0x4de4   :  { %4923 = vperm.xlu0 %8519, %v4381_v34  }
0x4de8   :  { %5485 = vperm.xlu0 %8519, %v4383_v33  }
0x4dec   :  { %6047 = vperm.xlu0 %8519, %v4385_v53  }
0x4ded   :  { %v11265_v3 = vpop.eup %8801 }
0x4df0   :  { %6609 = vperm.xlu0 %8519, %v4387_v15  }
0x4df4   :  { %7171 = vperm.xlu0 %8519, %v4389_v6  }
0x4e40   :  { %v7434_v21 = vpop.permute.xlu0 %7433 }
0x4e41   :  { %v7436_v47 = vmul.f32 %v11265_v3, %v7434_v21 }
0x4e43   :  { %7438 = vrot.lane.b32.xlu1 %v7436_v47, %s9042_s22 }
0x4e47   :  { %4638 = vperm.xlu1 %8520, %v4380_v20  }
0x4e4a   :  { %v7183_v61 = vpop.permute.xlu0 %7182  ;;  %v7190_v46 = vpop.permute.xlu1 %7189 }
0x4e4b   :  { %7244 = vrot.lane.b32.xlu1 %v7241_v25, %s9043_s13  ;;  %v7192_v2 = vadd.f32 %v11184_v52, %v7190_v46  ;;  %v7191_v4 = vadd.f32 %v11184_v52, %v7183_v61 }
0x4e4d   :  { %v7200_v48 = vsel %vm11621_vm8, %v7192_v2, -inf  ;;  %v7193_v54 = vsel %vm11621_vm8, %v7191_v4, -inf }
0x4e4e   :  { %v7201_v45 = vrot.slane %v7200_v48, 4  ;;  %v7194_v24 = vrot.slane %v7193_v54, 4 }
0x4e4f   :  { %5204 = vperm.xlu1 %8520, %v4382_v27  }
0x4e50   :  { %v7202_v38 = vmax.f32 %v7200_v48, %v7201_v45  ;;  %v7195_v1 = vmax.f32 %v7193_v54, %v7194_v24 }
0x4e52   :  { %v7203_v44 = vrot.slane %v7202_v38, 2  ;;  %v7196_v16 = vrot.slane %v7195_v1, 2 }
0x4e53   :  { %5766 = vperm.xlu1 %8520, %v4384_v10  }
0x4e54   :  { %v7204_v34 = vmax.f32 %v7202_v38, %v7203_v44  ;;  %v7197_v33 = vmax.f32 %v7195_v1, %v7196_v16 }
0x4e56   :  { %v7205_v53 = vrot.slane %v7204_v34, 1  ;;  %v7198_v15 = vrot.slane %v7197_v33, 1 }
0x4e57   :  { %v4503_v18 = vpop.permute.xlu0 %4502  ;;  %6328 = vperm.xlu1 %8520, %v4386_v58  }
0x4e58   :  { %vm4504_vm14 = vcmp.eq.s32.totalorder %v9291_v23, %v4503_v18  ;;  %v7206_v6 = vmax.f32 %v7204_v34, %v7205_v53  ;;  %v7199_v55 = vmax.f32 %v7197_v33, %v7198_v15 }
0x4e59   :  { %v11288_v12 = vsel %vm4504_vm14, 1.0, %v9035_v19  ;;  %vm4527_vm14 = vcmask 33792  }
0x4e5a   :  { %8396 = vmatmul.mubr.msk.f32.vlgmr.msra.gmra.mxu1 %vm4391_vm11, %v11288_v12  ;;  %v4526_v43 = vmul.f32 %v11288_v12, %v10905_v29  ;;  %v7208_v42 = vsub.f32 %v7192_v2, %v7206_v6  ;;  %v7207_v9 = vsub.f32 %v7191_v4, %v7199_v55 }
0x4e5b   :  { %6890 = vperm.xlu1 %8520, %v4388_v41   ;;  %8404 = vmatpush3.msk.msra.mxu1 %vm4394_vm13, %v11184_v52  ;;  %v11306_v1 = vpop.permute.xlu0 %7252 }
0x4e5c   :  { %8405 = vmatprep.mubr.msk.f32.mxu1 %vm9037_vm10, %v9035_v19  ;;  %8413 = vmatprep.subr.mxu1 %v9035_v19  ;;  %v4528_v21 = vsel %vm4527_vm14, %v4526_v43, 0.0  ;;  %v7211_v47 = vmul.f32 1.442695, %v7208_v42  ;;  %v7209_v20 = vmul.f32 1.442695, %v7207_v9 }
0x4e5e   :  { %8803 = vpow2.f32 %v7211_v47 }
0x4e5f   :  { %8805 = vpow2.f32 %v7209_v20  ;;  %v4924_v53 = vpop.permute.xlu0 %4923 }
0x4e6b   :  { %v8804_v25 = vpop.eup %8803 }
0x4e6c   :  { %v8806_v27 = vpop.eup %8805  ;;  %v7220_v10 = vsel %vm11621_vm8, %v8804_v25, 0.0 }
0x4e6d   :  { %v7213_v61 = vsel %vm11621_vm8, %v8806_v27, 0.0  ;;  %v7221_v58 = vrot.slane %v7220_v10, 4  ;;  %vm4925_vm8 = vcmp.eq.s32.totalorder %v9291_v23, %v4924_v53 }
0x4e6e   :  { %v7214_v18 = vrot.slane %v7213_v61, 4 }
0x4e6f   :  { %v7222_v41 = vadd.f32 %v7221_v58, %v7220_v10 }
0x4e70   :  { %v7215_v29 = vadd.f32 %v7214_v18, %v7213_v61 }
0x4e71   :  { %v7223_v46 = vrot.slane %v7222_v41, 2 }
0x4e72   :  { %v7216_v2 = vrot.slane %v7215_v29, 2 }
0x4e73   :  { %v7224_v4 = vadd.f32 %v7223_v46, %v7222_v41 }
0x4e74   :  { %v7217_v48 = vadd.f32 %v7216_v2, %v7215_v29 }
0x4e75   :  { %v7225_v54 = vrot.slane %v7224_v4, 1 }
0x4e76   :  { %v7218_v45 = vrot.slane %v7217_v48, 1 }
0x4e77   :  { %v7226_v24 = vadd.f32 %v7225_v54, %v7224_v4 }
0x4e78   :  { %v7219_v38 = vadd.f32 %v7218_v45, %v7217_v48 }
0x4e79   :  { %8807 = vlog2.f32 %v7226_v24 }
0x4e7a   :  { %8809 = vlog2.f32 %v7219_v38 }
0x4e7f   :  { %4529 = vadd.xlane.f32.xlu1 %v4528_v21 }
0x4e86   :  { %v8808_v44 = vpop.eup %8807 }
0x4e87   :  { %v8810_v16 = vpop.eup %8809  ;;  %v7230_v15 = vmul.f32 0.6931472, %v8808_v44 }
0x4e88   :  { %v7228_v33 = vmul.f32 0.6931472, %v8810_v16 }
0x4e89   :  { %v7232_v20 = vadd.f32 %v7230_v15, %v7206_v6  ;;  %v5486_v6 = vpop.permute.xlu0 %5485 }
0x4e8a   :  { %v7231_v9 = vadd.f32 %v7228_v33, %v7199_v55  ;;  %v11324_v55 = vsel %vm4925_vm8, 1.0, %v9035_v19 }
0x4e8d   :  { %v6048_v46 = vpop.permute.xlu0 %6047 }
0x4e91   :  { %v6610_v54 = vpop.permute.xlu0 %6609 }
0x4e95   :  { %v7172_v44 = vpop.permute.xlu0 %7171 }
0x4eb5   :  { %v7439_v34 = vpop.permute.xlu1 %7438 }
0x4eb6   :  { %v7441_v21 = vadd.f32 %v7439_v34, %v11262_v11  ;;  %v7248_v11 = vadd.f32 %v11192_v22, %v7231_v9 }
0x4eb8   :  { %8811 = vtanh.f32 %v7441_v21 }
0x4ec2   :  { %v4639_v43 = vpop.permute.xlu1 %4638 }
0x4ec3   :  { %vm4640_vm12 = vcmp.eq.s32.totalorder %v9291_v23, %v4639_v43 }
0x4ec4   :  { %v11311_v42 = vsel %vm4640_vm12, 1.0, %v9035_v19  ;;  %vm7254_vm12 = vcmp.eq.s32.totalorder %v11306_v1, 1 }
0x4ec5   :  { %v4816_v47 = vsel %vm4722_vm9, %v11311_v42, %v11288_v12  ;;  %vm5487_vm9 = vcmp.eq.s32.totalorder %v9291_v23, %v5486_v6  ;;  %v8812_v59 = vpop.eup %8811  ;;  %v4729_v14 = vmul.f32 %v11311_v42, %v10767_v60 }
0x4ec6   :  { %8406 = vmatmul.mubr.msk.f32.vlgmr.msra.gmra.mxu1 %vm4391_vm11, %v4816_v47  ;;  %v7245_v25 = vpop.permute.xlu1 %7244  ;;  %v5097_v12 = vsel %vm5006_vm15, %v11324_v55, %v4816_v47 }
0x4ec7   :  { %8414 = vmatpush3.msk.msra.mxu1 %vm4394_vm13, %v11184_v52  ;;  %v7249_v27 = vadd.f32 %v7245_v25, %v7232_v20  ;;  %8415 = vmatprep.mubr.msk.f32.mxu1 %vm9037_vm10, %v9035_v19  ;;  %v4730_v53 = vsel %vm4527_vm14, %v4729_v14, 0.0 }
0x4ec8   :  { %8423 = vmatprep.subr.mxu1 %v9035_v19 }
0x4ec9   :  { %v7257_v56 = vrot.slane %v7249_v27, 7 }
0x4eca   :  { %8416 = vmatmul.mubr.msk.f32.vlgmr.msra.gmra.mxu1 %vm4391_vm11, %v5097_v12  ;;  %v5205_v10 = vpop.permute.xlu1 %5204 }
0x4ecb   :  { %v7258_v61 = vsel %vm1711_vm1, %v7257_v56, %v7248_v11  ;;  %8424 = vmatpush3.msk.msra.mxu1 %vm4394_vm13, %v11184_v52  ;;  %vm5206_vm8 = vcmp.eq.s32.totalorder %v9291_v23, %v5205_v10  ;;  %8425 = vmatprep.mubr.msk.f32.mxu1 %vm9037_vm10, %v9035_v19  ;;  %v5013_v11 = vmul.f32 %v11324_v55, %v10788_v36 }
0x4ecc   :  { %v11340_v58 = vsel %vm5206_vm8, 1.0, %v9035_v19  ;;  %8433 = vmatprep.subr.mxu1 %v9035_v19  ;;  %v11346_v8 = vsel %vm7254_vm12, %v7258_v61, %v11232_v28  ;;  %v11359_v28 = vsel %vm5487_vm9, 1.0, %v9035_v19  ;;  %vm11648_vm8 = vcmp.gt.s32.totalorder %v10914_v37, 1 }
0x4ecd   :  { %v5378_v18 = vsel %vm5287_vm3, %v11340_v58, %v5097_v12  ;;  %v7468_v41 = vrot.slane %v11346_v8, %v9897_v63  ;;  %v7461_v5 = vrot.slane %v11346_v8, %v9894_v62  ;;  %vm6049_vm3 = vcmp.eq.s32.totalorder %v9291_v23, %v6048_v46 }
0x4ece   :  { %8426 = vmatmul.mubr.msk.f32.vlgmr.msra.gmra.mxu1 %vm4391_vm11, %v5378_v18  ;;  %v5767_v29 = vpop.permute.xlu1 %5766  ;;  %v5659_v63 = vsel %vm5568_vm4, %v11359_v28, %v5378_v18  ;;  %v11388_v48 = vsel %vm6049_vm3, 1.0, %v9035_v19  ;;  %v5294_v15 = vmul.f32 %v11340_v58, %v10806_v31  ;;  %v5575_v9 = vmul.f32 %v11359_v28, %v10826_v7 }
0x4ecf   :  { %8434 = vmatpush3.msk.msra.mxu1 %vm4394_vm13, %v11184_v52  ;;  %vm5768_vm15 = vcmp.eq.s32.totalorder %v9291_v23, %v5767_v29  ;;  %7470 = vbcast.lane.b32.xlu0 %v7468_v41, 256  ;;  %v6137_v47 = vmul.f32 %v11388_v48, %v10865_v39  ;;  %v7443_v12 = vsub.f32 1.0, %v11265_v3  ;;  %vm11649_vm9 = vcmp.gt.s32.totalorder %v10914_v37, 2 }
0x4ed0   :  { %8435 = vmatprep.mubr.msk.f32.mxu1 %vm9037_vm10, %v9035_v19  ;;  %8443 = vmatprep.subr.mxu1 %v9035_v19  ;;  %v11370_v2 = vsel %vm5768_vm15, 1.0, %v9035_v19  ;;  %v5295_v43 = vsel %vm4527_vm14, %v5294_v15, 0.0  ;;  %v5576_v1 = vsel %vm4527_vm14, %v5575_v9, 0.0  ;;  %vm11650_vm15 = vcmp.gt.s32.totalorder %v10914_v37, 3 }
0x4ed1   :  { %v5940_v62 = vsel %vm5849_vm7, %v11370_v2, %v5659_v63  ;;  %vm6611_vm7 = vcmp.eq.s32.totalorder %v9291_v23, %v6610_v54  ;;  %v5856_v21 = vmul.f32 %v11370_v2, %v10844_v49  ;;  %v6138_v31 = vsel %vm4527_vm14, %v6137_v47, 0.0 }
0x4ed2   :  { %8436 = vmatmul.mubr.msk.f32.vlgmr.msra.gmra.mxu1 %vm4391_vm11, %v5659_v63  ;;  %v6329_v4 = vpop.permute.xlu1 %6328  ;;  %v6221_v40 = vsel %vm6130_vm6, %v11388_v48, %v5940_v62  ;;  %v11416_v38 = vsel %vm6611_vm7, 1.0, %v9035_v19  ;;  %v5014_v49 = vsel %vm4527_vm14, %v5013_v11, 0.0  ;;  %vm11651_vm3 = vcmp.gt.s32.totalorder %v10914_v37, 4 }
0x4ed3   :  { %7463 = vbcast.lane.b32.xlu0 %v7461_v5, 256  ;;  %8444 = vmatpush3.msk.msra.mxu1 %vm4394_vm13, %v11184_v52  ;;  %vm6330_vm4 = vcmp.eq.s32.totalorder %v9291_v23, %v6329_v4  ;;  %v5857_v60 = vsel %vm4527_vm14, %v5856_v21, 0.0 }
0x4ed4   :  { %8445 = vmatprep.mubr.msk.f32.mxu1 %vm9037_vm10, %v9035_v19  ;;  %8453 = vmatprep.subr.mxu1 %v9035_v19  ;;  %v11397_v45 = vsel %vm6330_vm4, 1.0, %v9035_v19  ;;  %vm11652_vm4 = vcmp.gt.s32.totalorder %v10914_v37, 5 }
0x4ed5   :  { %v6502_v50 = vsel %vm6411_vm5, %v11397_v45, %v6221_v40  ;;  %vm7173_vm5 = vcmp.eq.s32.totalorder %v9291_v23, %v7172_v44  ;;  %v6418_v36 = vmul.f32 %v11397_v45, %v10883_v32 }
0x4ed6   :  { %8446 = vmatmul.mubr.msk.f32.vlgmr.msra.gmra.mxu1 %vm4391_vm11, %v5940_v62  ;;  %v6891_v24 = vpop.permute.xlu1 %6890  ;;  %v6783_v26 = vsel %vm6692_vm0, %v11416_v38, %v6502_v50  ;;  %v11441_v34 = vsel %vm7173_vm5, 1.0, %v9035_v19  ;;  %vm11654_vm5 = vcmp.gt.s32.totalorder %v10914_v37, 7 }
0x4ed7   :  { %7445 = vrot.lane.b32.xlu0 %v8812_v59, %s9043_s13  ;;  %8454 = vmatpush3.msk.msra.mxu1 %vm4394_vm13, %v11184_v52  ;;  %vm6892_vm6 = vcmp.eq.s32.totalorder %v9291_v23, %v6891_v24  ;;  %v6419_v29 = vsel %vm4527_vm14, %v6418_v36, 0.0 }
0x4ed8   :  { %8455 = vmatprep.mubr.msk.f32.mxu1 %vm9037_vm10, %v9035_v19  ;;  %8463 = vmatprep.subr.mxu1 %v9035_v19  ;;  %v11423_v16 = vsel %vm6892_vm6, 1.0, %v9035_v19  ;;  %vm11653_vm6 = vcmp.gt.s32.totalorder %v10914_v37, 6 }
0x4ed9   :  { %v7064_v57 = vsel %vm6973_vm2, %v11423_v16, %v6783_v26 }
0x4eda   :  { %8456 = vmatmul.mubr.msk.f32.vlgmr.msra.gmra.mxu1 %vm4391_vm11, %v6221_v40  ;;  %v11446_v33 = vsel %vm7254_vm12, %v11441_v34, %v7064_v57  ;;  %vm4507_vm12 = vcmp.gt.s32.totalorder %v11176_v35, 0 }
0x4edb   :  { %8464 = vmatpush3.msk.msra.mxu1 %vm4394_vm13, %v11184_v52  ;;  %8465 = vmatprep.mubr.msk.f32.mxu1 %vm9037_vm10, %v9035_v19 }
0x4edc   :  { %8473 = vmatprep.subr.mxu1 %v9035_v19 }
0x4ede   :  { %8466 = vmatmul.mubr.msk.f32.vlgmr.msra.gmra.mxu1 %vm4391_vm11, %v6502_v50 }
0x4edf   :  { %8474 = vmatpush3.msk.msra.mxu1 %vm4394_vm13, %v11184_v52  ;;  %8475 = vmatprep.mubr.msk.f32.mxu1 %vm9037_vm10, %v9035_v19 }
0x4ee0   :  { %8483 = vmatprep.subr.mxu1 %v9035_v19 }
0x4ee2   :  { %8476 = vmatmul.mubr.msk.f32.vlgmr.msra.gmra.mxu1 %vm4391_vm11, %v6783_v26 }
0x4ee3   :  { %8484 = vmatpush3.msk.msra.mxu1 %vm4394_vm13, %v11184_v52  ;;  %8485 = vmatprep.mubr.msk.f32.mxu1 %vm9037_vm10, %v9035_v19 }
0x4ee4   :  { %8493 = vmatprep.subr.mxu1 %v9035_v19 }
0x4ee6   :  { %8486 = vmatmul.mubr.msk.f32.vlgmr.msra.gmra.mxu1 %vm4391_vm11, %v7064_v57 }
0x4ee7   :  { %8494 = vmatpush3.msk.msra.mxu1 %vm4394_vm13, %v11184_v52  ;;  %8495 = vmatprep.mubr.msk.f32.mxu1 %vm9037_vm10, %v9035_v19  ;;  %vm7457_vm10 = vcmp.gt.s32.totalorder %v11176_v35, 11  ;;  %vm11644_vm13 = vcmask 36864  }
0x4eea   :  { %8496 = vmatmul.mubr.msk.f32.vlgmr.msra.gmra.mxu1 %vm4391_vm11, %v11446_v33  ;;  %vm11645_vm11 = vmmov %vm11644_vm13 }
0x4eeb   :  { %vm11646_vm2 = vmmov %vm11645_vm11 }
0x4eec   :  { %vm11647_vm0 = vmmov %vm11646_vm2 }
0x4ef6   :  { %4731 = vadd.xlane.f32.xlu0 %v4730_v53 }
0x4efa   :  { %5296 = vadd.xlane.f32.xlu0 %v5295_v43 }
0x4efe   :  { %5577 = vadd.xlane.f32.xlu0 %v5576_v1 }
0x4f02   :  { %5858 = vadd.xlane.f32.xlu0 %v5857_v60 }
0x4f06   :  { %6139 = vadd.xlane.f32.xlu0 %v6138_v31 }
0x4f08   :  { %v11495_v21 = vpop.xlane.xlu1 %4529 }
0x4f1a   :  { %v4805_v20 = vpop.f32.mrf.mxu1 }
0x4f1b   :  { %v4809_v25 = vmul.f32 %v11311_v42, %v4805_v20  ;;  %v7449_v42 = vmul.f32 %v11265_v3, %v11167_v13 }
0x4f1c   :  { %v8397_v7 = vpop.f32.mrf.mxu1 }
0x4f1d   :  { %v4810_v27 = vsel %vm4527_vm14, %v4809_v25, 0.0 }
0x4f1e   :  { %4811 = vadd.xlane.f32.xlu1 %v4810_v27 }
0x4f22   :  { %5015 = vadd.xlane.f32.xlu1 %v5014_v49 }
0x4f41   :  { %v11470_v56 = vpop.permute.xlu0 %7470 }
0x4f45   :  { %v11472_v39 = vpop.permute.xlu0 %7463 }
0x4f49   :  { %v7446_v6 = vpop.permute.xlu0 %7445 }
0x4f4a   :  { %v7448_v10 = vmul.f32 %v7446_v6, %v7443_v12 }
0x4f4c   :  { %v7450_v61 = vadd.f32 %v7449_v42, %v7448_v10  ;;  %v7473_v42 = vadd.f32 %v11184_v52, %v11470_v56 }
0x4f4e   :  { %v7521_v18 = vrot.slane %v7450_v61, %v9300_v30  ;;  %v7481_v10 = vsel %vm11644_vm13, %v7473_v42, -inf  ;;  %v7472_v61 = vadd.f32 %v11184_v52, %v11472_v39  ;;  %v6980_v52 = vmul.f32 %v11423_v16, %v11066_v17 }
0x4f4f   :  { %vm11656_vm13 = vcmp.gt.s32.totalorder %v11176_v35, 9 }
0x4f50   :  { %v7522_v41 = vrot.slane %v7521_v18, 1  ;;  %v7474_v36 = vsel %vm11645_vm11, %v7472_v61, -inf  ;;  %vm11657_vm11 = vcmp.gt.s32.totalorder %v11176_v35, 10 }
0x4f52   :  { %7525 = vrot.lane.b32.xlu0 %v7522_v41, %s9043_s13  ;;  %v7482_v41 = vrot.slane %v7481_v10, 4 }
0x4f71   :  { %6420 = vadd.xlane.f32.xlu0 %v6419_v29  ;;  %v7483_v29 = vmax.f32 %v7481_v10, %v7482_v41 }
0x4f7f   :  { %v4732_v25 = vpop.xlane.xlu0 %4731 }
0x4f86   :  { %v5086_v63 = vpop.f32.mrf.mxu1 }
0x4f87   :  { %v5090_v5 = vmul.f32 %v11324_v55, %v5086_v63  ;;  %v7475_v63 = vrot.slane %v7474_v36, 4 }
0x4f88   :  { %v8407_v46 = vpop.f32.mrf.mxu1 }
0x4f89   :  { %v5091_v4 = vsel %vm4527_vm14, %v5090_v5, 0.0  ;;  %v7484_v46 = vrot.slane %v7483_v29, 2 }
0x4f8a   :  { %v5367_v13 = vpop.f32.mrf.mxu1  ;;  %5092 = vadd.xlane.f32.xlu1 %v5091_v4  ;;  %v7476_v4 = vmax.f32 %v7474_v36, %v7475_v63 }
0x4f8b   :  { %v5371_v3 = vmul.f32 %v11340_v58, %v5367_v13  ;;  %v6699_v13 = vmul.f32 %v11416_v38, %v10939_v51  ;;  %v7485_v56 = vmax.f32 %v7483_v29, %v7484_v46 }
0x4f8c   :  { %v8417_v30 = vpop.f32.mrf.mxu1 }
0x4f8d   :  { %v5372_v62 = vsel %vm4527_vm14, %v5371_v3, 0.0  ;;  %v7477_v3 = vrot.slane %v7476_v4, 2  ;;  %v6700_v30 = vsel %vm4527_vm14, %v6699_v13, 0.0  ;;  %v7486_v39 = vrot.slane %v7485_v56, 1 }
0x4f8e   :  { %v5648_v59 = vpop.f32.mrf.mxu1  ;;  %5373 = vadd.xlane.f32.xlu1 %v5372_v62 }
0x4f8f   :  { %v5652_v32 = vmul.f32 %v11359_v28, %v5648_v59  ;;  %v7478_v62 = vmax.f32 %v7476_v4, %v7477_v3  ;;  %v7261_v59 = vmul.f32 %v11441_v34, %v11192_v22 }
0x4f90   :  { %v8427_v40 = vpop.f32.mrf.mxu1 }
0x4f91   :  { %v5653_v54 = vsel %vm4527_vm14, %v5652_v32, 0.0  ;;  %v7487_v32 = vmax.f32 %v7485_v56, %v7486_v39  ;;  %v7479_v40 = vrot.slane %v7478_v62, 1  ;;  %v7262_v51 = vsel %vm4527_vm14, %v7261_v59, 0.0 }
0x4f92   :  { %v5929_v24 = vpop.f32.mrf.mxu1  ;;  %5654 = vadd.xlane.f32.xlu1 %v5653_v54 }
0x4f93   :  { %v5933_v55 = vmul.f32 %v11370_v2, %v5929_v24  ;;  %v7480_v54 = vmax.f32 %v7478_v62, %v7479_v40 }
0x4f94   :  { %v8437_v50 = vpop.f32.mrf.mxu1 }
0x4f95   :  { %v5934_v26 = vsel %vm4527_vm14, %v5933_v55, 0.0  ;;  %v7488_v55 = vsub.f32 %v7472_v61, %v7480_v54 }
0x4f96   :  { %v6210_v44 = vpop.f32.mrf.mxu1  ;;  %5935 = vadd.xlane.f32.xlu1 %v5934_v26 }
0x4f97   :  { %v6214_v5 = vmul.f32 %v11388_v48, %v6210_v44  ;;  %v6981_v48 = vsel %vm4527_vm14, %v6980_v52, 0.0  ;;  %v7490_v17 = vmul.f32 1.442695, %v7488_v55 }
0x4f98   :  { %v8447_v58 = vpop.f32.mrf.mxu1 }
0x4f9a   :  { %v6491_v57 = vpop.f32.mrf.mxu1 }
0x4f9b   :  { %v6495_v14 = vmul.f32 %v11397_v45, %v6491_v57  ;;  %v7531_v45 = vsel %vm7457_vm10, 1, %v9034_v0 }
0x4f9c   :  { %v8457_v53 = vpop.f32.mrf.mxu1 }
0x4f9d   :  { %v6496_v15 = vsel %vm4527_vm14, %v6495_v14, 0.0 }
0x4f9e   :  { %v6772_v28 = vpop.f32.mrf.mxu1  ;;  %6497 = vadd.xlane.f32.xlu0 %v6496_v15 }
0x4f9f   :  { %v6776_v43 = vmul.f32 %v11416_v38, %v6772_v28  ;;  %v7489_v38 = vsub.f32 %v7473_v42, %v7487_v32 }
0x4fa0   :  { %v8467_v9 = vpop.f32.mrf.mxu1 }
0x4fa1   :  { %v6777_v1 = vsel %vm4527_vm14, %v6776_v43, 0.0  ;;  %v7492_v24 = vmul.f32 1.442695, %v7489_v38 }
0x4fa2   :  { %v7053_v2 = vpop.f32.mrf.mxu1  ;;  %6778 = vadd.xlane.f32.xlu0 %v6777_v1  ;;  %v5297_v1 = vpop.xlane.xlu0 %5296 }
0x4fa3   :  { %v7057_v60 = vmul.f32 %v11423_v16, %v7053_v2  ;;  %8813 = vpow2.f32 %v7492_v24  ;;  %v4390_v16 = vld [vmem:[%s11643_s29 + $0x16] sm:$0x3] }
0x4fa4   :  { %v8477_v47 = vpop.f32.mrf.mxu1  ;;  %8815 = vpow2.f32 %v7490_v17 }
0x4fa5   :  { %v7058_v31 = vsel %vm4527_vm14, %v7057_v60, 0.0 }
0x4fa6   :  { %v7334_v20 = vpop.f32.mrf.mxu1  ;;  %7059 = vadd.xlane.f32.xlu0 %v7058_v31 }
0x4fa7   :  { %v7338_v7 = vmul.f32 %v11441_v34, %v7334_v20  ;;  %7533 = vperm.xlu1 %8520, %v7531_v45   ;;  %v4812_v27 = vpop.xlane.xlu1 %4811  ;;  %v5578_v45 = vpop.xlane.xlu0 %5577 }
0x4fa8   :  { %v11503_v11 = vadd.f32 %v4812_v27, %v4732_v25  ;;  %v8487_v49 = vpop.f32.mrf.mxu1 }
0x4fa9   :  { %v7339_v12 = vsel %vm4527_vm14, %v7338_v7, 0.0  ;;  %v4531_v7 = vsel %vm4507_vm12, %v11495_v21, 0.0 }
0x4faa   :  { %v11506_v6 = vpop.f32.mrf.mxu1  ;;  %7340 = vadd.xlane.f32.xlu0 %v7339_v12  ;;  %v4814_v20 = vsel %vm11648_vm8, %v11503_v11, 0.0 }
0x4fab   :  { %7523 = vrot.lane.b32.xlu1 %v7521_v18, %s9043_s13  ;;  %v6215_v18 = vsel %vm4527_vm14, %v6214_v5, 0.0  ;;  %v5016_v31 = vpop.xlane.xlu1 %5015  ;;  %v5859_v49 = vpop.xlane.xlu0 %5858  ;;  %v4815_v12 = vadd.f32 %v4814_v20, %v4531_v7 }
0x4fac   :  { %v8497_v0 = vpop.f32.mrf.mxu1 }
0x4faf   :  { %v6140_v11 = vpop.xlane.xlu0 %6139 }
0x4fb0   :  { %v8814_v50 = vpop.eup %8813 }
0x4fb1   :  { %v7501_v22 = vsel %vm11646_vm2, %v8814_v50, 0.0  ;;  %v8816_v34 = vpop.eup %8815  ;;  %v7835_v50 = vld [vmem:[#allocation14] ss:$0 sm:$0xff] }
0x4fb2   :  { %v7502_v26 = vrot.slane %v7501_v22, 4  ;;  %v7494_v44 = vsel %vm11647_vm0, %v8816_v34, 0.0  ;;  %vm7653_vm0 = vcmask 1024  }
0x4fb3   :  { %v7495_v57 = vrot.slane %v7494_v44, 4 }
0x4fb4   :  { %v7503_v58 = vadd.f32 %v7502_v26, %v7501_v22 }
0x4fb5   :  { %v7496_v53 = vadd.f32 %v7495_v57, %v7494_v44 }
0x4fb6   :  { %v7504_v14 = vrot.slane %v7503_v58, 2 }
0x4fb7   :  { %v7497_v28 = vrot.slane %v7496_v53, 2 }
0x4fb8   :  { %v7505_v15 = vadd.f32 %v7504_v14, %v7503_v58 }
0x4fb9   :  { %v7498_v9 = vadd.f32 %v7497_v28, %v7496_v53 }
0x4fba   :  { %v7506_v43 = vrot.slane %v7505_v15, 1 }
0x4fbb   :  { %v7499_v60 = vrot.slane %v7498_v9, 1 }
0x4fbc   :  { %v7507_v2 = vadd.f32 %v7506_v43, %v7505_v15 }
0x4fbd   :  { %v7500_v47 = vadd.f32 %v7499_v60, %v7498_v9 }
0x4fbe   :  { %8817 = vlog2.f32 %v7507_v2 }
0x4fbf   :  { %8819 = vlog2.f32 %v7500_v47 }
0x4fcb   :  { %v8818_v36 = vpop.eup %8817 }
0x4fcc   :  { %v7511_v46 = vmul.f32 0.6931472, %v8818_v36  ;;  %v8820_v4 = vpop.eup %8819 }
0x4fcd   :  { %v7509_v39 = vmul.f32 0.6931472, %v8820_v4 }
0x4fcf   :  { %6216 = vadd.xlane.f32.xlu1 %v6215_v18  ;;  %v7526_v18 = vpop.permute.xlu0 %7525 }
0x4fd3   :  { %6701 = vadd.xlane.f32.xlu1 %v6700_v30  ;;  %v7513_v30 = vadd.f32 %v7511_v46, %v7487_v32 }
0x4fd5   :  { %v7530_v40 = vadd.f32 %v7526_v18, %v7513_v30 }
0x4fd7   :  { %6982 = vadd.xlane.f32.xlu1 %v6981_v48  ;;  %v7538_v55 = vrot.slane %v7530_v40, 7 }
0x4fdb   :  { %7263 = vadd.xlane.f32.xlu1 %v7262_v51  ;;  %v7512_v51 = vadd.f32 %v7509_v39, %v7480_v54 }
0x4fec   :  { %7452 = vperm.xlu1 %8520, %v4390_v16  }
0x4ffa   :  { %v6421_v62 = vpop.xlane.xlu0 %6420 }
0x5013   :  { %v5093_v25 = vpop.xlane.xlu1 %5092 }
0x5014   :  { %v5094_v27 = vadd.f32 %v5093_v25, %v5016_v31 }
0x5016   :  { %v5095_v0 = vsel %vm11649_vm9, %v5094_v27, 0.0 }
0x5017   :  { %v5096_v42 = vadd.f32 %v5095_v0, %v4815_v12  ;;  %v5374_v10 = vpop.xlane.xlu1 %5373 }
0x5018   :  { %v5375_v61 = vadd.f32 %v5374_v10, %v5297_v1 }
0x501a   :  { %v5376_v41 = vsel %vm11650_vm15, %v5375_v61, 0.0 }
0x501b   :  { %v5377_v29 = vadd.f32 %v5376_v41, %v5096_v42  ;;  %v5655_v63 = vpop.xlane.xlu1 %5654 }
0x501c   :  { %v5656_v5 = vadd.f32 %v5655_v63, %v5578_v45 }
0x501e   :  { %v5657_v21 = vsel %vm11651_vm3, %v5656_v5, 0.0 }
0x501f   :  { %v5658_v13 = vadd.f32 %v5657_v21, %v5377_v29  ;;  %v5936_v56 = vpop.xlane.xlu1 %5935 }
0x5020   :  { %v5937_v3 = vadd.f32 %v5936_v56, %v5859_v49 }
0x5022   :  { %v5938_v52 = vsel %vm11652_vm4, %v5937_v3, 0.0 }
0x5023   :  { %v5939_v48 = vadd.f32 %v5938_v52, %v5658_v13  ;;  %v7534_v59 = vpop.permute.xlu1 %7533 }
0x5024   :  { %vm7535_vm7 = vcmp.eq.s32.totalorder %v7534_v59, 1 }
0x5027   :  { %v6498_v38 = vpop.xlane.xlu0 %6497  ;;  %v7524_v24 = vpop.permute.xlu1 %7523 }
0x5028   :  { %v6499_v17 = vadd.f32 %v6498_v38, %v6421_v62  ;;  %v7529_v16 = vadd.f32 %v7524_v24, %v7512_v51 }
0x502a   :  { %v7539_v22 = vsel %vm1711_vm1, %v7538_v55, %v7529_v16  ;;  %v6500_v15 = vsel %vm11654_vm5, %v6499_v17, 0.0  ;;  %vm11655_vm1 = vcmp.gt.s32.totalorder %v11176_v35, 8 }
0x502b   :  { %v7541_v32 = vsel %vm7535_vm7, %v7539_v22, %v11346_v8  ;;  %v6779_v44 = vpop.xlane.xlu0 %6778 }
0x502c   :  { %v7633_v34 = vadd.f32 %v7835_v50, %v7541_v32 }
0x502e   :  { %v7634_v26 = vsel %vm4527_vm14, %v7633_v34, -inf }
0x502f   :  { %7635 = vmax.xlane.f32.xlu0 %v7634_v26  ;;  %v7060_v43 = vpop.xlane.xlu0 %7059 }
0x5033   :  { %v7341_v45 = vpop.xlane.xlu0 %7340 }
0x5058   :  { %v6217_v58 = vpop.xlane.xlu1 %6216 }
0x5059   :  { %v6218_v57 = vadd.f32 %v6217_v58, %v6140_v11 }
0x505b   :  { %v6219_v54 = vsel %vm11653_vm6, %v6218_v57, 0.0 }
0x505c   :  { %v6220_v14 = vadd.f32 %v6219_v54, %v5939_v48  ;;  %v6702_v53 = vpop.xlane.xlu1 %6701 }
0x505d   :  { %v6780_v28 = vadd.f32 %v6779_v44, %v6702_v53 }
0x505e   :  { %v6501_v9 = vadd.f32 %v6500_v15, %v6220_v14 }
0x505f   :  { %v6781_v8 = vsel %vm11655_vm1, %v6780_v28, 0.0 }
0x5060   :  { %v6782_v1 = vadd.f32 %v6781_v8, %v6501_v9  ;;  %v6983_v2 = vpop.xlane.xlu1 %6982 }
0x5061   :  { %v7061_v60 = vadd.f32 %v7060_v43, %v6983_v2 }
0x5063   :  { %v7062_v47 = vsel %vm11656_vm13, %v7061_v60, 0.0 }
0x5064   :  { %v7063_v31 = vadd.f32 %v7062_v47, %v6782_v1  ;;  %v7264_v20 = vpop.xlane.xlu1 %7263 }
0x5065   :  { %v7342_v25 = vadd.f32 %v7341_v45, %v7264_v20 }
0x5067   :  { %v7343_v37 = vsel %vm11657_vm11, %v7342_v25, 0.0 }
0x5068   :  { %v7344_v7 = vadd.f32 %v7343_v37, %v7063_v31  ;;  %v7453_v27 = vpop.permute.xlu1 %7452 }
0x5069   :  { %vm7454_vm2 = vcmp.eq.s32.totalorder %v9291_v23, %v7453_v27 }
0x506a   :  { %v7832_v49 = vsel %vm7454_vm2, 1.0, %v9035_v19 }
0x506b   :  { %v7626_v12 = vsel %vm7535_vm7, %v7832_v49, %v11446_v33  ;;  %v7542_v0 = vmul.f32 %v7832_v49, %v7524_v24  ;;  %v7619_v61 = vmul.f32 %v7832_v49, %v11506_v6 }
0x506c   :  { %v7646_v42 = vmul.f32 %v7835_v50, %v7626_v12 }
0x506d   :  { %v7543_v10 = vsel %vm4527_vm14, %v7542_v0, 0.0  ;;  %v7620_v36 = vsel %vm4527_vm14, %v7619_v61, 0.0 }
0x506e   :  { %7544 = vadd.xlane.f32.xlu0 %v7543_v10  ;;  %v7647_v41 = vsel %vm4527_vm14, %v7646_v42, 0.0 }
0x506f   :  { %7648 = vadd.xlane.f32.xlu1 %v7647_v41 }
0x5072   :  { %7621 = vadd.xlane.f32.xlu0 %v7620_v36 }
0x50b8   :  { %v7636_v11 = vpop.xlane.xlu0 %7635 }
0x50b9   :  { %v7637_v23 = vsub.f32 %v7633_v34, %v7636_v11 }
0x50bb   :  { %v7638_v29 = vmul.f32 1.442695, %v7637_v23 }
0x50bd   :  { %8821 = vpow2.f32 %v7638_v29 }
0x50ca   :  { %v8822_v19 = vpop.eup %8821 }
0x50cb   :  { %v7640_v33 = vsel %vm4527_vm14, %v8822_v19, 0.0  ;;  %vm7661_vm14 = vcmask 0  }
0x50cc   :  { %7641 = vadd.xlane.f32.xlu0 %v7640_v33 }
0x50f7   :  { %v7545_v63 = vpop.xlane.xlu0 %7544 }
0x50f8   :  { %v7649_v56 = vpop.xlane.xlu1 %7648 }
0x50fb   :  { %v7622_v5 = vpop.xlane.xlu0 %7621 }
0x50fc   :  { %v7623_v6 = vadd.f32 %v7622_v5, %v7545_v63 }
0x50fe   :  { %v7624_v21 = vsel %vm7457_vm10, %v7623_v6, 0.0 }
0x50ff   :  { %v7625_v4 = vadd.f32 %v7624_v21, %v7344_v7 }
0x5101   :  { %v7650_v3 = vadd.f32 %v7649_v56, %v7625_v4 }
0x5155   :  { %v7642_v46 = vpop.xlane.xlu0 %7641 }
0x5156   :  { %8823 = vlog2.f32 %v7642_v46 }
0x5163   :  { %v8824_v18 = vpop.eup %8823 }
0x5164   :  { %v7644_v13 = vmul.f32 0.6931472, %v8824_v18 }
0x5166   :  { %v7645_v30 = vadd.f32 %v7644_v13, %v7636_v11 }
0x5168   :  { %v7651_v52 = vsub.f32 %v7645_v30, %v7650_v3 }
0x516a   :  { %v7652_v39 = vsel %vm4507_vm12, %v7651_v52, 0.0 }
0x516b   :  { %v7654_v62 = vsel %vm7653_vm0, %v7652_v39, 0.0 }
0x516c   :  { %v7655_v48 = vrot.slane %v7654_v62, 4 }
0x516e   :  { %v7656_v59 = vadd.f32 %v7655_v48, %v7654_v62 }
0x5170   :  { %v7657_v40 = vrot.slane %v7656_v59, 2 }
0x5172   :  { %v7658_v51 = vadd.f32 %v7657_v40, %v7656_v59 }
0x5174   :  { %v7659_v38 = vrot.slane %v7658_v51, 1 }
0x5176   :  { %v7660_v24 = vadd.f32 %v7659_v38, %v7658_v51 }
0x5178   :  { %7662 = vst.msk [vmem:[#allocation16] sm:$0x1] %vm7661_vm14, %v7660_v24 }
0x5179   :  { %9003 = shalt.err (!%p9000_p2)
}
0x517a   :  { %7672 = dma.vmem_to_hbm [thread:$0]  %s7670_s4, 16, %s11602_s26, [#allocation4]  }
0x517b   :  { %9022 = dma.done.wait [#allocation4], 16  }
0x517c   :  { %9023 = vsyncadd [#allocation4], 4294967280 }
0x517d   :  { %7676 = vsyncpa [#allocation3], 1 }
0x517e   :  { %7677 = vsyncpa [#allocation6], 1 }
0x517f   :  { %7678 = vsyncpa [#allocation9], 1 }
0x5180   :  { %7679 = vsyncpa [#allocation12], 1 }
0x5181   :  { %7680 = vsyncpa [#allocation15], 1 }
0x5182   :  { %7681 = vsyncpa [#allocation4], 1 }

</bundles_post_ra>
